<compile_context>
chip_gen: v6e
topology: v6e:2x2x1
jax: 0.10.0
libtpu: 0.0.40
codegen_flags: <defaults>
</compile_context>

<pallas_src>
import functools

import jax
import jax.numpy as jnp
from jax import lax
from jax.experimental import pallas as pl
from jax.experimental.pallas import tpu as pltpu


# ---------------------------------------------------------------------------
# Pallas kernels
# ---------------------------------------------------------------------------
def _conv3x3_kernel(x_ref, w_ref, b_ref, o_ref, *, ho, wo, apply_relu, pad_out):
    """Direct 3x3 / stride-1 conv on one NHWC image.

    x_ref: (1, ho+2, wo+2, cin) bf16   (zero halo of 1 already present)
    w_ref: (3, 3, cin, cout)    bf16
    b_ref: (1, cout)            f32
    o_ref: (1, ho, wo, cout) or, if pad_out, (1, ho+2, wo+2, cout) with the
           zero halo written so the next layer can consume it directly.
    """
    cin = x_ref.shape[-1]
    cout = o_ref.shape[-1]
    x = x_ref[0]                                    # (ho+2, wo+2, cin)
    acc = jnp.zeros((ho * wo, cout), jnp.float32)
    for kh in range(3):
        for kw in range(3):
            patch = x[kh:kh + ho, kw:kw + wo, :].reshape(ho * wo, cin)
            acc = acc + jnp.dot(patch, w_ref[kh, kw],
                                preferred_element_type=jnp.float32)
    res = acc + b_ref[...]                          # f32 epilogue
    if apply_relu:
        res = jnp.maximum(res, 0.0)
    res = res.reshape(ho, wo, cout).astype(o_ref.dtype)
    if pad_out:
        o_ref[...] = jnp.zeros(o_ref.shape, o_ref.dtype)
        o_ref[0, 1:1 + ho, 1:1 + wo, :] = res
    else:
        o_ref[0] = res


def _deconv4x4_s2_kernel(x_ref, w_ref, b_ref, o_ref, *, hi, wi, apply_relu):
    """ConvTranspose2d(k=4, s=2, p=1) via polyphase decomposition (one image).

    x_ref: (1, hi+2, wi+2, cin) bf16   (zero halo of 1 already present)
    w_ref: (4, 4, cin, cout)    bf16   (w[kh, kw] = W_pt[:, :, kh, kw])
    b_ref: (1, cout)            f32
    o_ref: (1, 2, 2, hi, wi, cout)     parity-major; pixel-shuffled outside.

    Output y[2i+r, 2j+s] is a 2x2-tap stride-1 conv of the un-dilated input:
      r=0: padded rows {i, i+1}   with kernel rows {3, 1}
      r=1: padded rows {i+1, i+2} with kernel rows {2, 0}
    (same decomposition along the width with s).
    """
    cin = x_ref.shape[-1]
    cout = o_ref.shape[-1]
    x = x_ref[0]                                    # (hi+2, wi+2, cin)
    taps = ((0, (3, 1)), (1, (2, 0)))               # (base offset, kernel taps)
    for r in range(2):
        rb, khs = taps[r]
        for s in range(2):
            sb, kws = taps[s]
            acc = jnp.zeros((hi * wi, cout), jnp.float32)
            for d in range(2):
                for e in range(2):
                    patch = x[rb + d:rb + d + hi, sb + e:sb + e + wi, :]
                    patch = patch.reshape(hi * wi, cin)
                    acc = acc + jnp.dot(patch, w_ref[khs[d], kws[e]],
                                        preferred_element_type=jnp.float32)
            res = acc + b_ref[...]
            if apply_relu:
                res = jnp.maximum(res, 0.0)
            o_ref[0, r, s] = res.reshape(hi, wi, cout).astype(o_ref.dtype)


# ---------------------------------------------------------------------------
# Wrappers (pallas_call with BlockSpecs)
# ---------------------------------------------------------------------------
def conv3x3_relu(x_padded, w, b, *, apply_relu=True, pad_out=False,
                 out_dtype=jnp.bfloat16):
    """x_padded: (N, H+2, W+2, Cin) bf16 with zero halo; w: (3,3,Cin,Cout) bf16."""
    n, hp, wp, cin = x_padded.shape
    ho, wo = hp - 2, wp - 2
    cout = w.shape[-1]
    oshape = (n, ho + 2, wo + 2, cout) if pad_out else (n, ho, wo, cout)
    kernel = functools.partial(_conv3x3_kernel, ho=ho, wo=wo,
                               apply_relu=apply_relu, pad_out=pad_out)
    return pl.pallas_call(
        kernel,
        out_shape=jax.ShapeDtypeStruct(oshape, out_dtype),
        grid_spec=pltpu.PrefetchScalarGridSpec(
            num_scalar_prefetch=0,
            grid=(n,),
            in_specs=[
                pl.BlockSpec((1, hp, wp, cin), lambda i: (i, 0, 0, 0)),
                pl.BlockSpec((3, 3, cin, cout), lambda i: (0, 0, 0, 0)),
                pl.BlockSpec((1, cout), lambda i: (0, 0)),
            ],
            out_specs=pl.BlockSpec((1,) + oshape[1:], lambda i: (i, 0, 0, 0)),
        ),
        compiler_params=pltpu.CompilerParams(
            dimension_semantics=("parallel",)),
    )(x_padded, w, b)


def conv_transpose4x4_s2_relu(x_padded, w, b, *, apply_relu=True,
                              out_dtype=jnp.float32):
    """x_padded: (N, H+2, W+2, Cin) bf16 with zero halo; w: (4,4,Cin,Cout) bf16.

    Returns (N, 2H, 2W, Cout) in `out_dtype` (PyTorch ConvTranspose2d k=4,s=2,p=1).
    """
    n, hp, wp, cin = x_padded.shape
    hi, wi = hp - 2, wp - 2
    cout = w.shape[-1]
    kernel = functools.partial(_deconv4x4_s2_kernel, hi=hi, wi=wi,
                               apply_relu=apply_relu)
    y4 = pl.pallas_call(
        kernel,
        out_shape=jax.ShapeDtypeStruct((n, 2, 2, hi, wi, cout), out_dtype),
        grid_spec=pltpu.PrefetchScalarGridSpec(
            num_scalar_prefetch=0,
            grid=(n,),
            in_specs=[
                pl.BlockSpec((1, hp, wp, cin), lambda i: (i, 0, 0, 0)),
                pl.BlockSpec((4, 4, cin, cout), lambda i: (0, 0, 0, 0)),
                pl.BlockSpec((1, cout), lambda i: (0, 0)),
            ],
            out_specs=pl.BlockSpec((1, 2, 2, hi, wi, cout),
                                   lambda i: (i, 0, 0, 0, 0, 0)),
        ),
        compiler_params=pltpu.CompilerParams(
            dimension_semantics=("parallel",)),
    )(x_padded, w, b)
    # Pixel shuffle: y[n, 2i+r, 2j+s, c] = y4[n, r, s, i, j, c]
    y = jnp.transpose(y4, (0, 3, 1, 4, 2, 5)).reshape(n, 2 * hi, 2 * wi, cout)
    return y


# ---------------------------------------------------------------------------
# DecoderBlock parameters (weight layout hoisted to init) and forward pass
# ---------------------------------------------------------------------------
def init_decoder_block(key, in_channels, middle_channels, out_channels,
                       is_deconv=True):
    """Returns (kernel_params, torch_layout_params).

    kernel_params hold the pre-laid-out bf16 (kh, kw, Cin, Cout) weights and
    (1, Cout) f32 biases consumed by the Pallas kernels; torch_layout_params
    keep the original PyTorch-layout f32 tensors (used by the reference)."""
    k = jax.random.split(key, 4)
    if is_deconv:
        w1 = 0.05 * jax.random.normal(
            k[0], (middle_channels, in_channels, 3, 3), jnp.float32)     # OIHW
        b1 = 0.01 * jax.random.normal(k[1], (middle_channels,), jnp.float32)
        w2 = 0.05 * jax.random.normal(
            k[2], (middle_channels, out_channels, 4, 4), jnp.float32)    # (I,O,kh,kw)
        b2 = 0.01 * jax.random.normal(k[3], (out_channels,), jnp.float32)
        torch_p = dict(conv_w=w1, conv_b=b1, deconv_w=w2, deconv_b=b2)
        kern_p = dict(
            conv_w=jnp.transpose(w1, (2, 3, 1, 0)).astype(jnp.bfloat16),
            conv_b=b1.reshape(1, -1),
            deconv_w=jnp.transpose(w2, (2, 3, 0, 1)).astype(jnp.bfloat16),
            deconv_b=b2.reshape(1, -1),
        )
    else:
        w1 = 0.05 * jax.random.normal(
            k[0], (middle_channels, in_channels, 3, 3), jnp.float32)
        b1 = 0.01 * jax.random.normal(k[1], (middle_channels,), jnp.float32)
        w2 = 0.05 * jax.random.normal(
            k[2], (out_channels, middle_channels, 3, 3), jnp.float32)
        b2 = 0.01 * jax.random.normal(k[3], (out_channels,), jnp.float32)
        torch_p = dict(conv1_w=w1, conv1_b=b1, conv2_w=w2, conv2_b=b2)
        kern_p = dict(
            conv1_w=jnp.transpose(w1, (2, 3, 1, 0)).astype(jnp.bfloat16),
            conv1_b=b1.reshape(1, -1),
            conv2_w=jnp.transpose(w2, (2, 3, 1, 0)).astype(jnp.bfloat16),
            conv2_b=b2.reshape(1, -1),
        )
    return kern_p, torch_p


def decoder_block_forward(kparams, x_nchw, *, is_deconv=True):
    """PyTorch DecoderBlock.forward: NCHW in -> NCHW out."""
    x = jnp.transpose(x_nchw, (0, 2, 3, 1)).astype(jnp.bfloat16)      # NHWC bf16
    if is_deconv:
        xp = jnp.pad(x, ((0, 0), (1, 1), (1, 1), (0, 0)))
        h = conv3x3_relu(xp, kparams["conv_w"], kparams["conv_b"],
                         apply_relu=True, pad_out=True,
                         out_dtype=jnp.bfloat16)                      # halo'ed
        y = conv_transpose4x4_s2_relu(h, kparams["deconv_w"],
                                      kparams["deconv_b"],
                                      apply_relu=True,
                                      out_dtype=jnp.float32)
    else:
        n, hh, ww, c = x.shape
        # TODO(synk): bilinear Upsample (align_corners=False) stays plain-JAX glue.
        x = jax.image.resize(x.astype(jnp.float32), (n, 2 * hh, 2 * ww, c),
                             method="bilinear").astype(jnp.bfloat16)
        xp = jnp.pad(x, ((0, 0), (1, 1), (1, 1), (0, 0)))
        h = conv3x3_relu(xp, kparams["conv1_w"], kparams["conv1_b"],
                         apply_relu=True, pad_out=True,
                         out_dtype=jnp.bfloat16)
        y = conv3x3_relu(h, kparams["conv2_w"], kparams["conv2_b"],
                         apply_relu=True, pad_out=False,
                         out_dtype=jnp.float32)
    return jnp.transpose(y, (0, 3, 1, 2))                             # NCHW


# ---------------------------------------------------------------------------
# Pure-JAX f32 reference (PyTorch semantics) for a correctness check
# ---------------------------------------------------------------------------
def decoder_block_ref(torch_p, x_nchw):
    dn = ("NHWC", "HWIO", "NHWC")
    x = jnp.transpose(x_nchw, (0, 2, 3, 1))
    w1 = jnp.transpose(torch_p["conv_w"], (2, 3, 1, 0))               # HWIO
    y = lax.conv_general_dilated(x, w1, (1, 1), ((1, 1), (1, 1)),
                                 dimension_numbers=dn)
    y = jax.nn.relu(y + torch_p["conv_b"])
    # ConvTranspose2d(k=4, s=2, p=1) == conv with lhs_dilation=2, pad=k-1-p=2,
    # spatially flipped and channel-transposed weights.
    w2 = torch_p["deconv_w"][:, :, ::-1, ::-1]                        # (I,O,kh,kw)
    w2 = jnp.transpose(w2, (2, 3, 0, 1))                              # HWIO
    y = lax.conv_general_dilated(y, w2, (1, 1), ((2, 2), (2, 2)),
                                 lhs_dilation=(2, 2), dimension_numbers=dn)
    y = jax.nn.relu(y + torch_p["deconv_b"])
    return jnp.transpose(y, (0, 3, 1, 2))


if __name__ == "__main__":
    key = jax.random.PRNGKey(0)
    kx, kp = jax.random.split(key)

    # Small shapes consistent with the module: DecoderBlock(128, 128, 64)
    N, Cin, H, W = 2, 128, 16, 16
    Cmid, Cout = 128, 64
    x = jax.random.normal(kx, (N, Cin, H, W), jnp.float32)

    # is_deconv=True (the module default)
    kparams, tparams = init_decoder_block(kp, Cin, Cmid, Cout, is_deconv=True)
    fwd = jax.jit(functools.partial(decoder_block_forward, is_deconv=True))
    y = fwd(kparams, x)
    jax.block_until_ready(y)
    assert y.shape == (N, Cout, 2 * H, 2 * W), y.shape

    y_ref = decoder_block_ref(tparams, x)
    max_err = float(jnp.max(jnp.abs(y - y_ref)))
    assert max_err < 0.25, f"max abs err vs f32 reference: {max_err}"

    # Also exercise the is_deconv=False (bilinear upsample) branch.
    kparams2, _ = init_decoder_block(kp, Cin, Cmid, Cout, is_deconv=False)
    fwd2 = jax.jit(functools.partial(decoder_block_forward, is_deconv=False))
    y2 = fwd2(kparams2, x)
    jax.block_until_ready(y2)
    assert y2.shape == (N, Cout, 2 * H, 2 * W), y2.shape

    print("KERNEL_OK")
</pallas_src>

<mosaic_0001>
module attributes {stable_mosaic.version = 11 : i64} {
  func.func @_conv3x3_kernel(%arg0: i32, %arg1: memref<1x18x18x128xbf16, #tpu.memory_space<vmem>>, %arg2: memref<3x3x128x128xbf16, #tpu.memory_space<vmem>>, %arg3: memref<1x128xf32, #tpu.memory_space<vmem>>, %arg4: memref<1x18x18x128xbf16, #tpu.memory_space<vmem>>) attributes {dimension_semantics = [#tpu.dimension_semantics<parallel>], iteration_bounds = array<i64: 2>, scalar_prefetch = 0 : i64, scratch_operands = 0 : i64, tpu.core_type = #tpu.core_type<tc>, window_params = [{transform_indices = @transform_0, window_bounds = array<i64: 1, 18, 18, 128>}, {pipeline_mode = #tpu.pipeline_mode<synchronous>, transform_indices = @transform_1, window_bounds = array<i64: 3, 3, 128, 128>}, {pipeline_mode = #tpu.pipeline_mode<synchronous>, transform_indices = @transform_2, window_bounds = array<i64: 1, 128>}, {transform_indices = @transform_3, window_bounds = array<i64: 1, 18, 18, 128>}]} {
    %c0 = arith.constant 0 : index
    %c0_0 = arith.constant 0 : index
    %c0_1 = arith.constant 0 : index
    %c0_2 = arith.constant 0 : index
    %0 = vector.load %arg1[%c0, %c0_0, %c0_1, %c0_2] : memref<1x18x18x128xbf16, #tpu.memory_space<vmem>>, vector<1x18x18x128xbf16>
    %1 = vector.shape_cast %0 : vector<1x18x18x128xbf16> to vector<18x18x128xbf16>
    %cst = arith.constant 0.000000e+00 : f32
    %2 = vector.broadcast %cst : f32 to vector<256x128xf32>
    %3 = vector.extract_strided_slice %1 {offsets = [0, 0, 0], sizes = [16, 16, 128], strides = [1, 1, 1]} : vector<18x18x128xbf16> to vector<16x16x128xbf16>
    %4 = vector.shape_cast %3 : vector<16x16x128xbf16> to vector<256x128xbf16>
    %c0_3 = arith.constant 0 : index
    %c0_4 = arith.constant 0 : index
    %c0_5 = arith.constant 0 : index
    %c0_6 = arith.constant 0 : index
    %5 = vector.load %arg2[%c0_3, %c0_4, %c0_5, %c0_6] : memref<3x3x128x128xbf16, #tpu.memory_space<vmem>>, vector<1x1x128x128xbf16>
    %6 = vector.shape_cast %5 : vector<1x1x128x128xbf16> to vector<128x128xbf16>
    %cst_7 = arith.constant dense<0.000000e+00> : vector<256x128xf32>
    %7 = tpu.matmul %4, %6, %cst_7 {dimension_numbers = #tpu.dot_dimension_numbers<[1], [0], [0], [1], [0, 0, 1, 1], [], []>} : vector<256x128xbf16>, vector<128x128xbf16>, vector<256x128xf32> -> vector<256x128xf32>
    %8 = arith.addf %2, %7 : vector<256x128xf32>
    %9 = vector.extract_strided_slice %1 {offsets = [0, 1, 0], sizes = [16, 16, 128], strides = [1, 1, 1]} : vector<18x18x128xbf16> to vector<16x16x128xbf16>
    %10 = vector.shape_cast %9 : vector<16x16x128xbf16> to vector<256x128xbf16>
    %c0_8 = arith.constant 0 : index
    %c1 = arith.constant 1 : index
    %c0_9 = arith.constant 0 : index
    %c0_10 = arith.constant 0 : index
    %11 = vector.load %arg2[%c0_8, %c1, %c0_9, %c0_10] : memref<3x3x128x128xbf16, #tpu.memory_space<vmem>>, vector<1x1x128x128xbf16>
    %12 = vector.shape_cast %11 : vector<1x1x128x128xbf16> to vector<128x128xbf16>
    %cst_11 = arith.constant dense<0.000000e+00> : vector<256x128xf32>
    %13 = tpu.matmul %10, %12, %cst_11 {dimension_numbers = #tpu.dot_dimension_numbers<[1], [0], [0], [1], [0, 0, 1, 1], [], []>} : vector<256x128xbf16>, vector<128x128xbf16>, vector<256x128xf32> -> vector<256x128xf32>
    %14 = arith.addf %8, %13 : vector<256x128xf32>
    %15 = vector.extract_strided_slice %1 {offsets = [0, 2, 0], sizes = [16, 16, 128], strides = [1, 1, 1]} : vector<18x18x128xbf16> to vector<16x16x128xbf16>
    %16 = vector.shape_cast %15 : vector<16x16x128xbf16> to vector<256x128xbf16>
    %c0_12 = arith.constant 0 : index
    %c2 = arith.constant 2 : index
    %c0_13 = arith.constant 0 : index
    %c0_14 = arith.constant 0 : index
    %17 = vector.load %arg2[%c0_12, %c2, %c0_13, %c0_14] : memref<3x3x128x128xbf16, #tpu.memory_space<vmem>>, vector<1x1x128x128xbf16>
    %18 = vector.shape_cast %17 : vector<1x1x128x128xbf16> to vector<128x128xbf16>
    %cst_15 = arith.constant dense<0.000000e+00> : vector<256x128xf32>
    %19 = tpu.matmul %16, %18, %cst_15 {dimension_numbers = #tpu.dot_dimension_numbers<[1], [0], [0], [1], [0, 0, 1, 1], [], []>} : vector<256x128xbf16>, vector<128x128xbf16>, vector<256x128xf32> -> vector<256x128xf32>
    %20 = arith.addf %14, %19 : vector<256x128xf32>
    %21 = vector.extract_strided_slice %1 {offsets = [1, 0, 0], sizes = [16, 16, 128], strides = [1, 1, 1]} : vector<18x18x128xbf16> to vector<16x16x128xbf16>
    %22 = vector.shape_cast %21 : vector<16x16x128xbf16> to vector<256x128xbf16>
    %c1_16 = arith.constant 1 : index
    %c0_17 = arith.constant 0 : index
    %c0_18 = arith.constant 0 : index
    %c0_19 = arith.constant 0 : index
    %23 = vector.load %arg2[%c1_16, %c0_17, %c0_18, %c0_19] : memref<3x3x128x128xbf16, #tpu.memory_space<vmem>>, vector<1x1x128x128xbf16>
    %24 = vector.shape_cast %23 : vector<1x1x128x128xbf16> to vector<128x128xbf16>
    %cst_20 = arith.constant dense<0.000000e+00> : vector<256x128xf32>
    %25 = tpu.matmul %22, %24, %cst_20 {dimension_numbers = #tpu.dot_dimension_numbers<[1], [0], [0], [1], [0, 0, 1, 1], [], []>} : vector<256x128xbf16>, vector<128x128xbf16>, vector<256x128xf32> -> vector<256x128xf32>
    %26 = arith.addf %20, %25 : vector<256x128xf32>
    %27 = vector.extract_strided_slice %1 {offsets = [1, 1, 0], sizes = [16, 16, 128], strides = [1, 1, 1]} : vector<18x18x128xbf16> to vector<16x16x128xbf16>
    %28 = vector.shape_cast %27 : vector<16x16x128xbf16> to vector<256x128xbf16>
    %c1_21 = arith.constant 1 : index
    %c1_22 = arith.constant 1 : index
    %c0_23 = arith.constant 0 : index
    %c0_24 = arith.constant 0 : index
    %29 = vector.load %arg2[%c1_21, %c1_22, %c0_23, %c0_24] : memref<3x3x128x128xbf16, #tpu.memory_space<vmem>>, vector<1x1x128x128xbf16>
    %30 = vector.shape_cast %29 : vector<1x1x128x128xbf16> to vector<128x128xbf16>
    %cst_25 = arith.constant dense<0.000000e+00> : vector<256x128xf32>
    %31 = tpu.matmul %28, %30, %cst_25 {dimension_numbers = #tpu.dot_dimension_numbers<[1], [0], [0], [1], [0, 0, 1, 1], [], []>} : vector<256x128xbf16>, vector<128x128xbf16>, vector<256x128xf32> -> vector<256x128xf32>
    %32 = arith.addf %26, %31 : vector<256x128xf32>
    %33 = vector.extract_strided_slice %1 {offsets = [1, 2, 0], sizes = [16, 16, 128], strides = [1, 1, 1]} : vector<18x18x128xbf16> to vector<16x16x128xbf16>
    %34 = vector.shape_cast %33 : vector<16x16x128xbf16> to vector<256x128xbf16>
    %c1_26 = arith.constant 1 : index
    %c2_27 = arith.constant 2 : index
    %c0_28 = arith.constant 0 : index
    %c0_29 = arith.constant 0 : index
    %35 = vector.load %arg2[%c1_26, %c2_27, %c0_28, %c0_29] : memref<3x3x128x128xbf16, #tpu.memory_space<vmem>>, vector<1x1x128x128xbf16>
    %36 = vector.shape_cast %35 : vector<1x1x128x128xbf16> to vector<128x128xbf16>
    %cst_30 = arith.constant dense<0.000000e+00> : vector<256x128xf32>
    %37 = tpu.matmul %34, %36, %cst_30 {dimension_numbers = #tpu.dot_dimension_numbers<[1], [0], [0], [1], [0, 0, 1, 1], [], []>} : vector<256x128xbf16>, vector<128x128xbf16>, vector<256x128xf32> -> vector<256x128xf32>
    %38 = arith.addf %32, %37 : vector<256x128xf32>
    %39 = vector.extract_strided_slice %1 {offsets = [2, 0, 0], sizes = [16, 16, 128], strides = [1, 1, 1]} : vector<18x18x128xbf16> to vector<16x16x128xbf16>
    %40 = vector.shape_cast %39 : vector<16x16x128xbf16> to vector<256x128xbf16>
    %c2_31 = arith.constant 2 : index
    %c0_32 = arith.constant 0 : index
    %c0_33 = arith.constant 0 : index
    %c0_34 = arith.constant 0 : index
    %41 = vector.load %arg2[%c2_31, %c0_32, %c0_33, %c0_34] : memref<3x3x128x128xbf16, #tpu.memory_space<vmem>>, vector<1x1x128x128xbf16>
    %42 = vector.shape_cast %41 : vector<1x1x128x128xbf16> to vector<128x128xbf16>
    %cst_35 = arith.constant dense<0.000000e+00> : vector<256x128xf32>
    %43 = tpu.matmul %40, %42, %cst_35 {dimension_numbers = #tpu.dot_dimension_numbers<[1], [0], [0], [1], [0, 0, 1, 1], [], []>} : vector<256x128xbf16>, vector<128x128xbf16>, vector<256x128xf32> -> vector<256x128xf32>
    %44 = arith.addf %38, %43 : vector<256x128xf32>
    %45 = vector.extract_strided_slice %1 {offsets = [2, 1, 0], sizes = [16, 16, 128], strides = [1, 1, 1]} : vector<18x18x128xbf16> to vector<16x16x128xbf16>
    %46 = vector.shape_cast %45 : vector<16x16x128xbf16> to vector<256x128xbf16>
    %c2_36 = arith.constant 2 : index
    %c1_37 = arith.constant 1 : index
    %c0_38 = arith.constant 0 : index
    %c0_39 = arith.constant 0 : index
    %47 = vector.load %arg2[%c2_36, %c1_37, %c0_38, %c0_39] : memref<3x3x128x128xbf16, #tpu.memory_space<vmem>>, vector<1x1x128x128xbf16>
    %48 = vector.shape_cast %47 : vector<1x1x128x128xbf16> to vector<128x128xbf16>
    %cst_40 = arith.constant dense<0.000000e+00> : vector<256x128xf32>
    %49 = tpu.matmul %46, %48, %cst_40 {dimension_numbers = #tpu.dot_dimension_numbers<[1], [0], [0], [1], [0, 0, 1, 1], [], []>} : vector<256x128xbf16>, vector<128x128xbf16>, vector<256x128xf32> -> vector<256x128xf32>
    %50 = arith.addf %44, %49 : vector<256x128xf32>
    %51 = vector.extract_strided_slice %1 {offsets = [2, 2, 0], sizes = [16, 16, 128], strides = [1, 1, 1]} : vector<18x18x128xbf16> to vector<16x16x128xbf16>
    %52 = vector.shape_cast %51 : vector<16x16x128xbf16> to vector<256x128xbf16>
    %c2_41 = arith.constant 2 : index
    %c2_42 = arith.constant 2 : index
    %c0_43 = arith.constant 0 : index
    %c0_44 = arith.constant 0 : index
    %53 = vector.load %arg2[%c2_41, %c2_42, %c0_43, %c0_44] : memref<3x3x128x128xbf16, #tpu.memory_space<vmem>>, vector<1x1x128x128xbf16>
    %54 = vector.shape_cast %53 : vector<1x1x128x128xbf16> to vector<128x128xbf16>
    %cst_45 = arith.constant dense<0.000000e+00> : vector<256x128xf32>
    %55 = tpu.matmul %52, %54, %cst_45 {dimension_numbers = #tpu.dot_dimension_numbers<[1], [0], [0], [1], [0, 0, 1, 1], [], []>} : vector<256x128xbf16>, vector<128x128xbf16>, vector<256x128xf32> -> vector<256x128xf32>
    %56 = arith.addf %50, %55 : vector<256x128xf32>
    %c0_46 = arith.constant 0 : index
    %c0_47 = arith.constant 0 : index
    %57 = vector.load %arg3[%c0_46, %c0_47] : memref<1x128xf32, #tpu.memory_space<vmem>>, vector<1x128xf32>
    %58 = vector.broadcast %57 : vector<1x128xf32> to vector<256x128xf32>
    %59 = arith.addf %56, %58 : vector<256x128xf32>
    %cst_48 = arith.constant 0.000000e+00 : f32
    %60 = vector.broadcast %cst_48 : f32 to vector<256x128xf32>
    %61 = arith.maximumf %59, %60 : vector<256x128xf32>
    %62 = vector.shape_cast %61 : vector<256x128xf32> to vector<16x16x128xf32>
    %63 = arith.truncf %62 : vector<16x16x128xf32> to vector<16x16x128xbf16>
    %cst_49 = arith.constant 0.000000e+00 : bf16
    %64 = vector.broadcast %cst_49 : bf16 to vector<1x18x18x128xbf16>
    %c0_50 = arith.constant 0 : index
    %c0_51 = arith.constant 0 : index
    %c0_52 = arith.constant 0 : index
    %c0_53 = arith.constant 0 : index
    %65 = vector.load %arg4[%c0_50, %c0_51, %c0_52, %c0_53] : memref<1x18x18x128xbf16, #tpu.memory_space<vmem>>, vector<1x18x18x128xbf16>
    tpu.vector_store %arg4[%c0_50, %c0_51, %c0_52, %c0_53], %64 {strides = array<i32>} : memref<1x18x18x128xbf16, #tpu.memory_space<vmem>>, vector<1x18x18x128xbf16>,
    %c0_54 = arith.constant 0 : index
    %c1_55 = arith.constant 1 : index
    %c1_56 = arith.constant 1 : index
    %c0_57 = arith.constant 0 : index
    %66 = vector.load %arg4[%c0_54, %c1_55, %c1_56, %c0_57] : memref<1x18x18x128xbf16, #tpu.memory_space<vmem>>, vector<1x16x16x128xbf16>
    %67 = vector.shape_cast %66 : vector<1x16x16x128xbf16> to vector<16x16x128xbf16>
    %68 = vector.shape_cast %63 : vector<16x16x128xbf16> to vector<1x16x16x128xbf16>
    tpu.vector_store %arg4[%c0_54, %c1_55, %c1_56, %c0_57], %68 {strides = array<i32>} : memref<1x18x18x128xbf16, #tpu.memory_space<vmem>>, vector<1x16x16x128xbf16>,
    return
  }
  func.func @transform_0(%arg0: i32) -> (i32, i32, i32, i32) {
    %c0_i32 = arith.constant 0 : i32
    %c0_i32_0 = arith.constant 0 : i32
    %c0_i32_1 = arith.constant 0 : i32
    %c0_i32_2 = arith.constant 0 : i32
    return %arg0, %c0_i32, %c0_i32_0, %c0_i32_1 : i32, i32, i32, i32
  }
  func.func @transform_1(%arg0: i32) -> (i32, i32, i32, i32) {
    %c0_i32 = arith.constant 0 : i32
    %c0_i32_0 = arith.constant 0 : i32
    %c0_i32_1 = arith.constant 0 : i32
    %c0_i32_2 = arith.constant 0 : i32
    %c0_i32_3 = arith.constant 0 : i32
    return %c0_i32, %c0_i32_0, %c0_i32_1, %c0_i32_2 : i32, i32, i32, i32
  }
  func.func @transform_2(%arg0: i32) -> (i32, i32) {
    %c0_i32 = arith.constant 0 : i32
    %c0_i32_0 = arith.constant 0 : i32
    %c0_i32_1 = arith.constant 0 : i32
    return %c0_i32, %c0_i32_0 : i32, i32
  }
  func.func @transform_3(%arg0: i32) -> (i32, i32, i32, i32) {
    %c0_i32 = arith.constant 0 : i32
    %c0_i32_0 = arith.constant 0 : i32
    %c0_i32_1 = arith.constant 0 : i32
    %c0_i32_2 = arith.constant 0 : i32
    return %arg0, %c0_i32, %c0_i32_0, %c0_i32_1 : i32, i32, i32, i32
  }
}

module attributes {stable_mosaic.version = 11 : i64} {
  func.func @_deconv4x4_s2_kernel(%arg0: i32, %arg1: memref<1x18x18x128xbf16, #tpu.memory_space<vmem>>, %arg2: memref<4x4x128x64xbf16, #tpu.memory_space<vmem>>, %arg3: memref<1x64xf32, #tpu.memory_space<vmem>>, %arg4: memref<1x2x2x16x16x64xf32, #tpu.memory_space<vmem>>) attributes {dimension_semantics = [#tpu.dimension_semantics<parallel>], iteration_bounds = array<i64: 2>, scalar_prefetch = 0 : i64, scratch_operands = 0 : i64, tpu.core_type = #tpu.core_type<tc>, window_params = [{transform_indices = @transform_0, window_bounds = array<i64: 1, 18, 18, 128>}, {pipeline_mode = #tpu.pipeline_mode<synchronous>, transform_indices = @transform_1, window_bounds = array<i64: 4, 4, 128, 64>}, {pipeline_mode = #tpu.pipeline_mode<synchronous>, transform_indices = @transform_2, window_bounds = array<i64: 1, 64>}, {transform_indices = @transform_3, window_bounds = array<i64: 1, 2, 2, 16, 16, 64>}]} {
    %c0 = arith.constant 0 : index
    %c0_0 = arith.constant 0 : index
    %c0_1 = arith.constant 0 : index
    %c0_2 = arith.constant 0 : index
    %0 = vector.load %arg1[%c0, %c0_0, %c0_1, %c0_2] : memref<1x18x18x128xbf16, #tpu.memory_space<vmem>>, vector<1x18x18x128xbf16>
    %1 = vector.shape_cast %0 : vector<1x18x18x128xbf16> to vector<18x18x128xbf16>
    %cst = arith.constant 0.000000e+00 : f32
    %2 = vector.broadcast %cst : f32 to vector<256x64xf32>
    %3 = vector.extract_strided_slice %1 {offsets = [0, 0, 0], sizes = [16, 16, 128], strides = [1, 1, 1]} : vector<18x18x128xbf16> to vector<16x16x128xbf16>
    %4 = vector.shape_cast %3 : vector<16x16x128xbf16> to vector<256x128xbf16>
    %c3 = arith.constant 3 : index
    %c3_3 = arith.constant 3 : index
    %c0_4 = arith.constant 0 : index
    %c0_5 = arith.constant 0 : index
    %5 = vector.load %arg2[%c3, %c3_3, %c0_4, %c0_5] : memref<4x4x128x64xbf16, #tpu.memory_space<vmem>>, vector<1x1x128x64xbf16>
    %6 = vector.shape_cast %5 : vector<1x1x128x64xbf16> to vector<128x64xbf16>
    %cst_6 = arith.constant dense<0.000000e+00> : vector<256x64xf32>
    %7 = tpu.matmul %4, %6, %cst_6 {dimension_numbers = #tpu.dot_dimension_numbers<[1], [0], [0], [1], [0, 0, 1, 1], [], []>} : vector<256x128xbf16>, vector<128x64xbf16>, vector<256x64xf32> -> vector<256x64xf32>
    %8 = arith.addf %2, %7 : vector<256x64xf32>
    %9 = vector.extract_strided_slice %1 {offsets = [0, 1, 0], sizes = [16, 16, 128], strides = [1, 1, 1]} : vector<18x18x128xbf16> to vector<16x16x128xbf16>
    %10 = vector.shape_cast %9 : vector<16x16x128xbf16> to vector<256x128xbf16>
    %c3_7 = arith.constant 3 : index
    %c1 = arith.constant 1 : index
    %c0_8 = arith.constant 0 : index
    %c0_9 = arith.constant 0 : index
    %11 = vector.load %arg2[%c3_7, %c1, %c0_8, %c0_9] : memref<4x4x128x64xbf16, #tpu.memory_space<vmem>>, vector<1x1x128x64xbf16>
    %12 = vector.shape_cast %11 : vector<1x1x128x64xbf16> to vector<128x64xbf16>
    %cst_10 = arith.constant dense<0.000000e+00> : vector<256x64xf32>
    %13 = tpu.matmul %10, %12, %cst_10 {dimension_numbers = #tpu.dot_dimension_numbers<[1], [0], [0], [1], [0, 0, 1, 1], [], []>} : vector<256x128xbf16>, vector<128x64xbf16>, vector<256x64xf32> -> vector<256x64xf32>
    %14 = arith.addf %8, %13 : vector<256x64xf32>
    %15 = vector.extract_strided_slice %1 {offsets = [1, 0, 0], sizes = [16, 16, 128], strides = [1, 1, 1]} : vector<18x18x128xbf16> to vector<16x16x128xbf16>
    %16 = vector.shape_cast %15 : vector<16x16x128xbf16> to vector<256x128xbf16>
    %c1_11 = arith.constant 1 : index
    %c3_12 = arith.constant 3 : index
    %c0_13 = arith.constant 0 : index
    %c0_14 = arith.constant 0 : index
    %17 = vector.load %arg2[%c1_11, %c3_12, %c0_13, %c0_14] : memref<4x4x128x64xbf16, #tpu.memory_space<vmem>>, vector<1x1x128x64xbf16>
    %18 = vector.shape_cast %17 : vector<1x1x128x64xbf16> to vector<128x64xbf16>
    %cst_15 = arith.constant dense<0.000000e+00> : vector<256x64xf32>
    %19 = tpu.matmul %16, %18, %cst_15 {dimension_numbers = #tpu.dot_dimension_numbers<[1], [0], [0], [1], [0, 0, 1, 1], [], []>} : vector<256x128xbf16>, vector<128x64xbf16>, vector<256x64xf32> -> vector<256x64xf32>
    %20 = arith.addf %14, %19 : vector<256x64xf32>
    %21 = vector.extract_strided_slice %1 {offsets = [1, 1, 0], sizes = [16, 16, 128], strides = [1, 1, 1]} : vector<18x18x128xbf16> to vector<16x16x128xbf16>
    %22 = vector.shape_cast %21 : vector<16x16x128xbf16> to vector<256x128xbf16>
    %c1_16 = arith.constant 1 : index
    %c1_17 = arith.constant 1 : index
    %c0_18 = arith.constant 0 : index
    %c0_19 = arith.constant 0 : index
    %23 = vector.load %arg2[%c1_16, %c1_17, %c0_18, %c0_19] : memref<4x4x128x64xbf16, #tpu.memory_space<vmem>>, vector<1x1x128x64xbf16>
    %24 = vector.shape_cast %23 : vector<1x1x128x64xbf16> to vector<128x64xbf16>
    %cst_20 = arith.constant dense<0.000000e+00> : vector<256x64xf32>
    %25 = tpu.matmul %22, %24, %cst_20 {dimension_numbers = #tpu.dot_dimension_numbers<[1], [0], [0], [1], [0, 0, 1, 1], [], []>} : vector<256x128xbf16>, vector<128x64xbf16>, vector<256x64xf32> -> vector<256x64xf32>
    %26 = arith.addf %20, %25 : vector<256x64xf32>
    %c0_21 = arith.constant 0 : index
    %c0_22 = arith.constant 0 : index
    %27 = vector.load %arg3[%c0_21, %c0_22] : memref<1x64xf32, #tpu.memory_space<vmem>>, vector<1x64xf32>
    %28 = vector.broadcast %27 : vector<1x64xf32> to vector<256x64xf32>
    %29 = arith.addf %26, %28 : vector<256x64xf32>
    %cst_23 = arith.constant 0.000000e+00 : f32
    %30 = vector.broadcast %cst_23 : f32 to vector<256x64xf32>
    %31 = arith.maximumf %29, %30 : vector<256x64xf32>
    %32 = vector.shape_cast %31 : vector<256x64xf32> to vector<16x16x64xf32>
    %c0_24 = arith.constant 0 : index
    %c0_25 = arith.constant 0 : index
    %c0_26 = arith.constant 0 : index
    %c0_27 = arith.constant 0 : index
    %c0_28 = arith.constant 0 : index
    %c0_29 = arith.constant 0 : index
    %33 = vector.load %arg4[%c0_24, %c0_25, %c0_26, %c0_27, %c0_28, %c0_29] : memref<1x2x2x16x16x64xf32, #tpu.memory_space<vmem>>, vector<1x1x1x16x16x64xf32>
    %34 = vector.shape_cast %33 : vector<1x1x1x16x16x64xf32> to vector<16x16x64xf32>
    %35 = vector.shape_cast %32 : vector<16x16x64xf32> to vector<1x1x1x16x16x64xf32>
    tpu.vector_store %arg4[%c0_24, %c0_25, %c0_26, %c0_27, %c0_28, %c0_29], %35 {strides = array<i32>} : memref<1x2x2x16x16x64xf32, #tpu.memory_space<vmem>>, vector<1x1x1x16x16x64xf32>,
    %cst_30 = arith.constant 0.000000e+00 : f32
    %36 = vector.broadcast %cst_30 : f32 to vector<256x64xf32>
    %37 = vector.extract_strided_slice %1 {offsets = [0, 1, 0], sizes = [16, 16, 128], strides = [1, 1, 1]} : vector<18x18x128xbf16> to vector<16x16x128xbf16>
    %38 = vector.shape_cast %37 : vector<16x16x128xbf16> to vector<256x128xbf16>
    %c3_31 = arith.constant 3 : index
    %c2 = arith.constant 2 : index
    %c0_32 = arith.constant 0 : index
    %c0_33 = arith.constant 0 : index
    %39 = vector.load %arg2[%c3_31, %c2, %c0_32, %c0_33] : memref<4x4x128x64xbf16, #tpu.memory_space<vmem>>, vector<1x1x128x64xbf16>
    %40 = vector.shape_cast %39 : vector<1x1x128x64xbf16> to vector<128x64xbf16>
    %cst_34 = arith.constant dense<0.000000e+00> : vector<256x64xf32>
    %41 = tpu.matmul %38, %40, %cst_34 {dimension_numbers = #tpu.dot_dimension_numbers<[1], [0], [0], [1], [0, 0, 1, 1], [], []>} : vector<256x128xbf16>, vector<128x64xbf16>, vector<256x64xf32> -> vector<256x64xf32>
    %42 = arith.addf %36, %41 : vector<256x64xf32>
    %43 = vector.extract_strided_slice %1 {offsets = [0, 2, 0], sizes = [16, 16, 128], strides = [1, 1, 1]} : vector<18x18x128xbf16> to vector<16x16x128xbf16>
    %44 = vector.shape_cast %43 : vector<16x16x128xbf16> to vector<256x128xbf16>
    %c3_35 = arith.constant 3 : index
    %c0_36 = arith.constant 0 : index
    %c0_37 = arith.constant 0 : index
    %c0_38 = arith.constant 0 : index
    %45 = vector.load %arg2[%c3_35, %c0_36, %c0_37, %c0_38] : memref<4x4x128x64xbf16, #tpu.memory_space<vmem>>, vector<1x1x128x64xbf16>
    %46 = vector.shape_cast %45 : vector<1x1x128x64xbf16> to vector<128x64xbf16>
    %cst_39 = arith.constant dense<0.000000e+00> : vector<256x64xf32>
    %47 = tpu.matmul %44, %46, %cst_39 {dimension_numbers = #tpu.dot_dimension_numbers<[1], [0], [0], [1], [0, 0, 1, 1], [], []>} : vector<256x128xbf16>, vector<128x64xbf16>, vector<256x64xf32> -> vector<256x64xf32>
    %48 = arith.addf %42, %47 : vector<256x64xf32>
    %49 = vector.extract_strided_slice %1 {offsets = [1, 1, 0], sizes = [16, 16, 128], strides = [1, 1, 1]} : vector<18x18x128xbf16> to vector<16x16x128xbf16>
    %50 = vector.shape_cast %49 : vector<16x16x128xbf16> to vector<256x128xbf16>
    %c1_40 = arith.constant 1 : index
    %c2_41 = arith.constant 2 : index
    %c0_42 = arith.constant 0 : index
    %c0_43 = arith.constant 0 : index
    %51 = vector.load %arg2[%c1_40, %c2_41, %c0_42, %c0_43] : memref<4x4x128x64xbf16, #tpu.memory_space<vmem>>, vector<1x1x128x64xbf16>
    %52 = vector.shape_cast %51 : vector<1x1x128x64xbf16> to vector<128x64xbf16>
    %cst_44 = arith.constant dense<0.000000e+00> : vector<256x64xf32>
    %53 = tpu.matmul %50, %52, %cst_44 {dimension_numbers = #tpu.dot_dimension_numbers<[1], [0], [0], [1], [0, 0, 1, 1], [], []>} : vector<256x128xbf16>, vector<128x64xbf16>, vector<256x64xf32> -> vector<256x64xf32>
    %54 = arith.addf %48, %53 : vector<256x64xf32>
    %55 = vector.extract_strided_slice %1 {offsets = [1, 2, 0], sizes = [16, 16, 128], strides = [1, 1, 1]} : vector<18x18x128xbf16> to vector<16x16x128xbf16>
    %56 = vector.shape_cast %55 : vector<16x16x128xbf16> to vector<256x128xbf16>
    %c1_45 = arith.constant 1 : index
    %c0_46 = arith.constant 0 : index
    %c0_47 = arith.constant 0 : index
    %c0_48 = arith.constant 0 : index
    %57 = vector.load %arg2[%c1_45, %c0_46, %c0_47, %c0_48] : memref<4x4x128x64xbf16, #tpu.memory_space<vmem>>, vector<1x1x128x64xbf16>
    %58 = vector.shape_cast %57 : vector<1x1x128x64xbf16> to vector<128x64xbf16>
    %cst_49 = arith.constant dense<0.000000e+00> : vector<256x64xf32>
    %59 = tpu.matmul %56, %58, %cst_49 {dimension_numbers = #tpu.dot_dimension_numbers<[1], [0], [0], [1], [0, 0, 1, 1], [], []>} : vector<256x128xbf16>, vector<128x64xbf16>, vector<256x64xf32> -> vector<256x64xf32>
    %60 = arith.addf %54, %59 : vector<256x64xf32>
    %c0_50 = arith.constant 0 : index
    %c0_51 = arith.constant 0 : index
    %61 = vector.load %arg3[%c0_50, %c0_51] : memref<1x64xf32, #tpu.memory_space<vmem>>, vector<1x64xf32>
    %62 = vector.broadcast %61 : vector<1x64xf32> to vector<256x64xf32>
    %63 = arith.addf %60, %62 : vector<256x64xf32>
    %cst_52 = arith.constant 0.000000e+00 : f32
    %64 = vector.broadcast %cst_52 : f32 to vector<256x64xf32>
    %65 = arith.maximumf %63, %64 : vector<256x64xf32>
    %66 = vector.shape_cast %65 : vector<256x64xf32> to vector<16x16x64xf32>
    %c0_53 = arith.constant 0 : index
    %c0_54 = arith.constant 0 : index
    %c1_55 = arith.constant 1 : index
    %c0_56 = arith.constant 0 : index
    %c0_57 = arith.constant 0 : index
    %c0_58 = arith.constant 0 : index
    %67 = vector.load %arg4[%c0_53, %c0_54, %c1_55, %c0_56, %c0_57, %c0_58] : memref<1x2x2x16x16x64xf32, #tpu.memory_space<vmem>>, vector<1x1x1x16x16x64xf32>
    %68 = vector.shape_cast %67 : vector<1x1x1x16x16x64xf32> to vector<16x16x64xf32>
    %69 = vector.shape_cast %66 : vector<16x16x64xf32> to vector<1x1x1x16x16x64xf32>
    tpu.vector_store %arg4[%c0_53, %c0_54, %c1_55, %c0_56, %c0_57, %c0_58], %69 {strides = array<i32>} : memref<1x2x2x16x16x64xf32, #tpu.memory_space<vmem>>, vector<1x1x1x16x16x64xf32>,
    %cst_59 = arith.constant 0.000000e+00 : f32
    %70 = vector.broadcast %cst_59 : f32 to vector<256x64xf32>
    %71 = vector.extract_strided_slice %1 {offsets = [1, 0, 0], sizes = [16, 16, 128], strides = [1, 1, 1]} : vector<18x18x128xbf16> to vector<16x16x128xbf16>
    %72 = vector.shape_cast %71 : vector<16x16x128xbf16> to vector<256x128xbf16>
    %c2_60 = arith.constant 2 : index
    %c3_61 = arith.constant 3 : index
    %c0_62 = arith.constant 0 : index
    %c0_63 = arith.constant 0 : index
    %73 = vector.load %arg2[%c2_60, %c3_61, %c0_62, %c0_63] : memref<4x4x128x64xbf16, #tpu.memory_space<vmem>>, vector<1x1x128x64xbf16>
    %74 = vector.shape_cast %73 : vector<1x1x128x64xbf16> to vector<128x64xbf16>
    %cst_64 = arith.constant dense<0.000000e+00> : vector<256x64xf32>
    %75 = tpu.matmul %72, %74, %cst_64 {dimension_numbers = #tpu.dot_dimension_numbers<[1], [0], [0], [1], [0, 0, 1, 1], [], []>} : vector<256x128xbf16>, vector<128x64xbf16>, vector<256x64xf32> -> vector<256x64xf32>
    %76 = arith.addf %70, %75 : vector<256x64xf32>
    %77 = vector.extract_strided_slice %1 {offsets = [1, 1, 0], sizes = [16, 16, 128], strides = [1, 1, 1]} : vector<18x18x128xbf16> to vector<16x16x128xbf16>
    %78 = vector.shape_cast %77 : vector<16x16x128xbf16> to vector<256x128xbf16>
    %c2_65 = arith.constant 2 : index
    %c1_66 = arith.constant 1 : index
    %c0_67 = arith.constant 0 : index
    %c0_68 = arith.constant 0 : index
    %79 = vector.load %arg2[%c2_65, %c1_66, %c0_67, %c0_68] : memref<4x4x128x64xbf16, #tpu.memory_space<vmem>>, vector<1x1x128x64xbf16>
    %80 = vector.shape_cast %79 : vector<1x1x128x64xbf16> to vector<128x64xbf16>
    %cst_69 = arith.constant dense<0.000000e+00> : vector<256x64xf32>
    %81 = tpu.matmul %78, %80, %cst_69 {dimension_numbers = #tpu.dot_dimension_numbers<[1], [0], [0], [1], [0, 0, 1, 1], [], []>} : vector<256x128xbf16>, vector<128x64xbf16>, vector<256x64xf32> -> vector<256x64xf32>
    %82 = arith.addf %76, %81 : vector<256x64xf32>
    %83 = vector.extract_strided_slice %1 {offsets = [2, 0, 0], sizes = [16, 16, 128], strides = [1, 1, 1]} : vector<18x18x128xbf16> to vector<16x16x128xbf16>
    %84 = vector.shape_cast %83 : vector<16x16x128xbf16> to vector<256x128xbf16>
    %c0_70 = arith.constant 0 : index
    %c3_71 = arith.constant 3 : index
    %c0_72 = arith.constant 0 : index
    %c0_73 = arith.constant 0 : index
    %85 = vector.load %arg2[%c0_70, %c3_71, %c0_72, %c0_73] : memref<4x4x128x64xbf16, #tpu.memory_space<vmem>>, vector<1x1x128x64xbf16>
    %86 = vector.shape_cast %85 : vector<1x1x128x64xbf16> to vector<128x64xbf16>
    %cst_74 = arith.constant dense<0.000000e+00> : vector<256x64xf32>
    %87 = tpu.matmul %84, %86, %cst_74 {dimension_numbers = #tpu.dot_dimension_numbers<[1], [0], [0], [1], [0, 0, 1, 1], [], []>} : vector<256x128xbf16>, vector<128x64xbf16>, vector<256x64xf32> -> vector<256x64xf32>
    %88 = arith.addf %82, %87 : vector<256x64xf32>
    %89 = vector.extract_strided_slice %1 {offsets = [2, 1, 0], sizes = [16, 16, 128], strides = [1, 1, 1]} : vector<18x18x128xbf16> to vector<16x16x128xbf16>
    %90 = vector.shape_cast %89 : vector<16x16x128xbf16> to vector<256x128xbf16>
    %c0_75 = arith.constant 0 : index
    %c1_76 = arith.constant 1 : index
    %c0_77 = arith.constant 0 : index
    %c0_78 = arith.constant 0 : index
    %91 = vector.load %arg2[%c0_75, %c1_76, %c0_77, %c0_78] : memref<4x4x128x64xbf16, #tpu.memory_space<vmem>>, vector<1x1x128x64xbf16>
    %92 = vector.shape_cast %91 : vector<1x1x128x64xbf16> to vector<128x64xbf16>
    %cst_79 = arith.constant dense<0.000000e+00> : vector<256x64xf32>
    %93 = tpu.matmul %90, %92, %cst_79 {dimension_numbers = #tpu.dot_dimension_numbers<[1], [0], [0], [1], [0, 0, 1, 1], [], []>} : vector<256x128xbf16>, vector<128x64xbf16>, vector<256x64xf32> -> vector<256x64xf32>
    %94 = arith.addf %88, %93 : vector<256x64xf32>
    %c0_80 = arith.constant 0 : index
    %c0_81 = arith.constant 0 : index
    %95 = vector.load %arg3[%c0_80, %c0_81] : memref<1x64xf32, #tpu.memory_space<vmem>>, vector<1x64xf32>
    %96 = vector.broadcast %95 : vector<1x64xf32> to vector<256x64xf32>
    %97 = arith.addf %94, %96 : vector<256x64xf32>
    %cst_82 = arith.constant 0.000000e+00 : f32
    %98 = vector.broadcast %cst_82 : f32 to vector<256x64xf32>
    %99 = arith.maximumf %97, %98 : vector<256x64xf32>
    %100 = vector.shape_cast %99 : vector<256x64xf32> to vector<16x16x64xf32>
    %c0_83 = arith.constant 0 : index
    %c1_84 = arith.constant 1 : index
    %c0_85 = arith.constant 0 : index
    %c0_86 = arith.constant 0 : index
    %c0_87 = arith.constant 0 : index
    %c0_88 = arith.constant 0 : index
    %101 = vector.load %arg4[%c0_83, %c1_84, %c0_85, %c0_86, %c0_87, %c0_88] : memref<1x2x2x16x16x64xf32, #tpu.memory_space<vmem>>, vector<1x1x1x16x16x64xf32>
    %102 = vector.shape_cast %101 : vector<1x1x1x16x16x64xf32> to vector<16x16x64xf32>
    %103 = vector.shape_cast %100 : vector<16x16x64xf32> to vector<1x1x1x16x16x64xf32>
    tpu.vector_store %arg4[%c0_83, %c1_84, %c0_85, %c0_86, %c0_87, %c0_88], %103 {strides = array<i32>} : memref<1x2x2x16x16x64xf32, #tpu.memory_space<vmem>>, vector<1x1x1x16x16x64xf32>,
    %cst_89 = arith.constant 0.000000e+00 : f32
    %104 = vector.broadcast %cst_89 : f32 to vector<256x64xf32>
    %105 = vector.extract_strided_slice %1 {offsets = [1, 1, 0], sizes = [16, 16, 128], strides = [1, 1, 1]} : vector<18x18x128xbf16> to vector<16x16x128xbf16>
    %106 = vector.shape_cast %105 : vector<16x16x128xbf16> to vector<256x128xbf16>
    %c2_90 = arith.constant 2 : index
    %c2_91 = arith.constant 2 : index
    %c0_92 = arith.constant 0 : index
    %c0_93 = arith.constant 0 : index
    %107 = vector.load %arg2[%c2_90, %c2_91, %c0_92, %c0_93] : memref<4x4x128x64xbf16, #tpu.memory_space<vmem>>, vector<1x1x128x64xbf16>
    %108 = vector.shape_cast %107 : vector<1x1x128x64xbf16> to vector<128x64xbf16>
    %cst_94 = arith.constant dense<0.000000e+00> : vector<256x64xf32>
    %109 = tpu.matmul %106, %108, %cst_94 {dimension_numbers = #tpu.dot_dimension_numbers<[1], [0], [0], [1], [0, 0, 1, 1], [], []>} : vector<256x128xbf16>, vector<128x64xbf16>, vector<256x64xf32> -> vector<256x64xf32>
    %110 = arith.addf %104, %109 : vector<256x64xf32>
    %111 = vector.extract_strided_slice %1 {offsets = [1, 2, 0], sizes = [16, 16, 128], strides = [1, 1, 1]} : vector<18x18x128xbf16> to vector<16x16x128xbf16>
    %112 = vector.shape_cast %111 : vector<16x16x128xbf16> to vector<256x128xbf16>
    %c2_95 = arith.constant 2 : index
    %c0_96 = arith.constant 0 : index
    %c0_97 = arith.constant 0 : index
    %c0_98 = arith.constant 0 : index
    %113 = vector.load %arg2[%c2_95, %c0_96, %c0_97, %c0_98] : memref<4x4x128x64xbf16, #tpu.memory_space<vmem>>, vector<1x1x128x64xbf16>
    %114 = vector.shape_cast %113 : vector<1x1x128x64xbf16> to vector<128x64xbf16>
    %cst_99 = arith.constant dense<0.000000e+00> : vector<256x64xf32>
    %115 = tpu.matmul %112, %114, %cst_99 {dimension_numbers = #tpu.dot_dimension_numbers<[1], [0], [0], [1], [0, 0, 1, 1], [], []>} : vector<256x128xbf16>, vector<128x64xbf16>, vector<256x64xf32> -> vector<256x64xf32>
    %116 = arith.addf %110, %115 : vector<256x64xf32>
    %117 = vector.extract_strided_slice %1 {offsets = [2, 1, 0], sizes = [16, 16, 128], strides = [1, 1, 1]} : vector<18x18x128xbf16> to vector<16x16x128xbf16>
    %118 = vector.shape_cast %117 : vector<16x16x128xbf16> to vector<256x128xbf16>
    %c0_100 = arith.constant 0 : index
    %c2_101 = arith.constant 2 : index
    %c0_102 = arith.constant 0 : index
    %c0_103 = arith.constant 0 : index
    %119 = vector.load %arg2[%c0_100, %c2_101, %c0_102, %c0_103] : memref<4x4x128x64xbf16, #tpu.memory_space<vmem>>, vector<1x1x128x64xbf16>
    %120 = vector.shape_cast %119 : vector<1x1x128x64xbf16> to vector<128x64xbf16>
    %cst_104 = arith.constant dense<0.000000e+00> : vector<256x64xf32>
    %121 = tpu.matmul %118, %120, %cst_104 {dimension_numbers = #tpu.dot_dimension_numbers<[1], [0], [0], [1], [0, 0, 1, 1], [], []>} : vector<256x128xbf16>, vector<128x64xbf16>, vector<256x64xf32> -> vector<256x64xf32>
    %122 = arith.addf %116, %121 : vector<256x64xf32>
    %123 = vector.extract_strided_slice %1 {offsets = [2, 2, 0], sizes = [16, 16, 128], strides = [1, 1, 1]} : vector<18x18x128xbf16> to vector<16x16x128xbf16>
    %124 = vector.shape_cast %123 : vector<16x16x128xbf16> to vector<256x128xbf16>
    %c0_105 = arith.constant 0 : index
    %c0_106 = arith.constant 0 : index
    %c0_107 = arith.constant 0 : index
    %c0_108 = arith.constant 0 : index
    %125 = vector.load %arg2[%c0_105, %c0_106, %c0_107, %c0_108] : memref<4x4x128x64xbf16, #tpu.memory_space<vmem>>, vector<1x1x128x64xbf16>
    %126 = vector.shape_cast %125 : vector<1x1x128x64xbf16> to vector<128x64xbf16>
    %cst_109 = arith.constant dense<0.000000e+00> : vector<256x64xf32>
    %127 = tpu.matmul %124, %126, %cst_109 {dimension_numbers = #tpu.dot_dimension_numbers<[1], [0], [0], [1], [0, 0, 1, 1], [], []>} : vector<256x128xbf16>, vector<128x64xbf16>, vector<256x64xf32> -> vector<256x64xf32>
    %128 = arith.addf %122, %127 : vector<256x64xf32>
    %c0_110 = arith.constant 0 : index
    %c0_111 = arith.constant 0 : index
    %129 = vector.load %arg3[%c0_110, %c0_111] : memref<1x64xf32, #tpu.memory_space<vmem>>, vector<1x64xf32>
    %130 = vector.broadcast %129 : vector<1x64xf32> to vector<256x64xf32>
    %131 = arith.addf %128, %130 : vector<256x64xf32>
    %cst_112 = arith.constant 0.000000e+00 : f32
    %132 = vector.broadcast %cst_112 : f32 to vector<256x64xf32>
    %133 = arith.maximumf %131, %132 : vector<256x64xf32>
    %134 = vector.shape_cast %133 : vector<256x64xf32> to vector<16x16x64xf32>
    %c0_113 = arith.constant 0 : index
    %c1_114 = arith.constant 1 : index
    %c1_115 = arith.constant 1 : index
    %c0_116 = arith.constant 0 : index
    %c0_117 = arith.constant 0 : index
    %c0_118 = arith.constant 0 : index
    %135 = vector.load %arg4[%c0_113, %c1_114, %c1_115, %c0_116, %c0_117, %c0_118] : memref<1x2x2x16x16x64xf32, #tpu.memory_space<vmem>>, vector<1x1x1x16x16x64xf32>
    %136 = vector.shape_cast %135 : vector<1x1x1x16x16x64xf32> to vector<16x16x64xf32>
    %137 = vector.shape_cast %134 : vector<16x16x64xf32> to vector<1x1x1x16x16x64xf32>
    tpu.vector_store %arg4[%c0_113, %c1_114, %c1_115, %c0_116, %c0_117, %c0_118], %137 {strides = array<i32>} : memref<1x2x2x16x16x64xf32, #tpu.memory_space<vmem>>, vector<1x1x1x16x16x64xf32>,
    return
  }
  func.func @transform_0(%arg0: i32) -> (i32, i32, i32, i32) {
    %c0_i32 = arith.constant 0 : i32
    %c0_i32_0 = arith.constant 0 : i32
    %c0_i32_1 = arith.constant 0 : i32
    %c0_i32_2 = arith.constant 0 : i32
    return %arg0, %c0_i32, %c0_i32_0, %c0_i32_1 : i32, i32, i32, i32
  }
  func.func @transform_1(%arg0: i32) -> (i32, i32, i32, i32) {
    %c0_i32 = arith.constant 0 : i32
    %c0_i32_0 = arith.constant 0 : i32
    %c0_i32_1 = arith.constant 0 : i32
    %c0_i32_2 = arith.constant 0 : i32
    %c0_i32_3 = arith.constant 0 : i32
    return %c0_i32, %c0_i32_0, %c0_i32_1, %c0_i32_2 : i32, i32, i32, i32
  }
  func.func @transform_2(%arg0: i32) -> (i32, i32) {
    %c0_i32 = arith.constant 0 : i32
    %c0_i32_0 = arith.constant 0 : i32
    %c0_i32_1 = arith.constant 0 : i32
    return %c0_i32, %c0_i32_0 : i32, i32
  }
  func.func @transform_3(%arg0: i32) -> (i32, i32, i32, i32, i32, i32) {
    %c0_i32 = arith.constant 0 : i32
    %c0_i32_0 = arith.constant 0 : i32
    %c0_i32_1 = arith.constant 0 : i32
    %c0_i32_2 = arith.constant 0 : i32
    %c0_i32_3 = arith.constant 0 : i32
    %c0_i32_4 = arith.constant 0 : i32
    return %arg0, %c0_i32, %c0_i32_0, %c0_i32_1, %c0_i32_2, %c0_i32_3 : i32, i32, i32, i32, i32, i32
  }
}

</mosaic_0001>

<bundles_post_ra>
// kernel: decoder_block_forward.3
= control target key start
LH: loop header
LB: loop body
LE: loop exit
PB: predicated region body
PF: predicated region fallthrough
CT: control target
= control target key end

     0   :  { %s7304_s12 = smov 0   ;;  %s9736_s0 = inlined_call_operand.vmem [shape: bf16[2,18,18,128], index: 0, kind: input, shape index: {}]   ;;  %s9737_s1 = inlined_call_operand.vmem [shape: bf16[4,4,128,64], index: 1, kind: input, shape index: {}]   ;;  %s9738_s2 = inlined_call_operand.vmem [shape: f32[1,64], index: 2, kind: input, shape index: {}]   ;;  %s9739_s3 = inlined_call_operand.vmem [shape: f32[2,2,2,16,16,64], index: 3, kind: output, shape index: {}]  }
   0x1 LB: > { %s5402_s13 = sadd.s32 4294967295, %s7282_s12   ;;  %p5406_p0 = scmp.ge.s32.totalorder %s7282_s12, 1  ;;  %s7282_s12 = sphi %s7304_s12, %s13_s12  }
   0x2   : > { %p137_p1 = scmp.lt.s32.totalorder %s7282_s12, 3 }
   0x4   : > { %p138_p2 = pnand %p5406_p0, %p137_p1 }
   0x6   : > { %141 = sbr.rel (%p138_p2) target bundleno = 760 (0x2f8), region = 32 }
   0xb   : > { %v7114_v0 = vld [vmem:[%s9737_s1 + $0x378] sm:$0xff]   ;;  %p161_p3 = scmp.lt.s32.totalorder %s5402_s13, 1  ;;  %v7116_v2 = vld [vmem:[%s9737_s1 + $0x370] sm:$0xff]   ;;  %v7118_v4 = vld [vmem:[%s9737_s1 + $0x368] sm:$0xff]   ;;  %vm243_vm0 = vsmask.f32 3328 }
   0xc   : > { %v7115_v1 = vld [vmem:[%s9737_s1 + $0x3f8] sm:$0xff]   ;;  %6337 = vmatprep.subr.bf16.mxu0 %v7114_v0  ;;  %v7117_v3 = vld [vmem:[%s9737_s1 + $0x3f0] sm:$0xff]   ;;  %v7119_v5 = vld [vmem:[%s9737_s1 + $0x3e8] sm:$0xff]   ;;  %vm244_vm1 = vsmask.f32 7440  ;;  %v9843_v36 = vmov 0 }
   0xd   : > { %6385 = vmatprep.subr.bf16.mxu1 %v7115_v1  ;;  %6338 = vmatpush3.bf16.msra.mxu0 %v7114_v0  ;;  %s10157_s13 = smov (!%p161_p3, %s5402_s13), 1  ;;  %v7120_v6 = vld [vmem:[%s9737_s1 + $0x360] sm:$0xff]   ;;  %v7122_v8 = vld [vmem:[%s9737_s1 + $0x358] sm:$0xff]   ;;  %v7124_v10 = vld [vmem:[%s9737_s1 + $0x350] sm:$0xff]   ;;  %vm1912_vm3 = vcmask 1042432   ;;  %vm1913_vm4 = vcmask 1046532  }
   0xe   : > { %6386 = vmatpush3.bf16.msra.mxu1 %v7115_v1  ;;  %6339 = vmatprep.subr.bf16.mxu0 %v7116_v2  ;;  %v7121_v7 = vld [vmem:[%s9737_s1 + $0x3e0] sm:$0xff]   ;;  %s7105_s30 = smul.u32 216, %s10157_s13  ;;  %v7123_v9 = vld [vmem:[%s9737_s1 + $0x3d8] sm:$0xff]   ;;  %v7125_v11 = vld [vmem:[%s9737_s1 + $0x3d0] sm:$0xff]   ;;  %s5952_s25 = sshll.u32 %s10157_s13, 10  ;;  %vm1846_vm6 = vcmask 523264  }
   0xf   : > { %6387 = vmatprep.subr.bf16.mxu1 %v7117_v3  ;;  %v7126_v17 = vld [vmem:[%s9737_s1 + $0x348] sm:$0xff]   ;;  %vm7370_vm2 = vmor %vm243_vm0, %vm244_vm1  ;;  %v7128_v45 = vld [vmem:[%s9737_s1 + $0x340] sm:$0xff]   ;;  %s8415_s27 = scalar_lea.vmem %s9739_s3, %s5952_s25 }
  0x10   : > { %s7348_s10 = scalar_lea.vmem %s9736_s0, %s7105_s30  ;;  %v7127_v31 = vld [vmem:[%s9737_s1 + $0x3c8] sm:$0xff]   ;;  %v9844_v36 = vsel %vm7370_vm2, 4294967295, %v9843_v36  ;;  %v7129_v50 = vld [vmem:[%s9737_s1 + $0x3c0] sm:$0xff]   ;;  %v7132_v1 = vld [vmem:[%s9737_s1 + $0x1f8] sm:$0xff]  }
  0x11   : > { %6340 = vmatpush3.bf16.msra.mxu0 %v7116_v2  ;;  %v172_v12 = vld [vmem:[%s7348_s10] sm:$0xf]  ;;  %v173_v13 = vld [vmem:[%s7348_s10 + $0x4] sm:$0xf]  ;;  %v174_v14 = vld [vmem:[%s7348_s10 + $0x8] sm:$0x1] }
  0x12   : > { %6388 = vmatpush3.bf16.msra.mxu1 %v7117_v3  ;;  %6341 = vmatprep.subr.bf16.mxu0 %v7118_v4  ;;  %v247_v15 = vshrl.u32 %v172_v12, 16  ;;  %v250_v16 = vshll.u32 %v172_v12, 16  ;;  %v256_v18 = vshll.u32 %v173_v13, 16  ;;  %v260_v19 = vshrl.u32 %v173_v13, 16  ;;  %v175_v22 = vld [vmem:[%s7348_s10 + $0xc] sm:$0xf]  ;;  %vm7832_vm5 = vmor %vm1912_vm3, %vm1913_vm4 }
  0x13   : > { %6389 = vmatprep.subr.bf16.mxu1 %v7119_v5  ;;  %v266_v20 = vshll.u32 %v174_v14, 16  ;;  %v5466_v21 = vcombine.low %v172_v12, %v173_v13  ;;  %v176_v25 = vld [vmem:[%s7348_s10 + $0x10] sm:$0xf]  ;;  %v177_v26 = vld [vmem:[%s7348_s10 + $0x14] sm:$0x1]  ;;  %v271_v30 = vshrl.u32 %v175_v22, 16 }
  0x14   : > { %v249_v23 = vrot.slane %v247_v15, 4  ;;  %v252_v24 = vrot.slane %v250_v16, 5  ;;  %v258_v27 = vrot.slane %v256_v18, 5  ;;  %v262_v28 = vrot.slane %v260_v19, 4  ;;  %9845 = vst [vmem:[#allocation2_spill] sm:$0xff] %v9844_v36 }
  0x15   : > { %6342 = vmatpush3.bf16.msra.mxu0 %v7118_v4  ;;  %v268_v29 = vrot.slane %v266_v20, 5  ;;  %6401 = vmatprep.mubr.bf16.mxu1 %v5466_v21  ;;  %v274_v33 = vshll.u32 %v175_v22, 16  ;;  %v280_v34 = vshll.u32 %v176_v25, 16  ;;  %v284_v35 = vshrl.u32 %v176_v25, 16  ;;  %v178_v44 = vld [vmem:[%s7348_s10 + $0x18] sm:$0xf] }
  0x16   : > { %6390 = vmatpush3.bf16.msra.mxu1 %v7119_v5  ;;  %6343 = vmatprep.subr.bf16.mxu0 %v7120_v6  ;;  %v253_v32 = vor.u32 %v252_v24, %v249_v23  ;;  %v263_v37 = vor.u32 %v262_v28, %v258_v27  ;;  %v273_v38 = vrot.slane %v271_v30, 4  ;;  %v290_v39 = vshll.u32 %v177_v26, 16  ;;  %v179_v49 = vld [vmem:[%s7348_s10 + $0x1c] sm:$0xf]  ;;  %v180_v54 = vld [vmem:[%s7348_s10 + $0x20] sm:$0x1] }
  0x17   : > { %6391 = vmatprep.subr.bf16.mxu1 %v7121_v7  ;;  %v276_v41 = vrot.slane %v274_v33, 5  ;;  %v282_v42 = vrot.slane %v280_v34, 5  ;;  %v286_v43 = vrot.slane %v284_v35, 4  ;;  %v7378_v48 = vcombine.low %v175_v22, %v176_v25  ;;  %v181_v56 = vld [vmem:[%s7348_s10 + $0x24] sm:$0xf]  ;;  %v7136_v22 = vld [vmem:[%s9737_s1 + $0x1f0] sm:$0xff]  }
  0x18   : > { %v254_v40 = vrot.slane %v253_v32, 4  ;;  %v264_v46 = vrot.slane %v263_v37, 4  ;;  %v292_v47 = vrot.slane %v290_v39, 5  ;;  %v295_v55 = vshrl.u32 %v178_v44, 16  ;;  %v182_v61 = vld [vmem:[%s7348_s10 + $0x28] sm:$0xf] }
  0x19   : > { %6344 = vmatpush3.bf16.msra.mxu0 %v7120_v6  ;;  %v277_v52 = vor.u32 %v276_v41, %v273_v38  ;;  %v287_v53 = vor.u32 %v286_v43, %v282_v42  ;;  %v298_v58 = vshll.u32 %v178_v44, 16  ;;  %v304_v59 = vshll.u32 %v179_v49, 16  ;;  %v183_v3 = vld [vmem:[%s7348_s10 + $0x2c] sm:$0x1]  ;;  %v185_v28 = vld [vmem:[%s7348_s10 + $0x34] sm:$0xf] }
  0x1a   : > { %6392 = vmatpush3.bf16.msra.mxu1 %v7121_v7  ;;  %6345 = vmatprep.subr.bf16.mxu0 %v7122_v8  ;;  %v259_v51 = vsel %vm7370_vm2, %v254_v40, %v258_v27  ;;  %v269_v57 = vsel %vm7370_vm2, %v264_v46, %v268_v29  ;;  %v308_v60 = vshrl.u32 %v179_v49, 16  ;;  %v297_v2 = vrot.slane %v295_v55, 4  ;;  %v7137_v27 = vld [vmem:[%s9737_s1 + $0x170] sm:$0xff]   ;;  %v186_v32 = vld [vmem:[%s7348_s10 + $0x38] sm:$0x1]  ;;  %v7141_v55 = vld [vmem:[%s9737_s1 + $0x168] sm:$0xff]  }
  0x1b   : > { %6393 = vmatprep.subr.bf16.mxu1 %v7123_v9  ;;  %v7391_v62 = vcombine.low %v259_v51, %v269_v57  ;;  %v278_v63 = vrot.slane %v277_v52, 4  ;;  %v288_v0 = vrot.slane %v287_v53, 4  ;;  %v300_v4 = vrot.slane %v298_v58, 5  ;;  %v7426_v39 = vld [vmem:[%s7348_s10 + $0x3c] sm:$0xf] }
  0x1c   : > { %v306_v5 = vrot.slane %v304_v59, 5  ;;  %v310_v6 = vrot.slane %v308_v60, 4  ;;  %v314_v7 = vshll.u32 %v180_v54, 16  ;;  %v319_v12 = vshrl.u32 %v181_v56, 16  ;;  %v7439_v53 = vld [vmem:[%s7348_s10 + $0x40] sm:$0xf] }
  0x1d   : > { %6346 = vmatpush3.bf16.msra.mxu0 %v7122_v8  ;;  %9846 = vst [vmem:[#allocation3_spill] sm:$0xff] %v7391_v62  ;;  %6353 = vmatprep.mubr.bf16.mxu0 %v7391_v62  ;;  %v283_v8 = vsel %vm7370_vm2, %v278_v63, %v282_v42  ;;  %v301_v14 = vor.u32 %v300_v4, %v297_v2  ;;  %v322_v19 = vshll.u32 %v181_v56, 16  ;;  %v328_v20 = vshll.u32 %v182_v61, 16  ;;  %v7446_v60 = vld [vmem:[%s7348_s10 + $0x44] sm:$0x1] }
  0x1e   : > { %6394 = vmatpush3.bf16.msra.mxu1 %v7123_v9  ;;  %6347 = vmatprep.subr.bf16.mxu0 %v7124_v10  ;;  %v293_v9 = vsel %vm7370_vm2, %v288_v0, %v292_v47  ;;  %v311_v15 = vor.u32 %v310_v6, %v306_v5  ;;  %v316_v16 = vrot.slane %v314_v7, 5  ;;  %v321_v18 = vrot.slane %v319_v12, 4  ;;  %v7454_v2 = vld [vmem:[%s7348_s10 + $0x48] sm:$0xf]  ;;  %v7460_v7 = vld [vmem:[%s7348_s10 + $0x4c] sm:$0xf] }
  0x1f   : > { %6395 = vmatprep.subr.bf16.mxu1 %v7125_v11  ;;  %v7407_v13 = vcombine.low %v283_v8, %v293_v9  ;;  %v332_v21 = vshrl.u32 %v182_v61, 16  ;;  %v302_v23 = vrot.slane %v301_v14, 4  ;;  %v338_v25 = vshll.u32 %v183_v3, 16  ;;  %v7144_v8 = vld [vmem:[%s9737_s1 + $0x1e0] sm:$0xff]  }
  0x20   : > { %v312_v24 = vrot.slane %v311_v15, 4  ;;  %v7413_v26 = vcombine.low %v181_v56, %v182_v61  ;;  %v324_v29 = vrot.slane %v322_v19, 5  ;;  %v330_v30 = vrot.slane %v328_v20, 5  ;;  %v7472_v15 = vld [vmem:[%s7348_s10 + $0x50] sm:$0x1] }
  0x21   : > { %6348 = vmatpush3.bf16.msra.mxu0 %v7124_v10  ;;  %v7133_v10 = vld [vmem:[%s9737_s1 + $0x178] sm:$0xff]   ;;  %9848 = vst [vmem:[#allocation5_spill] sm:$0xff] %v7407_v13  ;;  %v307_v34 = vsel %vm7370_vm2, %v302_v23, %v306_v5  ;;  %v340_v37 = vrot.slane %v338_v25, 5  ;;  %v352_v46 = vshll.u32 %v185_v28, 16  ;;  %v356_v47 = vshrl.u32 %v185_v28, 16 }
  0x22   : > { %6396 = vmatpush3.bf16.msra.mxu1 %v7125_v11  ;;  %6349 = vmatprep.subr.bf16.mxu0 %v7126_v17  ;;  %v7405_v11 = vcombine.low %v178_v44, %v179_v49  ;;  %9849 = vst [vmem:[#allocation6_spill] sm:$0xff] %v7413_v26  ;;  %v317_v35 = vsel %vm7370_vm2, %v312_v24, %v316_v16  ;;  %v7140_v44 = vld [vmem:[%s9737_s1 + $0x1e8] sm:$0xff]   ;;  %v362_v49 = vshll.u32 %v186_v32, 16  ;;  %v367_v54 = vshrl.u32 %v7426_v39, 16  ;;  %v7145_v16 = vld [vmem:[%s9737_s1 + $0x160] sm:$0xff]  }
  0x23   : > { %6397 = vmatprep.subr.bf16.mxu1 %v7127_v31  ;;  %v7429_v40 = vcombine.low %v307_v34, %v317_v35  ;;  %v325_v41 = vor.u32 %v324_v29, %v321_v18  ;;  %v354_v57 = vrot.slane %v352_v46, 5  ;;  %v358_v58 = vrot.slane %v356_v47, 4 }
  0x24   : > { %9847 = vst [vmem:[#allocation4_spill] sm:$0xff] %v7405_v11  ;;  %v364_v59 = vrot.slane %v362_v49, 5  ;;  %v369_v0 = vrot.slane %v367_v54, 4  ;;  %v376_v6 = vshll.u32 %v7439_v53, 16  ;;  %v386_v12 = vshll.u32 %v7446_v60, 16 }
  0x25   : > { %6350 = vmatpush3.bf16.msra.mxu0 %v7126_v17  ;;  %v184_v17 = vld [vmem:[%s7348_s10 + $0x30] sm:$0xf]  ;;  %9850 = vst [vmem:[#allocation7_spill] sm:$0xff] %v7429_v40  ;;  %v359_v5 = vor.u32 %v358_v58, %v354_v57  ;;  %v7469_v14 = vcombine.low %v7426_v39, %v7439_v53  ;;  %v391_v20 = vshrl.u32 %v7454_v2, 16  ;;  %v394_v25 = vshll.u32 %v7454_v2, 16 }
  0x26   : > { %6398 = vmatpush3.bf16.msra.mxu1 %v7127_v31  ;;  %6351 = vmatprep.subr.bf16.mxu0 %v7128_v45  ;;  %v334_v31 = vrot.slane %v332_v21, 4  ;;  %v343_v33 = vshrl.u32 %v184_v17, 16  ;;  %v346_v38 = vshll.u32 %v184_v17, 16  ;;  %v7436_v52 = vcombine.low %v184_v17, %v185_v28  ;;  %v7482_v21 = vld [vmem:[%s7348_s10 + $0x54] sm:$0xf] }
  0x27   : > { %6399 = vmatprep.subr.bf16.mxu1 %v7129_v50  ;;  %v360_v18 = vrot.slane %v359_v5, 4  ;;  %v378_v19 = vrot.slane %v376_v6, 5  ;;  %v388_v24 = vrot.slane %v386_v12, 5  ;;  %v393_v28 = vrot.slane %v391_v20, 4  ;;  %v7511_v49 = vld [vmem:[%s7348_s10 + $0x5c] sm:$0x1] }
  0x28   : > { %v335_v42 = vor.u32 %v334_v31, %v330_v30  ;;  %v345_v43 = vrot.slane %v343_v33, 4  ;;  %v400_v29 = vshll.u32 %v7460_v7, 16  ;;  %v7148_v31 = vld [vmem:[%s9737_s1 + $0x1d8] sm:$0xff]   ;;  %v396_v35 = vrot.slane %v394_v25, 5  ;;  %v7520_v58 = vld [vmem:[%s7348_s10 + $0x64] sm:$0xf] }
  0x29   : > { %6352 = vmatpush3.bf16.msra.mxu0 %v7128_v45  ;;  %v348_v45 = vrot.slane %v346_v38, 5  ;;  %v7149_v38 = vld [vmem:[%s9737_s1 + $0x158] sm:$0xff]   ;;  %v7546_v20 = vld [vmem:[%s7348_s10 + $0x68] sm:$0x1] }
  0x2a   : > { %6400 = vmatpush3.bf16.msra.mxu1 %v7129_v50  ;;  %6433 = vmatprep.subr.bf16.mxu0 %v7132_v1  ;;  %v326_v50 = vrot.slane %v325_v41, 4  ;;  %v336_v51 = vrot.slane %v335_v42, 4  ;;  %v402_v41 = vrot.slane %v400_v29, 5  ;;  %v397_v47 = vor.u32 %v396_v35, %v393_v28  ;;  %v7157_v25 = vld [vmem:[%s9737_s1 + $0x148] sm:$0xff]  }
  0x2b   : > { %6481 = vmatprep.subr.bf16.mxu1 %v7133_v10  ;;  %v349_v56 = vor.u32 %v348_v45, %v345_v43  ;;  %v410_v43 = vshll.u32 %v7472_v15, 16 }
  0x2c   : > { %6354 = vmatmul.mubr.bf16.vlgmr.msra.gmra.mxu0 %v7407_v13  ;;  %v331_v61 = vsel %vm7370_vm2, %v326_v50, %v330_v30  ;;  %v341_v63 = vsel %vm7370_vm2, %v336_v51, %v340_v37  ;;  %v404_v30 = vshrl.u32 %v7460_v7, 16  ;;  %v7497_v37 = vld [vmem:[%s7348_s10 + $0x58] sm:$0xf]  ;;  %v415_v50 = vshrl.u32 %v7482_v21, 16  ;;  %v7515_v51 = vld [vmem:[%s7348_s10 + $0x60] sm:$0xf] }
  0x2d   : > { %6402 = vmatmul.mubr.bf16.vlgmr.msra.gmra.mxu1 %v7378_v48  ;;  %6434 = vmatpush3.bf16.msra.mxu0 %v7132_v1  ;;  %v370_v1 = vshll.u32 %v7426_v39, 16  ;;  %v7456_v3 = vcombine.low %v331_v61, %v341_v63  ;;  %v350_v4 = vrot.slane %v349_v56, 4  ;;  %v418_v56 = vshll.u32 %v7482_v21, 16 }
  0x2e   : > { %6482 = vmatpush3.bf16.msra.mxu1 %v7133_v10  ;;  %6405 = vmatprep.mubr.bf16.mxu1 %v7405_v11  ;;  %v380_v10 = vshrl.u32 %v7439_v53, 16  ;;  %v406_v42 = vrot.slane %v404_v30, 4  ;;  %v398_v61 = vrot.slane %v397_v47, 4  ;;  %v417_v63 = vrot.slane %v415_v50, 4 }
  0x2f   : > { %6357 = vmatprep.mubr.bf16.mxu0 %v7429_v40  ;;  %6435 = vmatprep.subr.bf16.mxu0 %v7136_v22  ;;  %9851 = vst [vmem:[#allocation8_spill] sm:$0xff] %v7456_v3  ;;  %v372_v9 = vrot.slane %v370_v1, 5  ;;  %v355_v17 = vsel %vm7370_vm2, %v350_v4, %v354_v57  ;;  %v424_v57 = vshll.u32 %v7497_v37, 16  ;;  %v7152_v1 = vld [vmem:[%s9737_s1 + $0x1d0] sm:$0xff]   ;;  %v420_v6 = vrot.slane %v418_v56, 5 }
  0x30   : > { %6483 = vmatprep.subr.bf16.mxu1 %v7137_v27  ;;  %v382_v23 = vrot.slane %v380_v10, 4  ;;  %v407_v54 = vor.u32 %v406_v42, %v402_v41  ;;  %v403_v10 = vsel %vm7370_vm2, %v398_v61, %v402_v41  ;;  %v448_v30 = vshll.u32 %v7520_v58, 16 }
  0x31   : > { %6436 = vmatpush3.bf16.msra.mxu0 %v7136_v22  ;;  %v373_v22 = vor.u32 %v372_v9, %v369_v0  ;;  %v428_v0 = vshrl.u32 %v7497_v37, 16  ;;  %v7153_v9 = vld [vmem:[%s9737_s1 + $0x150] sm:$0xff]   ;;  %v452_v42 = vshrl.u32 %v7520_v58, 16  ;;  %v458_v47 = vshll.u32 %v7546_v20, 16 }
  0x32   : > { %6484 = vmatpush3.bf16.msra.mxu1 %v7137_v27  ;;  %6437 = vmatprep.subr.bf16.mxu0 %v7140_v44  ;;  %v365_v27 = vsel %vm7370_vm2, %v360_v18, %v364_v59  ;;  %v383_v34 = vor.u32 %v382_v23, %v378_v19  ;;  %v408_v5 = vrot.slane %v407_v54, 4  ;;  %v442_v23 = vshll.u32 %v7515_v51, 16 }
  0x33   : > { %6485 = vmatprep.subr.bf16.mxu1 %v7141_v55  ;;  %v7494_v32 = vcombine.low %v355_v17, %v365_v27  ;;  %v374_v33 = vrot.slane %v373_v22, 4  ;;  %v430_v12 = vrot.slane %v428_v0, 4  ;;  %v7539_v17 = vcombine.low %v7482_v21, %v7497_v37 }
  0x34   : > { %6358 = vmatmul.mubr.bf16.gmra.mxu0 %v7456_v3  ;;  %v384_v46 = vrot.slane %v383_v34, 4  ;;  %v439_v22 = vshrl.u32 %v7515_v51, 16  ;;  %v444_v41 = vrot.slane %v442_v23, 5  ;;  %v7573_v50 = vcombine.low %v7515_v51, %v7520_v58 }
  0x35   : > { %6406 = vmatmul.mubr.bf16.gmra.mxu1 %v7413_v26  ;;  %6438 = vmatpush3.bf16.msra.mxu0 %v7140_v44  ;;  %v7505_v44 = vcombine.low %v7454_v2, %v7460_v7  ;;  %v379_v45 = vsel %vm7370_vm2, %v374_v33, %v378_v19  ;;  %9853 = vst [vmem:[#allocation10_spill] sm:$0xff] %v7539_v17  ;;  %v7563_v33 = vld [vmem:[%s7348_s10 + $0x70] sm:$0xf]  ;;  %v454_v56 = vrot.slane %v452_v42, 4  ;;  %v460_v61 = vrot.slane %v458_v47, 5 }
  0x36   : > { %6409 = vmatprep.mubr.bf16.mxu1 %v7436_v52  ;;  %6486 = vmatpush3.bf16.msra.mxu1 %v7141_v55  ;;  %v412_v55 = vrot.slane %v410_v43, 5  ;;  %v389_v59 = vsel %vm7370_vm2, %v384_v46, %v388_v24  ;;  %v421_v19 = vor.u32 %v420_v6, %v417_v63  ;;  %v7156_v24 = vld [vmem:[%s9737_s1 + $0x1c8] sm:$0xff]   ;;  %v441_v35 = vrot.slane %v439_v22, 4  ;;  %v7567_v43 = vld [vmem:[%s7348_s10 + $0x74] sm:$0x1]  ;;  %9854 = vst [vmem:[#allocation11_spill] sm:$0xff] %v7573_v50 }
  0x37   : > { %6439 = vmatprep.subr.bf16.mxu0 %v7144_v8  ;;  %6487 = vmatprep.subr.bf16.mxu1 %v7145_v16  ;;  %9852 = vst [vmem:[#allocation9_spill] sm:$0xff] %v7505_v44  ;;  %v7528_v4 = vcombine.low %v379_v45, %v389_v59  ;;  %v450_v46 = vrot.slane %v448_v30, 5  ;;  %v472_v0 = vshll.u32 %v7563_v33, 16  ;;  %v7597_v22 = vld [vmem:[%s7348_s10 + $0x7c] sm:$0xf] }
  0x38   : > { %6361 = vmatprep.mubr.bf16.mxu0 %v7494_v32  ;;  %v413_v18 = vsel %vm7370_vm2, %v408_v5, %v412_v55  ;;  %v422_v34 = vrot.slane %v421_v19, 4  ;;  %v445_v55 = vor.u32 %v444_v41, %v441_v35  ;;  %v482_v19 = vshll.u32 %v7567_v43, 16  ;;  %v7608_v30 = vld [vmem:[%s7348_s10 + $0x80] sm:$0x1] }
  0x39   : > { %6440 = vmatpush3.bf16.msra.mxu0 %v7144_v8  ;;  %v426_v8 = vrot.slane %v424_v57, 5  ;;  %v7556_v27 = vcombine.low %v403_v10, %v413_v18  ;;  %v474_v18 = vrot.slane %v472_v0, 5 }
  0x3a   : > { %6488 = vmatpush3.bf16.msra.mxu1 %v7145_v16  ;;  %6441 = vmatprep.subr.bf16.mxu0 %v7148_v31  ;;  %v434_v16 = vshll.u32 %v7511_v49, 16  ;;  %v446_v6 = vrot.slane %v445_v55, 4  ;;  %v484_v42 = vrot.slane %v482_v19, 5  ;;  %v496_v55 = vshll.u32 %v7597_v22, 16 }
  0x3b   : > { %6489 = vmatprep.subr.bf16.mxu1 %v7149_v38  ;;  %v431_v28 = vor.u32 %v430_v12, %v426_v8  ;;  %v427_v54 = vsel %vm7370_vm2, %v422_v34, %v426_v8  ;;  %v455_v8 = vor.u32 %v454_v56, %v450_v46  ;;  %v7161_v12 = vld [vmem:[%s9737_s1 + $0x140] sm:$0xff]   ;;  %v500_v56 = vshrl.u32 %v7597_v22, 16 }
  0x3c   : > { %6362 = vmatmul.mubr.bf16.gmra.mxu0 %v7528_v4  ;;  %v436_v29 = vrot.slane %v434_v16, 5  ;;  %v451_v23 = vsel %vm7370_vm2, %v446_v6, %v450_v46  ;;  %v7618_v46 = vld [vmem:[%s7348_s10 + $0x84] sm:$0xf] }
  0x3d   : > { %6410 = vmatmul.mubr.bf16.gmra.mxu1 %v7469_v14  ;;  %6442 = vmatpush3.bf16.msra.mxu0 %v7148_v31  ;;  %v7560_v31 = vld [vmem:[%s7348_s10 + $0x6c] sm:$0xf]  ;;  %v432_v45 = vrot.slane %v431_v28, 4  ;;  %v456_v28 = vrot.slane %v455_v8, 4  ;;  %v502_v8 = vrot.slane %v500_v56, 4 }
  0x3e   : > { %6413 = vmatprep.mubr.bf16.mxu1 %v7505_v44  ;;  %6490 = vmatpush3.bf16.msra.mxu1 %v7149_v38  ;;  %v7576_v38 = vld [vmem:[%s7348_s10 + $0x78] sm:$0xf]  ;;  %v463_v57 = vshrl.u32 %v7560_v31, 16  ;;  %v466_v63 = vshll.u32 %v7560_v31, 16 }
  0x3f   : > { %6443 = vmatprep.subr.bf16.mxu0 %v7152_v1  ;;  %6491 = vmatprep.subr.bf16.mxu1 %v7153_v9  ;;  %v437_v59 = vsel %vm7370_vm2, %v432_v45, %v436_v29  ;;  %v7605_v29 = vcombine.low %v7560_v31, %v7563_v33  ;;  %v487_v34 = vshrl.u32 %v7576_v38, 16  ;;  %v490_v45 = vshll.u32 %v7576_v38, 16 }
  0x40   : > { %6365 = vmatprep.mubr.bf16.mxu0 %v7556_v27  ;;  %v7588_v5 = vcombine.low %v427_v54, %v437_v59  ;;  %v465_v10 = vrot.slane %v463_v57, 4  ;;  %v468_v16 = vrot.slane %v466_v63, 5  ;;  %v461_v47 = vsel %vm7370_vm2, %v456_v28, %v460_v61  ;;  %v7625_v57 = vld [vmem:[%s7348_s10 + $0x88] sm:$0xf]  ;;  %v7630_v59 = vld [vmem:[%s9737_s1 + $0x3b8] sm:$0xff]  }
  0x41   : > { %6444 = vmatpush3.bf16.msra.mxu0 %v7152_v1  ;;  %v7160_v1 = vld [vmem:[%s9737_s1 + $0x1c0] sm:$0xff]   ;;  %9855 = vst [vmem:[#allocation12_spill] sm:$0xff] %v7605_v29  ;;  %v489_v54 = vrot.slane %v487_v34, 4  ;;  %v7632_v63 = vcombine.low %v451_v23, %v461_v47  ;;  %v492_v6 = vrot.slane %v490_v45, 5  ;;  %v498_v61 = vrot.slane %v496_v55, 5 }
  0x42   : > { %6445 = vmatprep.subr.bf16.mxu0 %v7156_v24  ;;  %6492 = vmatpush3.bf16.msra.mxu1 %v7153_v9  ;;  %v476_v9 = vshrl.u32 %v7563_v33, 16  ;;  %v469_v35 = vor.u32 %v468_v16, %v465_v10  ;;  %v506_v10 = vshll.u32 %v7608_v30, 16  ;;  %v7637_v16 = vcombine.low %v7576_v38, %v7597_v22  ;;  %v7655_v55 = vld [vmem:[%s7348_s10 + $0x90] sm:$0xf] }
  0x43   : > { %6493 = vmatprep.subr.bf16.mxu1 %v7157_v25  ;;  %9856 = vst [vmem:[#allocation13_spill] sm:$0xff] %v7632_v63  ;;  %v493_v23 = vor.u32 %v492_v6, %v489_v54  ;;  %v503_v28 = vor.u32 %v502_v8, %v498_v61  ;;  %v520_v45 = vshll.u32 %v7625_v57, 16  ;;  %v524_v54 = vshrl.u32 %v7625_v57, 16  ;;  %9858 = vst [vmem:[#allocation15_spill] sm:$0xff] %v7655_v55  ;;  %v7661_v8 = vld [vmem:[%s7348_s10 + $0x94] sm:$0xf] }
  0x44   : > { %6366 = vmatmul.mubr.bf16.gmra.mxu0 %v7588_v5  ;;  %v478_v41 = vrot.slane %v476_v9, 4  ;;  %9857 = vst [vmem:[#allocation14_spill] sm:$0xff] %v7637_v16  ;;  %v508_v34 = vrot.slane %v506_v10, 5  ;;  %9860 = vst [vmem:[#allocation17_spill] sm:$0xff] %v7661_v8 }
  0x45   : > { %6414 = vmatmul.mubr.bf16.gmra.mxu1 %v7539_v17  ;;  %6446 = vmatpush3.bf16.msra.mxu0 %v7156_v24  ;;  %v7614_v24 = vld [vmem:[%s9737_s1 + $0x338] sm:$0xff]   ;;  %v494_v47 = vrot.slane %v493_v23, 4  ;;  %v522_v6 = vrot.slane %v520_v45, 5  ;;  %v526_v10 = vrot.slane %v524_v54, 4  ;;  %v7668_v23 = vcombine.low %v7618_v46, %v7625_v57  ;;  %v7709_v17 = vld [vmem:[%s7348_s10 + $0xac] sm:$0xf] }
  0x46   : > { %6417 = vmatprep.mubr.bf16.mxu1 %v7573_v50  ;;  %6494 = vmatpush3.bf16.msra.mxu1 %v7157_v25  ;;  %v470_v25 = vrot.slane %v469_v35, 4  ;;  %v479_v0 = vor.u32 %v478_v41, %v474_v18  ;;  %v7645_v35 = vld [vmem:[%s7348_s10 + $0x8c] sm:$0x1]  ;;  %v514_v41 = vshll.u32 %v7618_v46, 16  ;;  %v538_v45 = vshll.u32 %v7655_v55, 16 }
  0x47   : > { %6447 = vmatprep.subr.bf16.mxu0 %v7160_v1  ;;  %6495 = vmatprep.subr.bf16.mxu1 %v7161_v12  ;;  %9861 = vst [vmem:[#allocation18_spill] sm:$0xff] %v7668_v23  ;;  %v527_v54 = vor.u32 %v526_v10, %v522_v6  ;;  %v7698_v10 = vld [vmem:[%s7348_s10 + $0xa8] sm:$0xf] }
  0x48   : > { %6369 = vmatprep.mubr.bf16.mxu0 %v7632_v63  ;;  %v475_v9 = vsel %vm7370_vm2, %v470_v25, %v474_v18  ;;  %v480_v19 = vrot.slane %v479_v0, 4  ;;  %v504_v25 = vrot.slane %v503_v28, 4  ;;  %v516_v0 = vrot.slane %v514_v41, 5 }
  0x49   : > { %6448 = vmatpush3.bf16.msra.mxu0 %v7160_v1  ;;  %v511_v1 = vshrl.u32 %v7618_v46, 16  ;;  %v548_v63 = vshrl.u32 %v7661_v8, 16 }
  0x4a   : > { %6529 = vmatprep.subr.bf16.mxu0 %v7614_v24  ;;  %6496 = vmatpush3.bf16.msra.mxu1 %v7161_v12  ;;  %v485_v18 = vsel %vm7370_vm2, %v480_v19, %v484_v42  ;;  %v499_v42 = vsel %vm7370_vm2, %v494_v47, %v498_v61  ;;  %v530_v19 = vshll.u32 %v7645_v35, 16  ;;  %v509_v28 = vsel %vm7370_vm2, %v504_v25, %v508_v34  ;;  %v7689_v34 = vld [vmem:[%s7348_s10 + $0xa4] sm:$0x1] }
  0x4b   : > { %6577 = vmatprep.subr.bf16.mxu1 %v7630_v59  ;;  %v513_v12 = vrot.slane %v511_v1, 4  ;;  %v7657_v56 = vcombine.low %v475_v9, %v485_v18  ;;  %v7671_v9 = vld [vmem:[%s7348_s10 + $0x98] sm:$0x1]  ;;  %v7674_v1 = vld [vmem:[%s7348_s10 + $0x9c] sm:$0xf]  ;;  %v535_v61 = vshrl.u32 %v7655_v55, 16  ;;  %v7684_v47 = vcombine.low %v499_v42, %v509_v28 }
  0x4c   : > { %9862 = vst [vmem:[#allocation19_spill] sm:$0xff] %v7671_v9  ;;  %9863 = vst [vmem:[#allocation20_spill] sm:$0xff] %v7674_v1  ;;  %v7682_v18 = vld [vmem:[%s7348_s10 + $0xa0] sm:$0xf]  ;;  %v532_v62 = vrot.slane %v530_v19, 5  ;;  %v7695_v42 = vcombine.low %v7655_v55, %v7661_v8 }
  0x4d   : > { %6418 = vmatmul.mubr.bf16.gmra.mxu1 %v7605_v29  ;;  %9859 = vst [vmem:[#allocation16_spill] sm:$0xff] %v7657_v56  ;;  %6370 = vmatmul.mubr.bf16.gmra.mxu0 %v7657_v56  ;;  %v517_v41 = vor.u32 %v516_v0, %v513_v12  ;;  %9864 = vst [vmem:[#allocation21_spill] sm:$0xff] %v7682_v18  ;;  %v537_v50 = vrot.slane %v535_v61, 4  ;;  %v540_v56 = vrot.slane %v538_v45, 5  ;;  %v528_v12 = vrot.slane %v527_v54, 4 }
  0x4e   : > { %6421 = vmatprep.mubr.bf16.mxu1 %v7637_v16  ;;  %9865 = vst [vmem:[#allocation22_spill] sm:$0xff] %v7684_v47  ;;  %v544_v16 = vshll.u32 %v7661_v8, 16  ;;  %9866 = vst [vmem:[#allocation23_spill] sm:$0xff] %v7689_v34  ;;  %6373 = vmatprep.mubr.bf16.mxu0 %v7684_v47  ;;  %v554_v0 = vshll.u32 %v7671_v9, 16  ;;  %v559_v61 = vshrl.u32 %v7674_v1, 16  ;;  %v562_v54 = vshll.u32 %v7674_v1, 16 }
  0x4f   : > { %v518_v29 = vrot.slane %v517_v41, 4  ;;  %9867 = vst [vmem:[#allocation24_spill] sm:$0xff] %v7695_v42  ;;  %v541_v28 = vor.u32 %v540_v56, %v537_v50  ;;  %v550_v41 = vrot.slane %v548_v63, 4  ;;  %v533_v45 = vsel %vm7370_vm2, %v528_v12, %v532_v62  ;;  %v7746_v55 = vld [vmem:[%s7348_s10 + $0xbc] sm:$0x1] }
  0x50   : > { %v546_v25 = vrot.slane %v544_v16, 5  ;;  %v556_v16 = vrot.slane %v554_v0, 5  ;;  %v568_v47 = vshll.u32 %v7682_v18, 16  ;;  %v561_v63 = vrot.slane %v559_v61, 4  ;;  %v7717_v0 = vld [vmem:[%s7348_s10 + $0xb0] sm:$0x1] }
  0x51   : > { %v523_v19 = vsel %vm7370_vm2, %v518_v29, %v522_v6  ;;  %v542_v50 = vrot.slane %v541_v28, 4  ;;  %v564_v56 = vrot.slane %v562_v54, 5  ;;  %v572_v6 = vshrl.u32 %v7682_v18, 16  ;;  %v7728_v61 = vld [vmem:[%s7348_s10 + $0xb4] sm:$0xf] }
  0x52   : > { %v7711_v44 = vcombine.low %v523_v19, %v533_v45  ;;  %v551_v29 = vor.u32 %v550_v41, %v546_v25  ;;  %v570_v62 = vrot.slane %v568_v47, 5  ;;  %v578_v12 = vshll.u32 %v7689_v34, 16  ;;  %v7732_v34 = vld [vmem:[%s7348_s10 + $0xb8] sm:$0xf] }
  0x53   : > { %v547_v19 = vsel %vm7370_vm2, %v542_v50, %v546_v25  ;;  %v7724_v28 = vcombine.low %v7674_v1, %v7682_v18  ;;  %v583_v41 = vshrl.u32 %v7698_v10, 16  ;;  %v565_v47 = vor.u32 %v564_v56, %v561_v63 }
  0x54   : > { %9868 = vst [vmem:[#allocation25_spill] sm:$0xff] %v7711_v44  ;;  %v552_v45 = vrot.slane %v551_v29, 4  ;;  %v574_v54 = vrot.slane %v572_v6, 4  ;;  %v592_v29 = vshll.u32 %v7709_v17, 16  ;;  %v7743_v8 = vcombine.low %v7698_v10, %v7709_v17 }
  0x55   : > { %6422 = vmatmul.mubr.bf16.gmra.mxu1 %v7668_v23  ;;  %6374 = vmatmul.mubr.bf16.gmra.mxu0 %v7711_v44  ;;  %9869 = vst [vmem:[#allocation26_spill] sm:$0xff] %v7724_v28  ;;  %v586_v23 = vshll.u32 %v7698_v10, 16  ;;  %v585_v50 = vrot.slane %v583_v41, 4  ;;  %v596_v44 = vshrl.u32 %v7709_v17, 16  ;;  %v566_v1 = vrot.slane %v565_v47, 4 }
  0x56   : > { %6425 = vmatprep.mubr.bf16.mxu1 %v7695_v42  ;;  %v580_v42 = vrot.slane %v578_v12, 5  ;;  %v557_v25 = vsel %vm7370_vm2, %v552_v45, %v556_v16  ;;  %v575_v9 = vor.u32 %v574_v54, %v570_v62  ;;  %v594_v56 = vrot.slane %v592_v29, 5  ;;  %9871 = vst [vmem:[#allocation28_spill] sm:$0xff] %v7743_v8 }
  0x57   : > { %v7738_v18 = vcombine.low %v547_v19, %v557_v25  ;;  %v588_v63 = vrot.slane %v586_v23, 5  ;;  %v598_v6 = vrot.slane %v596_v44, 4  ;;  %v602_v12 = vshll.u32 %v7717_v0, 16 }
  0x58   : > { %v571_v16 = vsel %vm7370_vm2, %v566_v1, %v570_v62  ;;  %v576_v19 = vrot.slane %v575_v9, 4  ;;  %v607_v23 = vshrl.u32 %v7728_v61, 16  ;;  %v610_v47 = vshll.u32 %v7728_v61, 16 }
  0x59   : > { %9870 = vst [vmem:[#allocation27_spill] sm:$0xff] %v7738_v18  ;;  %6377 = vmatprep.mubr.bf16.mxu0 %v7738_v18  ;;  %v589_v45 = vor.u32 %v588_v63, %v585_v50  ;;  %v599_v44 = vor.u32 %v598_v6, %v594_v56  ;;  %v604_v41 = vrot.slane %v602_v12, 5  ;;  %v616_v54 = vshll.u32 %v7732_v34, 16 }
  0x5a   : > { %v581_v25 = vsel %vm7370_vm2, %v576_v19, %v580_v42  ;;  %v609_v18 = vrot.slane %v607_v23, 4  ;;  %v620_v9 = vshrl.u32 %v7732_v34, 16  ;;  %v612_v50 = vrot.slane %v610_v47, 5 }
  0x5b   : > { %v590_v29 = vrot.slane %v589_v45, 4  ;;  %v7759_v1 = vcombine.low %v571_v16, %v581_v25  ;;  %v600_v62 = vrot.slane %v599_v44, 4  ;;  %v618_v63 = vrot.slane %v616_v54, 5  ;;  %v7784_v54 = vld [vmem:[%s7348_s10 + $0xc0] sm:$0xf] }
  0x5c   : > { %v622_v12 = vrot.slane %v620_v9, 4  ;;  %v613_v16 = vor.u32 %v612_v50, %v609_v18  ;;  %v7791_v25 = vld [vmem:[%s7348_s10 + $0xc4] sm:$0xf]  ;;  %v1493_v9 = vshll.u32 %v7784_v54, 16 }
  0x5d   : > { %6426 = vmatmul.mubr.bf16.gmra.mxu1 %v7724_v28  ;;  %9872 = vst [vmem:[#allocation29_spill] sm:$0xff] %v7759_v1  ;;  %v595_v6 = vsel %vm7370_vm2, %v590_v29, %v594_v56  ;;  %v7766_v28 = vcombine.low %v7728_v61, %v7732_v34  ;;  %6378 = vmatmul.mubr.bf16.gmra.mxu0 %v7759_v1  ;;  %v1490_v29 = vshrl.u32 %v7784_v54, 16  ;;  %v1503_v50 = vshrl.u32 %v7791_v25, 16 }
  0x5e   : > { %6429 = vmatprep.mubr.bf16.mxu1 %v7743_v8  ;;  %v626_v8 = vshll.u32 %v7746_v55, 16  ;;  %v605_v42 = vsel %vm7370_vm2, %v600_v62, %v604_v41  ;;  %v623_v45 = vor.u32 %v622_v12, %v618_v63  ;;  %v614_v56 = vrot.slane %v613_v16, 4 }
  0x5f   : > { %9873 = vst [vmem:[#allocation30_spill] sm:$0xff] %v7766_v28  ;;  %v7771_v19 = vcombine.low %v595_v6, %v605_v42  ;;  %v1499_v62 = vshll.u32 %v7791_v25, 16  ;;  %v7167_v6 = vld [vmem:[%s9737_s1 + $0x3a8] sm:$0xff]   ;;  %v7809_v12 = vrot.slane %v1490_v29, 4  ;;  %v7811_v42 = vrot.slane %v1493_v9, 5 }
  0x60   : > { %v628_v23 = vrot.slane %v626_v8, 5  ;;  %v624_v44 = vrot.slane %v623_v45, 4  ;;  %v619_v47 = vsel %vm7370_vm2, %v614_v56, %v618_v63  ;;  %v7165_v8 = vld [vmem:[%s9737_s1 + $0x3b0] sm:$0xff]   ;;  %v7815_v45 = vld [vmem:[%s7348_s10 + $0xc8] sm:$0x1]  ;;  %v7828_v29 = vrot.slane %v1503_v50, 4 }
  0x61   : > { %9874 = vst [vmem:[#allocation31_spill] sm:$0xff] %v7771_v19  ;;  %6381 = vmatprep.mubr.bf16.mxu0 %v7771_v19  ;;  %v7164_v63 = vld [vmem:[%s9737_s1 + $0x330] sm:$0xff]   ;;  %v7166_v56 = vld [vmem:[%s9737_s1 + $0x328] sm:$0xff]   ;;  %v5563_v9 = vrot.slane %v7454_v2, 9  ;;  %v1962_v50 = vrot.slane %v7472_v15, 5  ;;  %v5564_v16 = vrot.slane %v7482_v21, 9 }
  0x62   : > { %v629_v41 = vsel %vm7370_vm2, %v624_v44, %v628_v23  ;;  %v5562_v23 = vrot.slane %v7426_v39, 9  ;;  %v9876_v39 = vmov 0  ;;  %v1966_v21 = vrot.slane %v7497_v37, 5 }
  0x63   : > { %v7780_v18 = vcombine.low %v619_v47, %v629_v41  ;;  %v1952_v47 = vrot.slane %v7439_v53, 5  ;;  %v7826_v41 = vrot.slane %v1499_v62, 5  ;;  %v9877_v39 = vsel %vm7832_vm5, 4294967295, %v9876_v39 }
  0x64   : > { %9878 = vst [vmem:[#allocation33_spill] sm:$0xff] %v9877_v39  ;;  %v1959_v62 = vrot.slane %v7460_v7, 5  ;;  %v7168_v7 = vld [vmem:[%s9737_s1 + $0x320] sm:$0xff]   ;;  %v5565_v44 = vrot.slane %v7515_v51, 9  ;;  %v1967_v37 = vsel %vm7832_vm5, %v5564_v16, %v1966_v21  ;;  %v1980_v51 = vrot.slane %v7563_v33, 5  ;;  %v7203_v39 = vld [vmem:[%s9737_s1 + $0x258] sm:$0xff]  }
  0x65   : > { %6430 = vmatmul.mubr.bf16.gmra.mxu1 %v7766_v28  ;;  %9875 = vst [vmem:[#allocation32_spill] sm:$0xff] %v7780_v18  ;;  %6382 = vmatmul.mubr.bf16.gmra.mxu0 %v7780_v18  ;;  %v1953_v53 = vsel %vm7832_vm5, %v5562_v23, %v1952_v47  ;;  %v1983_v16 = vrot.slane %v7567_v43, 5 }
  0x66   : > { %6497 = vmatprep.mubr.bf16.mxu1 %v7407_v13  ;;  %6449 = vmatprep.mubr.bf16.mxu0 %v7378_v48  ;;  %v1960_v23 = vsel %vm7832_vm5, %v5563_v9, %v1959_v62  ;;  %v1973_v9 = vrot.slane %v7520_v58, 5  ;;  %v7173_v58 = vld [vmem:[%s9737_s1 + $0x390] sm:$0xff]  }
  0x6d   : > { %6498 = vmatmul.mubr.bf16.vlgmr.msra.gmra.mxu1 %v7429_v40  ;;  %6450 = vmatmul.mubr.bf16.vlgmr.msra.gmra.mxu0 %v7405_v11 }
  0x6e   : > { %6578 = vmatpush3.bf16.msra.mxu1 %v7630_v59  ;;  %6501 = vmatprep.mubr.bf16.mxu1 %v7456_v3  ;;  %v7169_v59 = vld [vmem:[%s9737_s1 + $0x3a0] sm:$0xff]  }
  0x6f   : > { %6579 = vmatprep.subr.bf16.mxu1 %v7165_v8  ;;  %6530 = vmatpush3.bf16.msra.mxu0 %v7614_v24  ;;  %v1954_v24 = vrot.slane %v1952_v47, 4  ;;  %v1961_v47 = vrot.slane %v1959_v62, 4 }
  0x70   : > { %6453 = vmatprep.mubr.bf16.mxu0 %v7413_v26  ;;  %6531 = vmatprep.subr.bf16.mxu0 %v7164_v63 }
  0x72   : > { %6580 = vmatpush3.bf16.msra.mxu1 %v7165_v8  ;;  %v1955_v8 = vrot.slane %v7446_v60, 5  ;;  %v1509_v60 = vshll.u32 %v7815_v45, 16 }
  0x73   : > { %6581 = vmatprep.subr.bf16.mxu1 %v7167_v6  ;;  %6532 = vmatpush3.bf16.msra.mxu0 %v7164_v63  ;;  %v1963_v63 = vsel %vm7832_vm5, %v1961_v47, %v1962_v50  ;;  %v7170_v50 = vld [vmem:[%s9737_s1 + $0x318] sm:$0xff]   ;;  %v1987_v47 = vrot.slane %v7597_v22, 5 }
  0x74   : > { %v1956_v2 = vsel %vm7832_vm5, %v1954_v24, %v1955_v8  ;;  %6533 = vmatprep.subr.bf16.mxu0 %v7166_v56  ;;  %v7171_v8 = vld [vmem:[%s9737_s1 + $0x398] sm:$0xff]   ;;  %v1976_v24 = vrot.slane %v7546_v20, 5  ;;  %v7866_v62 = vcombine.low %v1960_v23, %v1963_v63  ;;  %v1974_v20 = vsel %vm7832_vm5, %v5565_v44, %v1973_v9 }
  0x75   : > { %6502 = vmatmul.mubr.bf16.gmra.mxu1 %v7494_v32  ;;  %v7853_v15 = vcombine.low %v1953_v53, %v1956_v2  ;;  %v5566_v53 = vrot.slane %v7560_v31, 9  ;;  %6454 = vmatmul.mubr.bf16.gmra.mxu0 %v7436_v52  ;;  %v1975_v31 = vrot.slane %v1973_v9, 4  ;;  %v5567_v2 = vrot.slane %v7576_v38, 9 }
  0x76   : > { %6505 = vmatprep.mubr.bf16.mxu1 %v7528_v4  ;;  %6582 = vmatpush3.bf16.msra.mxu1 %v7167_v6  ;;  %v1969_v6 = vrot.slane %v7511_v49, 5  ;;  %9880 = vst [vmem:[#allocation35_spill] sm:$0xff] %v7866_v62  ;;  %v1968_v49 = vrot.slane %v1966_v21, 4  ;;  %v1982_v23 = vrot.slane %v1980_v51, 4  ;;  %v1990_v38 = vrot.slane %v7608_v30, 5  ;;  %v7172_v30 = vld [vmem:[%s9737_s1 + $0x310] sm:$0xff]  }
  0x77   : > { %6583 = vmatprep.subr.bf16.mxu1 %v7169_v59  ;;  %9879 = vst [vmem:[#allocation34_spill] sm:$0xff] %v7853_v15  ;;  %6457 = vmatprep.mubr.bf16.mxu0 %v7469_v14  ;;  %v1977_v43 = vsel %vm7832_vm5, %v1975_v31, %v1976_v24  ;;  %v1988_v22 = vsel %vm7832_vm5, %v5567_v2, %v1987_v47  ;;  %v1989_v63 = vrot.slane %v1987_v47, 4  ;;  %v1997_v24 = vrot.slane %v7645_v35, 5  ;;  %v9886_v31 = vld [vmem:[#allocation19_spill] sm:$0xff]  ;;  %v9887_v2 = vld [vmem:[#allocation20_spill] sm:$0xff]  ;;  %v7178_v47 = vld [vmem:[%s9737_s1 + $0x380] sm:$0xff]  }
  0x78   : > { %6534 = vmatpush3.bf16.msra.mxu0 %v7166_v56  ;;  %v1970_v33 = vsel %vm7832_vm5, %v1968_v49, %v1969_v6  ;;  %v5568_v56 = vrot.slane %v7618_v46, 9  ;;  %v7895_v21 = vcombine.low %v1974_v20, %v1977_v43  ;;  %v1984_v6 = vsel %vm7832_vm5, %v1982_v23, %v1983_v16  ;;  %v7175_v49 = vld [vmem:[%s9737_s1 + $0x388] sm:$0xff]  }
  0x79   : > { %6535 = vmatprep.subr.bf16.mxu0 %v7168_v7  ;;  %v7888_v44 = vcombine.low %v1967_v37, %v1970_v33  ;;  %v1994_v46 = vrot.slane %v7625_v57, 5  ;;  %v2004_v16 = vrot.slane %v9886_v31, 5  ;;  %v5570_v33 = vrot.slane %v9887_v2, 9  ;;  %v9892_v31 = vld [vmem:[#allocation10_spill] sm:$0xff] }
  0x7a   : > { %6584 = vmatpush3.bf16.msra.mxu1 %v7169_v59  ;;  %v1981_v59 = vsel %vm7832_vm5, %v5566_v53, %v1980_v51  ;;  %9882 = vst [vmem:[#allocation37_spill] sm:$0xff] %v7895_v21  ;;  %v9884_v53 = vld [vmem:[#allocation15_spill] sm:$0xff]  ;;  %v9885_v51 = vld [vmem:[#allocation17_spill] sm:$0xff] }
  0x7b   : > { %6585 = vmatprep.subr.bf16.mxu1 %v7171_v8  ;;  %9881 = vst [vmem:[#allocation36_spill] sm:$0xff] %v7888_v44  ;;  %v7905_v9 = vcombine.low %v1981_v59, %v1984_v6  ;;  %v5569_v37 = vrot.slane %v9884_v53, 9  ;;  %v2001_v20 = vrot.slane %v9885_v51, 5  ;;  %v1995_v35 = vsel %vm7832_vm5, %v5568_v56, %v1994_v46  ;;  %v9889_v59 = vld [vmem:[#allocation21_spill] sm:$0xff]  ;;  %v9890_v6 = vld [vmem:[#allocation23_spill] sm:$0xff] }
  0x7c   : > { %6536 = vmatpush3.bf16.msra.mxu0 %v7168_v7  ;;  %v1996_v7 = vrot.slane %v1994_v46, 4  ;;  %v2008_v23 = vrot.slane %v9889_v59, 5  ;;  %v5571_v53 = vrot.slane %v7698_v10, 9  ;;  %v2015_v51 = vrot.slane %v7709_v17, 5 }
  0x7d   : > { %6506 = vmatmul.mubr.bf16.gmra.mxu1 %v7556_v27  ;;  %9883 = vst [vmem:[#allocation38_spill] sm:$0xff] %v7905_v9  ;;  %6537 = vmatprep.subr.bf16.mxu0 %v7170_v50  ;;  %v2002_v43 = vsel %vm7832_vm5, %v5569_v37, %v2001_v20  ;;  %v2025_v59 = vrot.slane %v7746_v55, 5  ;;  %v7261_v55 = vld [vmem:[%s7348_s10 + $0x4] sm:$0xf] }
  0x7e   : > { %6509 = vmatprep.mubr.bf16.mxu1 %v7588_v5  ;;  %6586 = vmatpush3.bf16.msra.mxu1 %v7171_v8  ;;  %v1991_v8 = vsel %vm7832_vm5, %v1989_v63, %v1990_v38  ;;  %v2003_v38 = vrot.slane %v2001_v20, 4  ;;  %v2011_v63 = vrot.slane %v9890_v6, 5  ;;  %v1998_v56 = vsel %vm7832_vm5, %v1996_v7, %v1997_v24  ;;  %v7174_v24 = vld [vmem:[%s9737_s1 + $0x308] sm:$0xff]  }
  0x7f   : > { %6587 = vmatprep.subr.bf16.mxu1 %v7173_v58  ;;  %v7918_v57 = vcombine.low %v1988_v22, %v1991_v8  ;;  %v9891_v22 = vld [vmem:[#allocation9_spill] sm:$0xff]  ;;  %v2009_v46 = vsel %vm7832_vm5, %v5570_v33, %v2008_v23  ;;  %v2010_v8 = vrot.slane %v2008_v23, 4  ;;  %v7937_v37 = vcombine.low %v1995_v35, %v1998_v56  ;;  %v9897_v23 = vld [vmem:[#allocation16_spill] sm:$0xff] }
  0x80   : > { %6458 = vmatmul.mubr.bf16.gmra.mxu0 %v9891_v22  ;;  %v2005_v10 = vsel %vm7832_vm5, %v2003_v38, %v2004_v16  ;;  %v5572_v20 = vrot.slane %v7728_v61, 9  ;;  %v2017_v16 = vrot.slane %v2015_v51, 4  ;;  %v9895_v33 = vld [vmem:[#allocation13_spill] sm:$0xff]  ;;  %v2022_v7 = vrot.slane %v7732_v34, 5 }
  0x81   : > { %9888 = vst [vmem:[#allocation15_spill] sm:$0xff] %v7918_v57  ;;  %6461 = vmatprep.mubr.bf16.mxu0 %v9892_v31  ;;  %6538 = vmatpush3.bf16.msra.mxu0 %v7170_v50  ;;  %9893 = vst [vmem:[#allocation17_spill] sm:$0xff] %v7937_v37  ;;  %v7946_v2 = vcombine.low %v2002_v43, %v2005_v10  ;;  %v2012_v17 = vsel %vm7832_vm5, %v2010_v8, %v2011_v63  ;;  %v7177_v43 = vld [vmem:[%s9737_s1 + $0x300] sm:$0xff]   ;;  %v7968_v38 = vld [vmem:[%s9737_s1 + $0x138] sm:$0xff]   ;;  %v1917_v34 = vrot.slane %v7261_v55, 5 }
  0x82   : > { %6588 = vmatpush3.bf16.msra.mxu1 %v7173_v58  ;;  %v2018_v58 = vrot.slane %v7717_v0, 5  ;;  %6539 = vmatprep.subr.bf16.mxu0 %v7172_v30  ;;  %v2016_v50 = vsel %vm7832_vm5, %v5571_v53, %v2015_v51  ;;  %v7954_v0 = vld [vmem:[%s7348_s10] sm:$0xf]  ;;  %v7957_v35 = vcombine.low %v2009_v46, %v2012_v17  ;;  %v2024_v53 = vrot.slane %v2022_v7, 4  ;;  %v9899_v46 = vld [vmem:[#allocation11_spill] sm:$0xff] }
  0x83   : > { %6589 = vmatprep.subr.bf16.mxu1 %v7175_v49  ;;  %9894 = vst [vmem:[#allocation19_spill] sm:$0xff] %v7946_v2  ;;  %v1511_v8 = vrot.slane %v1509_v60, 5  ;;  %v7263_v10 = vld [vmem:[%s7348_s10 + $0xc] sm:$0xf]  ;;  %v9902_v60 = vld [vmem:[#allocation22_spill] sm:$0xff] }
  0x84   : > { %9896 = vst [vmem:[#allocation20_spill] sm:$0xff] %v7957_v35  ;;  %v2019_v6 = vsel %vm7832_vm5, %v2017_v16, %v2018_v58  ;;  %v2026_v56 = vsel %vm7832_vm5, %v2024_v53, %v2025_v59  ;;  %v5558_v58 = vrot.slane %v7263_v10, 9  ;;  %v1496_v16 = vor.u32 %v7811_v42, %v7809_v12  ;;  %v9905_v55 = vld [vmem:[#allocation18_spill] sm:$0xff]  ;;  %v7265_v53 = vld [vmem:[%s7348_s10 + $0x14] sm:$0x1] }
  0x85   : > { %6510 = vmatmul.mubr.bf16.gmra.mxu1 %v9895_v33  ;;  %6540 = vmatpush3.bf16.msra.mxu0 %v7172_v30  ;;  %v7973_v63 = vcombine.low %v2016_v50, %v2019_v6  ;;  %v7262_v30 = vld [vmem:[%s7348_s10 + $0x8] sm:$0x1]  ;;  %v9901_v50 = vld [vmem:[#allocation12_spill] sm:$0xff]  ;;  %v1506_v12 = vor.u32 %v7828_v29, %v7826_v41 }
  0x86   : > { %6513 = vmatprep.mubr.bf16.mxu1 %v9897_v23  ;;  %6590 = vmatpush3.bf16.msra.mxu1 %v7175_v49  ;;  %v2023_v49 = vsel %vm7832_vm5, %v5572_v20, %v2022_v7  ;;  %v1920_v51 = vrot.slane %v7262_v30, 5  ;;  %v7987_v20 = vld [vmem:[%s9737_s1 + $0x1b8] sm:$0xff]   ;;  %v9904_v7 = vld [vmem:[#allocation14_spill] sm:$0xff]  ;;  %v1497_v59 = vrot.slane %v1496_v16, 4  ;;  %v7264_v6 = vld [vmem:[%s7348_s10 + $0x10] sm:$0xf] }
  0x87   : > { %6591 = vmatprep.subr.bf16.mxu1 %v7178_v47  ;;  %9898 = vst [vmem:[#allocation21_spill] sm:$0xff] %v7973_v63  ;;  %6541 = vmatprep.subr.bf16.mxu0 %v7174_v24  ;;  %v7989_v17 = vcombine.low %v2023_v49, %v2026_v56  ;;  %v1919_v49 = vrot.slane %v1917_v34, 4  ;;  %v1927_v56 = vrot.slane %v7265_v53, 5  ;;  %v9906_v30 = vld [vmem:[#allocation27_spill] sm:$0xff]  ;;  %v9907_v42 = vld [vmem:[#allocation24_spill] sm:$0xff]  ;;  %v9908_v16 = vld [vmem:[#allocation26_spill] sm:$0xff] }
  0x88   : > { %6462 = vmatmul.mubr.bf16.gmra.mxu0 %v9899_v46  ;;  %v1502_v29 = vsel %vm7370_vm2, %v1497_v59, %v7826_v41 }
  0x89   : > { %9900 = vst [vmem:[#allocation23_spill] sm:$0xff] %v7989_v17  ;;  %6465 = vmatprep.mubr.bf16.mxu0 %v9901_v50  ;;  %6542 = vmatpush3.bf16.msra.mxu0 %v7174_v24  ;;  %v1924_v24 = vrot.slane %v7264_v6, 5  ;;  %v7266_v6 = vld [vmem:[%s7348_s10 + $0x18] sm:$0xf]  ;;  %v9911_v50 = vrot.slane %v7954_v0, 9  ;;  %v1921_v41 = vsel %vm7832_vm5, %v1919_v49, %v1920_v51  ;;  %v8036_v0 = vcombine.low %v7784_v54, %v7791_v25 }
  0x8a   : > { %6592 = vmatpush3.bf16.msra.mxu1 %v7178_v47  ;;  %6543 = vmatprep.subr.bf16.mxu0 %v7177_v43  ;;  %v9903_v47 = vld [vmem:[#allocation25_spill] sm:$0xff]  ;;  %v5559_v61 = vrot.slane %v7266_v6, 9  ;;  %v9916_v49 = vrot.slane %v7784_v54, 9 }
  0x8b   : > { %6673 = vmatprep.subr.bf16.mxu1 %v7968_v38  ;;  %v1926_v10 = vrot.slane %v1924_v24, 4  ;;  %v1918_v46 = vsel %vm7832_vm5, %v9911_v50, %v1917_v34  ;;  %9913 = vst [vmem:[#allocation10_spill] sm:$0xff] %v8036_v0  ;;  %v9914_v34 = vld [vmem:[#allocation3_spill] sm:$0xff] }
  0x8c   : > { %v5589_v51 = vcombine.low %v1918_v46, %v1921_v41  ;;  %v7271_v46 = vld [vmem:[%s7348_s10 + $0x2c] sm:$0x1] }
  0x8d   : > { %6514 = vmatmul.mubr.bf16.gmra.mxu1 %v9902_v60  ;;  %6544 = vmatpush3.bf16.msra.mxu0 %v7177_v43  ;;  %v1507_v43 = vrot.slane %v1506_v12, 4  ;;  %v1928_v54 = vsel %vm7832_vm5, %v1926_v10, %v1927_v56  ;;  %v1941_v41 = vrot.slane %v7271_v46, 5  ;;  %v7188_v46 = vld [vmem:[%s9737_s1 + $0x118] sm:$0xff]  }
  0x8e   : > { %6517 = vmatprep.mubr.bf16.mxu1 %v9903_v47  ;;  %6625 = vmatprep.subr.bf16.mxu0 %v7987_v20 }
  0x8f   : > { %v1512_v53 = vsel %vm7370_vm2, %v1507_v43, %v1511_v8  ;;  %v7269_v8 = vld [vmem:[%s7348_s10 + $0x24] sm:$0xf]  ;;  %v7270_v43 = vld [vmem:[%s7348_s10 + $0x28] sm:$0xf] }
  0x90   : > { %6466 = vmatmul.mubr.bf16.gmra.mxu0 %v9904_v7  ;;  %v8017_v12 = vcombine.low %v1502_v29, %v1512_v53  ;;  %v5560_v59 = vrot.slane %v7269_v8, 9  ;;  %v1938_v29 = vrot.slane %v7270_v43, 5  ;;  %v9912_v53 = vrot.slane %v7791_v25, 5 }
  0x91   : > { %6469 = vmatprep.mubr.bf16.mxu0 %v9905_v55  ;;  %v7267_v55 = vld [vmem:[%s7348_s10 + $0x1c] sm:$0xf]  ;;  %v1925_v25 = vsel %vm7832_vm5, %v5558_v58, %v1924_v24  ;;  %v7181_v24 = vld [vmem:[%s9737_s1 + $0x1b0] sm:$0xff]  }
  0x92   : > { %v1931_v7 = vrot.slane %v7267_v55, 5  ;;  %9909 = vst [vmem:[#allocation9_spill] sm:$0xff] %v8017_v12  ;;  %v7268_v55 = vld [vmem:[%s7348_s10 + $0x20] sm:$0x1]  ;;  %v2789_v36 = vrot.slane %v9912_v53, 4  ;;  %v9915_v50 = vmov %v9912_v53  ;;  %v8065_v58 = vcombine.low %v1925_v25, %v1928_v54 }
  0x93   : > { %v2788_v8 = vsel %vm7832_vm5, %v9916_v49, %v9915_v50  ;;  %v1940_v49 = vrot.slane %v1938_v29, 4  ;;  %v7185_v54 = vld [vmem:[%s9737_s1 + $0x1a0] sm:$0xff]  }
  0x94   : > { %v1933_v6 = vrot.slane %v1931_v7, 4  ;;  %9918 = vst [vmem:[#allocation16_spill] sm:$0xff] %v8065_v58 }
  0x95   : > { %6518 = vmatmul.mubr.bf16.gmra.mxu1 %v9906_v30 }
  0x96   : > { %6521 = vmatprep.mubr.bf16.mxu1 %v7759_v1 }
  0x98   : > { %6470 = vmatmul.mubr.bf16.gmra.mxu0 %v9907_v42  ;;  %v1934_v42 = vrot.slane %v7268_v55, 5  ;;  %v2790_v55 = vrot.slane %v7815_v45, 5  ;;  %v7182_v45 = vld [vmem:[%s9737_s1 + $0x130] sm:$0xff]  }
  0x99   : > { %6473 = vmatprep.mubr.bf16.mxu0 %v9908_v16  ;;  %v9910_v16 = vld [vmem:[#allocation28_spill] sm:$0xff] }
  0x9a   : > { %v2791_v43 = vsel %vm7832_vm5, %v2789_v36, %v2790_v55  ;;  %v1932_v55 = vsel %vm7832_vm5, %v5559_v61, %v1931_v7  ;;  %v1935_v50 = vsel %vm7832_vm5, %v1933_v6, %v1934_v42  ;;  %v7184_v61 = vld [vmem:[%s9737_s1 + $0x128] sm:$0xff]   ;;  %v7274_v42 = vld [vmem:[%s7348_s10 + $0x38] sm:$0x1]  ;;  %v1942_v6 = vsel %vm7832_vm5, %v1940_v49, %v1941_v41  ;;  %v7190_v41 = vld [vmem:[%s9737_s1 + $0x110] sm:$0xff]  }
  0x9b   : > { %v8047_v53 = vcombine.low %v2788_v8, %v2791_v43  ;;  %v7273_v8 = vld [vmem:[%s7348_s10 + $0x34] sm:$0xf]  ;;  %v8075_v7 = vcombine.low %v1932_v55, %v1935_v50  ;;  %v1948_v10 = vrot.slane %v7274_v42, 5  ;;  %v7186_v43 = vld [vmem:[%s9737_s1 + $0x120] sm:$0xff]   ;;  %v7192_v55 = vld [vmem:[%s9737_s1 + $0x108] sm:$0xff]  }
  0x9c   : > { %v7194_v50 = vld [vmem:[%s9737_s1 + $0x100] sm:$0xff]   ;;  %v7191_v49 = vld [vmem:[%s9737_s1 + $0x188] sm:$0xff]  }
  0x9d   : > { %6522 = vmatmul.mubr.bf16.gmra.mxu1 %v7771_v19  ;;  %9917 = vst [vmem:[#allocation13_spill] sm:$0xff] %v8047_v53  ;;  %9919 = vst [vmem:[#allocation3_spill] sm:$0xff] %v8075_v7 }
  0x9e   : > { %6525 = vmatprep.mubr.bf16.mxu1 %v7780_v18 }
  0xa0   : > { %6474 = vmatmul.mubr.bf16.gmra.mxu0 %v9910_v16 }
  0xa1   : > { %6477 = vmatprep.mubr.bf16.mxu0 %v7766_v28 }
  0xa5   : > { %6526 = vmatmul.mubr.bf16.gmra.mxu1 %v8017_v12 }
  0xa6   : > { %6593 = vmatprep.mubr.bf16.mxu1 %v9914_v34  ;;  %v7272_v34 = vld [vmem:[%s7348_s10 + $0x30] sm:$0xf] }
  0xa7   : > { %v5561_v36 = vrot.slane %v7272_v34, 9  ;;  %v7187_v34 = vld [vmem:[%s9737_s1 + $0x198] sm:$0xff]  }
  0xa8   : > { %6478 = vmatmul.mubr.bf16.gmra.mxu0 %v8036_v0  ;;  %v7207_v0 = vld [vmem:[%s9737_s1 + $0x248] sm:$0xff]  }
  0xa9   : > { %6545 = vmatprep.mubr.bf16.mxu0 %v5589_v51  ;;  %v1945_v51 = vrot.slane %v7273_v8, 5  ;;  %v7193_v8 = vld [vmem:[%s9737_s1 + $0x180] sm:$0xff]  }
  0xab   : > { %v1947_v56 = vrot.slane %v1945_v51, 4  ;;  %v1946_v25 = vsel %vm7832_vm5, %v5561_v36, %v1945_v51  ;;  %v7189_v36 = vld [vmem:[%s9737_s1 + $0x190] sm:$0xff]   ;;  %v7196_v51 = vld [vmem:[%s9737_s1 + $0x2f8] sm:$0xff]  }
  0xad   : > { %6594 = vmatmul.mubr.bf16.vlgmr.msra.gmra.mxu1 %v7407_v13 }
  0xae   : > { %6674 = vmatpush3.bf16.msra.mxu1 %v7968_v38  ;;  %6597 = vmatprep.mubr.bf16.mxu1 %v7429_v40  ;;  %v1939_v38 = vsel %vm7832_vm5, %v5560_v59, %v1938_v29 }
  0xaf   : > { %6675 = vmatprep.subr.bf16.mxu1 %v7182_v45  ;;  %v8096_v59 = vcombine.low %v1939_v38, %v1942_v6 }
  0xb0   : > { %6546 = vmatmul.mubr.bf16.vlgmr.msra.gmra.mxu0 %v8065_v58 }
  0xb1   : > { %6626 = vmatpush3.bf16.msra.mxu0 %v7987_v20  ;;  %6549 = vmatprep.mubr.bf16.mxu0 %v8075_v7  ;;  %v7183_v20 = vld [vmem:[%s9737_s1 + $0x1a8] sm:$0xff]   ;;  %9920 = vst [vmem:[#allocation39_spill] sm:$0xff] %v8096_v59 }
  0xb2   : > { %6676 = vmatpush3.bf16.msra.mxu1 %v7182_v45  ;;  %6627 = vmatprep.subr.bf16.mxu0 %v7181_v24  ;;  %v1949_v45 = vsel %vm7832_vm5, %v1947_v56, %v1948_v10 }
  0xb3   : > { %6677 = vmatprep.subr.bf16.mxu1 %v7184_v61  ;;  %v8099_v29 = vcombine.low %v1946_v25, %v1949_v45  ;;  %v7200_v25 = vld [vmem:[%s9737_s1 + $0x2e8] sm:$0xff]  }
  0xb5   : > { %6598 = vmatmul.mubr.bf16.gmra.mxu1 %v7456_v3  ;;  %6628 = vmatpush3.bf16.msra.mxu0 %v7181_v24  ;;  %9921 = vst [vmem:[#allocation40_spill] sm:$0xff] %v8099_v29  ;;  %v7195_v24 = vld [vmem:[%s9737_s1 + $0x278] sm:$0xff]  }
  0xb6   : > { %6601 = vmatprep.mubr.bf16.mxu1 %v7494_v32  ;;  %6678 = vmatpush3.bf16.msra.mxu1 %v7184_v61  ;;  %v7198_v61 = vld [vmem:[%s9737_s1 + $0x2f0] sm:$0xff]  }
  0xb7   : > { %6679 = vmatprep.subr.bf16.mxu1 %v7186_v43  ;;  %6629 = vmatprep.subr.bf16.mxu0 %v7183_v20 }
  0xb8   : > { %6550 = vmatmul.mubr.bf16.gmra.mxu0 %v8096_v59 }
  0xb9   : > { %6553 = vmatprep.mubr.bf16.mxu0 %v8099_v29  ;;  %6630 = vmatpush3.bf16.msra.mxu0 %v7183_v20 }
  0xba   : > { %6680 = vmatpush3.bf16.msra.mxu1 %v7186_v43  ;;  %6631 = vmatprep.subr.bf16.mxu0 %v7185_v54  ;;  %v7197_v43 = vld [vmem:[%s9737_s1 + $0x270] sm:$0xff]  }
  0xbb   : > { %6681 = vmatprep.subr.bf16.mxu1 %v7188_v46 }
  0xbd   : > { %6602 = vmatmul.mubr.bf16.gmra.mxu1 %v7528_v4  ;;  %6632 = vmatpush3.bf16.msra.mxu0 %v7185_v54 }
  0xbe   : > { %6605 = vmatprep.mubr.bf16.mxu1 %v7556_v27  ;;  %6682 = vmatpush3.bf16.msra.mxu1 %v7188_v46  ;;  %v7202_v46 = vld [vmem:[%s9737_s1 + $0x2e0] sm:$0xff]  }
  0xbf   : > { %6683 = vmatprep.subr.bf16.mxu1 %v7190_v41  ;;  %6633 = vmatprep.subr.bf16.mxu0 %v7187_v34 }
  0xc0   : > { %6554 = vmatmul.mubr.bf16.gmra.mxu0 %v7853_v15 }
  0xc1   : > { %6557 = vmatprep.mubr.bf16.mxu0 %v7866_v62  ;;  %6634 = vmatpush3.bf16.msra.mxu0 %v7187_v34  ;;  %v7199_v34 = vld [vmem:[%s9737_s1 + $0x268] sm:$0xff]  }
  0xc2   : > { %6684 = vmatpush3.bf16.msra.mxu1 %v7190_v41  ;;  %6635 = vmatprep.subr.bf16.mxu0 %v7189_v36 }
  0xc3   : > { %6685 = vmatprep.subr.bf16.mxu1 %v7192_v55 }
  0xc5   : > { %6606 = vmatmul.mubr.bf16.gmra.mxu1 %v7588_v5  ;;  %6636 = vmatpush3.bf16.msra.mxu0 %v7189_v36 }
  0xc6   : > { %6609 = vmatprep.mubr.bf16.mxu1 %v9895_v33  ;;  %6686 = vmatpush3.bf16.msra.mxu1 %v7192_v55 }
  0xc7   : > { %6687 = vmatprep.subr.bf16.mxu1 %v7194_v50  ;;  %6637 = vmatprep.subr.bf16.mxu0 %v7191_v49 }
  0xc8   : > { %6558 = vmatmul.mubr.bf16.gmra.mxu0 %v7888_v44 }
  0xc9   : > { %6561 = vmatprep.mubr.bf16.mxu0 %v7895_v21  ;;  %6638 = vmatpush3.bf16.msra.mxu0 %v7191_v49 }
  0xca   : > { %6688 = vmatpush3.bf16.msra.mxu1 %v7194_v50  ;;  %6639 = vmatprep.subr.bf16.mxu0 %v7193_v8 }
  0xcb   : > { %6769 = vmatprep.subr.bf16.mxu1 %v7196_v51 }
  0xcd   : > { %6610 = vmatmul.mubr.bf16.gmra.mxu1 %v9897_v23  ;;  %6640 = vmatpush3.bf16.msra.mxu0 %v7193_v8  ;;  %v7201_v8 = vld [vmem:[%s9737_s1 + $0x260] sm:$0xff]  }
  0xce   : > { %6613 = vmatprep.mubr.bf16.mxu1 %v9902_v60  ;;  %6721 = vmatprep.subr.bf16.mxu0 %v7195_v24 }
  0xd0   : > { %6562 = vmatmul.mubr.bf16.gmra.mxu0 %v7905_v9 }
  0xd1   : > { %6565 = vmatprep.mubr.bf16.mxu0 %v7918_v57 }
  0xd5   : > { %6614 = vmatmul.mubr.bf16.gmra.mxu1 %v9903_v47 }
  0xd6   : > { %6617 = vmatprep.mubr.bf16.mxu1 %v9906_v30 }
  0xd8   : > { %6566 = vmatmul.mubr.bf16.gmra.mxu0 %v7937_v37 }
  0xd9   : > { %6569 = vmatprep.mubr.bf16.mxu0 %v7946_v2 }
  0xdd   : > { %6618 = vmatmul.mubr.bf16.gmra.mxu1 %v7759_v1 }
  0xde   : > { %6621 = vmatprep.mubr.bf16.mxu1 %v7771_v19 }
  0xe0   : > { %6570 = vmatmul.mubr.bf16.gmra.mxu0 %v7957_v35 }
  0xe1   : > { %6573 = vmatprep.mubr.bf16.mxu0 %v7973_v63 }
  0xe5   : > { %6622 = vmatmul.mubr.bf16.gmra.mxu1 %v7780_v18 }
  0xe6   : > { %6689 = vmatprep.mubr.bf16.mxu1 %v8065_v58 }
  0xe8   : > { %6574 = vmatmul.mubr.bf16.gmra.mxu0 %v7989_v17 }
  0xe9   : > { %6641 = vmatprep.mubr.bf16.mxu0 %v7407_v13 }
  0xec   : > { %v8163_v56 = vpop.f32.mrf.mxu0 }
  0xed   : > { %v8165_v42 = vpop.f32.mrf.mxu1  ;;  %6690 = vmatmul.mubr.bf16.vlgmr.msra.gmra.mxu1 %v8075_v7 }
  0xee   : > { %v8168_v10 = vpop.f32.mrf.mxu0  ;;  %6770 = vmatpush3.bf16.msra.mxu1 %v7196_v51  ;;  %6693 = vmatprep.mubr.bf16.mxu1 %v8096_v59  ;;  %v7204_v51 = vld [vmem:[%s9737_s1 + $0x2d8] sm:$0xff]   ;;  %v7205_v59 = vld [vmem:[%s9737_s1 + $0x250] sm:$0xff]  }
  0xef   : > { %v8171_v38 = vpop.f32.mrf.mxu1  ;;  %6771 = vmatprep.subr.bf16.mxu1 %v7198_v61 }
  0xf0   : > { %v8173_v6 = vpop.f32.mrf.mxu0  ;;  %6642 = vmatmul.mubr.bf16.vlgmr.msra.gmra.mxu0 %v7429_v40 }
  0xf1   : > { %v8181_v45 = vpop.f32.mrf.mxu1  ;;  %6722 = vmatpush3.bf16.msra.mxu0 %v7195_v24  ;;  %6645 = vmatprep.mubr.bf16.mxu0 %v7456_v3 }
  0xf2   : > { %v8184_v20 = vpop.f32.mrf.mxu0  ;;  %6772 = vmatpush3.bf16.msra.mxu1 %v7198_v61  ;;  %6723 = vmatprep.subr.bf16.mxu0 %v7197_v43 }
  0xf3   : > { %v8186_v54 = vpop.f32.mrf.mxu1  ;;  %6773 = vmatprep.subr.bf16.mxu1 %v7200_v25 }
  0xf4   : > { %v8192_v41 = vpop.f32.mrf.mxu0 }
  0xf5   : > { %v8197_v36 = vpop.f32.mrf.mxu1  ;;  %6694 = vmatmul.mubr.bf16.gmra.mxu1 %v8099_v29  ;;  %6724 = vmatpush3.bf16.msra.mxu0 %v7197_v43 }
  0xf6   : > { %v8200_v55 = vpop.f32.mrf.mxu0  ;;  %6697 = vmatprep.mubr.bf16.mxu1 %v7853_v15  ;;  %6774 = vmatpush3.bf16.msra.mxu1 %v7200_v25  ;;  %v7206_v25 = vld [vmem:[%s9737_s1 + $0x2d0] sm:$0xff]  }
  0xf7   : > { %v8203_v50 = vpop.f32.mrf.mxu1  ;;  %6775 = vmatprep.subr.bf16.mxu1 %v7202_v46  ;;  %6725 = vmatprep.subr.bf16.mxu0 %v7199_v34 }
  0xf8   : > { %v8205_v49 = vpop.f32.mrf.mxu0  ;;  %6646 = vmatmul.mubr.bf16.gmra.mxu0 %v7494_v32 }
  0xf9   : > { %v8213_v24 = vpop.f32.mrf.mxu1  ;;  %6649 = vmatprep.mubr.bf16.mxu0 %v7528_v4  ;;  %6726 = vmatpush3.bf16.msra.mxu0 %v7199_v34 }
  0xfa   : > { %v8216_v61 = vpop.f32.mrf.mxu0  ;;  %6776 = vmatpush3.bf16.msra.mxu1 %v7202_v46  ;;  %6727 = vmatprep.subr.bf16.mxu0 %v7201_v8 }
  0xfb   : > { %v8218_v43 = vpop.f32.mrf.mxu1  ;;  %6777 = vmatprep.subr.bf16.mxu1 %v7204_v51 }
  0xfc   : > { %v8230_v46 = vpop.f32.mrf.mxu0 }
  0xfd   : > { %v8227_v15 = vpop.f32.mrf.mxu1  ;;  %6698 = vmatmul.mubr.bf16.gmra.mxu1 %v7866_v62  ;;  %6728 = vmatpush3.bf16.msra.mxu0 %v7201_v8  ;;  %v7208_v62 = vld [vmem:[%s9737_s1 + $0x2c8] sm:$0xff]  }
  0xfe   : > { %6701 = vmatprep.mubr.bf16.mxu1 %v7888_v44  ;;  %6778 = vmatpush3.bf16.msra.mxu1 %v7204_v51  ;;  %v8235_v29 = vpop.f32.mrf.mxu0  ;;  %v7210_v44 = vld [vmem:[%s9737_s1 + $0x2c0] sm:$0xff]  }
  0xff   : > { %v8233_v34 = vpop.f32.mrf.mxu1  ;;  %6779 = vmatprep.subr.bf16.mxu1 %v7206_v25  ;;  %6729 = vmatprep.subr.bf16.mxu0 %v7203_v39 }
 0x100   : > { %6650 = vmatmul.mubr.bf16.gmra.mxu0 %v7556_v27  ;;  %v8246_v51 = vpop.f32.mrf.mxu0 }
 0x101   : > { %v8243_v7 = vpop.f32.mrf.mxu1  ;;  %6653 = vmatprep.mubr.bf16.mxu0 %v7588_v5  ;;  %6730 = vmatpush3.bf16.msra.mxu0 %v7203_v39 }
 0x102   : > { %6780 = vmatpush3.bf16.msra.mxu1 %v7206_v25  ;;  %v8254_v58 = vpop.f32.mrf.mxu0  ;;  %6731 = vmatprep.subr.bf16.mxu0 %v7205_v59 }
 0x103   : > { %v8248_v8 = vpop.f32.mrf.mxu1  ;;  %6781 = vmatprep.subr.bf16.mxu1 %v7208_v62 }
 0x104   : > { %9922 = vst [vmem:[#allocation41_spill] sm:$0xff] %v8248_v8  ;;  %v8262_v25 = vpop.f32.mrf.mxu0  ;;  %v7209_v8 = vld [vmem:[%s9737_s1 + $0x240] sm:$0xff]  }
 0x105   : > { %v8259_v28 = vpop.f32.mrf.mxu1  ;;  %6702 = vmatmul.mubr.bf16.gmra.mxu1 %v7895_v21  ;;  %6732 = vmatpush3.bf16.msra.mxu0 %v7205_v59  ;;  %v8275_v21 = vld [vmem:[%s9737_s1 + $0x78] sm:$0xff]  }
 0x106   : > { %9923 = vst [vmem:[#allocation42_spill] sm:$0xff] %v8259_v28  ;;  %6705 = vmatprep.mubr.bf16.mxu1 %v7905_v9  ;;  %6782 = vmatpush3.bf16.msra.mxu1 %v7208_v62  ;;  %v8267_v16 = vpop.f32.mrf.mxu0 }
 0x107   : > { %v8265_v39 = vpop.f32.mrf.mxu1  ;;  %6783 = vmatprep.subr.bf16.mxu1 %v7210_v44  ;;  %6733 = vmatprep.subr.bf16.mxu0 %v7207_v0 }
 0x108   : > { %9924 = vst [vmem:[#allocation43_spill] sm:$0xff] %v8265_v39  ;;  %6654 = vmatmul.mubr.bf16.gmra.mxu0 %v9895_v33  ;;  %v8280_v62 = vpop.f32.mrf.mxu0  ;;  %v8290_v39 = vld [vmem:[%s9737_s1 + $0xf8] sm:$0xff]  }
 0x109   : > { %v8277_v28 = vpop.f32.mrf.mxu1  ;;  %9926 = vst [vmem:[#allocation45_spill] sm:$0xff] %v8280_v62  ;;  %6657 = vmatprep.mubr.bf16.mxu0 %v9897_v23  ;;  %6734 = vmatpush3.bf16.msra.mxu0 %v7207_v0 }
 0x10a   : > { %9925 = vst [vmem:[#allocation44_spill] sm:$0xff] %v8277_v28  ;;  %6784 = vmatpush3.bf16.msra.mxu1 %v7210_v44  ;;  %v8285_v9 = vpop.f32.mrf.mxu0  ;;  %6735 = vmatprep.subr.bf16.mxu0 %v7209_v8 }
 0x10b   : > { %v8282_v59 = vpop.f32.mrf.mxu1  ;;  %9928 = vst [vmem:[#allocation47_spill] sm:$0xff] %v8285_v9  ;;  %6865 = vmatprep.subr.bf16.mxu1 %v8275_v21 }
 0x10c   : > { %9927 = vst [vmem:[#allocation46_spill] sm:$0xff] %v8282_v59 }
 0x10d   : > { %v8293_v28 = vpop.f32.mrf.mxu1  ;;  %6706 = vmatmul.mubr.bf16.gmra.mxu1 %v7918_v57  ;;  %6736 = vmatpush3.bf16.msra.mxu0 %v7209_v8  ;;  %v8299_v0 = vpop.f32.mrf.mxu0 }
 0x10e   : > { %6709 = vmatprep.mubr.bf16.mxu1 %v7937_v37  ;;  %6817 = vmatprep.subr.bf16.mxu0 %v8290_v39 }
 0x10f   : > { %v8297_v44 = vpop.f32.mrf.mxu1  ;;  %v8305_v9 = vpop.f32.mrf.mxu0 }
 0x110   : > { %9929 = vst [vmem:[#allocation48_spill] sm:$0xff] %v8297_v44  ;;  %6658 = vmatmul.mubr.bf16.gmra.mxu0 %v9902_v60 }
 0x111   : > { %v8302_v59 = vpop.f32.mrf.mxu1  ;;  %6661 = vmatprep.mubr.bf16.mxu0 %v9903_v47  ;;  %v8310_v57 = vpop.f32.mrf.mxu0 }
 0x112   : > { %9930 = vst [vmem:[#allocation49_spill] sm:$0xff] %v8302_v59 }
 0x113   : > { %v8307_v62 = vpop.f32.mrf.mxu1  ;;  %v8315_v8 = vpop.f32.mrf.mxu0 }
 0x114   : > { %9931 = vst [vmem:[#allocation50_spill] sm:$0xff] %v8307_v62 }
 0x115   : > { %v8312_v37 = vpop.f32.mrf.mxu1  ;;  %6710 = vmatmul.mubr.bf16.gmra.mxu1 %v7946_v2  ;;  %v8320_v59 = vpop.f32.mrf.mxu0 }
 0x116   : > { %9932 = vst [vmem:[#allocation51_spill] sm:$0xff] %v8312_v37  ;;  %6713 = vmatprep.mubr.bf16.mxu1 %v7957_v35 }
 0x117   : > { %v8318_v44 = vpop.f32.mrf.mxu1  ;;  %v8325_v62 = vpop.f32.mrf.mxu0 }
 0x118   : > { %9933 = vst [vmem:[#allocation52_spill] sm:$0xff] %v8318_v44  ;;  %6662 = vmatmul.mubr.bf16.gmra.mxu0 %v9906_v30 }
 0x119   : > { %v8322_v60 = vpop.f32.mrf.mxu1  ;;  %6665 = vmatprep.mubr.bf16.mxu0 %v7759_v1  ;;  %v8330_v37 = vpop.f32.mrf.mxu0 }
 0x11a   : > { %9934 = vst [vmem:[#allocation53_spill] sm:$0xff] %v8322_v60  ;;  %9936 = vst [vmem:[#allocation55_spill] sm:$0xff] %v8330_v37 }
 0x11b   : > { %v8327_v47 = vpop.f32.mrf.mxu1  ;;  %v8335_v35 = vpop.f32.mrf.mxu0 }
 0x11c   : > { %9935 = vst [vmem:[#allocation54_spill] sm:$0xff] %v8327_v47 }
 0x11d   : > { %v8332_v2 = vpop.f32.mrf.mxu1  ;;  %6714 = vmatmul.mubr.bf16.gmra.mxu1 %v7973_v63  ;;  %v8342_v30 = vpop.f32.mrf.mxu0 }
 0x11e   : > { %9937 = vst [vmem:[#allocation56_spill] sm:$0xff] %v8332_v2  ;;  %6717 = vmatprep.mubr.bf16.mxu1 %v7989_v17 }
 0x11f   : > { %v8338_v44 = vpop.f32.mrf.mxu1  ;;  %v8348_v37 = vpop.f32.mrf.mxu0 }
 0x120   : > { %9938 = vst [vmem:[#allocation57_spill] sm:$0xff] %v8338_v44  ;;  %6666 = vmatmul.mubr.bf16.gmra.mxu0 %v7771_v19 }
 0x121   : > { %v8340_v60 = vpop.f32.mrf.mxu1  ;;  %6669 = vmatprep.mubr.bf16.mxu0 %v7780_v18  ;;  %v8353_v63 = vpop.f32.mrf.mxu0 }
 0x122   : > { %9939 = vst [vmem:[#allocation58_spill] sm:$0xff] %v8340_v60  ;;  %9942 = vst [vmem:[#allocation61_spill] sm:$0xff] %v8353_v63 }
 0x123   : > { %v8345_v47 = vpop.f32.mrf.mxu1  ;;  %v8358_v60 = vpop.f32.mrf.mxu0 }
 0x124   : > { %9940 = vst [vmem:[#allocation59_spill] sm:$0xff] %v8345_v47  ;;  %9944 = vst [vmem:[#allocation63_spill] sm:$0xff] %v8358_v60 }
 0x125   : > { %v8350_v2 = vpop.f32.mrf.mxu1  ;;  %6718 = vmatmul.mubr.bf16.gmra.mxu1 %v8047_v53  ;;  %v8362_v19 = vpop.f32.mrf.mxu0  ;;  %v7214_v53 = vld [vmem:[%s9737_s1 + $0x70] sm:$0xff]  }
 0x126   : > { %9941 = vst [vmem:[#allocation60_spill] sm:$0xff] %v8350_v2  ;;  %6785 = vmatprep.mubr.bf16.mxu1 %v7378_v48  ;;  %9946 = vst [vmem:[#allocation65_spill] sm:$0xff] %v8362_v19  ;;  %v7218_v19 = vld [vmem:[%s9737_s1 + $0x60] sm:$0xff]  }
 0x127   : > { %v8356_v17 = vpop.f32.mrf.mxu1  ;;  %v8371_v2 = vpop.f32.mrf.mxu0 }
 0x128   : > { %9943 = vst [vmem:[#allocation62_spill] sm:$0xff] %v8356_v17  ;;  %6670 = vmatmul.mubr.bf16.gmra.mxu0 %v8017_v12  ;;  %9948 = vst [vmem:[#allocation67_spill] sm:$0xff] %v8371_v2  ;;  %v7216_v12 = vld [vmem:[%s9737_s1 + $0x68] sm:$0xff]  }
 0x129   : > { %v8360_v44 = vpop.f32.mrf.mxu1  ;;  %6737 = vmatprep.mubr.bf16.mxu0 %v7407_v13  ;;  %v8374_v17 = vpop.f32.mrf.mxu0  ;;  %v7213_v13 = vld [vmem:[%s9737_s1 + $0xf0] sm:$0xff]  }
 0x12a   : > { %9945 = vst [vmem:[#allocation64_spill] sm:$0xff] %v8360_v44  ;;  %9949 = vst [vmem:[#allocation68_spill] sm:$0xff] %v8374_v17 }
 0x12b   : > { %v8365_v47 = vpop.f32.mrf.mxu1 }
 0x12c   : > { %9947 = vst [vmem:[#allocation66_spill] sm:$0xff] %v8365_v47  ;;  %v8378_v47 = vpop.f32.mrf.mxu0 }
 0x12d   : > { %v6499_v48 = vpop.f32.mrf.mxu1  ;;  %6786 = vmatmul.mubr.bf16.vlgmr.msra.gmra.mxu1 %v7405_v11  ;;  %9950 = vst [vmem:[#allocation69_spill] sm:$0xff] %v8378_v47  ;;  %v1107_v11 = vadd.f32 %v8165_v42, %v8163_v56  ;;  %v8399_v56 = vld [vmem:[%s9738_s2] ss:$0 sm:$0xff] }
 0x12e   : > { %6866 = vmatpush3.bf16.msra.mxu1 %v8275_v21  ;;  %6789 = vmatprep.mubr.bf16.mxu1 %v7413_v26  ;;  %v6451_v21 = vpop.f32.mrf.mxu0  ;;  %v1099_v26 = vadd.f32 %v8171_v38, %v8168_v10 }
 0x12f   : > { %v1616_v44 = vpop.f32.mrf.mxu1  ;;  %6867 = vmatprep.subr.bf16.mxu1 %v7214_v53  ;;  %v1459_v47 = vadd.f32 %v6451_v21, %v1107_v11  ;;  %v7215_v11 = vld [vmem:[%s9737_s1 + $0xe8] sm:$0xff]   ;;  %v1102_v21 = vadd.f32 %v8186_v54, %v8184_v20 }
 0x130   : > { %6738 = vmatmul.mubr.bf16.vlgmr.msra.gmra.mxu0 %v7429_v40  ;;  %v1330_v42 = vpop.f32.mrf.mxu0 }
 0x131   : > { %v6500_v17 = vpop.f32.mrf.mxu1  ;;  %6818 = vmatpush3.bf16.msra.mxu0 %v8290_v39  ;;  %6741 = vmatprep.mubr.bf16.mxu0 %v7456_v3  ;;  %v1745_v10 = vadd.f32 %v6499_v48, %v1459_v47  ;;  %v1457_v38 = vadd.f32 %v1330_v42, %v1099_v26  ;;  %v1123_v26 = vadd.f32 %v8197_v36, %v8192_v41 }
 0x132   : > { %6868 = vmatpush3.bf16.msra.mxu1 %v7214_v53  ;;  %6819 = vmatprep.subr.bf16.mxu0 %v7213_v13  ;;  %v1110_v53 = vadd.f32 %v8181_v45, %v8173_v6  ;;  %v6452_v3 = vpop.f32.mrf.mxu0  ;;  %v1115_v41 = vadd.f32 %v8203_v50, %v8200_v55 }
 0x133   : > { %v1619_v2 = vpop.f32.mrf.mxu1  ;;  %6869 = vmatprep.subr.bf16.mxu1 %v7216_v12  ;;  %v1784_v40 = vadd.f32 %v8399_v56, %v1745_v10  ;;  %v1743_v60 = vadd.f32 %v1616_v44, %v1457_v38 }
 0x134   : > { %v1460_v63 = vadd.f32 %v6452_v3, %v1110_v53  ;;  %v1333_v47 = vpop.f32.mrf.mxu0 }
 0x135   : > { %v6503_v39 = vpop.f32.mrf.mxu1  ;;  %6790 = vmatmul.mubr.bf16.gmra.mxu1 %v7436_v52  ;;  %6820 = vmatpush3.bf16.msra.mxu0 %v7213_v13  ;;  %v7220_v13 = vld [vmem:[%s9737_s1 + $0x58] sm:$0xff]   ;;  %v1816_v3 = vmax.f32 %v1784_v40, 0.0  ;;  %v1782_v6 = vadd.f32 %v8399_v56, %v1743_v60  ;;  %v1458_v20 = vadd.f32 %v1333_v47, %v1102_v21 }
 0x136   : > { %6793 = vmatprep.mubr.bf16.mxu1 %v7469_v14  ;;  %6870 = vmatpush3.bf16.msra.mxu1 %v7216_v12  ;;  %v7217_v12 = vld [vmem:[%s9737_s1 + $0xe0] sm:$0xff]   ;;  %v1746_v45 = vadd.f32 %v6500_v17, %v1460_v63  ;;  %v6455_v36 = vpop.f32.mrf.mxu0  ;;  %v7222_v63 = vld [vmem:[%s9737_s1 + $0x50] sm:$0xff]   ;;  %v1126_v17 = vadd.f32 %v8213_v24, %v8205_v49  ;;  %v7219_v60 = vld [vmem:[%s9737_s1 + $0xd8] sm:$0xff]   ;;  %v1118_v49 = vadd.f32 %v8218_v43, %v8216_v61 }
 0x137   : > { %v1632_v18 = vpop.f32.mrf.mxu1  ;;  %6871 = vmatprep.subr.bf16.mxu1 %v7218_v19  ;;  %6821 = vmatprep.subr.bf16.mxu0 %v7215_v11  ;;  %1849 = vst.msk [vmem:[%s8415_s27 + $0x10] sm:$0xff] %vm1846_vm6, %v1816_v3  ;;  %v1814_v44 = vmax.f32 %v1782_v6, 0.0  ;;  %v1744_v42 = vadd.f32 %v1619_v2, %v1458_v20  ;;  %v1463_v40 = vadd.f32 %v6455_v36, %v1123_v26  ;;  %v7221_v43 = vld [vmem:[%s9737_s1 + $0xd0] sm:$0xff]  }
 0x138   : > { %6742 = vmatmul.mubr.bf16.gmra.mxu0 %v7494_v32  ;;  %v1785_v48 = vadd.f32 %v8399_v56, %v1746_v45  ;;  %v1139_v3 = vadd.f32 %v8227_v15, %v8230_v46  ;;  %v1131_v15 = vadd.f32 %v8233_v34, %v8235_v29  ;;  %v7226_v29 = vld [vmem:[%s9737_s1 + $0x40] sm:$0xff]   ;;  %v1142_v34 = vadd.f32 %v8243_v7, %v8246_v51  ;;  %v9952_v7 = vld [vmem:[#allocation41_spill] sm:$0xff] }
 0x139   : > { %v6504_v54 = vpop.f32.mrf.mxu1  ;;  %6745 = vmatprep.mubr.bf16.mxu0 %v7528_v4  ;;  %6822 = vmatpush3.bf16.msra.mxu0 %v7215_v11  ;;  %1847 = vst.msk [vmem:[%s8415_s27] sm:$0xff] %vm1846_vm6, %v1814_v44  ;;  %v1783_v55 = vadd.f32 %v8399_v56, %v1744_v42  ;;  %v1749_v50 = vadd.f32 %v6503_v39, %v1463_v40  ;;  %v7223_v40 = vld [vmem:[%s9737_s1 + $0xc8] sm:$0xff]  }
 0x13a   : > { %6872 = vmatpush3.bf16.msra.mxu1 %v7218_v19  ;;  %v1346_v19 = vpop.f32.mrf.mxu0  ;;  %6823 = vmatprep.subr.bf16.mxu0 %v7217_v12  ;;  %v1817_v2 = vmax.f32 %v1785_v48, 0.0  ;;  %v1134_v51 = vadd.f32 %v9952_v7, %v8254_v58 }
 0x13b   : > { %v1635_v53 = vpop.f32.mrf.mxu1  ;;  %6873 = vmatprep.subr.bf16.mxu1 %v7220_v13  ;;  %v1461_v11 = vadd.f32 %v1346_v19, %v1115_v41  ;;  %v1815_v38 = vmax.f32 %v1783_v55, 0.0  ;;  %v1788_v21 = vadd.f32 %v8399_v56, %v1749_v50  ;;  %v9953_v50 = vld [vmem:[#allocation12_spill] sm:$0xff] }
 0x13c   : > { %v6456_v24 = vpop.f32.mrf.mxu0  ;;  %1850 = vst.msk [vmem:[%s8415_s27 + $0x18] sm:$0xff] %vm1846_vm6, %v1817_v2  ;;  %v9951_v2 = vld [vmem:[#allocation11_spill] sm:$0xff] }
 0x13d   : > { %v6507_v10 = vpop.f32.mrf.mxu1  ;;  %6794 = vmatmul.mubr.bf16.gmra.mxu1 %v9891_v22  ;;  %v1747_v26 = vadd.f32 %v1632_v18, %v1461_v11  ;;  %v1464_v47 = vadd.f32 %v6456_v24, %v1126_v17  ;;  %6824 = vmatpush3.bf16.msra.mxu0 %v7217_v12  ;;  %1848 = vst.msk [vmem:[%s8415_s27 + $0x8] sm:$0xff] %vm1846_vm6, %v1815_v38  ;;  %v1820_v18 = vmax.f32 %v1788_v21, 0.0  ;;  %v9954_v21 = vld [vmem:[#allocation42_spill] sm:$0xff] }
 0x13e   : > { %6797 = vmatprep.mubr.bf16.mxu1 %v9892_v31  ;;  %6874 = vmatpush3.bf16.msra.mxu1 %v7220_v13  ;;  %v1349_v61 = vpop.f32.mrf.mxu0  ;;  %v7224_v13 = vld [vmem:[%s9737_s1 + $0x48] sm:$0xff]  }
 0x13f   : > { %v1648_v39 = vpop.f32.mrf.mxu1  ;;  %6875 = vmatprep.subr.bf16.mxu1 %v7222_v63  ;;  %6825 = vmatprep.subr.bf16.mxu0 %v7219_v60  ;;  %v1786_v12 = vadd.f32 %v8399_v56, %v1747_v26  ;;  %v1750_v6 = vadd.f32 %v6504_v54, %v1464_v47  ;;  %v1462_v45 = vadd.f32 %v1349_v61, %v1118_v49  ;;  %v7225_v47 = vld [vmem:[%s9737_s1 + $0xc0] sm:$0xff]  }
 0x140   : > { %v6459_v46 = vpop.f32.mrf.mxu0  ;;  %6746 = vmatmul.mubr.bf16.gmra.mxu0 %v7556_v27  ;;  %1853 = vst.msk [vmem:[%s8415_s27 + $0x30] sm:$0xff] %vm1846_vm6, %v1820_v18  ;;  %v1155_v26 = vadd.f32 %v9954_v21, %v8262_v25  ;;  %v9955_v25 = vld [vmem:[#allocation43_spill] sm:$0xff]  ;;  %v1171_v21 = vadd.f32 %v8293_v28, %v8299_v0 }
 0x141   : > { %v6508_v20 = vpop.f32.mrf.mxu1  ;;  %v1818_v41 = vmax.f32 %v1786_v12, 0.0  ;;  %v1789_v36 = vadd.f32 %v8399_v56, %v1750_v6  ;;  %v1748_v44 = vadd.f32 %v1635_v53, %v1462_v45  ;;  %v1467_v48 = vadd.f32 %v6459_v46, %v1139_v3  ;;  %6749 = vmatprep.mubr.bf16.mxu0 %v7588_v5  ;;  %6826 = vmatpush3.bf16.msra.mxu0 %v7219_v60  ;;  %v8495_v3 = vld [vmem:[%s9737_s1 + $0x2b8] sm:$0xff]  }
 0x142   : > { %6876 = vmatpush3.bf16.msra.mxu1 %v7222_v63  ;;  %v1362_v54 = vpop.f32.mrf.mxu0  ;;  %6827 = vmatprep.subr.bf16.mxu0 %v7221_v43  ;;  %v1147_v12 = vadd.f32 %v9955_v25, %v8267_v16 }
 0x143   : > { %v1651_v42 = vpop.f32.mrf.mxu1  ;;  %6877 = vmatprep.subr.bf16.mxu1 %v7224_v13  ;;  %1851 = vst.msk [vmem:[%s8415_s27 + $0x20] sm:$0xff] %vm1846_vm6, %v1818_v41  ;;  %v1821_v53 = vmax.f32 %v1789_v36, 0.0  ;;  %v1787_v63 = vadd.f32 %v8399_v56, %v1748_v44  ;;  %v1753_v17 = vadd.f32 %v6507_v10, %v1467_v48  ;;  %v1465_v19 = vadd.f32 %v1362_v54, %v1131_v15  ;;  %v9957_v44 = vld [vmem:[#allocation44_spill] sm:$0xff] }
 0x144   : > { %v6460_v55 = vpop.f32.mrf.mxu0 }
 0x145   : > { %v6511_v60 = vpop.f32.mrf.mxu1  ;;  %6798 = vmatmul.mubr.bf16.gmra.mxu1 %v9951_v2  ;;  %1854 = vst.msk [vmem:[%s8415_s27 + $0x38] sm:$0xff] %vm1846_vm6, %v1821_v53  ;;  %v1819_v11 = vmax.f32 %v1787_v63, 0.0  ;;  %v1792_v49 = vadd.f32 %v8399_v56, %v1753_v17  ;;  %v1751_v24 = vadd.f32 %v1648_v39, %v1465_v19  ;;  %v1468_v38 = vadd.f32 %v6460_v55, %v1142_v34  ;;  %v9958_v63 = vld [vmem:[#allocation14_spill] sm:$0xff]  ;;  %v9959_v17 = vld [vmem:[#allocation47_spill] sm:$0xff] }
 0x146   : > { %6801 = vmatprep.mubr.bf16.mxu1 %v9953_v50  ;;  %6878 = vmatpush3.bf16.msra.mxu1 %v7224_v13  ;;  %v1365_v58 = vpop.f32.mrf.mxu0  ;;  %v9960_v19 = vld [vmem:[#allocation46_spill] sm:$0xff] }
 0x147   : > { %v1664_v10 = vpop.f32.mrf.mxu1  ;;  %6828 = vmatpush3.bf16.msra.mxu0 %v7221_v43  ;;  %6879 = vmatprep.subr.bf16.mxu1 %v7226_v29  ;;  %1852 = vst.msk [vmem:[%s8415_s27 + $0x28] sm:$0xff] %vm1846_vm6, %v1819_v11  ;;  %v1824_v39 = vmax.f32 %v1792_v49, 0.0  ;;  %v1790_v61 = vadd.f32 %v8399_v56, %v1751_v24  ;;  %v1754_v43 = vadd.f32 %v6508_v20, %v1468_v38  ;;  %v9956_v20 = vld [vmem:[#allocation45_spill] sm:$0xff]  ;;  %v9961_v55 = vld [vmem:[#allocation18_spill] sm:$0xff] }
 0x148   : > { %6829 = vmatprep.subr.bf16.mxu0 %v7223_v40  ;;  %v1466_v13 = vadd.f32 %v1365_v58, %v1134_v51  ;;  %v6463_v6 = vpop.f32.mrf.mxu0  ;;  %6750 = vmatmul.mubr.bf16.gmra.mxu0 %v9895_v33  ;;  %v1158_v16 = vadd.f32 %v9957_v44, %v9956_v20  ;;  %v1150_v7 = vadd.f32 %v9960_v19, %v9959_v17  ;;  %v9968_v17 = vld [vmem:[#allocation26_spill] sm:$0xff] }
 0x149   : > { %v6512_v18 = vpop.f32.mrf.mxu1  ;;  %1857 = vst.msk [vmem:[%s8415_s27 + $0x50] sm:$0xff] %vm1846_vm6, %v1824_v39  ;;  %v1822_v45 = vmax.f32 %v1790_v61, 0.0  ;;  %v1793_v15 = vadd.f32 %v8399_v56, %v1754_v43  ;;  %v1471_v41 = vadd.f32 %v6463_v6, %v1155_v26  ;;  %6753 = vmatprep.mubr.bf16.mxu0 %v9897_v23 }
 0x14a   : > { %6880 = vmatpush3.bf16.msra.mxu1 %v7226_v29  ;;  %v1752_v46 = vadd.f32 %v1651_v42, %v1466_v13  ;;  %v1378_v48 = vpop.f32.mrf.mxu0  ;;  %v8512_v29 = vld [vmem:[%s9737_s1 + $0x238] sm:$0xff]  }
 0x14b   : > { %v1667_v36 = vpop.f32.mrf.mxu1  ;;  %6830 = vmatpush3.bf16.msra.mxu0 %v7223_v40  ;;  %6961 = vmatprep.subr.bf16.mxu1 %v8495_v3  ;;  %1855 = vst.msk [vmem:[%s8415_s27 + $0x40] sm:$0xff] %vm1846_vm6, %v1822_v45  ;;  %v1825_v42 = vmax.f32 %v1793_v15, 0.0  ;;  %v1757_v54 = vadd.f32 %v6511_v60, %v1471_v41  ;;  %v1469_v40 = vadd.f32 %v1378_v48, %v1147_v12 }
 0x14c   : > { %6831 = vmatprep.subr.bf16.mxu0 %v7225_v47  ;;  %v1791_v34 = vadd.f32 %v8399_v56, %v1752_v46  ;;  %v6464_v51 = vpop.f32.mrf.mxu0  ;;  %v9964_v46 = vld [vmem:[#allocation25_spill] sm:$0xff] }
 0x14d   : > { %v6515_v53 = vpop.f32.mrf.mxu1  ;;  %6802 = vmatmul.mubr.bf16.gmra.mxu1 %v9958_v63  ;;  %1858 = vst.msk [vmem:[%s8415_s27 + $0x58] sm:$0xff] %vm1846_vm6, %v1825_v42  ;;  %v1796_v49 = vadd.f32 %v8399_v56, %v1757_v54  ;;  %v1755_v24 = vadd.f32 %v1664_v10, %v1469_v40  ;;  %v1472_v38 = vadd.f32 %v6464_v51, %v1158_v16  ;;  %v9962_v10 = vld [vmem:[#allocation48_spill] sm:$0xff] }
 0x14e   : > { %6805 = vmatprep.mubr.bf16.mxu1 %v9961_v55  ;;  %v1823_v11 = vmax.f32 %v1791_v34, 0.0  ;;  %v1381_v26 = vpop.f32.mrf.mxu0  ;;  %v1163_v25 = vadd.f32 %v9962_v10, %v8305_v9  ;;  %v9966_v34 = vld [vmem:[#allocation24_spill] sm:$0xff] }
 0x14f   : > { %v1680_v60 = vpop.f32.mrf.mxu1  ;;  %6832 = vmatpush3.bf16.msra.mxu0 %v7225_v47  ;;  %v1828_v58 = vmax.f32 %v1796_v49, 0.0  ;;  %v1794_v39 = vadd.f32 %v8399_v56, %v1755_v24  ;;  %v1758_v61 = vadd.f32 %v6512_v18, %v1472_v38  ;;  %v1470_v43 = vadd.f32 %v1381_v26, %v1150_v7  ;;  %v9963_v47 = vld [vmem:[#allocation22_spill] sm:$0xff]  ;;  %v9965_v18 = vld [vmem:[#allocation49_spill] sm:$0xff] }
 0x150   : > { %6913 = vmatprep.subr.bf16.mxu0 %v8512_v29  ;;  %1856 = vst.msk [vmem:[%s8415_s27 + $0x48] sm:$0xff] %vm1846_vm6, %v1823_v11  ;;  %v6467_v12 = vpop.f32.mrf.mxu0  ;;  %6754 = vmatmul.mubr.bf16.gmra.mxu0 %v9963_v47  ;;  %v1174_v41 = vadd.f32 %v9965_v18, %v8310_v57 }
 0x151   : > { %v6516_v13 = vpop.f32.mrf.mxu1  ;;  %1861 = vst.msk [vmem:[%s8415_s27 + $0x70] sm:$0xff] %vm1846_vm6, %v1828_v58  ;;  %v1826_v28 = vmax.f32 %v1794_v39, 0.0  ;;  %v1797_v0 = vadd.f32 %v8399_v56, %v1758_v61  ;;  %v1756_v6 = vadd.f32 %v1667_v36, %v1470_v43  ;;  %v1475_v45 = vadd.f32 %v6467_v12, %v1171_v21  ;;  %6757 = vmatprep.mubr.bf16.mxu0 %v9964_v46  ;;  %v9967_v36 = vld [vmem:[#allocation50_spill] sm:$0xff]  ;;  %v9970_v39 = vld [vmem:[#allocation52_spill] sm:$0xff] }
 0x152   : > { %v1394_v20 = vpop.f32.mrf.mxu0  ;;  %v1166_v54 = vadd.f32 %v9967_v36, %v8315_v8  ;;  %v1179_v61 = vadd.f32 %v9970_v39, %v8325_v62  ;;  %v9976_v36 = vld [vmem:[#allocation30_spill] sm:$0xff] }
 0x153   : > { %v1683_v15 = vpop.f32.mrf.mxu1  ;;  %1859 = vst.msk [vmem:[%s8415_s27 + $0x60] sm:$0xff] %vm1846_vm6, %v1826_v28  ;;  %v1829_v9 = vmax.f32 %v1797_v0, 0.0  ;;  %v1795_v44 = vadd.f32 %v8399_v56, %v1756_v6  ;;  %v1761_v16 = vadd.f32 %v6515_v53, %v1475_v45  ;;  %v1473_v48 = vadd.f32 %v1394_v20, %v1163_v25  ;;  %v9969_v53 = vld [vmem:[#allocation51_spill] sm:$0xff]  ;;  %v9973_v0 = vld [vmem:[#allocation53_spill] sm:$0xff] }
 0x154   : > { %v6468_v40 = vpop.f32.mrf.mxu0  ;;  %v1187_v49 = vadd.f32 %v9969_v53, %v8320_v59 }
 0x155   : > { %v6519_v42 = vpop.f32.mrf.mxu1  ;;  %6806 = vmatmul.mubr.bf16.gmra.mxu1 %v9966_v34  ;;  %1862 = vst.msk [vmem:[%s8415_s27 + $0x78] sm:$0xff] %vm1846_vm6, %v1829_v9  ;;  %v1827_v57 = vmax.f32 %v1795_v44, 0.0  ;;  %v1800_v19 = vadd.f32 %v8399_v56, %v1761_v16  ;;  %v1759_v7 = vadd.f32 %v1680_v60, %v1473_v48  ;;  %v1476_v51 = vadd.f32 %v6468_v40, %v1174_v41  ;;  %v9971_v60 = vld [vmem:[#allocation27_spill] sm:$0xff]  ;;  %v9974_v44 = vld [vmem:[#allocation28_spill] sm:$0xff] }
 0x156   : > { %6809 = vmatprep.mubr.bf16.mxu1 %v9968_v17  ;;  %v1397_v24 = vpop.f32.mrf.mxu0 }
 0x157   : > { %v1696_v11 = vpop.f32.mrf.mxu1  ;;  %1860 = vst.msk [vmem:[%s8415_s27 + $0x68] sm:$0xff] %vm1846_vm6, %v1827_v57  ;;  %v1832_v38 = vmax.f32 %v1800_v19, 0.0  ;;  %v1798_v8 = vadd.f32 %v8399_v56, %v1759_v7  ;;  %v1762_v21 = vadd.f32 %v6516_v13, %v1476_v51  ;;  %v1474_v26 = vadd.f32 %v1397_v24, %v1166_v54  ;;  %v9972_v13 = vld [vmem:[#allocation55_spill] sm:$0xff] }
 0x158   : > { %v6471_v43 = vpop.f32.mrf.mxu0  ;;  %6758 = vmatmul.mubr.bf16.gmra.mxu0 %v9971_v60  ;;  %v1190_v6 = vadd.f32 %v9973_v0, %v9972_v13 }
 0x159   : > { %v6520_v58 = vpop.f32.mrf.mxu1  ;;  %1865 = vst.msk [vmem:[%s8415_s27 + $0x90] sm:$0xff] %vm1846_vm6, %v1832_v38  ;;  %v1830_v10 = vmax.f32 %v1798_v8, 0.0  ;;  %v1801_v59 = vadd.f32 %v8399_v56, %v1762_v21  ;;  %v1760_v25 = vadd.f32 %v1683_v15, %v1474_v26  ;;  %v1479_v12 = vadd.f32 %v6471_v43, %v1187_v49  ;;  %6761 = vmatprep.mubr.bf16.mxu0 %v7759_v1  ;;  %v9975_v15 = vld [vmem:[#allocation54_spill] sm:$0xff]  ;;  %v9978_v21 = vld [vmem:[#allocation57_spill] sm:$0xff] }
 0x15a   : > { %v1410_v45 = vpop.f32.mrf.mxu0  ;;  %v1182_v16 = vadd.f32 %v9975_v15, %v8335_v35  ;;  %v1195_v26 = vadd.f32 %v9978_v21, %v8348_v37 }
 0x15b   : > { %v1699_v28 = vpop.f32.mrf.mxu1  ;;  %1863 = vst.msk [vmem:[%s8415_s27 + $0x80] sm:$0xff] %vm1846_vm6, %v1830_v10  ;;  %v1833_v62 = vmax.f32 %v1801_v59, 0.0  ;;  %v1799_v18 = vadd.f32 %v8399_v56, %v1760_v25  ;;  %v1765_v41 = vadd.f32 %v6519_v42, %v1479_v12  ;;  %v1477_v20 = vadd.f32 %v1410_v45, %v1179_v61  ;;  %v9977_v42 = vld [vmem:[#allocation56_spill] sm:$0xff]  ;;  %v9982_v12 = vld [vmem:[#allocation58_spill] sm:$0xff] }
 0x15c   : > { %v6472_v48 = vpop.f32.mrf.mxu0  ;;  %v1203_v51 = vadd.f32 %v9977_v42, %v8342_v30  ;;  %v9980_v25 = vld [vmem:[#allocation32_spill] sm:$0xff] }
 0x15d   : > { %v6523_v9 = vpop.f32.mrf.mxu1  ;;  %6810 = vmatmul.mubr.bf16.gmra.mxu1 %v9974_v44  ;;  %1866 = vst.msk [vmem:[%s8415_s27 + $0x98] sm:$0xff] %vm1846_vm6, %v1833_v62  ;;  %v1831_v54 = vmax.f32 %v1799_v18, 0.0  ;;  %v1804_v40 = vadd.f32 %v8399_v56, %v1765_v41  ;;  %v1763_v57 = vadd.f32 %v1696_v11, %v1477_v20  ;;  %v1480_v19 = vadd.f32 %v6472_v48, %v1190_v6  ;;  %v9979_v11 = vld [vmem:[#allocation31_spill] sm:$0xff]  ;;  %v9983_v41 = vld [vmem:[#allocation10_spill] sm:$0xff] }
 0x15e   : > { %6813 = vmatprep.mubr.bf16.mxu1 %v9976_v36  ;;  %v1413_v53 = vpop.f32.mrf.mxu0  ;;  %v9985_v20 = vld [vmem:[#allocation59_spill] sm:$0xff] }
 0x15f   : > { %v1712_v7 = vpop.f32.mrf.mxu1  ;;  %1864 = vst.msk [vmem:[%s8415_s27 + $0x88] sm:$0xff] %vm1846_vm6, %v1831_v54  ;;  %v1836_v49 = vmax.f32 %v1804_v40, 0.0  ;;  %v1802_v35 = vadd.f32 %v8399_v56, %v1763_v57  ;;  %v1766_v24 = vadd.f32 %v6520_v58, %v1480_v19  ;;  %v1478_v38 = vadd.f32 %v1413_v53, %v1182_v16  ;;  %v9981_v58 = vld [vmem:[#allocation61_spill] sm:$0xff]  ;;  %v9986_v48 = vld [vmem:[#allocation7_spill] sm:$0xff] }
 0x160   : > { %v6475_v39 = vpop.f32.mrf.mxu0  ;;  %6762 = vmatmul.mubr.bf16.gmra.mxu0 %v9979_v11  ;;  %v1206_v13 = vadd.f32 %v9982_v12, %v9981_v58 }
 0x161   : > { %v6524_v8 = vpop.f32.mrf.mxu1  ;;  %1869 = vst.msk [vmem:[%s8415_s27 + $0xb0] sm:$0xff] %vm1846_vm6, %v1836_v49  ;;  %v1834_v61 = vmax.f32 %v1802_v35, 0.0  ;;  %v1805_v30 = vadd.f32 %v8399_v56, %v1766_v24  ;;  %v1764_v43 = vadd.f32 %v1699_v28, %v1478_v38  ;;  %v1483_v10 = vadd.f32 %v6475_v39, %v1203_v51  ;;  %6765 = vmatprep.mubr.bf16.mxu0 %v9980_v25  ;;  %v9984_v28 = vld [vmem:[#allocation63_spill] sm:$0xff]  ;;  %v9988_v51 = vld [vmem:[#allocation60_spill] sm:$0xff] }
 0x162   : > { %v1426_v0 = vpop.f32.mrf.mxu0  ;;  %v1198_v15 = vadd.f32 %v9985_v20, %v9984_v28  ;;  %v9989_v39 = vld [vmem:[#allocation67_spill] sm:$0xff] }
 0x163   : > { %v1715_v59 = vpop.f32.mrf.mxu1  ;;  %1867 = vst.msk [vmem:[%s8415_s27 + $0xa0] sm:$0xff] %vm1846_vm6, %v1834_v61  ;;  %v1837_v37 = vmax.f32 %v1805_v30, 0.0  ;;  %v1803_v6 = vadd.f32 %v8399_v56, %v1764_v43  ;;  %v1769_v45 = vadd.f32 %v6523_v9, %v1483_v10  ;;  %v1481_v62 = vadd.f32 %v1426_v0, %v1195_v26  ;;  %v9987_v9 = vld [vmem:[#allocation65_spill] sm:$0xff]  ;;  %v9990_v61 = vld [vmem:[#allocation62_spill] sm:$0xff] }
 0x164   : > { %v6476_v16 = vpop.f32.mrf.mxu0  ;;  %v1219_v53 = vadd.f32 %v9988_v51, %v9987_v9  ;;  %v1211_v30 = vadd.f32 %v9990_v61, %v9989_v39 }
 0x165   : > { %v6527_v18 = vpop.f32.mrf.mxu1  ;;  %6814 = vmatmul.mubr.bf16.gmra.mxu1 %v9983_v41  ;;  %1870 = vst.msk [vmem:[%s8415_s27 + $0xb8] sm:$0xff] %vm1846_vm6, %v1837_v37  ;;  %v1835_v54 = vmax.f32 %v1803_v6, 0.0  ;;  %v1808_v40 = vadd.f32 %v8399_v56, %v1769_v45  ;;  %v1767_v57 = vadd.f32 %v1712_v7, %v1481_v62  ;;  %v1484_v19 = vadd.f32 %v6476_v16, %v1206_v13  ;;  %v9991_v7 = vld [vmem:[#allocation9_spill] sm:$0xff]  ;;  %v9992_v37 = vld [vmem:[#allocation4_spill] sm:$0xff] }
 0x166   : > { %6881 = vmatprep.mubr.bf16.mxu1 %v9986_v48  ;;  %v1429_v49 = vpop.f32.mrf.mxu0  ;;  %v9993_v6 = vld [vmem:[#allocation68_spill] sm:$0xff] }
 0x167   : > { %v1728_v42 = vpop.f32.mrf.mxu1  ;;  %1868 = vst.msk [vmem:[%s8415_s27 + $0xa8] sm:$0xff] %vm1846_vm6, %v1835_v54  ;;  %v1840_v35 = vmax.f32 %v1808_v40, 0.0  ;;  %v1806_v24 = vadd.f32 %v8399_v56, %v1767_v57  ;;  %v1770_v38 = vadd.f32 %v6524_v8, %v1484_v19  ;;  %v1482_v21 = vadd.f32 %v1429_v49, %v1198_v15  ;;  %v7230_v8 = vld [vmem:[%s9737_s1 + $0x2b0] sm:$0xff]   ;;  %v9996_v57 = vld [vmem:[#allocation69_spill] sm:$0xff]  ;;  %v9997_v19 = vld [vmem:[#allocation66_spill] sm:$0xff] }
 0x168   : > { %v6479_v43 = vpop.f32.mrf.mxu0  ;;  %6766 = vmatmul.mubr.bf16.gmra.mxu0 %v9991_v7  ;;  %v9994_v45 = vld [vmem:[#allocation64_spill] sm:$0xff]  ;;  %v1214_v9 = vadd.f32 %v9997_v19, %v9996_v57 }
 0x169   : > { %v6528_v26 = vpop.f32.mrf.mxu1  ;;  %1873 = vst.msk [vmem:[%s8415_s27 + $0xd0] sm:$0xff] %vm1846_vm6, %v1840_v35  ;;  %v1838_v10 = vmax.f32 %v1806_v24, 0.0  ;;  %v1809_v58 = vadd.f32 %v8399_v56, %v1770_v38  ;;  %v1768_v12 = vadd.f32 %v1715_v59, %v1482_v21  ;;  %v1487_v13 = vadd.f32 %v6479_v43, %v1219_v53  ;;  %6833 = vmatprep.mubr.bf16.mxu0 %v9992_v37  ;;  %v9995_v40 = vld [vmem:[#allocation8_spill] sm:$0xff] }
 0x16a   : > { %v1222_v62 = vadd.f32 %v9994_v45, %v9993_v6  ;;  %v1442_v28 = vpop.f32.mrf.mxu0  ;;  %v7229_v21 = vld [vmem:[%s9737_s1 + $0x230] sm:$0xff]  }
 0x16b   : > { %v1731_v0 = vpop.f32.mrf.mxu1  ;;  %1871 = vst.msk [vmem:[%s8415_s27 + $0xc0] sm:$0xff] %vm1846_vm6, %v1838_v10  ;;  %v1841_v20 = vmax.f32 %v1809_v58, 0.0  ;;  %v1807_v15 = vadd.f32 %v8399_v56, %v1768_v12  ;;  %v1773_v16 = vadd.f32 %v6527_v18, %v1487_v13  ;;  %v1485_v59 = vadd.f32 %v1442_v28, %v1211_v30  ;;  %v9998_v58 = vld [vmem:[#allocation6_spill] sm:$0xff] }
 0x16c   : > { %v6480_v51 = vpop.f32.mrf.mxu0 }
 0x16d   : > { %v8618_v54 = vpop.f32.mrf.mxu1  ;;  %6882 = vmatmul.mubr.bf16.vlgmr.msra.gmra.mxu1 %v9995_v40  ;;  %1874 = vst.msk [vmem:[%s8415_s27 + $0xd8] sm:$0xff] %vm1846_vm6, %v1841_v20  ;;  %v1839_v53 = vmax.f32 %v1807_v15, 0.0  ;;  %v1812_v49 = vadd.f32 %v8399_v56, %v1773_v16  ;;  %v1771_v18 = vadd.f32 %v1728_v42, %v1485_v59  ;;  %v1488_v35 = vadd.f32 %v6480_v51, %v1222_v62  ;;  %v7236_v16 = vld [vmem:[%s9737_s1 + $0x298] sm:$0xff]  }
 0x16e   : > { %6962 = vmatpush3.bf16.msra.mxu1 %v8495_v3  ;;  %6885 = vmatprep.mubr.bf16.mxu1 %v7494_v32  ;;  %v1445_v38 = vpop.f32.mrf.mxu0  ;;  %v7232_v3 = vld [vmem:[%s9737_s1 + $0x2a8] sm:$0xff]  }
 0x16f   : > { %v8628_v24 = vpop.f32.mrf.mxu1  ;;  %6963 = vmatprep.subr.bf16.mxu1 %v7230_v8  ;;  %1872 = vst.msk [vmem:[%s8415_s27 + $0xc8] sm:$0xff] %vm1846_vm6, %v1839_v53  ;;  %v1844_v39 = vmax.f32 %v1812_v49, 0.0  ;;  %v1810_v61 = vadd.f32 %v8399_v56, %v1771_v18  ;;  %v1774_v42 = vadd.f32 %v6528_v26, %v1488_v35  ;;  %v1486_v30 = vadd.f32 %v1445_v38, %v1214_v9  ;;  %v7234_v26 = vld [vmem:[%s9737_s1 + $0x2a0] sm:$0xff]   ;;  %v7238_v9 = vld [vmem:[%s9737_s1 + $0x290] sm:$0xff]   ;;  %v7235_v53 = vld [vmem:[%s9737_s1 + $0x218] sm:$0xff]  }
 0x170   : > { %v8641_v10 = vpop.f32.mrf.mxu0  ;;  %6834 = vmatmul.mubr.bf16.vlgmr.msra.gmra.mxu0 %v9998_v58  ;;  %v7237_v35 = vld [vmem:[%s9737_s1 + $0x210] sm:$0xff]   ;;  %v7240_v38 = vld [vmem:[%s9737_s1 + $0x288] sm:$0xff]  }
 0x171   : > { %v8639_v43 = vpop.f32.mrf.mxu1  ;;  %1877 = vst.msk [vmem:[%s8415_s27 + $0xf0] sm:$0xff] %vm1846_vm6, %v1844_v39  ;;  %v1842_v12 = vmax.f32 %v1810_v61, 0.0  ;;  %v1813_v13 = vadd.f32 %v8399_v56, %v1774_v42  ;;  %v1772_v37 = vadd.f32 %v1731_v0, %v1486_v30  ;;  %6914 = vmatpush3.bf16.msra.mxu0 %v8512_v29  ;;  %6837 = vmatprep.mubr.bf16.mxu0 %v7436_v52  ;;  %v7243_v61 = vld [vmem:[%s9737_s1 + $0x280] sm:$0xff]   ;;  %v7239_v30 = vld [vmem:[%s9737_s1 + $0x208] sm:$0xff]  }
 0x172   : > { %6964 = vmatpush3.bf16.msra.mxu1 %v7230_v8  ;;  %v8654_v45 = vpop.f32.mrf.mxu0  ;;  %6915 = vmatprep.subr.bf16.mxu0 %v7229_v21  ;;  %v7231_v8 = vld [vmem:[%s9737_s1 + $0x228] sm:$0xff]  }
 0x173   : > { %v8648_v6 = vpop.f32.mrf.mxu1  ;;  %6965 = vmatprep.subr.bf16.mxu1 %v7232_v3  ;;  %1875 = vst.msk [vmem:[%s8415_s27 + $0xe0] sm:$0xff] %vm1846_vm6, %v1842_v12  ;;  %v1845_v29 = vmax.f32 %v1813_v13, 0.0  ;;  %v1811_v0 = vadd.f32 %v8399_v56, %v1772_v37  ;;  %v7233_v56 = vld [vmem:[%s9737_s1 + $0x220] sm:$0xff]   ;;  %v8746_v37 = vld [vmem:[%s9737_s1 + $0x38] sm:$0xff]  }
 0x174   : > { %v8665_v52 = vpop.f32.mrf.mxu0  ;;  %v7242_v13 = vld [vmem:[%s9737_s1 + $0x200] sm:$0xff]  }
 0x175   : > { %v8662_v62 = vpop.f32.mrf.mxu1  ;;  %6886 = vmatmul.mubr.bf16.gmra.mxu1 %v7528_v4  ;;  %1878 = vst.msk [vmem:[%s8415_s27 + $0xf8] sm:$0xff] %vm1846_vm6, %v1845_v29  ;;  %v1843_v28 = vmax.f32 %v1811_v0, 0.0  ;;  %6916 = vmatpush3.bf16.msra.mxu0 %v7229_v21  ;;  %v8757_v0 = vld [vmem:[%s7348_s10 + $0xcc] sm:$0xf] }
 0x176   : > { %6889 = vmatprep.mubr.bf16.mxu1 %v7556_v27  ;;  %6966 = vmatpush3.bf16.msra.mxu1 %v7232_v3  ;;  %v8672_v15 = vpop.f32.mrf.mxu0  ;;  %10001 = vst [vmem:[#allocation12_spill] sm:$0xff] %v8757_v0 }
 0x177   : > { %v8670_v20 = vpop.f32.mrf.mxu1  ;;  %6967 = vmatprep.subr.bf16.mxu1 %v7234_v26  ;;  %6917 = vmatprep.subr.bf16.mxu0 %v7231_v8  ;;  %1876 = vst.msk [vmem:[%s8415_s27 + $0xe8] sm:$0xff] %vm1846_vm6, %v1843_v28  ;;  %v8760_v28 = vld [vmem:[%s7348_s10 + $0xd0] sm:$0xf] }
 0x178   : > { %v8684_v57 = vpop.f32.mrf.mxu0  ;;  %6838 = vmatmul.mubr.bf16.gmra.mxu0 %v7469_v14  ;;  %10002 = vst [vmem:[#allocation42_spill] sm:$0xff] %v8760_v28 }
 0x179   : > { %v8682_v59 = vpop.f32.mrf.mxu1  ;;  %6841 = vmatprep.mubr.bf16.mxu0 %v9891_v22  ;;  %6918 = vmatpush3.bf16.msra.mxu0 %v7231_v8 }
 0x17a   : > { %6968 = vmatpush3.bf16.msra.mxu1 %v7234_v26  ;;  %v8693_v51 = vpop.f32.mrf.mxu0  ;;  %6919 = vmatprep.subr.bf16.mxu0 %v7233_v56 }
 0x17b   : > { %v8687_v19 = vpop.f32.mrf.mxu1  ;;  %6969 = vmatprep.subr.bf16.mxu1 %v7236_v16 }
 0x17c   : > { %v8701_v14 = vpop.f32.mrf.mxu0 }
 0x17d   : > { %v8698_v49 = vpop.f32.mrf.mxu1  ;;  %6890 = vmatmul.mubr.bf16.gmra.mxu1 %v7588_v5  ;;  %6920 = vmatpush3.bf16.msra.mxu0 %v7233_v56 }
 0x17e   : > { %6893 = vmatprep.mubr.bf16.mxu1 %v9895_v33  ;;  %6970 = vmatpush3.bf16.msra.mxu1 %v7236_v16  ;;  %v8706_v18 = vpop.f32.mrf.mxu0  ;;  %v8767_v16 = vld [vmem:[%s9737_s1 + $0xb8] sm:$0xff]  }
 0x17f   : > { %v8704_v22 = vpop.f32.mrf.mxu1  ;;  %6971 = vmatprep.subr.bf16.mxu1 %v7238_v9  ;;  %6921 = vmatprep.subr.bf16.mxu0 %v7235_v53 }
 0x180   : > { %v8716_v3 = vpop.f32.mrf.mxu0  ;;  %6842 = vmatmul.mubr.bf16.gmra.mxu0 %v9892_v31 }
 0x181   : > { %v8714_v21 = vpop.f32.mrf.mxu1  ;;  %6845 = vmatprep.mubr.bf16.mxu0 %v9951_v2  ;;  %6922 = vmatpush3.bf16.msra.mxu0 %v7235_v53  ;;  %v3878_v53 = vshll.u32 %v8757_v0, 16 }
 0x182   : > { %6972 = vmatpush3.bf16.msra.mxu1 %v7238_v9  ;;  %v8725_v42 = vpop.f32.mrf.mxu0  ;;  %6923 = vmatprep.subr.bf16.mxu0 %v7237_v35  ;;  %v3875_v9 = vshrl.u32 %v8757_v0, 16 }
 0x183   : > { %v8719_v39 = vpop.f32.mrf.mxu1  ;;  %6973 = vmatprep.subr.bf16.mxu1 %v7240_v38 }
 0x184   : > { %v8733_v31 = vpop.f32.mrf.mxu0 }
 0x185   : > { %v8730_v58 = vpop.f32.mrf.mxu1  ;;  %6894 = vmatmul.mubr.bf16.gmra.mxu1 %v9897_v23  ;;  %6924 = vmatpush3.bf16.msra.mxu0 %v7237_v35  ;;  %v3888_v35 = vshrl.u32 %v8760_v28, 16 }
 0x186   : > { %6897 = vmatprep.mubr.bf16.mxu1 %v9963_v47  ;;  %6974 = vmatpush3.bf16.msra.mxu1 %v7240_v38  ;;  %v8738_v12 = vpop.f32.mrf.mxu0  ;;  %v3884_v38 = vshll.u32 %v8760_v28, 16 }
 0x187   : > { %v8736_v2 = vpop.f32.mrf.mxu1  ;;  %6975 = vmatprep.subr.bf16.mxu1 %v7243_v61  ;;  %6925 = vmatprep.subr.bf16.mxu0 %v7239_v30 }
 0x188   : > { %v8750_v8 = vpop.f32.mrf.mxu0  ;;  %6846 = vmatmul.mubr.bf16.gmra.mxu0 %v9953_v50  ;;  %v3886_v47 = vrot.slane %v3884_v38, 5 }
 0x189   : > { %v8748_v26 = vpop.f32.mrf.mxu1  ;;  %6849 = vmatprep.mubr.bf16.mxu0 %v9958_v63  ;;  %6926 = vmatpush3.bf16.msra.mxu0 %v7239_v30 }
 0x18a   : > { %9999 = vst [vmem:[#allocation11_spill] sm:$0xff] %v8748_v26  ;;  %6976 = vmatpush3.bf16.msra.mxu1 %v7243_v61  ;;  %v8762_v56 = vpop.f32.mrf.mxu0  ;;  %6927 = vmatprep.subr.bf16.mxu0 %v7242_v13  ;;  %v3890_v26 = vrot.slane %v3888_v35, 4 }
 0x18b   : > { %v8753_v29 = vpop.f32.mrf.mxu1  ;;  %7057 = vmatprep.subr.bf16.mxu1 %v8746_v37 }
 0x18c   : > { %10000 = vst [vmem:[#allocation41_spill] sm:$0xff] %v8753_v29  ;;  %v8773_v63 = vpop.f32.mrf.mxu0  ;;  %v3880_v29 = vrot.slane %v3878_v53, 5 }
 0x18d   : > { %v8770_v50 = vpop.f32.mrf.mxu1  ;;  %6898 = vmatmul.mubr.bf16.gmra.mxu1 %v9964_v46  ;;  %10004 = vst [vmem:[#allocation45_spill] sm:$0xff] %v8773_v63  ;;  %6928 = vmatpush3.bf16.msra.mxu0 %v7242_v13 }
 0x18e   : > { %10003 = vst [vmem:[#allocation43_spill] sm:$0xff] %v8770_v50  ;;  %6901 = vmatprep.mubr.bf16.mxu1 %v9971_v60  ;;  %v8782_v30 = vpop.f32.mrf.mxu0  ;;  %7009 = vmatprep.subr.bf16.mxu0 %v8767_v16  ;;  %v3877_v60 = vrot.slane %v3875_v9, 4  ;;  %v3891_v9 = vor.u32 %v3890_v26, %v3886_v47 }
 0x18f   : > { %v8780_v61 = vpop.f32.mrf.mxu1  ;;  %10006 = vst [vmem:[#allocation14_spill] sm:$0xff] %v8782_v30 }
 0x190   : > { %10005 = vst [vmem:[#allocation44_spill] sm:$0xff] %v8780_v61  ;;  %v8787_v46 = vpop.f32.mrf.mxu0  ;;  %6850 = vmatmul.mubr.bf16.gmra.mxu0 %v9961_v55  ;;  %v8794_v61 = vld [vmem:[%s7348_s10 + $0xd4] sm:$0x1]  ;;  %v3881_v55 = vor.u32 %v3880_v29, %v3877_v60 }
 0x191   : > { %v8785_v50 = vpop.f32.mrf.mxu1  ;;  %6853 = vmatprep.mubr.bf16.mxu0 %v9966_v34  ;;  %10009 = vst [vmem:[#allocation18_spill] sm:$0xff] %v8794_v61  ;;  %v3894_v53 = vshll.u32 %v8794_v61, 16 }
 0x192   : > { %10007 = vst [vmem:[#allocation47_spill] sm:$0xff] %v8785_v50  ;;  %v8796_v13 = vpop.f32.mrf.mxu0 }
 0x193   : > { %v8790_v63 = vpop.f32.mrf.mxu1  ;;  %10010 = vst [vmem:[#allocation48_spill] sm:$0xff] %v8796_v13  ;;  %v3896_v13 = vrot.slane %v3894_v53, 5 }
 0x194   : > { %10008 = vst [vmem:[#allocation46_spill] sm:$0xff] %v8790_v63  ;;  %v8801_v50 = vpop.f32.mrf.mxu0 }
 0x195   : > { %v8798_v30 = vpop.f32.mrf.mxu1  ;;  %6902 = vmatmul.mubr.bf16.gmra.mxu1 %v7759_v1  ;;  %10012 = vst [vmem:[#allocation24_spill] sm:$0xff] %v8801_v50  ;;  %v3892_v1 = vrot.slane %v3891_v9, 4 }
 0x196   : > { %10011 = vst [vmem:[#allocation49_spill] sm:$0xff] %v8798_v30  ;;  %6905 = vmatprep.mubr.bf16.mxu1 %v9979_v11  ;;  %v8807_v38 = vpop.f32.mrf.mxu0  ;;  %v3882_v30 = vrot.slane %v3881_v55, 4 }
 0x197   : > { %v8805_v35 = vpop.f32.mrf.mxu1  ;;  %v3897_v55 = vsel %vm7370_vm2, %v3892_v1, %v3896_v13  ;;  %v10021_v13 = vld [vmem:[#allocation5_spill] sm:$0xff] }
 0x198   : > { %v8811_v63 = vpop.f32.mrf.mxu0  ;;  %6854 = vmatmul.mubr.bf16.gmra.mxu0 %v9968_v17  ;;  %v3887_v17 = vsel %vm7370_vm2, %v3882_v30, %v3886_v47  ;;  %v5768_v30 = vcombine.low %v8757_v0, %v8760_v28 }
 0x199   : > { %v8809_v34 = vpop.f32.mrf.mxu1  ;;  %6857 = vmatprep.mubr.bf16.mxu0 %v9974_v44 }
 0x19a   : > { %v8817_v60 = vpop.f32.mrf.mxu0 }
 0x19b   : > { %v8814_v50 = vpop.f32.mrf.mxu1 }
 0x19c   : > { %10013 = vst [vmem:[#allocation50_spill] sm:$0xff] %v8814_v50  ;;  %v8822_v29 = vpop.f32.mrf.mxu0  ;;  %v8835_v50 = vcombine.low %v3887_v17, %v3897_v55 }
 0x19d   : > { %v8819_v26 = vpop.f32.mrf.mxu1  ;;  %6906 = vmatmul.mubr.bf16.gmra.mxu1 %v9980_v25 }
 0x19e   : > { %10014 = vst [vmem:[#allocation26_spill] sm:$0xff] %v8819_v26  ;;  %6909 = vmatprep.mubr.bf16.mxu1 %v9991_v7  ;;  %v8831_v53 = vpop.f32.mrf.mxu0  ;;  %10017 = vst [vmem:[#allocation52_spill] sm:$0xff] %v8835_v50 }
 0x19f   : > { %v8829_v9 = vpop.f32.mrf.mxu1 }
 0x1a0   : > { %v8837_v26 = vpop.f32.mrf.mxu0  ;;  %6858 = vmatmul.mubr.bf16.gmra.mxu0 %v9976_v36 }
 0x1a1   : > { %v8833_v44 = vpop.f32.mrf.mxu1  ;;  %6861 = vmatprep.mubr.bf16.mxu0 %v9983_v41 }
 0x1a2   : > { %10016 = vst [vmem:[#allocation51_spill] sm:$0xff] %v8833_v44  ;;  %v8843_v47 = vpop.f32.mrf.mxu0 }
 0x1a3   : > { %v8840_v25 = vpop.f32.mrf.mxu1 }
 0x1a4   : > { %10018 = vst [vmem:[#allocation55_spill] sm:$0xff] %v8840_v25  ;;  %v8848_v1 = vpop.f32.mrf.mxu0 }
 0x1a5   : > { %v8845_v61 = vpop.f32.mrf.mxu1  ;;  %6910 = vmatmul.mubr.bf16.gmra.mxu1 %v8835_v50  ;;  %10020 = vst [vmem:[#allocation28_spill] sm:$0xff] %v8848_v1  ;;  %v7247_v50 = vld [vmem:[%s9737_s1 + $0x30] sm:$0xff]  }
 0x1a6   : > { %10019 = vst [vmem:[#allocation53_spill] sm:$0xff] %v8845_v61  ;;  %6977 = vmatprep.mubr.bf16.mxu1 %v10021_v13  ;;  %v8855_v36 = vpop.f32.mrf.mxu0  ;;  %v10027_v61 = vld [vmem:[#allocation16_spill] sm:$0xff] }
 0x1a7   : > { %v8853_v17 = vpop.f32.mrf.mxu1  ;;  %10023 = vst [vmem:[#allocation30_spill] sm:$0xff] %v8855_v36  ;;  %v7251_v36 = vld [vmem:[%s9737_s1 + $0x20] sm:$0xff]  }
 0x1a8   : > { %10022 = vst [vmem:[#allocation54_spill] sm:$0xff] %v8853_v17  ;;  %v8859_v41 = vpop.f32.mrf.mxu0  ;;  %6862 = vmatmul.mubr.bf16.gmra.mxu0 %v5768_v30 }
 0x1a9   : > { %v8857_v55 = vpop.f32.mrf.mxu1  ;;  %10025 = vst [vmem:[#allocation57_spill] sm:$0xff] %v8859_v41  ;;  %6929 = vmatprep.mubr.bf16.mxu0 %v10027_v61  ;;  %v7246_v61 = vld [vmem:[%s9737_s1 + $0xb0] sm:$0xff]   ;;  %v10032_v41 = vld [vmem:[#allocation39_spill] sm:$0xff] }
 0x1aa   : > { %10024 = vst [vmem:[#allocation56_spill] sm:$0xff] %v8857_v55  ;;  %v8867_v0 = vpop.f32.mrf.mxu0  ;;  %v7249_v55 = vld [vmem:[%s9737_s1 + $0x28] sm:$0xff]  }
 0x1ab   : > { %v8861_v25 = vpop.f32.mrf.mxu1  ;;  %10028 = vst [vmem:[#allocation61_spill] sm:$0xff] %v8867_v0 }
 0x1ac   : > { %10026 = vst [vmem:[#allocation31_spill] sm:$0xff] %v8861_v25  ;;  %v8870_v28 = vpop.f32.mrf.mxu0 }
 0x1ad   : > { %v6691_v13 = vpop.f32.mrf.mxu1  ;;  %6978 = vmatmul.mubr.bf16.vlgmr.msra.gmra.mxu1 %v9986_v48  ;;  %10029 = vst [vmem:[#allocation58_spill] sm:$0xff] %v8870_v28  ;;  %v2408_v48 = vadd.f32 %v8618_v54, %v8641_v10  ;;  %v8895_v54 = vld [vmem:[%s9738_s2] ss:$0 sm:$0xff] }
 0x1ae   : > { %7058 = vmatpush3.bf16.msra.mxu1 %v8746_v37  ;;  %6981 = vmatprep.mubr.bf16.mxu1 %v9995_v40  ;;  %v8874_v25 = vpop.f32.mrf.mxu0  ;;  %v10031_v37 = vld [vmem:[#allocation3_spill] sm:$0xff]  ;;  %v2400_v40 = vadd.f32 %v8628_v24, %v8654_v45  ;;  %v2411_v24 = vadd.f32 %v8639_v43, %v8665_v52  ;;  %v7250_v43 = vld [vmem:[%s9737_s1 + $0xa0] sm:$0xff]  }
 0x1af   : > { %v2895_v30 = vpop.f32.mrf.mxu1  ;;  %7059 = vmatprep.subr.bf16.mxu1 %v7247_v50  ;;  %10030 = vst [vmem:[#allocation10_spill] sm:$0xff] %v8874_v25 }
 0x1b0   : > { %v6643_v17 = vpop.f32.mrf.mxu0  ;;  %6930 = vmatmul.mubr.bf16.vlgmr.msra.gmra.mxu0 %v10031_v37 }
 0x1b1   : > { %v6692_v28 = vpop.f32.mrf.mxu1  ;;  %v2754_v25 = vadd.f32 %v6643_v17, %v2408_v48  ;;  %7010 = vmatpush3.bf16.msra.mxu0 %v8767_v16  ;;  %6933 = vmatprep.mubr.bf16.mxu0 %v10032_v41  ;;  %v7248_v48 = vld [vmem:[%s9737_s1 + $0xa8] sm:$0xff]   ;;  %v2403_v17 = vadd.f32 %v8648_v6, %v8672_v15  ;;  %v7253_v6 = vld [vmem:[%s9737_s1 + $0x18] sm:$0xff]  }
 0x1b2   : > { %7060 = vmatpush3.bf16.msra.mxu1 %v7247_v50  ;;  %v2625_v10 = vpop.f32.mrf.mxu0  ;;  %7011 = vmatprep.subr.bf16.mxu0 %v7246_v61 }
 0x1b3   : > { %v2898_v0 = vpop.f32.mrf.mxu1  ;;  %7061 = vmatprep.subr.bf16.mxu1 %v7249_v55  ;;  %v3024_v45 = vadd.f32 %v6691_v13, %v2754_v25  ;;  %v2752_v16 = vadd.f32 %v2625_v10, %v2400_v40  ;;  %v2424_v25 = vadd.f32 %v8662_v62, %v8684_v57  ;;  %v10033_v57 = vld [vmem:[#allocation40_spill] sm:$0xff] }
 0x1b4   : > { %v6644_v41 = vpop.f32.mrf.mxu0 }
 0x1b5   : > { %v6695_v50 = vpop.f32.mrf.mxu1  ;;  %6982 = vmatmul.mubr.bf16.gmra.mxu1 %v7494_v32  ;;  %v3063_v37 = vadd.f32 %v8895_v54, %v3024_v45  ;;  %v3022_v7 = vadd.f32 %v2895_v30, %v2752_v16  ;;  %v2755_v44 = vadd.f32 %v6644_v41, %v2411_v24  ;;  %7012 = vmatpush3.bf16.msra.mxu0 %v7246_v61 }
 0x1b6   : > { %6985 = vmatprep.mubr.bf16.mxu1 %v7528_v4  ;;  %7062 = vmatpush3.bf16.msra.mxu1 %v7249_v55  ;;  %v2628_v40 = vpop.f32.mrf.mxu0  ;;  %v2416_v30 = vadd.f32 %v8670_v20, %v8693_v51  ;;  %v7255_v20 = vld [vmem:[%s9737_s1 + $0x10] sm:$0xff]   ;;  %v2427_v51 = vadd.f32 %v8682_v59, %v8701_v14  ;;  %v2419_v59 = vadd.f32 %v8687_v19, %v8706_v18 }
 0x1b7   : > { %v2911_v1 = vpop.f32.mrf.mxu1  ;;  %7063 = vmatprep.subr.bf16.mxu1 %v7251_v36  ;;  %7013 = vmatprep.subr.bf16.mxu0 %v7248_v48  ;;  %v3095_v52 = vmax.f32 %v3063_v37, 0.0  ;;  %v3061_v15 = vadd.f32 %v8895_v54, %v3022_v7  ;;  %v3025_v55 = vadd.f32 %v6692_v28, %v2755_v44  ;;  %v2753_v41 = vadd.f32 %v2628_v40, %v2403_v17  ;;  %v10034_v7 = vld [vmem:[#allocation34_spill] sm:$0xff]  ;;  %v7252_v44 = vld [vmem:[%s9737_s1 + $0x98] sm:$0xff]   ;;  %v7254_v18 = vld [vmem:[%s9737_s1 + $0x90] sm:$0xff]  }
 0x1b8   : > { %v6647_v62 = vpop.f32.mrf.mxu0  ;;  %6934 = vmatmul.mubr.bf16.gmra.mxu0 %v10033_v57 }
 0x1b9   : > { %v6696_v13 = vpop.f32.mrf.mxu1  ;;  %5674 = vst.msk [vmem:[%s8415_s27 + $0x110] sm:$0xff] %vm1846_vm6, %v3095_v52  ;;  %v3093_v61 = vmax.f32 %v3061_v15, 0.0  ;;  %v3064_v10 = vadd.f32 %v8895_v54, %v3025_v55  ;;  %v3023_v24 = vadd.f32 %v2898_v0, %v2753_v41  ;;  %v2758_v37 = vadd.f32 %v6647_v62, %v2424_v25  ;;  %6937 = vmatprep.mubr.bf16.mxu0 %v10034_v7 }
 0x1ba   : > { %7064 = vmatpush3.bf16.msra.mxu1 %v7251_v36  ;;  %7014 = vmatpush3.bf16.msra.mxu0 %v7248_v48  ;;  %v2641_v28 = vpop.f32.mrf.mxu0  ;;  %v2440_v55 = vadd.f32 %v8698_v49, %v8716_v3  ;;  %v2432_v49 = vadd.f32 %v8704_v22, %v8725_v42  ;;  %v7259_v22 = vld [vmem:[%s9737_s1] sm:$0xff]   ;;  %v2443_v42 = vadd.f32 %v8714_v21, %v8733_v31 }
 0x1bb   : > { %v2914_v45 = vpop.f32.mrf.mxu1  ;;  %7015 = vmatprep.subr.bf16.mxu0 %v7250_v43  ;;  %7065 = vmatprep.subr.bf16.mxu1 %v7253_v6  ;;  %5672 = vst.msk [vmem:[%s8415_s27 + $0x100] sm:$0xff] %vm1846_vm6, %v3093_v61  ;;  %v3096_v0 = vmax.f32 %v3064_v10, 0.0  ;;  %v3062_v36 = vadd.f32 %v8895_v54, %v3023_v24  ;;  %v3028_v48 = vadd.f32 %v6695_v50, %v2758_v37  ;;  %v10035_v61 = vld [vmem:[#allocation35_spill] sm:$0xff] }
 0x1bc   : > { %v2756_v16 = vadd.f32 %v2641_v28, %v2416_v30  ;;  %v6648_v14 = vpop.f32.mrf.mxu0  ;;  %v2435_v21 = vadd.f32 %v8719_v39, %v8738_v12  ;;  %v7258_v12 = vld [vmem:[%s9737_s1 + $0x80] sm:$0xff]  }
 0x1bd   : > { %v6699_v17 = vpop.f32.mrf.mxu1  ;;  %6986 = vmatmul.mubr.bf16.gmra.mxu1 %v7556_v27  ;;  %5675 = vst.msk [vmem:[%s8415_s27 + $0x118] sm:$0xff] %vm1846_vm6, %v3096_v0  ;;  %v3094_v25 = vmax.f32 %v3062_v36, 0.0  ;;  %v3067_v40 = vadd.f32 %v8895_v54, %v3028_v48  ;;  %v2759_v15 = vadd.f32 %v6648_v14, %v2427_v51  ;;  %v10036_v0 = vld [vmem:[#allocation36_spill] sm:$0xff] }
 0x1be   : > { %6989 = vmatprep.mubr.bf16.mxu1 %v7588_v5  ;;  %7066 = vmatpush3.bf16.msra.mxu1 %v7253_v6  ;;  %v3026_v52 = vadd.f32 %v2911_v1, %v2756_v16  ;;  %v2644_v19 = vpop.f32.mrf.mxu0  ;;  %v7257_v6 = vld [vmem:[%s9737_s1 + $0x8] sm:$0xff]  }
 0x1bf   : > { %v2927_v50 = vpop.f32.mrf.mxu1  ;;  %7016 = vmatpush3.bf16.msra.mxu0 %v7250_v43  ;;  %7067 = vmatprep.subr.bf16.mxu1 %v7255_v20  ;;  %5673 = vst.msk [vmem:[%s8415_s27 + $0x108] sm:$0xff] %vm1846_vm6, %v3094_v25  ;;  %v3099_v1 = vmax.f32 %v3067_v40, 0.0  ;;  %v3029_v41 = vadd.f32 %v6696_v13, %v2759_v15  ;;  %v2757_v30 = vadd.f32 %v2644_v19, %v2419_v59 }
 0x1c0   : > { %7017 = vmatprep.subr.bf16.mxu0 %v7252_v44  ;;  %v3065_v43 = vadd.f32 %v8895_v54, %v3026_v52  ;;  %v6651_v3 = vpop.f32.mrf.mxu0  ;;  %6938 = vmatmul.mubr.bf16.gmra.mxu0 %v10035_v61  ;;  %v2456_v52 = vadd.f32 %v8730_v58, %v8750_v8  ;;  %v10037_v58 = vld [vmem:[#allocation37_spill] sm:$0xff] }
 0x1c1   : > { %v6700_v62 = vpop.f32.mrf.mxu1  ;;  %5678 = vst.msk [vmem:[%s8415_s27 + $0x130] sm:$0xff] %vm1846_vm6, %v3099_v1  ;;  %v3068_v24 = vadd.f32 %v8895_v54, %v3029_v41  ;;  %v3027_v37 = vadd.f32 %v2914_v45, %v2757_v30  ;;  %v2762_v51 = vadd.f32 %v6651_v3, %v2440_v55  ;;  %6941 = vmatprep.mubr.bf16.mxu0 %v10036_v0  ;;  %v10038_v3 = vld [vmem:[#allocation38_spill] sm:$0xff] }
 0x1c2   : > { %7068 = vmatpush3.bf16.msra.mxu1 %v7255_v20  ;;  %v3097_v10 = vmax.f32 %v3065_v43, 0.0  ;;  %v2657_v13 = vpop.f32.mrf.mxu0  ;;  %v7256_v20 = vld [vmem:[%s9737_s1 + $0x88] sm:$0xff]  }
 0x1c3   : > { %v2930_v28 = vpop.f32.mrf.mxu1  ;;  %7018 = vmatpush3.bf16.msra.mxu0 %v7252_v44  ;;  %7069 = vmatprep.subr.bf16.mxu1 %v7257_v6  ;;  %v3100_v45 = vmax.f32 %v3068_v24, 0.0  ;;  %v3066_v44 = vadd.f32 %v8895_v54, %v3027_v37  ;;  %v3032_v36 = vadd.f32 %v6699_v17, %v2762_v51  ;;  %v2760_v48 = vadd.f32 %v2657_v13, %v2432_v49  ;;  %v10042_v13 = vld [vmem:[#allocation14_spill] sm:$0xff] }
 0x1c4   : > { %7019 = vmatprep.subr.bf16.mxu0 %v7254_v18  ;;  %5676 = vst.msk [vmem:[%s8415_s27 + $0x120] sm:$0xff] %vm1846_vm6, %v3097_v10  ;;  %v6652_v31 = vpop.f32.mrf.mxu0  ;;  %v10040_v10 = vld [vmem:[#allocation11_spill] sm:$0xff] }
 0x1c5   : > { %v6703_v16 = vpop.f32.mrf.mxu1  ;;  %6990 = vmatmul.mubr.bf16.gmra.mxu1 %v9895_v33  ;;  %5679 = vst.msk [vmem:[%s8415_s27 + $0x138] sm:$0xff] %vm1846_vm6, %v3100_v45  ;;  %v3098_v59 = vmax.f32 %v3066_v44, 0.0  ;;  %v3071_v14 = vadd.f32 %v8895_v54, %v3032_v36  ;;  %v3030_v25 = vadd.f32 %v2927_v50, %v2760_v48  ;;  %v2763_v40 = vadd.f32 %v6652_v31, %v2443_v42  ;;  %v10041_v42 = vld [vmem:[#allocation22_spill] sm:$0xff]  ;;  %v10043_v45 = vld [vmem:[#allocation41_spill] sm:$0xff] }
 0x1c6   : > { %6993 = vmatprep.mubr.bf16.mxu1 %v9897_v23  ;;  %7070 = vmatpush3.bf16.msra.mxu1 %v7257_v6  ;;  %v2660_v39 = vpop.f32.mrf.mxu0  ;;  %v2451_v44 = vadd.f32 %v10043_v45, %v10042_v13  ;;  %v10044_v36 = vld [vmem:[#allocation25_spill] sm:$0xff]  ;;  %v10052_v45 = vld [vmem:[#allocation27_spill] sm:$0xff] }
 0x1c7   : > { %v2943_v17 = vpop.f32.mrf.mxu1  ;;  %7020 = vmatpush3.bf16.msra.mxu0 %v7254_v18  ;;  %7071 = vmatprep.subr.bf16.mxu1 %v7259_v22  ;;  %5677 = vst.msk [vmem:[%s8415_s27 + $0x128] sm:$0xff] %vm1846_vm6, %v3098_v59  ;;  %v3103_v15 = vmax.f32 %v3071_v14, 0.0  ;;  %v3069_v55 = vadd.f32 %v8895_v54, %v3030_v25  ;;  %v3033_v50 = vadd.f32 %v6700_v62, %v2763_v40  ;;  %v10039_v62 = vld [vmem:[#allocation45_spill] sm:$0xff]  ;;  %v10045_v14 = vld [vmem:[#allocation43_spill] sm:$0xff] }
 0x1c8   : > { %7021 = vmatprep.subr.bf16.mxu0 %v7256_v20  ;;  %v2761_v19 = vadd.f32 %v2660_v39, %v2435_v21  ;;  %v2448_v18 = vadd.f32 %v8736_v2, %v8762_v56  ;;  %v6655_v1 = vpop.f32.mrf.mxu0  ;;  %6942 = vmatmul.mubr.bf16.gmra.mxu0 %v10037_v58  ;;  %v2459_v24 = vadd.f32 %v10040_v10, %v10039_v62  ;;  %v10049_v62 = vld [vmem:[#allocation17_spill] sm:$0xff]  ;;  %v10051_v10 = vld [vmem:[#allocation47_spill] sm:$0xff] }
 0x1c9   : > { %v6704_v6 = vpop.f32.mrf.mxu1  ;;  %5682 = vst.msk [vmem:[%s8415_s27 + $0x150] sm:$0xff] %vm1846_vm6, %v3103_v15  ;;  %v3101_v8 = vmax.f32 %v3069_v55, 0.0  ;;  %v3072_v43 = vadd.f32 %v8895_v54, %v3033_v50  ;;  %v2766_v30 = vadd.f32 %v6655_v1, %v2456_v52  ;;  %6945 = vmatprep.mubr.bf16.mxu0 %v10038_v3  ;;  %v2472_v25 = vadd.f32 %v10045_v14, %v8787_v46 }
 0x1ca   : > { %7072 = vmatpush3.bf16.msra.mxu1 %v7259_v22  ;;  %v3031_v41 = vadd.f32 %v2930_v28, %v2761_v19  ;;  %v2673_v2 = vpop.f32.mrf.mxu0  ;;  %v10046_v19 = vld [vmem:[#allocation48_spill] sm:$0xff] }
 0x1cb   : > { %v2946_v49 = vpop.f32.mrf.mxu1  ;;  %7022 = vmatpush3.bf16.msra.mxu0 %v7256_v20  ;;  %5680 = vst.msk [vmem:[%s8415_s27 + $0x140] sm:$0xff] %vm1846_vm6, %v3101_v8  ;;  %v3104_v56 = vmax.f32 %v3072_v43, 0.0  ;;  %v3036_v51 = vadd.f32 %v6703_v16, %v2766_v30  ;;  %v2764_v22 = vadd.f32 %v2673_v2, %v2448_v18  ;;  %v10047_v18 = vld [vmem:[#allocation44_spill] sm:$0xff]  ;;  %v10048_v8 = vld [vmem:[#allocation15_spill] sm:$0xff] }
 0x1cc   : > { %7023 = vmatprep.subr.bf16.mxu0 %v7258_v12  ;;  %v3070_v37 = vadd.f32 %v8895_v54, %v3031_v41  ;;  %v6656_v20 = vpop.f32.mrf.mxu0  ;;  %v2464_v1 = vadd.f32 %v10047_v18, %v10046_v19  ;;  %v2480_v18 = vadd.f32 %v8805_v35, %v8817_v60 }
 0x1cd   : > { %v6707_v28 = vpop.f32.mrf.mxu1  ;;  %6994 = vmatmul.mubr.bf16.gmra.mxu1 %v10041_v42  ;;  %5683 = vst.msk [vmem:[%s8415_s27 + $0x158] sm:$0xff] %vm1846_vm6, %v3104_v56  ;;  %v3075_v21 = vadd.f32 %v8895_v54, %v3036_v51  ;;  %v3034_v31 = vadd.f32 %v2943_v17, %v2764_v22  ;;  %v2767_v59 = vadd.f32 %v6656_v20, %v2459_v24 }
 0x1ce   : > { %6997 = vmatprep.mubr.bf16.mxu1 %v10044_v36  ;;  %v3102_v48 = vmax.f32 %v3070_v37, 0.0  ;;  %v2676_v40 = vpop.f32.mrf.mxu0 }
 0x1cf   : > { %v2959_v16 = vpop.f32.mrf.mxu1  ;;  %7024 = vmatpush3.bf16.msra.mxu0 %v7258_v12  ;;  %v3107_v52 = vmax.f32 %v3075_v21, 0.0  ;;  %v3073_v39 = vadd.f32 %v8895_v54, %v3034_v31  ;;  %v3037_v15 = vadd.f32 %v6704_v6, %v2767_v59  ;;  %v2765_v55 = vadd.f32 %v2676_v40, %v2451_v44  ;;  %v10050_v6 = vld [vmem:[#allocation24_spill] sm:$0xff] }
 0x1d0   : > { %5681 = vst.msk [vmem:[%s8415_s27 + $0x148] sm:$0xff] %vm1846_vm6, %v3102_v48  ;;  %v6659_v17 = vpop.f32.mrf.mxu0  ;;  %6946 = vmatmul.mubr.bf16.gmra.mxu0 %v10048_v8  ;;  %v2475_v24 = vadd.f32 %v10051_v10, %v10050_v6  ;;  %v10054_v48 = vld [vmem:[#allocation29_spill] sm:$0xff] }
 0x1d1   : > { %v6708_v50 = vpop.f32.mrf.mxu1  ;;  %5686 = vst.msk [vmem:[%s8415_s27 + $0x170] sm:$0xff] %vm1846_vm6, %v3107_v52  ;;  %v3105_v12 = vmax.f32 %v3073_v39, 0.0  ;;  %v3076_v46 = vadd.f32 %v8895_v54, %v3037_v15  ;;  %v3035_v43 = vadd.f32 %v2946_v49, %v2765_v55  ;;  %v2770_v41 = vadd.f32 %v6659_v17, %v2472_v25  ;;  %6949 = vmatprep.mubr.bf16.mxu0 %v10049_v62  ;;  %v10053_v49 = vld [vmem:[#allocation46_spill] sm:$0xff] }
 0x1d2   : > { %v2689_v2 = vpop.f32.mrf.mxu0  ;;  %v2467_v44 = vadd.f32 %v10053_v49, %v8807_v38 }
 0x1d3   : > { %v2962_v30 = vpop.f32.mrf.mxu1  ;;  %5684 = vst.msk [vmem:[%s8415_s27 + $0x160] sm:$0xff] %vm1846_vm6, %v3105_v12  ;;  %v3108_v56 = vmax.f32 %v3076_v46, 0.0  ;;  %v3074_v37 = vadd.f32 %v8895_v54, %v3035_v43  ;;  %v3040_v51 = vadd.f32 %v6707_v28, %v2770_v41  ;;  %v2768_v22 = vadd.f32 %v2689_v2, %v2464_v1  ;;  %v10055_v28 = vld [vmem:[#allocation49_spill] sm:$0xff]  ;;  %v10057_v41 = vld [vmem:[#allocation20_spill] sm:$0xff] }
 0x1d4   : > { %v6660_v20 = vpop.f32.mrf.mxu0  ;;  %v2488_v40 = vadd.f32 %v10055_v28, %v8811_v63 }
 0x1d5   : > { %v6711_v13 = vpop.f32.mrf.mxu1  ;;  %6998 = vmatmul.mubr.bf16.gmra.mxu1 %v10052_v45  ;;  %5687 = vst.msk [vmem:[%s8415_s27 + $0x178] sm:$0xff] %vm1846_vm6, %v3108_v56  ;;  %v3106_v21 = vmax.f32 %v3074_v37, 0.0  ;;  %v3079_v31 = vadd.f32 %v8895_v54, %v3040_v51  ;;  %v3038_v59 = vadd.f32 %v2959_v16, %v2768_v22  ;;  %v2771_v14 = vadd.f32 %v6660_v20, %v2475_v24  ;;  %v10056_v16 = vld [vmem:[#allocation19_spill] sm:$0xff]  ;;  %v10059_v51 = vld [vmem:[#allocation32_spill] sm:$0xff] }
 0x1d6   : > { %7001 = vmatprep.mubr.bf16.mxu1 %v10054_v48  ;;  %v2692_v52 = vpop.f32.mrf.mxu0 }
 0x1d7   : > { %v2975_v25 = vpop.f32.mrf.mxu1  ;;  %5685 = vst.msk [vmem:[%s8415_s27 + $0x168] sm:$0xff] %vm1846_vm6, %v3106_v21  ;;  %v3111_v39 = vmax.f32 %v3079_v31, 0.0  ;;  %v3077_v38 = vadd.f32 %v8895_v54, %v3038_v59  ;;  %v3041_v15 = vadd.f32 %v6708_v50, %v2771_v14  ;;  %v2769_v55 = vadd.f32 %v2692_v52, %v2467_v44 }
 0x1d8   : > { %v6663_v1 = vpop.f32.mrf.mxu0  ;;  %6950 = vmatmul.mubr.bf16.gmra.mxu0 %v10056_v16  ;;  %v2491_v50 = vadd.f32 %v8809_v34, %v8822_v29 }
 0x1d9   : > { %v6712_v19 = vpop.f32.mrf.mxu1  ;;  %5690 = vst.msk [vmem:[%s8415_s27 + $0x190] sm:$0xff] %vm1846_vm6, %v3111_v39  ;;  %v3109_v17 = vmax.f32 %v3077_v38, 0.0  ;;  %v3080_v63 = vadd.f32 %v8895_v54, %v3041_v15  ;;  %v3039_v12 = vadd.f32 %v2962_v30, %v2769_v55  ;;  %v2774_v46 = vadd.f32 %v6663_v1, %v2488_v40  ;;  %6953 = vmatprep.mubr.bf16.mxu0 %v10057_v41  ;;  %v10058_v30 = vld [vmem:[#allocation50_spill] sm:$0xff]  ;;  %v10064_v1 = vld [vmem:[#allocation51_spill] sm:$0xff] }
 0x1da   : > { %v2705_v6 = vpop.f32.mrf.mxu0  ;;  %v2483_v56 = vadd.f32 %v10058_v30, %v8831_v53  ;;  %v2496_v40 = vadd.f32 %v8829_v9, %v8843_v47 }
 0x1db   : > { %v2978_v43 = vpop.f32.mrf.mxu1  ;;  %5688 = vst.msk [vmem:[%s8415_s27 + $0x180] sm:$0xff] %vm1846_vm6, %v3109_v17  ;;  %v3112_v35 = vmax.f32 %v3080_v63, 0.0  ;;  %v3078_v60 = vadd.f32 %v8895_v54, %v3039_v12  ;;  %v3044_v10 = vadd.f32 %v6711_v13, %v2774_v46  ;;  %v2772_v24 = vadd.f32 %v2705_v6, %v2480_v18  ;;  %v10060_v13 = vld [vmem:[#allocation26_spill] sm:$0xff]  ;;  %v10062_v18 = vld [vmem:[#allocation23_spill] sm:$0xff]  ;;  %v10065_v6 = vld [vmem:[#allocation9_spill] sm:$0xff] }
 0x1dc   : > { %v6664_v37 = vpop.f32.mrf.mxu0  ;;  %v2504_v20 = vadd.f32 %v10060_v13, %v8837_v26 }
 0x1dd   : > { %v6715_v2 = vpop.f32.mrf.mxu1  ;;  %7002 = vmatmul.mubr.bf16.gmra.mxu1 %v9979_v11  ;;  %5691 = vst.msk [vmem:[%s8415_s27 + $0x198] sm:$0xff] %vm1846_vm6, %v3112_v35  ;;  %v3110_v34 = vmax.f32 %v3078_v60, 0.0  ;;  %v3083_v29 = vadd.f32 %v8895_v54, %v3044_v10  ;;  %v3042_v22 = vadd.f32 %v2975_v25, %v2772_v24  ;;  %v2775_v49 = vadd.f32 %v6664_v37, %v2491_v50  ;;  %v10061_v25 = vld [vmem:[#allocation21_spill] sm:$0xff]  ;;  %v10067_v35 = vld [vmem:[#allocation55_spill] sm:$0xff] }
 0x1de   : > { %7005 = vmatprep.mubr.bf16.mxu1 %v10059_v51  ;;  %v2708_v21 = vpop.f32.mrf.mxu0  ;;  %v10068_v24 = vld [vmem:[#allocation3_spill] sm:$0xff] }
 0x1df   : > { %v2991_v44 = vpop.f32.mrf.mxu1  ;;  %5689 = vst.msk [vmem:[%s8415_s27 + $0x188] sm:$0xff] %vm1846_vm6, %v3110_v34  ;;  %v3115_v31 = vmax.f32 %v3083_v29, 0.0  ;;  %v3081_v53 = vadd.f32 %v8895_v54, %v3042_v22  ;;  %v3045_v59 = vadd.f32 %v6712_v19, %v2775_v49  ;;  %v2773_v14 = vadd.f32 %v2708_v21, %v2483_v56  ;;  %v10063_v19 = vld [vmem:[#allocation28_spill] sm:$0xff]  ;;  %v10070_v22 = vld [vmem:[#allocation53_spill] sm:$0xff] }
 0x1e0   : > { %v6667_v52 = vpop.f32.mrf.mxu0  ;;  %6954 = vmatmul.mubr.bf16.gmra.mxu0 %v10061_v25  ;;  %v2507_v17 = vadd.f32 %v10064_v1, %v10063_v19 }
 0x1e1   : > { %v6716_v28 = vpop.f32.mrf.mxu1  ;;  %5694 = vst.msk [vmem:[%s8415_s27 + $0x1b0] sm:$0xff] %vm1846_vm6, %v3115_v31  ;;  %v3113_v39 = vmax.f32 %v3081_v53, 0.0  ;;  %v3084_v26 = vadd.f32 %v8895_v54, %v3045_v59  ;;  %v3043_v38 = vadd.f32 %v2978_v43, %v2773_v14  ;;  %v2778_v15 = vadd.f32 %v6667_v52, %v2504_v20  ;;  %6957 = vmatprep.mubr.bf16.mxu0 %v10062_v18  ;;  %v10066_v43 = vld [vmem:[#allocation30_spill] sm:$0xff]  ;;  %v10071_v14 = vld [vmem:[#allocation61_spill] sm:$0xff] }
 0x1e2   : > { %v2721_v63 = vpop.f32.mrf.mxu0  ;;  %v2499_v60 = vadd.f32 %v10067_v35, %v10066_v43 }
 0x1e3   : > { %v2994_v55 = vpop.f32.mrf.mxu1  ;;  %5692 = vst.msk [vmem:[%s8415_s27 + $0x1a0] sm:$0xff] %vm1846_vm6, %v3113_v39  ;;  %v3116_v9 = vmax.f32 %v3084_v26, 0.0  ;;  %v3082_v47 = vadd.f32 %v8895_v54, %v3043_v38  ;;  %v3048_v12 = vadd.f32 %v6715_v2, %v2778_v15  ;;  %v2776_v46 = vadd.f32 %v2721_v63, %v2496_v40  ;;  %v10069_v2 = vld [vmem:[#allocation57_spill] sm:$0xff]  ;;  %v10072_v40 = vld [vmem:[#allocation54_spill] sm:$0xff]  ;;  %v10076_v63 = vld [vmem:[#allocation56_spill] sm:$0xff] }
 0x1e4   : > { %v6668_v10 = vpop.f32.mrf.mxu0  ;;  %v2520_v49 = vadd.f32 %v10070_v22, %v10069_v2  ;;  %v2512_v52 = vadd.f32 %v10072_v40, %v10071_v14  ;;  %v10080_v14 = vld [vmem:[#allocation8_spill] sm:$0xff] }
 0x1e5   : > { %v6719_v50 = vpop.f32.mrf.mxu1  ;;  %7006 = vmatmul.mubr.bf16.gmra.mxu1 %v10065_v6  ;;  %5695 = vst.msk [vmem:[%s8415_s27 + $0x1b8] sm:$0xff] %vm1846_vm6, %v3116_v9  ;;  %v3114_v30 = vmax.f32 %v3082_v47, 0.0  ;;  %v3087_v56 = vadd.f32 %v8895_v54, %v3048_v12  ;;  %v3046_v37 = vadd.f32 %v2991_v44, %v2776_v46  ;;  %v2779_v34 = vadd.f32 %v6668_v10, %v2507_v17  ;;  %v10073_v44 = vld [vmem:[#allocation13_spill] sm:$0xff]  ;;  %v10074_v17 = vld [vmem:[#allocation7_spill] sm:$0xff]  ;;  %v10078_v10 = vld [vmem:[#allocation10_spill] sm:$0xff] }
 0x1e6   : > { %7073 = vmatprep.mubr.bf16.mxu1 %v10068_v24  ;;  %v2724_v13 = vpop.f32.mrf.mxu0  ;;  %v10079_v24 = vld [vmem:[#allocation31_spill] sm:$0xff] }
 0x1e7   : > { %v3007_v29 = vpop.f32.mrf.mxu1  ;;  %5693 = vst.msk [vmem:[%s8415_s27 + $0x1a8] sm:$0xff] %vm1846_vm6, %v3114_v30  ;;  %v3119_v20 = vmax.f32 %v3087_v56, 0.0  ;;  %v3085_v21 = vadd.f32 %v8895_v54, %v3046_v37  ;;  %v3049_v31 = vadd.f32 %v6716_v28, %v2779_v34  ;;  %v2777_v53 = vadd.f32 %v2724_v13, %v2499_v60  ;;  %v10075_v28 = vld [vmem:[#allocation58_spill] sm:$0xff] }
 0x1e8   : > { %v6671_v39 = vpop.f32.mrf.mxu0  ;;  %6958 = vmatmul.mubr.bf16.gmra.mxu0 %v10073_v44  ;;  %v2523_v9 = vadd.f32 %v10076_v63, %v10075_v28  ;;  %v2515_v30 = vadd.f32 %v10079_v24, %v10078_v10 }
 0x1e9   : > { %v6720_v59 = vpop.f32.mrf.mxu1  ;;  %5698 = vst.msk [vmem:[%s8415_s27 + $0x1d0] sm:$0xff] %vm1846_vm6, %v3119_v20  ;;  %v3117_v26 = vmax.f32 %v3085_v21, 0.0  ;;  %v3088_v38 = vadd.f32 %v8895_v54, %v3049_v31  ;;  %v3047_v15 = vadd.f32 %v2994_v55, %v2777_v53  ;;  %v2782_v19 = vadd.f32 %v6671_v39, %v2520_v49  ;;  %7025 = vmatprep.mubr.bf16.mxu0 %v10074_v17  ;;  %v10077_v55 = vld [vmem:[#allocation39_spill] sm:$0xff] }
 0x1ea   : > { %v2737_v47 = vpop.f32.mrf.mxu0 }
 0x1eb   : > { %v3010_v1 = vpop.f32.mrf.mxu1  ;;  %5696 = vst.msk [vmem:[%s8415_s27 + $0x1c0] sm:$0xff] %vm1846_vm6, %v3117_v26  ;;  %v3120_v12 = vmax.f32 %v3088_v38, 0.0  ;;  %v3086_v46 = vadd.f32 %v8895_v54, %v3047_v15  ;;  %v3052_v43 = vadd.f32 %v6719_v50, %v2782_v19  ;;  %v2780_v35 = vadd.f32 %v2737_v47, %v2512_v52 }
 0x1ec   : > { %v6672_v56 = vpop.f32.mrf.mxu0 }
 0x1ed   : > { %v9093_v60 = vpop.f32.mrf.mxu1  ;;  %7074 = vmatmul.mubr.bf16.vlgmr.msra.gmra.mxu1 %v10077_v55  ;;  %5699 = vst.msk [vmem:[%s8415_s27 + $0x1d8] sm:$0xff] %vm1846_vm6, %v3120_v12  ;;  %v3118_v37 = vmax.f32 %v3086_v46, 0.0  ;;  %v3091_v34 = vadd.f32 %v8895_v54, %v3052_v43  ;;  %v3050_v2 = vadd.f32 %v3007_v29, %v2780_v35  ;;  %v2783_v22 = vadd.f32 %v6672_v56, %v2523_v9 }
 0x1ee   : > { %7077 = vmatprep.mubr.bf16.mxu1 %v10033_v57  ;;  %v2740_v49 = vpop.f32.mrf.mxu0 }
 0x1ef   : > { %v9102_v50 = vpop.f32.mrf.mxu1  ;;  %5697 = vst.msk [vmem:[%s8415_s27 + $0x1c8] sm:$0xff] %vm1846_vm6, %v3118_v37  ;;  %v3123_v13 = vmax.f32 %v3091_v34, 0.0  ;;  %v3089_v20 = vadd.f32 %v8895_v54, %v3050_v2  ;;  %v3053_v21 = vadd.f32 %v6720_v59, %v2783_v22  ;;  %v2781_v31 = vadd.f32 %v2740_v49, %v2515_v30  ;;  %v10081_v22 = vld [vmem:[#allocation42_spill] sm:$0xff] }
 0x1f0   : > { %v9109_v53 = vpop.f32.mrf.mxu0  ;;  %7026 = vmatmul.mubr.bf16.vlgmr.msra.gmra.mxu0 %v10080_v14  ;;  %v4977_v49 = vrot.slane %v10081_v22, 5 }
 0x1f1   : > { %v9107_v57 = vpop.f32.mrf.mxu1  ;;  %5702 = vst.msk [vmem:[%s8415_s27 + $0x1f0] sm:$0xff] %vm1846_vm6, %v3123_v13  ;;  %v3121_v29 = vmax.f32 %v3089_v20, 0.0  ;;  %v3092_v40 = vadd.f32 %v8895_v54, %v3053_v21  ;;  %v3051_v52 = vadd.f32 %v3010_v1, %v2781_v31  ;;  %7029 = vmatprep.mubr.bf16.mxu0 %v7494_v32 }
 0x1f2   : > { %v9118_v59 = vpop.f32.mrf.mxu0  ;;  %v4979_v14 = vrot.slane %v4977_v49, 4 }
 0x1f3   : > { %v9115_v39 = vpop.f32.mrf.mxu1  ;;  %5700 = vst.msk [vmem:[%s8415_s27 + $0x1e0] sm:$0xff] %vm1846_vm6, %v3121_v29  ;;  %v3124_v26 = vmax.f32 %v3092_v40, 0.0  ;;  %v3090_v38 = vadd.f32 %v8895_v54, %v3051_v52 }
 0x1f4   : > { %v9126_v19 = vpop.f32.mrf.mxu0 }
 0x1f5   : > { %v9123_v15 = vpop.f32.mrf.mxu1  ;;  %7078 = vmatmul.mubr.bf16.gmra.mxu1 %v10034_v7  ;;  %5703 = vst.msk [vmem:[%s8415_s27 + $0x1f8] sm:$0xff] %vm1846_vm6, %v3124_v26  ;;  %v3122_v1 = vmax.f32 %v3090_v38, 0.0 }
 0x1f6   : > { %7081 = vmatprep.mubr.bf16.mxu1 %v10035_v61  ;;  %v9133_v32 = vpop.f32.mrf.mxu0 }
 0x1f7   : > { %v9131_v17 = vpop.f32.mrf.mxu1  ;;  %5701 = vst.msk [vmem:[%s8415_s27 + $0x1e8] sm:$0xff] %vm1846_vm6, %v3122_v1 }
 0x1f8   : > { %v9139_v63 = vpop.f32.mrf.mxu0  ;;  %7030 = vmatmul.mubr.bf16.gmra.mxu0 %v7528_v4 }
 0x1f9   : > { %v9137_v28 = vpop.f32.mrf.mxu1  ;;  %7033 = vmatprep.mubr.bf16.mxu0 %v7556_v27 }
 0x1fa   : > { %v9145_v61 = vpop.f32.mrf.mxu0 }
 0x1fb   : > { %v9142_v7 = vpop.f32.mrf.mxu1 }
 0x1fc   : > { %v9150_v47 = vpop.f32.mrf.mxu0 }
 0x1fd   : > { %v9147_v9 = vpop.f32.mrf.mxu1  ;;  %7082 = vmatmul.mubr.bf16.gmra.mxu1 %v10036_v0 }
 0x1fe   : > { %7085 = vmatprep.mubr.bf16.mxu1 %v10037_v58  ;;  %v9155_v46 = vpop.f32.mrf.mxu0 }
 0x1ff   : > { %v9153_v12 = vpop.f32.mrf.mxu1 }
 0x200   : > { %v9159_v4 = vpop.f32.mrf.mxu0  ;;  %7034 = vmatmul.mubr.bf16.gmra.mxu0 %v7588_v5 }
 0x201   : > { %v9157_v43 = vpop.f32.mrf.mxu1  ;;  %7037 = vmatprep.mubr.bf16.mxu0 %v9895_v33 }
 0x202   : > { %v9165_v35 = vpop.f32.mrf.mxu0 }
 0x203   : > { %v9162_v27 = vpop.f32.mrf.mxu1 }
 0x204   : > { %v9170_v58 = vpop.f32.mrf.mxu0 }
 0x205   : > { %v9167_v0 = vpop.f32.mrf.mxu1  ;;  %7086 = vmatmul.mubr.bf16.gmra.mxu1 %v10038_v3 }
 0x206   : > { %7089 = vmatprep.mubr.bf16.mxu1 %v10048_v8  ;;  %v9175_v10 = vpop.f32.mrf.mxu0 }
 0x207   : > { %v9173_v55 = vpop.f32.mrf.mxu1 }
 0x208   : > { %v9179_v5 = vpop.f32.mrf.mxu0  ;;  %7038 = vmatmul.mubr.bf16.gmra.mxu0 %v9897_v23 }
 0x209   : > { %v9177_v24 = vpop.f32.mrf.mxu1  ;;  %7041 = vmatprep.mubr.bf16.mxu0 %v10041_v42 }
 0x20a   : > { %v9185_v30 = vpop.f32.mrf.mxu0 }
 0x20b   : > { %v9182_v33 = vpop.f32.mrf.mxu1 }
 0x20c   : > { %v9190_v8 = vpop.f32.mrf.mxu0 }
 0x20d   : > { %v9187_v3 = vpop.f32.mrf.mxu1  ;;  %7090 = vmatmul.mubr.bf16.gmra.mxu1 %v10049_v62 }
 0x20e   : > { %7093 = vmatprep.mubr.bf16.mxu1 %v10056_v16  ;;  %v9195_v37 = vpop.f32.mrf.mxu0 }
 0x20f   : > { %v9193_v56 = vpop.f32.mrf.mxu1 }
 0x210   : > { %v9199_v23 = vpop.f32.mrf.mxu0  ;;  %7042 = vmatmul.mubr.bf16.gmra.mxu0 %v10044_v36 }
 0x211   : > { %v9197_v34 = vpop.f32.mrf.mxu1  ;;  %7045 = vmatprep.mubr.bf16.mxu0 %v10052_v45  ;;  %v10082_v45 = vld [vmem:[#allocation12_spill] sm:$0xff] }
 0x212   : > { %v9205_v2 = vpop.f32.mrf.mxu0  ;;  %v5907_v31 = vrot.slane %v10082_v45, 9 }
 0x213   : > { %v9202_v42 = vpop.f32.mrf.mxu1 }
 0x214   : > { %v9210_v16 = vpop.f32.mrf.mxu0  ;;  %v4978_v38 = vsel %vm7832_vm5, %v5907_v31, %v4977_v49 }
 0x215   : > { %v9207_v62 = vpop.f32.mrf.mxu1  ;;  %7094 = vmatmul.mubr.bf16.gmra.mxu1 %v10057_v41  ;;  %v10083_v41 = vld [vmem:[#allocation18_spill] sm:$0xff] }
 0x216   : > { %7097 = vmatprep.mubr.bf16.mxu1 %v10061_v25  ;;  %v9216_v20 = vpop.f32.mrf.mxu0  ;;  %v4980_v29 = vrot.slane %v10083_v41, 5 }
 0x217   : > { %v9214_v13 = vpop.f32.mrf.mxu1 }
 0x218   : > { %v9220_v21 = vpop.f32.mrf.mxu0  ;;  %7046 = vmatmul.mubr.bf16.gmra.mxu0 %v10054_v48  ;;  %v4981_v1 = vsel %vm7832_vm5, %v4979_v14, %v4980_v29 }
 0x219   : > { %v9218_v36 = vpop.f32.mrf.mxu1  ;;  %7049 = vmatprep.mubr.bf16.mxu0 %v9979_v11  ;;  %v5908_v41 = vcombine.low %v4978_v38, %v4981_v1 }
 0x21a   : > { %v9228_v25 = vpop.f32.mrf.mxu0 }
 0x21b   : > { %v9225_v40 = vpop.f32.mrf.mxu1 }
 0x21c   : > { %10084 = vst [vmem:[#allocation63_spill] sm:$0xff] %v9225_v40  ;;  %v9233_v26 = vpop.f32.mrf.mxu0 }
 0x21d   : > { %v9230_v52 = vpop.f32.mrf.mxu1  ;;  %7098 = vmatmul.mubr.bf16.gmra.mxu1 %v10062_v18 }
 0x21e   : > { %10085 = vst [vmem:[#allocation59_spill] sm:$0xff] %v9230_v52  ;;  %7101 = vmatprep.mubr.bf16.mxu1 %v10073_v44  ;;  %v9242_v45 = vpop.f32.mrf.mxu0 }
 0x21f   : > { %v9240_v22 = vpop.f32.mrf.mxu1  ;;  %10088 = vst [vmem:[#allocation60_spill] sm:$0xff] %v9242_v45 }
 0x220   : > { %10087 = vst [vmem:[#allocation65_spill] sm:$0xff] %v9240_v22  ;;  %v9246_v52 = vpop.f32.mrf.mxu0  ;;  %7050 = vmatmul.mubr.bf16.gmra.mxu0 %v10059_v51  ;;  %v10099_v51 = vld [vmem:[#allocation52_spill] sm:$0xff] }
 0x221   : > { %v9244_v11 = vpop.f32.mrf.mxu1  ;;  %10090 = vst [vmem:[#allocation62_spill] sm:$0xff] %v9246_v52  ;;  %7053 = vmatprep.mubr.bf16.mxu0 %v10065_v6 }
 0x222   : > { %10089 = vst [vmem:[#allocation67_spill] sm:$0xff] %v9244_v11  ;;  %v9252_v44 = vpop.f32.mrf.mxu0 }
 0x223   : > { %v9249_v18 = vpop.f32.mrf.mxu1  ;;  %10092 = vst [vmem:[#allocation68_spill] sm:$0xff] %v9252_v44 }
 0x224   : > { %10091 = vst [vmem:[#allocation4_spill] sm:$0xff] %v9249_v18  ;;  %v9256_v31 = vpop.f32.mrf.mxu0 }
 0x225   : > { %v9254_v49 = vpop.f32.mrf.mxu1  ;;  %7102 = vmatmul.mubr.bf16.gmra.mxu1 %v5908_v41  ;;  %10094 = vst [vmem:[#allocation69_spill] sm:$0xff] %v9256_v31 }
 0x226   : > { %10093 = vst [vmem:[#allocation64_spill] sm:$0xff] %v9254_v49  ;;  %v9260_v29 = vpop.f32.mrf.mxu0 }
 0x227   : > { %v9258_v14 = vpop.f32.mrf.mxu1  ;;  %10096 = vst [vmem:[#allocation6_spill] sm:$0xff] %v9260_v29 }
 0x228   : > { %10095 = vst [vmem:[#allocation66_spill] sm:$0xff] %v9258_v14  ;;  %v9264_v38 = vpop.f32.mrf.mxu0  ;;  %7054 = vmatmul.mubr.bf16.gmra.mxu0 %v10099_v51  ;;  %v3492_v14 = vadd.f32 %v9093_v60, %v9109_v53 }
 0x229   : > { %v9262_v48 = vpop.f32.mrf.mxu1  ;;  %10098 = vst [vmem:[#allocation5_spill] sm:$0xff] %v9264_v38 }
 0x22a   : > { %10097 = vst [vmem:[#allocation2_spill] sm:$0xff] %v9262_v48  ;;  %v9269_v6 = vpop.f32.mrf.mxu0  ;;  %v3484_v48 = vadd.f32 %v9102_v50, %v9118_v59  ;;  %v3508_v50 = vadd.f32 %v9123_v15, %v9139_v63 }
 0x22b   : > { %v9267_v1 = vpop.f32.mrf.mxu1  ;;  %10101 = vst [vmem:[#allocation40_spill] sm:$0xff] %v9269_v6 }
 0x22c   : > { %10100 = vst [vmem:[#allocation16_spill] sm:$0xff] %v9267_v1  ;;  %v9271_v11 = vpop.f32.mrf.mxu0  ;;  %v3495_v1 = vadd.f32 %v9107_v57, %v9126_v19 }
 0x22d   : > { %v6883_v18 = vpop.f32.mrf.mxu1  ;;  %10102 = vst [vmem:[#allocation34_spill] sm:$0xff] %v9271_v11 }
 0x22e   : > { %v9273_v49 = vpop.f32.mrf.mxu0 }
 0x22f   : > { %v4001_v41 = vpop.f32.mrf.mxu1  ;;  %10103 = vst [vmem:[#allocation35_spill] sm:$0xff] %v9273_v49  ;;  %v3487_v49 = vadd.f32 %v9115_v39, %v9133_v32 }
 0x230   : > { %v6835_v31 = vpop.f32.mrf.mxu0 }
 0x231   : > { %v6884_v29 = vpop.f32.mrf.mxu1  ;;  %v3844_v38 = vadd.f32 %v6835_v31, %v3492_v14  ;;  %v3500_v14 = vadd.f32 %v9131_v17, %v9145_v61 }
 0x232   : > { %v3715_v22 = vpop.f32.mrf.mxu0 }
 0x233   : > { %v4004_v51 = vpop.f32.mrf.mxu1  ;;  %v4130_v6 = vadd.f32 %v6883_v18, %v3844_v38  ;;  %v3842_v44 = vadd.f32 %v3715_v22, %v3484_v48  ;;  %v3511_v48 = vadd.f32 %v9137_v28, %v9150_v47 }
 0x234   : > { %v6836_v52 = vpop.f32.mrf.mxu0 }
 0x235   : > { %v6887_v11 = vpop.f32.mrf.mxu1  ;;  %v4169_v60 = vadd.f32 %v8895_v54, %v4130_v6  ;;  %v4128_v53 = vadd.f32 %v4001_v41, %v3842_v44  ;;  %v3845_v40 = vadd.f32 %v6836_v52, %v3495_v1  ;;  %v3503_v1 = vadd.f32 %v9142_v7, %v9155_v46 }
 0x236   : > { %v3718_v59 = vpop.f32.mrf.mxu0 }
 0x237   : > { %v4017_v45 = vpop.f32.mrf.mxu1  ;;  %v4201_v31 = vmax.f32 %v4169_v60, 0.0  ;;  %v4167_v57 = vadd.f32 %v8895_v54, %v4128_v53  ;;  %v4131_v19 = vadd.f32 %v6884_v29, %v3845_v40  ;;  %v3843_v22 = vadd.f32 %v3718_v59, %v3487_v49 }
 0x238   : > { %v6839_v39 = vpop.f32.mrf.mxu0  ;;  %v3524_v53 = vadd.f32 %v9147_v9, %v9159_v4 }
 0x239   : > { %v6888_v18 = vpop.f32.mrf.mxu1  ;;  %5805 = vst.msk [vmem:[%s8415_s27 + $0x210] sm:$0xff] %vm1846_vm6, %v4201_v31  ;;  %v4199_v32 = vmax.f32 %v4167_v57, 0.0  ;;  %v4170_v52 = vadd.f32 %v8895_v54, %v4131_v19  ;;  %v4129_v44 = vadd.f32 %v4004_v51, %v3843_v22  ;;  %v3848_v15 = vadd.f32 %v6839_v39, %v3508_v50 }
 0x23a   : > { %v3731_v38 = vpop.f32.mrf.mxu0  ;;  %v3516_v57 = vadd.f32 %v9153_v12, %v9165_v35  ;;  %v3527_v39 = vadd.f32 %v9157_v43, %v9170_v58 }
 0x23b   : > { %v4020_v63 = vpop.f32.mrf.mxu1  ;;  %5803 = vst.msk [vmem:[%s8415_s27 + $0x200] sm:$0xff] %vm1846_vm6, %v4199_v32  ;;  %v4202_v40 = vmax.f32 %v4170_v52, 0.0  ;;  %v4168_v17 = vadd.f32 %v8895_v54, %v4129_v44  ;;  %v4134_v61 = vadd.f32 %v6887_v11, %v3848_v15  ;;  %v3846_v49 = vadd.f32 %v3731_v38, %v3500_v14 }
 0x23c   : > { %v6840_v6 = vpop.f32.mrf.mxu0  ;;  %v3519_v15 = vadd.f32 %v9162_v27, %v9175_v10 }
 0x23d   : > { %v6891_v29 = vpop.f32.mrf.mxu1  ;;  %5806 = vst.msk [vmem:[%s8415_s27 + $0x218] sm:$0xff] %vm1846_vm6, %v4202_v40  ;;  %v4200_v41 = vmax.f32 %v4168_v17, 0.0  ;;  %v4173_v28 = vadd.f32 %v8895_v54, %v4134_v61  ;;  %v4132_v47 = vadd.f32 %v4017_v45, %v3846_v49  ;;  %v3849_v51 = vadd.f32 %v6840_v6, %v3511_v48 }
 0x23e   : > { %v3734_v50 = vpop.f32.mrf.mxu0  ;;  %v3540_v17 = vadd.f32 %v9167_v0, %v9179_v5  ;;  %v3532_v6 = vadd.f32 %v9173_v55, %v9185_v30  ;;  %v9339_v55 = vld [vmem:[%s9738_s2] ss:$0 sm:$0xff] }
 0x23f   : > { %v4033_v60 = vpop.f32.mrf.mxu1  ;;  %5804 = vst.msk [vmem:[%s8415_s27 + $0x208] sm:$0xff] %vm1846_vm6, %v4200_v41  ;;  %v4205_v11 = vmax.f32 %v4173_v28, 0.0  ;;  %v4171_v7 = vadd.f32 %v8895_v54, %v4132_v47  ;;  %v4135_v46 = vadd.f32 %v6888_v18, %v3849_v51  ;;  %v3847_v59 = vadd.f32 %v3734_v50, %v3503_v1 }
 0x240   : > { %v6843_v19 = vpop.f32.mrf.mxu0 }
 0x241   : > { %v6892_v31 = vpop.f32.mrf.mxu1  ;;  %5809 = vst.msk [vmem:[%s8415_s27 + $0x230] sm:$0xff] %vm1846_vm6, %v4205_v11  ;;  %v4203_v45 = vmax.f32 %v4171_v7, 0.0  ;;  %v4174_v9 = vadd.f32 %v8895_v54, %v4135_v46  ;;  %v4133_v4 = vadd.f32 %v4020_v63, %v3847_v59  ;;  %v3852_v22 = vadd.f32 %v6843_v19, %v3524_v53 }
 0x242   : > { %v3747_v32 = vpop.f32.mrf.mxu0  ;;  %v3535_v46 = vadd.f32 %v9182_v33, %v9195_v37 }
 0x243   : > { %v4036_v14 = vpop.f32.mrf.mxu1  ;;  %5807 = vst.msk [vmem:[%s8415_s27 + $0x220] sm:$0xff] %vm1846_vm6, %v4203_v45  ;;  %v4206_v18 = vmax.f32 %v4174_v9, 0.0  ;;  %v4172_v12 = vadd.f32 %v8895_v54, %v4133_v4  ;;  %v4138_v35 = vadd.f32 %v6891_v29, %v3852_v22  ;;  %v3850_v52 = vadd.f32 %v3747_v32, %v3516_v57 }
 0x244   : > { %v6844_v48 = vpop.f32.mrf.mxu0  ;;  %v3556_v45 = vadd.f32 %v9187_v3, %v9199_v23 }
 0x245   : > { %v6895_v44 = vpop.f32.mrf.mxu1  ;;  %5810 = vst.msk [vmem:[%s8415_s27 + $0x238] sm:$0xff] %vm1846_vm6, %v4206_v18  ;;  %v4204_v63 = vmax.f32 %v4172_v12, 0.0  ;;  %v4177_v43 = vadd.f32 %v8895_v54, %v4138_v35  ;;  %v4136_v58 = vadd.f32 %v4033_v60, %v3850_v52  ;;  %v3853_v38 = vadd.f32 %v6844_v48, %v3527_v39 }
 0x246   : > { %v3750_v61 = vpop.f32.mrf.mxu0  ;;  %v3543_v60 = vadd.f32 %v9177_v24, %v9190_v8  ;;  %v3548_v39 = vadd.f32 %v9193_v56, %v9205_v2  ;;  %v3559_v52 = vadd.f32 %v9197_v34, %v9210_v16 }
 0x247   : > { %v4049_v40 = vpop.f32.mrf.mxu1  ;;  %5808 = vst.msk [vmem:[%s8415_s27 + $0x228] sm:$0xff] %vm1846_vm6, %v4204_v63  ;;  %v4209_v49 = vmax.f32 %v4177_v43, 0.0  ;;  %v4175_v27 = vadd.f32 %v8895_v54, %v4136_v58  ;;  %v4139_v10 = vadd.f32 %v6892_v31, %v3853_v38  ;;  %v3851_v29 = vadd.f32 %v3750_v61, %v3519_v15 }
 0x248   : > { %v6847_v41 = vpop.f32.mrf.mxu0  ;;  %v3551_v43 = vadd.f32 %v9202_v42, %v9216_v20  ;;  %v3572_v61 = vadd.f32 %v9207_v62, %v9220_v21 }
 0x249   : > { %v6896_v1 = vpop.f32.mrf.mxu1  ;;  %5813 = vst.msk [vmem:[%s8415_s27 + $0x250] sm:$0xff] %vm1846_vm6, %v4209_v49  ;;  %v4207_v28 = vmax.f32 %v4175_v27, 0.0  ;;  %v4178_v0 = vadd.f32 %v8895_v54, %v4139_v10  ;;  %v4137_v5 = vadd.f32 %v4036_v14, %v3851_v29  ;;  %v3856_v47 = vadd.f32 %v6847_v41, %v3540_v17 }
 0x24a   : > { %v3763_v53 = vpop.f32.mrf.mxu0 }
 0x24b   : > { %v4052_v51 = vpop.f32.mrf.mxu1  ;;  %5811 = vst.msk [vmem:[%s8415_s27 + $0x240] sm:$0xff] %vm1846_vm6, %v4207_v28  ;;  %v4210_v50 = vmax.f32 %v4178_v0, 0.0  ;;  %v4176_v30 = vadd.f32 %v9339_v55, %v4137_v5  ;;  %v4142_v11 = vadd.f32 %v6895_v44, %v3856_v47  ;;  %v3854_v54 = vadd.f32 %v3763_v53, %v3532_v6 }
 0x24c   : > { %v6848_v59 = vpop.f32.mrf.mxu0  ;;  %v3575_v5 = vadd.f32 %v9218_v36, %v9233_v26 }
 0x24d   : > { %v6899_v7 = vpop.f32.mrf.mxu1  ;;  %5814 = vst.msk [vmem:[%s8415_s27 + $0x258] sm:$0xff] %vm1846_vm6, %v4210_v50  ;;  %v4208_v24 = vmax.f32 %v4176_v30, 0.0  ;;  %v4181_v8 = vadd.f32 %v9339_v55, %v4142_v11  ;;  %v4140_v31 = vadd.f32 %v4049_v40, %v3854_v54  ;;  %v3857_v57 = vadd.f32 %v6848_v59, %v3543_v60  ;;  %v10104_v50 = vld [vmem:[#allocation60_spill] sm:$0xff]  ;;  %v10105_v30 = vld [vmem:[#allocation63_spill] sm:$0xff] }
 0x24e   : > { %v3766_v9 = vpop.f32.mrf.mxu0  ;;  %v3567_v11 = vadd.f32 %v10105_v30, %v10104_v50  ;;  %v10118_v50 = vld [vmem:[#allocation34_spill] sm:$0xff] }
 0x24f   : > { %v4065_v19 = vpop.f32.mrf.mxu1  ;;  %5812 = vst.msk [vmem:[%s8415_s27 + $0x248] sm:$0xff] %vm1846_vm6, %v4208_v24  ;;  %v4213_v4 = vmax.f32 %v4181_v8, 0.0  ;;  %v4179_v33 = vadd.f32 %v9339_v55, %v4140_v31  ;;  %v4143_v37 = vadd.f32 %v6896_v1, %v3857_v57  ;;  %v3855_v22 = vadd.f32 %v3766_v9, %v3535_v46  ;;  %v10106_v24 = vld [vmem:[#allocation62_spill] sm:$0xff]  ;;  %v10107_v8 = vld [vmem:[#allocation59_spill] sm:$0xff] }
 0x250   : > { %v6851_v32 = vpop.f32.mrf.mxu0  ;;  %v3564_v1 = vadd.f32 %v9214_v13, %v9228_v25  ;;  %v3588_v31 = vadd.f32 %v10107_v8, %v10106_v24  ;;  %v10119_v30 = vld [vmem:[#allocation2_spill] sm:$0xff]  ;;  %v10120_v24 = vld [vmem:[#allocation35_spill] sm:$0xff]  ;;  %v10121_v8 = vld [vmem:[#allocation16_spill] sm:$0xff] }
 0x251   : > { %v6900_v14 = vpop.f32.mrf.mxu1  ;;  %5817 = vst.msk [vmem:[%s8415_s27 + $0x270] sm:$0xff] %vm1846_vm6, %v4213_v4  ;;  %v4211_v18 = vmax.f32 %v4179_v33, 0.0  ;;  %v4182_v3 = vadd.f32 %v9339_v55, %v4143_v37  ;;  %v4141_v23 = vadd.f32 %v4052_v51, %v3855_v22  ;;  %v3860_v12 = vadd.f32 %v6851_v32, %v3556_v45  ;;  %v10108_v37 = vld [vmem:[#allocation68_spill] sm:$0xff]  ;;  %v10109_v22 = vld [vmem:[#allocation65_spill] sm:$0xff] }
 0x252   : > { %v3779_v44 = vpop.f32.mrf.mxu0 }
 0x253   : > { %v4068_v35 = vpop.f32.mrf.mxu1  ;;  %5815 = vst.msk [vmem:[%s8415_s27 + $0x260] sm:$0xff] %vm1846_vm6, %v4211_v18  ;;  %v4214_v15 = vmax.f32 %v4182_v3, 0.0  ;;  %v4180_v56 = vadd.f32 %v9339_v55, %v4141_v23  ;;  %v4146_v2 = vadd.f32 %v6899_v7, %v3860_v12  ;;  %v3858_v48 = vadd.f32 %v3779_v44, %v3548_v39 }
 0x254   : > { %v6852_v58 = vpop.f32.mrf.mxu0 }
 0x255   : > { %v6903_v63 = vpop.f32.mrf.mxu1  ;;  %5818 = vst.msk [vmem:[%s8415_s27 + $0x278] sm:$0xff] %vm1846_vm6, %v4214_v15  ;;  %v4212_v38 = vmax.f32 %v4180_v56, 0.0  ;;  %v4185_v34 = vadd.f32 %v9339_v55, %v4146_v2  ;;  %v4144_v16 = vadd.f32 %v4065_v19, %v3858_v48  ;;  %v3861_v40 = vadd.f32 %v6852_v58, %v3559_v52  ;;  %v10111_v52 = vld [vmem:[#allocation67_spill] sm:$0xff]  ;;  %v10112_v58 = vld [vmem:[#allocation6_spill] sm:$0xff] }
 0x256   : > { %v3782_v49 = vpop.f32.mrf.mxu0 }
 0x257   : > { %v4081_v17 = vpop.f32.mrf.mxu1  ;;  %5816 = vst.msk [vmem:[%s8415_s27 + $0x268] sm:$0xff] %vm1846_vm6, %v4212_v38  ;;  %v4217_v27 = vmax.f32 %v4185_v34, 0.0  ;;  %v4183_v42 = vadd.f32 %v9339_v55, %v4144_v16  ;;  %v4147_v20 = vadd.f32 %v6900_v14, %v3861_v40  ;;  %v3859_v10 = vadd.f32 %v3782_v49, %v3551_v43  ;;  %v10113_v38 = vld [vmem:[#allocation4_spill] sm:$0xff] }
 0x258   : > { %v6855_v6 = vpop.f32.mrf.mxu0  ;;  %v3580_v14 = vadd.f32 %v10109_v22, %v10108_v37  ;;  %v3583_v34 = vadd.f32 %v10113_v38, %v10112_v58 }
 0x259   : > { %v6904_v29 = vpop.f32.mrf.mxu1  ;;  %5821 = vst.msk [vmem:[%s8415_s27 + $0x290] sm:$0xff] %vm1846_vm6, %v4217_v27  ;;  %v4215_v41 = vmax.f32 %v4183_v42, 0.0  ;;  %v4186_v62 = vadd.f32 %v9339_v55, %v4147_v20  ;;  %v4145_v21 = vadd.f32 %v4068_v35, %v3859_v10  ;;  %v3864_v28 = vadd.f32 %v6855_v6, %v3572_v61  ;;  %v10110_v35 = vld [vmem:[#allocation69_spill] sm:$0xff]  ;;  %v10115_v20 = vld [vmem:[#allocation64_spill] sm:$0xff] }
 0x25a   : > { %v3795_v47 = vpop.f32.mrf.mxu0  ;;  %v3591_v44 = vadd.f32 %v10111_v52, %v10110_v35  ;;  %v10114_v42 = vld [vmem:[#allocation5_spill] sm:$0xff] }
 0x25b   : > { %v4084_v0 = vpop.f32.mrf.mxu1  ;;  %5819 = vst.msk [vmem:[%s8415_s27 + $0x280] sm:$0xff] %vm1846_vm6, %v4215_v41  ;;  %v4218_v51 = vmax.f32 %v4186_v62, 0.0  ;;  %v4184_v13 = vadd.f32 %v9339_v55, %v4145_v21  ;;  %v4150_v25 = vadd.f32 %v6903_v63, %v3864_v28  ;;  %v3862_v60 = vadd.f32 %v3795_v47, %v3564_v1  ;;  %v10116_v28 = vld [vmem:[#allocation40_spill] sm:$0xff] }
 0x25c   : > { %v6856_v54 = vpop.f32.mrf.mxu0  ;;  %v3604_v10 = vadd.f32 %v10115_v20, %v10114_v42 }
 0x25d   : > { %v6907_v53 = vpop.f32.mrf.mxu1  ;;  %5822 = vst.msk [vmem:[%s8415_s27 + $0x298] sm:$0xff] %vm1846_vm6, %v4218_v51  ;;  %v4216_v7 = vmax.f32 %v4184_v13, 0.0  ;;  %v4189_v36 = vadd.f32 %v9339_v55, %v4150_v25  ;;  %v4148_v26 = vadd.f32 %v4081_v17, %v3862_v60  ;;  %v3865_v46 = vadd.f32 %v6856_v54, %v3575_v5 }
 0x25e   : > { %v3798_v57 = vpop.f32.mrf.mxu0 }
 0x25f   : > { %v4097_v59 = vpop.f32.mrf.mxu1  ;;  %5820 = vst.msk [vmem:[%s8415_s27 + $0x288] sm:$0xff] %vm1846_vm6, %v4216_v7  ;;  %v4221_v19 = vmax.f32 %v4189_v36, 0.0  ;;  %v4187_v45 = vadd.f32 %v9339_v55, %v4148_v26  ;;  %v4151_v9 = vadd.f32 %v6904_v29, %v3865_v46  ;;  %v3863_v4 = vadd.f32 %v3798_v57, %v3567_v11 }
 0x260   : > { %v6859_v39 = vpop.f32.mrf.mxu0  ;;  %v3607_v11 = vadd.f32 %v10119_v30, %v10118_v50 }
 0x261   : > { %v6908_v33 = vpop.f32.mrf.mxu1  ;;  %5825 = vst.msk [vmem:[%s8415_s27 + $0x2b0] sm:$0xff] %vm1846_vm6, %v4221_v19  ;;  %v4219_v32 = vmax.f32 %v4187_v45, 0.0  ;;  %v4190_v18 = vadd.f32 %v9339_v55, %v4151_v9  ;;  %v4149_v3 = vadd.f32 %v4084_v0, %v3863_v4  ;;  %v3868_v23 = vadd.f32 %v6859_v39, %v3588_v31  ;;  %v10117_v0 = vld [vmem:[#allocation66_spill] sm:$0xff] }
 0x262   : > { %v3811_v15 = vpop.f32.mrf.mxu0  ;;  %v3596_v5 = vadd.f32 %v10117_v0, %v10116_v28  ;;  %v3599_v31 = vadd.f32 %v10121_v8, %v10120_v24 }
 0x263   : > { %v4100_v12 = vpop.f32.mrf.mxu1  ;;  %5823 = vst.msk [vmem:[%s8415_s27 + $0x2a0] sm:$0xff] %vm1846_vm6, %v4219_v32  ;;  %v4222_v56 = vmax.f32 %v4190_v18, 0.0  ;;  %v4188_v2 = vadd.f32 %v9339_v55, %v4149_v3  ;;  %v4154_v48 = vadd.f32 %v6907_v53, %v3868_v23  ;;  %v3866_v63 = vadd.f32 %v3811_v15, %v3580_v14 }
 0x264   : > { %v6860_v16 = vpop.f32.mrf.mxu0 }
 0x265   : > { %v6911_v43 = vpop.f32.mrf.mxu1  ;;  %5826 = vst.msk [vmem:[%s8415_s27 + $0x2b8] sm:$0xff] %vm1846_vm6, %v4222_v56  ;;  %v4220_v40 = vmax.f32 %v4188_v2, 0.0  ;;  %v4193_v17 = vadd.f32 %v9339_v55, %v4154_v48  ;;  %v4152_v61 = vadd.f32 %v4097_v59, %v3866_v63  ;;  %v3869_v49 = vadd.f32 %v6860_v16, %v3591_v44 }
 0x266   : > { %v3814_v29 = vpop.f32.mrf.mxu0 }
 0x267   : > { %v4113_v27 = vpop.f32.mrf.mxu1  ;;  %5824 = vst.msk [vmem:[%s8415_s27 + $0x2a8] sm:$0xff] %vm1846_vm6, %v4220_v40  ;;  %v4225_v1 = vmax.f32 %v4193_v17, 0.0  ;;  %v4191_v6 = vadd.f32 %v9339_v55, %v4152_v61  ;;  %v4155_v41 = vadd.f32 %v6908_v33, %v3869_v49  ;;  %v3867_v62 = vadd.f32 %v3814_v29, %v3583_v34 }
 0x268   : > { %v6863_v47 = vpop.f32.mrf.mxu0 }
 0x269   : > { %v6912_v21 = vpop.f32.mrf.mxu1  ;;  %5829 = vst.msk [vmem:[%s8415_s27 + $0x2d0] sm:$0xff] %vm1846_vm6, %v4225_v1  ;;  %v4223_v51 = vmax.f32 %v4191_v6, 0.0  ;;  %v4194_v13 = vadd.f32 %v9339_v55, %v4155_v41  ;;  %v4153_v25 = vadd.f32 %v4100_v12, %v3867_v62  ;;  %v3872_v60 = vadd.f32 %v6863_v47, %v3604_v10 }
 0x26a   : > { %v3827_v54 = vpop.f32.mrf.mxu0 }
 0x26b   : > { %v4116_v53 = vpop.f32.mrf.mxu1  ;;  %5827 = vst.msk [vmem:[%s8415_s27 + $0x2c0] sm:$0xff] %vm1846_vm6, %v4223_v51  ;;  %v4226_v7 = vmax.f32 %v4194_v13, 0.0  ;;  %v4192_v36 = vadd.f32 %v9339_v55, %v4153_v25  ;;  %v4158_v26 = vadd.f32 %v6911_v43, %v3872_v60  ;;  %v3870_v46 = vadd.f32 %v3827_v54, %v3596_v5 }
 0x26c   : > { %v6864_v57 = vpop.f32.mrf.mxu0 }
 0x26d   : > { %v9422_v59 = vpop.f32.mrf.mxu1  ;;  %5830 = vst.msk [vmem:[%s8415_s27 + $0x2d8] sm:$0xff] %vm1846_vm6, %v4226_v7  ;;  %v4224_v19 = vmax.f32 %v4192_v36, 0.0  ;;  %v4197_v45 = vadd.f32 %v9339_v55, %v4158_v26  ;;  %v4156_v9 = vadd.f32 %v4113_v27, %v3870_v46  ;;  %v3873_v4 = vadd.f32 %v6864_v57, %v3607_v11 }
 0x26e   : > { %v3830_v37 = vpop.f32.mrf.mxu0 }
 0x26f   : > { %v9429_v33 = vpop.f32.mrf.mxu1  ;;  %5828 = vst.msk [vmem:[%s8415_s27 + $0x2c8] sm:$0xff] %vm1846_vm6, %v4224_v19  ;;  %v4229_v22 = vmax.f32 %v4197_v45, 0.0  ;;  %v4195_v14 = vadd.f32 %v9339_v55, %v4156_v9  ;;  %v4159_v39 = vadd.f32 %v6912_v21, %v3873_v4  ;;  %v3871_v32 = vadd.f32 %v3830_v37, %v3599_v31 }
 0x270   : > { %v9436_v3 = vpop.f32.mrf.mxu0 }
 0x271   : > { %v9434_v18 = vpop.f32.mrf.mxu1  ;;  %5833 = vst.msk [vmem:[%s8415_s27 + $0x2f0] sm:$0xff] %vm1846_vm6, %v4229_v22  ;;  %v4227_v23 = vmax.f32 %v4195_v14, 0.0  ;;  %v4198_v12 = vadd.f32 %v9339_v55, %v4159_v39  ;;  %v4157_v35 = vadd.f32 %v4116_v53, %v3871_v32 }
 0x272   : > { %v9443_v44 = vpop.f32.mrf.mxu0 }
 0x273   : > { %v9441_v52 = vpop.f32.mrf.mxu1  ;;  %5831 = vst.msk [vmem:[%s8415_s27 + $0x2e0] sm:$0xff] %vm1846_vm6, %v4227_v23  ;;  %v4230_v15 = vmax.f32 %v4198_v12, 0.0  ;;  %v4196_v56 = vadd.f32 %v9339_v55, %v4157_v35 }
 0x274   : > { %v9450_v48 = vpop.f32.mrf.mxu0 }
 0x275   : > { %v9448_v2 = vpop.f32.mrf.mxu1  ;;  %5834 = vst.msk [vmem:[%s8415_s27 + $0x2f8] sm:$0xff] %vm1846_vm6, %v4230_v15  ;;  %v4228_v63 = vmax.f32 %v4196_v56, 0.0 }
 0x276   : > { %v9456_v58 = vpop.f32.mrf.mxu0 }
 0x277   : > { %v9454_v43 = vpop.f32.mrf.mxu1  ;;  %5832 = vst.msk [vmem:[%s8415_s27 + $0x2e8] sm:$0xff] %vm1846_vm6, %v4228_v63 }
 0x278   : > { %v9462_v34 = vpop.f32.mrf.mxu0 }
 0x279   : > { %v9460_v38 = vpop.f32.mrf.mxu1 }
 0x27a   : > { %v9466_v55 = vpop.f32.mrf.mxu0 }
 0x27b   : > { %v9464_v16 = vpop.f32.mrf.mxu1 }
 0x27c   : > { %v9470_v17 = vpop.f32.mrf.mxu0 }
 0x27d   : > { %v9468_v40 = vpop.f32.mrf.mxu1 }
 0x27e   : > { %v9474_v49 = vpop.f32.mrf.mxu0 }
 0x27f   : > { %v9472_v61 = vpop.f32.mrf.mxu1 }
 0x280   : > { %v9478_v42 = vpop.f32.mrf.mxu0 }
 0x281   : > { %v9476_v27 = vpop.f32.mrf.mxu1 }
 0x282   : > { %v9482_v10 = vpop.f32.mrf.mxu0 }
 0x283   : > { %v9480_v20 = vpop.f32.mrf.mxu1 }
 0x284   : > { %v9486_v1 = vpop.f32.mrf.mxu0 }
 0x285   : > { %v9484_v29 = vpop.f32.mrf.mxu1 }
 0x286   : > { %v9490_v41 = vpop.f32.mrf.mxu0 }
 0x287   : > { %v9488_v6 = vpop.f32.mrf.mxu1 }
 0x288   : > { %v9494_v21 = vpop.f32.mrf.mxu0 }
 0x289   : > { %v9492_v62 = vpop.f32.mrf.mxu1 }
 0x28a   : > { %v9498_v0 = vpop.f32.mrf.mxu0 }
 0x28b   : > { %v9496_v28 = vpop.f32.mrf.mxu1 }
 0x28c   : > { %v9502_v47 = vpop.f32.mrf.mxu0 }
 0x28d   : > { %v9500_v5 = vpop.f32.mrf.mxu1 }
 0x28e   : > { %v9506_v13 = vpop.f32.mrf.mxu0 }
 0x28f   : > { %v9504_v51 = vpop.f32.mrf.mxu1 }
 0x290   : > { %v9510_v60 = vpop.f32.mrf.mxu0 }
 0x291   : > { %v9508_v25 = vpop.f32.mrf.mxu1 }
 0x292   : > { %v9514_v50 = vpop.f32.mrf.mxu0 }
 0x293   : > { %v9512_v53 = vpop.f32.mrf.mxu1 }
 0x294   : > { %v9518_v11 = vpop.f32.mrf.mxu0 }
 0x295   : > { %v9516_v30 = vpop.f32.mrf.mxu1 }
 0x296   : > { %v9522_v7 = vpop.f32.mrf.mxu0 }
 0x297   : > { %v9520_v54 = vpop.f32.mrf.mxu1 }
 0x298   : > { %v9526_v26 = vpop.f32.mrf.mxu0 }
 0x299   : > { %v9524_v36 = vpop.f32.mrf.mxu1 }
 0x29a   : > { %v9530_v24 = vpop.f32.mrf.mxu0 }
 0x29b   : > { %v9528_v46 = vpop.f32.mrf.mxu1 }
 0x29c   : > { %10122 = vst [vmem:[#allocation36_spill] sm:$0xff] %v9528_v46  ;;  %v9534_v31 = vpop.f32.mrf.mxu0 }
 0x29d   : > { %v9532_v8 = vpop.f32.mrf.mxu1 }
 0x29e   : > { %10123 = vst [vmem:[#allocation37_spill] sm:$0xff] %v9532_v8  ;;  %v9538_v19 = vpop.f32.mrf.mxu0  ;;  %v4614_v8 = vadd.f32 %v9448_v2, %v9462_v34 }
 0x29f   : > { %v9536_v57 = vpop.f32.mrf.mxu1 }
 0x2a0   : > { %10124 = vst [vmem:[#allocation38_spill] sm:$0xff] %v9536_v57  ;;  %v9542_v9 = vpop.f32.mrf.mxu0 }
 0x2a1   : > { %v9540_v45 = vpop.f32.mrf.mxu1  ;;  %10126 = vst [vmem:[#allocation11_spill] sm:$0xff] %v9542_v9 }
 0x2a2   : > { %10125 = vst [vmem:[#allocation45_spill] sm:$0xff] %v9540_v45  ;;  %v9546_v37 = vpop.f32.mrf.mxu0 }
 0x2a3   : > { %v9544_v4 = vpop.f32.mrf.mxu1  ;;  %10128 = vst [vmem:[#allocation14_spill] sm:$0xff] %v9546_v37 }
 0x2a4   : > { %10127 = vst [vmem:[#allocation22_spill] sm:$0xff] %v9544_v4  ;;  %v9550_v14 = vpop.f32.mrf.mxu0 }
 0x2a5   : > { %v9548_v22 = vpop.f32.mrf.mxu1  ;;  %10130 = vst [vmem:[#allocation25_spill] sm:$0xff] %v9550_v14 }
 0x2a6   : > { %10129 = vst [vmem:[#allocation41_spill] sm:$0xff] %v9548_v22  ;;  %v9554_v32 = vpop.f32.mrf.mxu0  ;;  %v4598_v22 = vadd.f32 %v9422_v59, %v9436_v3  ;;  %v4593_v3 = vadd.f32 %v9441_v52, %v9456_v58 }
 0x2a7   : > { %v9552_v39 = vpop.f32.mrf.mxu1  ;;  %10132 = vst [vmem:[#allocation48_spill] sm:$0xff] %v9554_v32 }
 0x2a8   : > { %10131 = vst [vmem:[#allocation43_spill] sm:$0xff] %v9552_v39  ;;  %v9558_v12 = vpop.f32.mrf.mxu0 }
 0x2a9   : > { %v9556_v23 = vpop.f32.mrf.mxu1  ;;  %10134 = vst [vmem:[#allocation15_spill] sm:$0xff] %v9558_v12 }
 0x2aa   : > { %10133 = vst [vmem:[#allocation44_spill] sm:$0xff] %v9556_v23  ;;  %v9562_v15 = vpop.f32.mrf.mxu0  ;;  %v4590_v23 = vadd.f32 %v9429_v33, %v9443_v44 }
 0x2ab   : > { %v9560_v35 = vpop.f32.mrf.mxu1  ;;  %10136 = vst [vmem:[#allocation24_spill] sm:$0xff] %v9562_v15 }
 0x2ac   : > { %10135 = vst [vmem:[#allocation17_spill] sm:$0xff] %v9560_v35  ;;  %v9564_v63 = vpop.f32.mrf.mxu0  ;;  %v9575_v35 = vld [vmem:[%s9738_s2] ss:$0 sm:$0xff] }
 0x2ad   : > { %v7075_v56 = vpop.f32.mrf.mxu1  ;;  %10137 = vst [vmem:[#allocation47_spill] sm:$0xff] %v9564_v63  ;;  %v4601_v63 = vadd.f32 %v9434_v18, %v9450_v48 }
 0x2ae   : > { %v9566_v45 = vpop.f32.mrf.mxu0 }
 0x2af   : > { %v5084_v4 = vpop.f32.mrf.mxu1  ;;  %10138 = vst [vmem:[#allocation27_spill] sm:$0xff] %v9566_v45 }
 0x2b0   : > { %v7027_v14 = vpop.f32.mrf.mxu0 }
 0x2b1   : > { %v7076_v39 = vpop.f32.mrf.mxu1  ;;  %v4944_v32 = vadd.f32 %v7027_v14, %v4598_v22 }
 0x2b2   : > { %v4815_v15 = vpop.f32.mrf.mxu0 }
 0x2b3   : > { %v5087_v12 = vpop.f32.mrf.mxu1  ;;  %v5213_v45 = vadd.f32 %v7075_v56, %v4944_v32  ;;  %v4942_v57 = vadd.f32 %v4815_v15, %v4590_v23  ;;  %v4606_v15 = vadd.f32 %v9454_v43, %v9466_v55 }
 0x2b4   : > { %v7028_v59 = vpop.f32.mrf.mxu0 }
 0x2b5   : > { %v7079_v37 = vpop.f32.mrf.mxu1  ;;  %v5252_v33 = vadd.f32 %v9575_v35, %v5213_v45  ;;  %v5211_v44 = vadd.f32 %v5084_v4, %v4942_v57  ;;  %v4945_v22 = vadd.f32 %v7028_v59, %v4601_v63  ;;  %v4617_v4 = vadd.f32 %v9460_v38, %v9470_v17 }
 0x2b6   : > { %v4818_v9 = vpop.f32.mrf.mxu0  ;;  %v4609_v63 = vadd.f32 %v9464_v16, %v9474_v49 }
 0x2b7   : > { %v5100_v14 = vpop.f32.mrf.mxu1  ;;  %v5284_v46 = vmax.f32 %v5252_v33, 0.0  ;;  %v5250_v18 = vadd.f32 %v9575_v35, %v5211_v44  ;;  %v5214_v48 = vadd.f32 %v7076_v39, %v4945_v22  ;;  %v4943_v32 = vadd.f32 %v4818_v9, %v4593_v3 }
 0x2b8   : > { %v7031_v52 = vpop.f32.mrf.mxu0  ;;  %v4630_v33 = vadd.f32 %v9468_v40, %v9478_v42 }
 0x2b9   : > { %v7080_v23 = vpop.f32.mrf.mxu1  ;;  %5920 = vst.msk [vmem:[%s8415_s27 + $0x310] sm:$0xff] %vm1846_vm6, %v5284_v46  ;;  %v5282_v58 = vmax.f32 %v5250_v18, 0.0  ;;  %v5253_v57 = vadd.f32 %v9575_v35, %v5214_v48  ;;  %v5212_v45 = vadd.f32 %v5087_v12, %v4943_v32  ;;  %v4948_v2 = vadd.f32 %v7031_v52, %v4614_v8 }
 0x2ba   : > { %v4831_v56 = vpop.f32.mrf.mxu0  ;;  %v4622_v48 = vadd.f32 %v9472_v61, %v9482_v10 }
 0x2bb   : > { %v5103_v34 = vpop.f32.mrf.mxu1  ;;  %5918 = vst.msk [vmem:[%s8415_s27 + $0x300] sm:$0xff] %vm1846_vm6, %v5282_v58  ;;  %v5285_v9 = vmax.f32 %v5253_v57, 0.0  ;;  %v5251_v43 = vadd.f32 %v9575_v35, %v5212_v45  ;;  %v5217_v55 = vadd.f32 %v7079_v37, %v4948_v2  ;;  %v4946_v39 = vadd.f32 %v4831_v56, %v4606_v15 }
 0x2bc   : > { %v7032_v59 = vpop.f32.mrf.mxu0  ;;  %v4633_v58 = vadd.f32 %v9476_v27, %v9486_v1 }
 0x2bd   : > { %v7083_v46 = vpop.f32.mrf.mxu1  ;;  %5921 = vst.msk [vmem:[%s8415_s27 + $0x318] sm:$0xff] %vm1846_vm6, %v5285_v9  ;;  %v5283_v8 = vmax.f32 %v5251_v43, 0.0  ;;  %v5256_v38 = vadd.f32 %v9575_v35, %v5217_v55  ;;  %v5215_v17 = vadd.f32 %v5100_v14, %v4946_v39  ;;  %v4949_v12 = vadd.f32 %v7032_v59, %v4617_v4 }
 0x2be   : > { %v4834_v44 = vpop.f32.mrf.mxu0  ;;  %v4625_v4 = vadd.f32 %v9480_v20, %v9490_v41  ;;  %v4646_v55 = vadd.f32 %v9484_v29, %v9494_v21 }
 0x2bf   : > { %v5116_v3 = vpop.f32.mrf.mxu1  ;;  %5919 = vst.msk [vmem:[%s8415_s27 + $0x308] sm:$0xff] %vm1846_vm6, %v5283_v8  ;;  %v5288_v37 = vmax.f32 %v5256_v38, 0.0  ;;  %v5254_v16 = vadd.f32 %v9575_v35, %v5215_v17  ;;  %v5218_v49 = vadd.f32 %v7080_v23, %v4949_v12  ;;  %v4947_v22 = vadd.f32 %v4834_v44, %v4609_v63 }
 0x2c0   : > { %v7035_v32 = vpop.f32.mrf.mxu0  ;;  %v4638_v8 = vadd.f32 %v9488_v6, %v9498_v0 }
 0x2c1   : > { %v7084_v18 = vpop.f32.mrf.mxu1  ;;  %5924 = vst.msk [vmem:[%s8415_s27 + $0x330] sm:$0xff] %vm1846_vm6, %v5288_v37  ;;  %v5286_v14 = vmax.f32 %v5254_v16, 0.0  ;;  %v5257_v40 = vadd.f32 %v9575_v35, %v5218_v49  ;;  %v5216_v42 = vadd.f32 %v5103_v34, %v4947_v22  ;;  %v4952_v15 = vadd.f32 %v7035_v32, %v4630_v33 }
 0x2c2   : > { %v4847_v57 = vpop.f32.mrf.mxu0  ;;  %v4649_v33 = vadd.f32 %v9492_v62, %v9502_v47  ;;  %v4641_v22 = vadd.f32 %v9496_v28, %v9506_v13 }
 0x2c3   : > { %v5119_v52 = vpop.f32.mrf.mxu1  ;;  %5922 = vst.msk [vmem:[%s8415_s27 + $0x320] sm:$0xff] %vm1846_vm6, %v5286_v14  ;;  %v5289_v23 = vmax.f32 %v5257_v40, 0.0  ;;  %v5255_v61 = vadd.f32 %v9575_v35, %v5216_v42  ;;  %v5221_v10 = vadd.f32 %v7083_v46, %v4952_v15  ;;  %v4950_v45 = vadd.f32 %v4847_v57, %v4622_v48 }
 0x2c4   : > { %v7036_v56 = vpop.f32.mrf.mxu0  ;;  %v4662_v40 = vadd.f32 %v9500_v5, %v9510_v60  ;;  %v4654_v57 = vadd.f32 %v9504_v51, %v9514_v50 }
 0x2c5   : > { %v7087_v2 = vpop.f32.mrf.mxu1  ;;  %5925 = vst.msk [vmem:[%s8415_s27 + $0x338] sm:$0xff] %vm1846_vm6, %v5289_v23  ;;  %v5287_v34 = vmax.f32 %v5255_v61, 0.0  ;;  %v5260_v27 = vadd.f32 %v9575_v35, %v5221_v10  ;;  %v5219_v1 = vadd.f32 %v5116_v3, %v4950_v45  ;;  %v4953_v9 = vadd.f32 %v7036_v56, %v4633_v58 }
 0x2c6   : > { %v4850_v39 = vpop.f32.mrf.mxu0 }
 0x2c7   : > { %v5132_v43 = vpop.f32.mrf.mxu1  ;;  %5923 = vst.msk [vmem:[%s8415_s27 + $0x328] sm:$0xff] %vm1846_vm6, %v5287_v34  ;;  %v5292_v46 = vmax.f32 %v5260_v27, 0.0  ;;  %v5258_v20 = vadd.f32 %v9575_v35, %v5219_v1  ;;  %v5222_v41 = vadd.f32 %v7084_v18, %v4953_v9  ;;  %v4951_v63 = vadd.f32 %v4850_v39, %v4625_v4 }
 0x2c8   : > { %v7039_v38 = vpop.f32.mrf.mxu0  ;;  %v4657_v1 = vadd.f32 %v9512_v53, %v9522_v7 }
 0x2c9   : > { %v7088_v59 = vpop.f32.mrf.mxu1  ;;  %5928 = vst.msk [vmem:[%s8415_s27 + $0x350] sm:$0xff] %vm1846_vm6, %v5292_v46  ;;  %v5290_v17 = vmax.f32 %v5258_v20, 0.0  ;;  %v5261_v29 = vadd.f32 %v9575_v35, %v5222_v41  ;;  %v5220_v21 = vadd.f32 %v5119_v52, %v4951_v63  ;;  %v4956_v12 = vadd.f32 %v7039_v38, %v4646_v55 }
 0x2ca   : > { %v4863_v44 = vpop.f32.mrf.mxu0  ;;  %v4678_v46 = vadd.f32 %v9516_v30, %v9526_v26 }
 0x2cb   : > { %v5135_v3 = vpop.f32.mrf.mxu1  ;;  %5926 = vst.msk [vmem:[%s8415_s27 + $0x340] sm:$0xff] %vm1846_vm6, %v5290_v17  ;;  %v5293_v37 = vmax.f32 %v5261_v29, 0.0  ;;  %v5259_v6 = vadd.f32 %v9575_v35, %v5220_v21  ;;  %v5225_v0 = vadd.f32 %v7087_v2, %v4956_v12  ;;  %v4954_v16 = vadd.f32 %v4863_v44, %v4638_v8 }
 0x2cc   : > { %v7040_v18 = vpop.f32.mrf.mxu0  ;;  %v4665_v2 = vadd.f32 %v9508_v25, %v9518_v11  ;;  %v4670_v8 = vadd.f32 %v9520_v54, %v9530_v24  ;;  %v4681_v12 = vadd.f32 %v9524_v36, %v9534_v31 }
 0x2cd   : > { %v7091_v49 = vpop.f32.mrf.mxu1  ;;  %5929 = vst.msk [vmem:[%s8415_s27 + $0x358] sm:$0xff] %vm1846_vm6, %v5293_v37  ;;  %v5291_v48 = vmax.f32 %v5259_v6, 0.0  ;;  %v5264_v62 = vadd.f32 %v9575_v35, %v5225_v0  ;;  %v5223_v47 = vadd.f32 %v5132_v43, %v4954_v16  ;;  %v4957_v32 = vadd.f32 %v7040_v18, %v4649_v33  ;;  %v10139_v6 = vld [vmem:[#allocation36_spill] sm:$0xff] }
 0x2ce   : > { %v4866_v42 = vpop.f32.mrf.mxu0  ;;  %v4673_v0 = vadd.f32 %v10139_v6, %v9538_v19 }
 0x2cf   : > { %v5148_v14 = vpop.f32.mrf.mxu1  ;;  %5927 = vst.msk [vmem:[%s8415_s27 + $0x348] sm:$0xff] %vm1846_vm6, %v5291_v48  ;;  %v5296_v15 = vmax.f32 %v5264_v62, 0.0  ;;  %v5262_v28 = vadd.f32 %v9575_v35, %v5223_v47  ;;  %v5226_v13 = vadd.f32 %v7088_v59, %v4957_v32  ;;  %v4955_v52 = vadd.f32 %v4866_v42, %v4641_v22  ;;  %v10140_v48 = vld [vmem:[#allocation11_spill] sm:$0xff]  ;;  %v10141_v62 = vld [vmem:[#allocation37_spill] sm:$0xff] }
 0x2d0   : > { %v7043_v23 = vpop.f32.mrf.mxu0  ;;  %v4694_v47 = vadd.f32 %v10141_v62, %v10140_v48 }
 0x2d1   : > { %v7092_v58 = vpop.f32.mrf.mxu1  ;;  %5932 = vst.msk [vmem:[%s8415_s27 + $0x370] sm:$0xff] %vm1846_vm6, %v5296_v15  ;;  %v5294_v61 = vmax.f32 %v5262_v28, 0.0  ;;  %v5265_v5 = vadd.f32 %v9575_v35, %v5226_v13  ;;  %v5224_v60 = vadd.f32 %v5135_v3, %v4955_v52  ;;  %v4960_v10 = vadd.f32 %v7043_v23, %v4662_v40  ;;  %v10142_v28 = vld [vmem:[#allocation14_spill] sm:$0xff] }
 0x2d2   : > { %v4879_v4 = vpop.f32.mrf.mxu0  ;;  %v10143_v13 = vld [vmem:[#allocation38_spill] sm:$0xff] }
 0x2d3   : > { %v5151_v45 = vpop.f32.mrf.mxu1  ;;  %5930 = vst.msk [vmem:[%s8415_s27 + $0x360] sm:$0xff] %vm1846_vm6, %v5294_v61  ;;  %v5297_v56 = vmax.f32 %v5265_v5, 0.0  ;;  %v5263_v51 = vadd.f32 %v9575_v35, %v5224_v60  ;;  %v5229_v50 = vadd.f32 %v7091_v49, %v4960_v10  ;;  %v4958_v34 = vadd.f32 %v4879_v4, %v4654_v57  ;;  %v10144_v10 = vld [vmem:[#allocation25_spill] sm:$0xff] }
 0x2d4   : > { %v7044_v9 = vpop.f32.mrf.mxu0  ;;  %v4686_v52 = vadd.f32 %v10143_v13, %v10142_v28 }
 0x2d5   : > { %v7095_v27 = vpop.f32.mrf.mxu1  ;;  %5933 = vst.msk [vmem:[%s8415_s27 + $0x378] sm:$0xff] %vm1846_vm6, %v5297_v56  ;;  %v5295_v43 = vmax.f32 %v5263_v51, 0.0  ;;  %v5268_v25 = vadd.f32 %v9575_v35, %v5229_v50  ;;  %v5227_v11 = vadd.f32 %v5148_v14, %v4958_v34  ;;  %v4961_v55 = vadd.f32 %v7044_v9, %v4665_v2 }
 0x2d6   : > { %v4882_v20 = vpop.f32.mrf.mxu0 }
 0x2d7   : > { %v5164_v39 = vpop.f32.mrf.mxu1  ;;  %5931 = vst.msk [vmem:[%s8415_s27 + $0x368] sm:$0xff] %vm1846_vm6, %v5295_v43  ;;  %v5300_v41 = vmax.f32 %v5268_v25, 0.0  ;;  %v5266_v53 = vadd.f32 %v9575_v35, %v5227_v11  ;;  %v5230_v7 = vadd.f32 %v7092_v58, %v4961_v55  ;;  %v4959_v63 = vadd.f32 %v4882_v20, %v4657_v1  ;;  %v10147_v1 = vld [vmem:[#allocation22_spill] sm:$0xff]  ;;  %v10148_v20 = vld [vmem:[#allocation15_spill] sm:$0xff] }
 0x2d8   : > { %v7047_v38 = vpop.f32.mrf.mxu0 }
 0x2d9   : > { %v7096_v59 = vpop.f32.mrf.mxu1  ;;  %5936 = vst.msk [vmem:[%s8415_s27 + $0x390] sm:$0xff] %vm1846_vm6, %v5300_v41  ;;  %v5298_v17 = vmax.f32 %v5266_v53, 0.0  ;;  %v5269_v30 = vadd.f32 %v9575_v35, %v5230_v7  ;;  %v5228_v26 = vadd.f32 %v5151_v45, %v4959_v63  ;;  %v4964_v29 = vadd.f32 %v7047_v38, %v4678_v46  ;;  %v10145_v45 = vld [vmem:[#allocation45_spill] sm:$0xff] }
 0x2da   : > { %v4895_v3 = vpop.f32.mrf.mxu0  ;;  %v4697_v2 = vadd.f32 %v10145_v45, %v10144_v10  ;;  %v10149_v41 = vld [vmem:[#allocation41_spill] sm:$0xff] }
 0x2db   : > { %v5167_v21 = vpop.f32.mrf.mxu1  ;;  %5934 = vst.msk [vmem:[%s8415_s27 + $0x380] sm:$0xff] %vm1846_vm6, %v5298_v17  ;;  %v5301_v33 = vmax.f32 %v5269_v30, 0.0  ;;  %v5267_v54 = vadd.f32 %v9575_v35, %v5228_v26  ;;  %v5233_v24 = vadd.f32 %v7095_v27, %v4964_v29  ;;  %v4962_v44 = vadd.f32 %v4895_v3, %v4670_v8  ;;  %v10146_v27 = vld [vmem:[#allocation48_spill] sm:$0xff]  ;;  %v10151_v30 = vld [vmem:[#allocation43_spill] sm:$0xff] }
 0x2dc   : > { %v7048_v16 = vpop.f32.mrf.mxu0  ;;  %v4689_v9 = vadd.f32 %v10147_v1, %v10146_v27  ;;  %v4710_v53 = vadd.f32 %v10149_v41, %v10148_v20  ;;  %v10150_v17 = vld [vmem:[#allocation24_spill] sm:$0xff] }
 0x2dd   : > { %v7099_v37 = vpop.f32.mrf.mxu1  ;;  %5937 = vst.msk [vmem:[%s8415_s27 + $0x398] sm:$0xff] %vm1846_vm6, %v5301_v33  ;;  %v5299_v49 = vmax.f32 %v5267_v54, 0.0  ;;  %v5272_v36 = vadd.f32 %v9575_v35, %v5233_v24  ;;  %v5231_v31 = vadd.f32 %v5164_v39, %v4962_v44  ;;  %v4965_v22 = vadd.f32 %v7048_v16, %v4681_v12  ;;  %v10152_v24 = vld [vmem:[#allocation47_spill] sm:$0xff]  ;;  %v10153_v44 = vld [vmem:[#allocation44_spill] sm:$0xff] }
 0x2de   : > { %v4898_v32 = vpop.f32.mrf.mxu0  ;;  %v4702_v26 = vadd.f32 %v10151_v30, %v10150_v17 }
 0x2df   : > { %v5180_v18 = vpop.f32.mrf.mxu1  ;;  %5935 = vst.msk [vmem:[%s8415_s27 + $0x388] sm:$0xff] %vm1846_vm6, %v5299_v49  ;;  %v5304_v14 = vmax.f32 %v5272_v36, 0.0  ;;  %v5270_v19 = vadd.f32 %v9575_v35, %v5231_v31  ;;  %v5234_v40 = vadd.f32 %v7096_v59, %v4965_v22  ;;  %v4963_v42 = vadd.f32 %v4898_v32, %v4673_v0  ;;  %v10154_v31 = vld [vmem:[#allocation27_spill] sm:$0xff]  ;;  %v10155_v22 = vld [vmem:[#allocation17_spill] sm:$0xff] }
 0x2e0   : > { %v7051_v58 = vpop.f32.mrf.mxu0 }
 0x2e1   : > { %v7100_v15 = vpop.f32.mrf.mxu1  ;;  %5940 = vst.msk [vmem:[%s8415_s27 + $0x3b0] sm:$0xff] %vm1846_vm6, %v5304_v14  ;;  %v5302_v57 = vmax.f32 %v5270_v19, 0.0  ;;  %v5273_v23 = vadd.f32 %v9575_v35, %v5234_v40  ;;  %v5232_v61 = vadd.f32 %v5167_v21, %v4963_v42  ;;  %v4968_v5 = vadd.f32 %v7051_v58, %v4694_v47 }
 0x2e2   : > { %v4911_v4 = vpop.f32.mrf.mxu0 }
 0x2e3   : > { %v5183_v60 = vpop.f32.mrf.mxu1  ;;  %5938 = vst.msk [vmem:[%s8415_s27 + $0x3a0] sm:$0xff] %vm1846_vm6, %v5302_v57  ;;  %v5305_v56 = vmax.f32 %v5273_v23, 0.0  ;;  %v5271_v51 = vadd.f32 %v9575_v35, %v5232_v61  ;;  %v5237_v50 = vadd.f32 %v7099_v37, %v4968_v5  ;;  %v4966_v34 = vadd.f32 %v4911_v4, %v4686_v52 }
 0x2e4   : > { %v7052_v43 = vpop.f32.mrf.mxu0  ;;  %v4713_v37 = vadd.f32 %v10153_v44, %v10152_v24 }
 0x2e5   : > { %v7103_v25 = vpop.f32.mrf.mxu1  ;;  %5941 = vst.msk [vmem:[%s8415_s27 + $0x3b8] sm:$0xff] %vm1846_vm6, %v5305_v56  ;;  %v5303_v11 = vmax.f32 %v5271_v51, 0.0  ;;  %v5276_v55 = vadd.f32 %v9575_v35, %v5237_v50  ;;  %v5235_v39 = vadd.f32 %v5180_v18, %v4966_v34  ;;  %v4969_v46 = vadd.f32 %v7052_v43, %v4697_v2 }
 0x2e6   : > { %v4914_v7 = vpop.f32.mrf.mxu0  ;;  %v4705_v18 = vadd.f32 %v10155_v22, %v10154_v31 }
 0x2e7   : > { %5939 = vst.msk [vmem:[%s8415_s27 + $0x3a8] sm:$0xff] %vm1846_vm6, %v5303_v11  ;;  %v5308_v63 = vmax.f32 %v5276_v55, 0.0  ;;  %v5274_v59 = vadd.f32 %v9575_v35, %v5235_v39  ;;  %v5238_v8 = vadd.f32 %v7100_v15, %v4969_v46  ;;  %v4967_v38 = vadd.f32 %v4914_v7, %v4689_v9  ;;  %v5196_v21 = vpop.f32.mrf.mxu1 }
 0x2e8   : > { %v7055_v29 = vpop.f32.mrf.mxu0 }
 0x2e9   : > { %5944 = vst.msk [vmem:[%s8415_s27 + $0x3d0] sm:$0xff] %vm1846_vm6, %v5308_v63  ;;  %v5306_v12 = vmax.f32 %v5274_v59, 0.0  ;;  %v5277_v3 = vadd.f32 %v9575_v35, %v5238_v8  ;;  %v5236_v33 = vadd.f32 %v5183_v60, %v4967_v38  ;;  %v4972_v54 = vadd.f32 %v7055_v29, %v4710_v53  ;;  %v7104_v62 = vpop.f32.mrf.mxu1 }
 0x2ea   : > { %v4927_v6 = vpop.f32.mrf.mxu0 }
 0x2eb   : > { %5942 = vst.msk [vmem:[%s8415_s27 + $0x3c0] sm:$0xff] %vm1846_vm6, %v5306_v12  ;;  %v5309_v0 = vmax.f32 %v5277_v3, 0.0  ;;  %v5275_v16 = vadd.f32 %v9575_v35, %v5236_v33  ;;  %v5241_v49 = vadd.f32 %v7103_v25, %v4972_v54  ;;  %v4970_v36 = vadd.f32 %v4927_v6, %v4702_v26  ;;  %v5199_v52 = vpop.f32.mrf.mxu1 }
 0x2ec   : > { %v7056_v48 = vpop.f32.mrf.mxu0 }
 0x2ed   : > { %5945 = vst.msk [vmem:[%s8415_s27 + $0x3d8] sm:$0xff] %vm1846_vm6, %v5309_v0  ;;  %v5307_v47 = vmax.f32 %v5275_v16, 0.0  ;;  %v5280_v32 = vadd.f32 %v9575_v35, %v5241_v49  ;;  %v5239_v14 = vadd.f32 %v5196_v21, %v4970_v36  ;;  %v4973_v19 = vadd.f32 %v7056_v48, %v4713_v37 }
 0x2ee   : > { %v4930_v40 = vpop.f32.mrf.mxu0 }
 0x2ef   : > { %5943 = vst.msk [vmem:[%s8415_s27 + $0x3c8] sm:$0xff] %vm1846_vm6, %v5307_v47  ;;  %v5312_v42 = vmax.f32 %v5280_v32, 0.0  ;;  %v5278_v15 = vadd.f32 %v9575_v35, %v5239_v14  ;;  %v5242_v28 = vadd.f32 %v7104_v62, %v4973_v19  ;;  %v4971_v13 = vadd.f32 %v4930_v40, %v4705_v18 }
 0x2f1   : > { %5948 = vst.msk [vmem:[%s8415_s27 + $0x3f0] sm:$0xff] %vm1846_vm6, %v5312_v42  ;;  %v5310_v58 = vmax.f32 %v5278_v15, 0.0  ;;  %v5281_v57 = vadd.f32 %v9575_v35, %v5242_v28  ;;  %v5240_v23 = vadd.f32 %v5199_v52, %v4971_v13 }
 0x2f3   : > { %5946 = vst.msk [vmem:[%s8415_s27 + $0x3e0] sm:$0xff] %vm1846_vm6, %v5310_v58  ;;  %v5313_v61 = vmax.f32 %v5281_v57, 0.0  ;;  %v5279_v5 = vadd.f32 %v9575_v35, %v5240_v23 }
 0x2f5   : > { %5949 = vst.msk [vmem:[%s8415_s27 + $0x3f8] sm:$0xff] %vm1846_vm6, %v5313_v61  ;;  %v5311_v60 = vmax.f32 %v5279_v5, 0.0 }
 0x2f7   : > { %5947 = vst.msk [vmem:[%s8415_s27 + $0x3e8] sm:$0xff] %vm1846_vm6, %v5311_v60 }
 0x2f8 PF: > { %s13_s12 = sadd.s32 1, %s7282_s12  }
 0x2f9   : > { %p10_p4 = scmp.ge.s32.totalorder %s13_s12, 4  }
 0x2fb   :  { %12 = sbr.rel (!%p10_p4) target bundleno = 1 (0x1), region = 80 }

// kernel: decoder_block_forward.2
= control target key start
LH: loop header
LB: loop body
LE: loop exit
PB: predicated region body
PF: predicated region fallthrough
CT: control target
= control target key end

     0   :  { %s5262_s12 = smov 0   ;;  %s7024_s0 = inlined_call_operand.vmem [shape: bf16[2,18,18,128], index: 0, kind: input, shape index: {}]   ;;  %s7025_s1 = inlined_call_operand.vmem [shape: bf16[3,3,128,128], index: 1, kind: input, shape index: {}]   ;;  %s7026_s2 = inlined_call_operand.vmem [shape: f32[1,128], index: 2, kind: input, shape index: {}]   ;;  %s7027_s3 = inlined_call_operand.vmem [shape: bf16[2,18,18,128], index: 3, kind: output, shape index: {}]  }
   0x1 LB: > { %s4034_s13 = sadd.s32 4294967295, %s5239_s12   ;;  %p4038_p0 = scmp.ge.s32.totalorder %s5239_s12, 1  ;;  %s5239_s12 = sphi %s5262_s12, %s13_s12  }
   0x2   : > { %p137_p1 = scmp.lt.s32.totalorder %s5239_s12, 3 }
   0x4   : > { %p138_p2 = pnand %p4038_p0, %p137_p1 }
   0x6   : > { %141 = sbr.rel (%p138_p2) target bundleno = 589 (0x24d), region = 32 }
   0xb   : > { %v5134_v0 = vld [vmem:[%s7025_s1 + $0x78] sm:$0xff]   ;;  %p161_p3 = scmp.lt.s32.totalorder %s4034_s13, 1  ;;  %v5135_v1 = vld [vmem:[%s7025_s1 + $0x70] sm:$0xff]   ;;  %v5136_v2 = vld [vmem:[%s7025_s1 + $0x68] sm:$0xff]   ;;  %vm242_vm0 = vsmask.f32 3328 }
   0xc   : > { %4676 = vmatprep.subr.bf16.mxu0 %v5134_v0  ;;  %5108 = vmatprep.subr.bf16.mxu1 %v5134_v0  ;;  %v5137_v3 = vld [vmem:[%s7025_s1 + $0x60] sm:$0xff]   ;;  %vm243_vm1 = vsmask.f32 7440  ;;  %v5138_v9 = vld [vmem:[%s7025_s1 + $0x58] sm:$0xff]   ;;  %v5139_v28 = vld [vmem:[%s7025_s1 + $0x50] sm:$0xff]   ;;  %v7064_v29 = vmov 0 }
   0xd   : > { %s7133_s13 = smov (!%p161_p3, %s4034_s13), 1  ;;  %4677 = vmatpush3.bf16.msra.mxu0 %v5134_v0  ;;  %5116 = vmatpush3.bf16.msra.mxu1 %v5134_v0  ;;  %vm5321_vm2 = vmor %vm242_vm0, %vm243_vm1  ;;  %v5140_v59 = vld [vmem:[%s7025_s1 + $0x48] sm:$0xff]   ;;  %vm1240_vm3 = vcmask 1042432   ;;  %vm1241_vm4 = vcmask 1046532   ;;  %vm3862_vm6 = vcmask 1043456   ;;  %vm3869_vm10 = vcmask 1040384  }
   0xe   : > { %4678 = vmatprep.subr.bf16.mxu0 %v5135_v1  ;;  %5109 = vmatprep.subr.bf16.mxu1 %v5135_v1  ;;  %s5124_s20 = smul.u32 216, %s7133_s13  ;;  %v7065_v29 = vsel %vm5321_vm2, 4294967295, %v7064_v29  ;;  %vm5667_vm5 = vmor %vm1240_vm3, %vm1241_vm4  ;;  %vm3863_vm7 = vsmask.f32 7938  ;;  %vm3538_vm8 = vsmask.f32 256 }
   0xf   : > { %7066 = vst [vmem:[#allocation2_spill] sm:$0xff] %v7065_v29  ;;  %vm3539_vm9 = vsmask.f32 4368  ;;  %vm6686_vm11 = vmand %vm3862_vm6, %vm3863_vm7 }
  0x10   : > { %s5287_s23 = scalar_lea.vmem %s7024_s0, %s5124_s20  ;;  %s6396_s25 = scalar_lea.vmem %s7027_s3, %s5124_s20  ;;  %vm6701_vm12 = vmor %vm3538_vm8, %vm3539_vm9 }
  0x11   : > { %4679 = vmatpush3.bf16.msra.mxu0 %v5135_v1  ;;  %5117 = vmatpush3.bf16.msra.mxu1 %v5135_v1  ;;  %v5293_v4 = vld [vmem:[%s5287_s23] sm:$0xf]  ;;  %v5296_v5 = vld [vmem:[%s5287_s23 + $0x4] sm:$0xf]  ;;  %v5299_v6 = vld [vmem:[%s5287_s23 + $0x8] sm:$0x1] }
  0x12   : > { %4680 = vmatprep.subr.bf16.mxu0 %v5136_v2  ;;  %5110 = vmatprep.subr.bf16.mxu1 %v5136_v2  ;;  %v246_v7 = vshrl.u32 %v5293_v4, 16  ;;  %v249_v8 = vshll.u32 %v5293_v4, 16  ;;  %v255_v10 = vshll.u32 %v5296_v5, 16  ;;  %v259_v11 = vshrl.u32 %v5296_v5, 16  ;;  %v196_v14 = vld [vmem:[%s5287_s23 + $0x60] sm:$0xf]  ;;  %vm6710_vm13 = vmand %vm3869_vm10, %vm3538_vm8 }
  0x13   : > { %v265_v12 = vshll.u32 %v5299_v6, 16  ;;  %v197_v17 = vld [vmem:[%s5287_s23 + $0x64] sm:$0xf]  ;;  %v198_v18 = vld [vmem:[%s5287_s23 + $0x68] sm:$0x1]  ;;  %v438_v22 = vshrl.u32 %v196_v14, 16 }
  0x14   : > { %v248_v15 = vrot.slane %v246_v7, 4  ;;  %v251_v16 = vrot.slane %v249_v8, 5  ;;  %v257_v19 = vrot.slane %v255_v10, 5  ;;  %v261_v20 = vrot.slane %v259_v11, 4  ;;  %v5314_v23 = vld [vmem:[%s5287_s23 + $0xc] sm:$0xf] }
  0x15   : > { %4681 = vmatpush3.bf16.msra.mxu0 %v5136_v2  ;;  %5118 = vmatpush3.bf16.msra.mxu1 %v5136_v2  ;;  %v267_v21 = vrot.slane %v265_v12, 5  ;;  %v441_v25 = vshll.u32 %v196_v14, 16  ;;  %v447_v26 = vshll.u32 %v197_v17, 16  ;;  %v451_v27 = vshrl.u32 %v197_v17, 16  ;;  %v5326_v33 = vld [vmem:[%s5287_s23 + $0x10] sm:$0xf] }
  0x16   : > { %4682 = vmatprep.subr.bf16.mxu0 %v5137_v3  ;;  %5111 = vmatprep.subr.bf16.mxu1 %v5137_v3  ;;  %v252_v24 = vor.u32 %v251_v16, %v248_v15  ;;  %v262_v30 = vor.u32 %v261_v20, %v257_v19  ;;  %v440_v31 = vrot.slane %v438_v22, 4  ;;  %v457_v32 = vshll.u32 %v198_v18, 16  ;;  %v5330_v39 = vld [vmem:[%s5287_s23 + $0x14] sm:$0x1]  ;;  %v199_v44 = vld [vmem:[%s5287_s23 + $0x6c] sm:$0xf] }
  0x17   : > { %v270_v34 = vshrl.u32 %v5314_v23, 16  ;;  %v443_v36 = vrot.slane %v441_v25, 5  ;;  %v449_v37 = vrot.slane %v447_v26, 5  ;;  %v453_v38 = vrot.slane %v451_v27, 4  ;;  %v200_v49 = vld [vmem:[%s5287_s23 + $0x70] sm:$0xf] }
  0x18   : > { %v253_v35 = vrot.slane %v252_v24, 4  ;;  %v263_v40 = vrot.slane %v262_v30, 4  ;;  %v459_v41 = vrot.slane %v457_v32, 5  ;;  %v273_v43 = vshll.u32 %v5314_v23, 16  ;;  %v201_v54 = vld [vmem:[%s5287_s23 + $0x74] sm:$0x1] }
  0x19   : > { %4683 = vmatpush3.bf16.msra.mxu0 %v5137_v3  ;;  %5119 = vmatpush3.bf16.msra.mxu1 %v5137_v3  ;;  %v272_v42 = vrot.slane %v270_v34, 4  ;;  %v444_v46 = vor.u32 %v443_v36, %v440_v31  ;;  %v454_v47 = vor.u32 %v453_v38, %v449_v37  ;;  %v279_v48 = vshll.u32 %v5326_v33, 16  ;;  %v5354_v16 = vld [vmem:[%s5287_s23 + $0x18] sm:$0xf]  ;;  %v5141_v17 = vld [vmem:[%s7025_s1 + $0x40] sm:$0xff]  }
  0x1a   : > { %4684 = vmatprep.subr.bf16.mxu0 %v5138_v9  ;;  %5112 = vmatprep.subr.bf16.mxu1 %v5138_v9  ;;  %v258_v45 = vsel %vm5321_vm2, %v253_v35, %v257_v19  ;;  %v268_v50 = vsel %vm5321_vm2, %v263_v40, %v267_v21  ;;  %v275_v51 = vrot.slane %v273_v43, 5  ;;  %v283_v52 = vshrl.u32 %v5326_v33, 16  ;;  %v5362_v21 = vld [vmem:[%s5287_s23 + $0x1c] sm:$0xf]  ;;  %v5370_v27 = vld [vmem:[%s5287_s23 + $0x20] sm:$0x1] }
  0x1b   : > { %v289_v53 = vshll.u32 %v5330_v39, 16  ;;  %v4057_v55 = vcombine.low %v258_v45, %v268_v50  ;;  %v445_v56 = vrot.slane %v444_v46, 4  ;;  %v455_v57 = vrot.slane %v454_v47, 4  ;;  %v202_v35 = vld [vmem:[%s5287_s23 + $0x78] sm:$0xf] }
  0x1c   : > { %v281_v58 = vrot.slane %v279_v48, 5  ;;  %v276_v60 = vor.u32 %v275_v51, %v272_v42  ;;  %v285_v61 = vrot.slane %v283_v52, 4  ;;  %v462_v2 = vshrl.u32 %v199_v44, 16  ;;  %v5142_v42 = vld [vmem:[%s7025_s1 + $0x38] sm:$0xff]  }
  0x1d   : > { %4685 = vmatpush3.bf16.msra.mxu0 %v5138_v9  ;;  %5120 = vmatpush3.bf16.msra.mxu1 %v5138_v9  ;;  %v291_v62 = vrot.slane %v289_v53, 5  ;;  %v450_v0 = vsel %vm5321_vm2, %v445_v56, %v449_v37  ;;  %v460_v1 = vsel %vm5321_vm2, %v455_v57, %v459_v41  ;;  %v465_v3 = vshll.u32 %v199_v44, 16  ;;  %v5382_v41 = vld [vmem:[%s5287_s23 + $0x7c] sm:$0xf]  ;;  %v5396_v57 = vld [vmem:[%s5287_s23 + $0x24] sm:$0xf] }
  0x1e   : > { %4686 = vmatprep.subr.bf16.mxu0 %v5139_v28  ;;  %5113 = vmatprep.subr.bf16.mxu1 %v5139_v28  ;;  %v5351_v7 = vcombine.low %v450_v0, %v460_v1  ;;  %v277_v8 = vrot.slane %v276_v60, 4  ;;  %v286_v9 = vor.u32 %v285_v61, %v281_v58  ;;  %v471_v10 = vshll.u32 %v200_v49, 16  ;;  %v5143_v43 = vld [vmem:[%s7025_s1 + $0xb8] sm:$0xff]   ;;  %v5405_v0 = vld [vmem:[%s5287_s23 + $0x28] sm:$0xf] }
  0x1f   : > { %4692 = vmatprep.mubr.bf16.mxu0 %v4057_v55  ;;  %v464_v11 = vrot.slane %v462_v2, 4  ;;  %v467_v12 = vrot.slane %v465_v3, 5  ;;  %v475_v14 = vshrl.u32 %v200_v49, 16  ;;  %v481_v15 = vshll.u32 %v201_v54, 16  ;;  %v204_v55 = vld [vmem:[%s5287_s23 + $0x80] sm:$0x1] }
  0x20   : > { %7067 = vst [vmem:[#allocation3_spill] sm:$0xff] %v5351_v7  ;;  %v282_v18 = vsel %vm5321_vm2, %v277_v8, %v281_v58  ;;  %v287_v19 = vrot.slane %v286_v9, 4  ;;  %v473_v20 = vrot.slane %v471_v10, 5  ;;  %v5366_v22 = vcombine.low %v5314_v23, %v5326_v33  ;;  %4708 = vmatprep.mubr.bf16.mxu1 %v5351_v7  ;;  %v5145_v2 = vld [vmem:[%s7025_s1 + $0xb0] sm:$0xff]   ;;  %v5413_v10 = vld [vmem:[%s5287_s23 + $0x2c] sm:$0x1] }
  0x21   : > { %4687 = vmatpush3.bf16.msra.mxu0 %v5139_v28  ;;  %5121 = vmatpush3.bf16.msra.mxu1 %v5139_v28  ;;  %v468_v24 = vor.u32 %v467_v12, %v464_v11  ;;  %v477_v25 = vrot.slane %v475_v14, 4  ;;  %v483_v26 = vrot.slane %v481_v15, 5  ;;  %v294_v28 = vshrl.u32 %v5354_v16, 16  ;;  %v5416_v11 = vld [vmem:[%s5287_s23 + $0x84] sm:$0xf] }
  0x22   : > { %4688 = vmatprep.subr.bf16.mxu0 %v5140_v59  ;;  %5114 = vmatprep.subr.bf16.mxu1 %v5140_v59  ;;  %v292_v30 = vsel %vm5321_vm2, %v287_v19, %v291_v62  ;;  %v297_v31 = vshll.u32 %v5354_v16, 16  ;;  %v303_v32 = vshll.u32 %v5362_v21, 16  ;;  %v307_v34 = vshrl.u32 %v5362_v21, 16 }
  0x23   : > { %v5379_v36 = vcombine.low %v282_v18, %v292_v30  ;;  %v469_v37 = vrot.slane %v468_v24, 4  ;;  %v478_v38 = vor.u32 %v477_v25, %v473_v20  ;;  %v296_v40 = vrot.slane %v294_v28, 4  ;;  %v5420_v18 = vld [vmem:[%s5287_s23 + $0x88] sm:$0xf] }
  0x24   : > { %v299_v44 = vrot.slane %v297_v31, 5  ;;  %v305_v45 = vrot.slane %v303_v32, 5  ;;  %v309_v46 = vrot.slane %v307_v34, 4  ;;  %v313_v47 = vshll.u32 %v5370_v27, 16  ;;  %v5147_v28 = vld [vmem:[%s7025_s1 + $0xa8] sm:$0xff]  }
  0x25   : > { %4689 = vmatpush3.bf16.msra.mxu0 %v5140_v59  ;;  %5122 = vmatpush3.bf16.msra.mxu1 %v5140_v59  ;;  %7068 = vst [vmem:[#allocation4_spill] sm:$0xff] %v5379_v36  ;;  %v474_v48 = vsel %vm5321_vm2, %v469_v37, %v473_v20  ;;  %v479_v49 = vrot.slane %v478_v38, 4  ;;  %v486_v50 = vshrl.u32 %v202_v35, 16  ;;  %v489_v51 = vshll.u32 %v202_v35, 16  ;;  %v5144_v59 = vld [vmem:[%s7025_s1 + $0x30] sm:$0xff]  }
  0x26   : > { %4690 = vmatprep.subr.bf16.mxu0 %v5141_v17  ;;  %5115 = vmatprep.subr.bf16.mxu1 %v5141_v17  ;;  %v300_v52 = vor.u32 %v299_v44, %v296_v40  ;;  %v310_v53 = vor.u32 %v309_v46, %v305_v45  ;;  %v315_v54 = vrot.slane %v313_v47, 5  ;;  %v495_v56 = vshll.u32 %v5382_v41, 16  ;;  %v5440_v44 = vld [vmem:[%s5287_s23 + $0x8c] sm:$0x1] }
  0x27   : > { %v484_v58 = vsel %vm5321_vm2, %v479_v49, %v483_v26  ;;  %v488_v60 = vrot.slane %v486_v50, 4  ;;  %v491_v61 = vrot.slane %v489_v51, 5  ;;  %v499_v62 = vshrl.u32 %v5382_v41, 16  ;;  %v5146_v26 = vld [vmem:[%s7025_s1 + $0x28] sm:$0xff]   ;;  %v5450_v51 = vld [vmem:[%s5287_s23 + $0x30] sm:$0xf] }
  0x28   : > { %v5407_v1 = vcombine.low %v474_v48, %v484_v58  ;;  %v301_v3 = vrot.slane %v300_v52, 4  ;;  %v311_v8 = vrot.slane %v310_v53, 4  ;;  %v497_v9 = vrot.slane %v495_v56, 5 }
  0x29   : > { %4691 = vmatpush3.bf16.msra.mxu0 %v5141_v17  ;;  %5123 = vmatpush3.bf16.msra.mxu1 %v5141_v17  ;;  %v492_v12 = vor.u32 %v491_v61, %v488_v60  ;;  %v501_v14 = vrot.slane %v499_v62, 4  ;;  %v505_v15 = vshll.u32 %v204_v55, 16  ;;  %v318_v17 = vshrl.u32 %v5396_v57, 16  ;;  %v5149_v62 = vld [vmem:[%s7025_s1 + $0xa0] sm:$0xff]  }
  0x2a   : > { %7069 = vst [vmem:[#allocation5_spill] sm:$0xff] %v5407_v1  ;;  %4724 = vmatprep.subr.bf16.mxu1 %v5142_v42  ;;  %4772 = vmatprep.subr.bf16.mxu0 %v5143_v43  ;;  %v306_v19 = vsel %vm5321_vm2, %v301_v3, %v305_v45  ;;  %v316_v20 = vsel %vm5321_vm2, %v311_v8, %v315_v54  ;;  %v321_v24 = vshll.u32 %v5396_v57, 16  ;;  %v327_v25 = vshll.u32 %v5405_v0, 16 }
  0x2b   : > { %v5436_v30 = vcombine.low %v306_v19, %v316_v20  ;;  %v493_v31 = vrot.slane %v492_v12, 4  ;;  %v502_v32 = vor.u32 %v501_v14, %v497_v9  ;;  %v507_v34 = vrot.slane %v505_v15, 5  ;;  %v5472_v19 = vld [vmem:[%s5287_s23 + $0x38] sm:$0x1] }
  0x2c   : > { %4693 = vmatmul.mubr.bf16.vlgmr.msra.gmra.mxu0 %v5379_v36  ;;  %4709 = vmatmul.mubr.bf16.vlgmr.msra.gmra.mxu1 %v5407_v1  ;;  %v320_v35 = vrot.slane %v318_v17, 4  ;;  %v323_v37 = vrot.slane %v321_v24, 5  ;;  %v329_v38 = vrot.slane %v327_v25, 5  ;;  %v331_v40 = vshrl.u32 %v5405_v0, 16  ;;  %v5618_v1 = vld [vmem:[%s5287_s23 + $0x58] sm:$0xf] }
  0x2d   : > { %4725 = vmatpush3.bf16.msra.mxu1 %v5142_v42  ;;  %4773 = vmatpush3.bf16.msra.mxu0 %v5143_v43  ;;  %7070 = vst [vmem:[#allocation6_spill] sm:$0xff] %v5436_v30  ;;  %v498_v42 = vsel %vm5321_vm2, %v493_v31, %v497_v9  ;;  %v503_v43 = vrot.slane %v502_v32, 4  ;;  %v337_v45 = vshll.u32 %v5413_v10, 16  ;;  %v510_v46 = vshrl.u32 %v5416_v11, 16 }
  0x2e   : > { %4726 = vmatprep.subr.bf16.mxu1 %v5144_v59  ;;  %4774 = vmatprep.subr.bf16.mxu0 %v5145_v2  ;;  %v324_v47 = vor.u32 %v323_v37, %v320_v35  ;;  %v333_v48 = vrot.slane %v331_v40, 4  ;;  %v513_v49 = vshll.u32 %v5416_v11, 16  ;;  %v519_v50 = vshll.u32 %v5420_v18, 16 }
  0x2f   : > { %4696 = vmatprep.mubr.bf16.mxu0 %v5436_v30  ;;  %v508_v52 = vsel %vm5321_vm2, %v503_v43, %v507_v34  ;;  %v339_v53 = vrot.slane %v337_v45, 5  ;;  %v512_v54 = vrot.slane %v510_v46, 4  ;;  %v523_v55 = vshrl.u32 %v5420_v18, 16  ;;  %v5477_v34 = vld [vmem:[%s5287_s23 + $0x90] sm:$0xf] }
  0x30   : > { %v5455_v56 = vcombine.low %v498_v42, %v508_v52  ;;  %v325_v58 = vrot.slane %v324_v47, 4  ;;  %v334_v60 = vor.u32 %v333_v48, %v329_v38  ;;  %v515_v61 = vrot.slane %v513_v49, 5  ;;  %v5483_v42 = vld [vmem:[%s5287_s23 + $0x94] sm:$0xf]  ;;  %v5492_v47 = vld [vmem:[%s5287_s23 + $0x98] sm:$0x1] }
  0x31   : > { %4727 = vmatpush3.bf16.msra.mxu1 %v5144_v59  ;;  %4775 = vmatpush3.bf16.msra.mxu0 %v5145_v2  ;;  %v5148_v59 = vld [vmem:[%s7025_s1 + $0x20] sm:$0xff]   ;;  %v5464_v2 = vld [vmem:[%s5287_s23 + $0x34] sm:$0xf]  ;;  %v521_v3 = vrot.slane %v519_v50, 5  ;;  %v525_v8 = vrot.slane %v523_v55, 4  ;;  %v529_v9 = vshll.u32 %v5440_v44, 16 }
  0x32   : > { %7071 = vst [vmem:[#allocation7_spill] sm:$0xff] %v5455_v56  ;;  %4728 = vmatprep.subr.bf16.mxu1 %v5146_v26  ;;  %4776 = vmatprep.subr.bf16.mxu0 %v5147_v28  ;;  %v342_v12 = vshrl.u32 %v5450_v51, 16  ;;  %v330_v14 = vsel %vm5321_vm2, %v325_v58, %v329_v38  ;;  %v335_v15 = vrot.slane %v334_v60, 4  ;;  %v516_v17 = vor.u32 %v515_v61, %v512_v54  ;;  %v5151_v48 = vld [vmem:[%s7025_s1 + $0x98] sm:$0xff]   ;;  %v5504_v55 = vld [vmem:[%s5287_s23 + $0x40] sm:$0xf] }
  0x33   : > { %4712 = vmatprep.mubr.bf16.mxu1 %v5455_v56  ;;  %v345_v20 = vshll.u32 %v5450_v51, 16  ;;  %v526_v24 = vor.u32 %v525_v8, %v521_v3  ;;  %v531_v25 = vrot.slane %v529_v9, 5  ;;  %v351_v32 = vshll.u32 %v5464_v2, 16  ;;  %v5501_v54 = vld [vmem:[%s5287_s23 + $0x3c] sm:$0xf]  ;;  %v5152_v58 = vld [vmem:[%s7025_s1 + $0x10] sm:$0xff]  }
  0x34   : > { %v344_v31 = vrot.slane %v342_v12, 4  ;;  %v340_v35 = vsel %vm5321_vm2, %v335_v15, %v339_v53  ;;  %v517_v37 = vrot.slane %v516_v17, 4  ;;  %v355_v40 = vshrl.u32 %v5464_v2, 16  ;;  %v5153_v9 = vld [vmem:[%s7025_s1 + $0x90] sm:$0xff]  }
  0x35   : > { %4729 = vmatpush3.bf16.msra.mxu1 %v5146_v26  ;;  %4777 = vmatpush3.bf16.msra.mxu0 %v5147_v28  ;;  %v347_v38 = vrot.slane %v345_v20, 5  ;;  %v5150_v26 = vld [vmem:[%s7025_s1 + $0x18] sm:$0xff]   ;;  %v5488_v28 = vcombine.low %v330_v14, %v340_v35  ;;  %v527_v43 = vrot.slane %v526_v24, 4  ;;  %v353_v45 = vrot.slane %v351_v32, 5 }
  0x36   : > { %4730 = vmatprep.subr.bf16.mxu1 %v5148_v59  ;;  %4778 = vmatprep.subr.bf16.mxu0 %v5149_v62  ;;  %v361_v46 = vshll.u32 %v5472_v19, 16  ;;  %v522_v49 = vsel %vm5321_vm2, %v517_v37, %v521_v3  ;;  %v357_v52 = vrot.slane %v355_v40, 4  ;;  %v534_v53 = vshrl.u32 %v5477_v34, 16  ;;  %v5525_v32 = vld [vmem:[%s5287_s23 + $0x9c] sm:$0xf] }
  0x37   : > { %7072 = vst [vmem:[#allocation8_spill] sm:$0xff] %v5488_v28  ;;  %v348_v50 = vor.u32 %v347_v38, %v344_v31  ;;  %4697 = vmatmul.mubr.bf16.gmra.mxu0 %v5488_v28  ;;  %v532_v60 = vsel %vm5321_vm2, %v527_v43, %v531_v25  ;;  %v537_v3 = vshll.u32 %v5477_v34, 16  ;;  %v543_v8 = vshll.u32 %v5483_v42, 16  ;;  %v5522_v31 = vld [vmem:[%s5287_s23 + $0x44] sm:$0x1] }
  0x38   : > { %v363_v61 = vrot.slane %v361_v46, 5  ;;  %v5517_v12 = vcombine.low %v522_v49, %v532_v60  ;;  %v358_v15 = vor.u32 %v357_v52, %v353_v45  ;;  %v536_v17 = vrot.slane %v534_v53, 4  ;;  %v5533_v40 = vld [vmem:[%s5287_s23 + $0xa0] sm:$0xf] }
  0x39   : > { %4731 = vmatpush3.bf16.msra.mxu1 %v5148_v59  ;;  %4779 = vmatpush3.bf16.msra.mxu0 %v5149_v62  ;;  %v349_v14 = vrot.slane %v348_v50, 4  ;;  %v539_v20 = vrot.slane %v537_v3, 5  ;;  %v545_v59 = vrot.slane %v543_v8, 5  ;;  %v547_v24 = vshrl.u32 %v5483_v42, 16  ;;  %v5154_v3 = vld [vmem:[%s7025_s1 + $0x8] sm:$0xff]  }
  0x3a   : > { %7073 = vst [vmem:[#allocation9_spill] sm:$0xff] %v5517_v12  ;;  %4732 = vmatprep.subr.bf16.mxu1 %v5150_v26  ;;  %v553_v25 = vshll.u32 %v5492_v47, 16  ;;  %4780 = vmatprep.subr.bf16.mxu0 %v5151_v48  ;;  %v359_v35 = vrot.slane %v358_v15, 4  ;;  %v366_v37 = vshrl.u32 %v5501_v54, 16  ;;  %v369_v38 = vshll.u32 %v5501_v54, 16 }
  0x3b   : > { %4713 = vmatmul.mubr.bf16.gmra.mxu1 %v5517_v12  ;;  %v354_v62 = vsel %vm5321_vm2, %v349_v14, %v353_v45  ;;  %v540_v43 = vor.u32 %v539_v20, %v536_v17  ;;  %v549_v46 = vrot.slane %v547_v24, 4  ;;  %v375_v50 = vshll.u32 %v5504_v55, 16 }
  0x3c   : > { %v555_v49 = vrot.slane %v553_v25, 5  ;;  %v364_v52 = vsel %vm5321_vm2, %v359_v35, %v363_v61  ;;  %v368_v53 = vrot.slane %v366_v37, 4  ;;  %v371_v60 = vrot.slane %v369_v38, 5  ;;  %v5553_v35 = vld [vmem:[%s5287_s23 + $0xa4] sm:$0x1] }
  0x3d   : > { %4733 = vmatpush3.bf16.msra.mxu1 %v5150_v26  ;;  %v379_v45 = vshrl.u32 %v5504_v55, 16  ;;  %4781 = vmatpush3.bf16.msra.mxu0 %v5151_v48  ;;  %v5542_v8 = vcombine.low %v354_v62, %v364_v52  ;;  %v541_v14 = vrot.slane %v540_v43, 4  ;;  %v550_v15 = vor.u32 %v549_v46, %v545_v59  ;;  %v5155_v26 = vld [vmem:[%s7025_s1 + $0x88] sm:$0xff]  }
  0x3e   : > { %4734 = vmatprep.subr.bf16.mxu1 %v5152_v58  ;;  %v377_v17 = vrot.slane %v375_v50, 5  ;;  %4782 = vmatprep.subr.bf16.mxu0 %v5153_v9  ;;  %v372_v61 = vor.u32 %v371_v60, %v368_v53  ;;  %v385_v48 = vshll.u32 %v5522_v31, 16  ;;  %v558_v24 = vshrl.u32 %v5525_v32, 16  ;;  %v5558_v53 = vld [vmem:[%s5287_s23 + $0x48] sm:$0xf] }
  0x3f   : > { %7074 = vst [vmem:[#allocation10_spill] sm:$0xff] %v5542_v8  ;;  %v381_v20 = vrot.slane %v379_v45, 4  ;;  %4700 = vmatprep.mubr.bf16.mxu0 %v5542_v8  ;;  %v546_v25 = vsel %vm5321_vm2, %v541_v14, %v545_v59  ;;  %v551_v62 = vrot.slane %v550_v15, 4  ;;  %v561_v37 = vshll.u32 %v5525_v32, 16  ;;  %v5156_v59 = vld [vmem:[%s7025_s1] sm:$0xff]  }
  0x40   : > { %v567_v38 = vshll.u32 %v5533_v40, 16  ;;  %v373_v43 = vrot.slane %v372_v61, 4  ;;  %v387_v50 = vrot.slane %v385_v48, 5  ;;  %v560_v52 = vrot.slane %v558_v24, 4  ;;  %v5567_v15 = vld [vmem:[%s5287_s23 + $0x4c] sm:$0xf] }
  0x41   : > { %4735 = vmatpush3.bf16.msra.mxu1 %v5152_v58  ;;  %v382_v46 = vor.u32 %v381_v20, %v377_v17  ;;  %4783 = vmatpush3.bf16.msra.mxu0 %v5153_v9  ;;  %v556_v60 = vsel %vm5321_vm2, %v551_v62, %v555_v49  ;;  %v563_v45 = vrot.slane %v561_v37, 5  ;;  %v571_v58 = vshrl.u32 %v5533_v40, 16  ;;  %v5157_v9 = vld [vmem:[%s7025_s1 + $0x80] sm:$0xff]   ;;  %v5578_v37 = vld [vmem:[%s5287_s23 + $0x50] sm:$0x1] }
  0x42   : > { %4736 = vmatprep.subr.bf16.mxu1 %v5154_v3  ;;  %v569_v14 = vrot.slane %v567_v38, 5  ;;  %4784 = vmatprep.subr.bf16.mxu0 %v5155_v26  ;;  %v5572_v61 = vcombine.low %v546_v25, %v556_v60  ;;  %v378_v20 = vsel %vm5321_vm2, %v373_v43, %v377_v17  ;;  %v577_v49 = vshll.u32 %v5553_v35, 16 }
  0x43   : > { %v383_v48 = vrot.slane %v382_v46, 4  ;;  %v564_v24 = vor.u32 %v563_v45, %v560_v52  ;;  %v573_v62 = vrot.slane %v571_v58, 4  ;;  %v390_v38 = vshrl.u32 %v5558_v53, 16  ;;  %v5588_v46 = vld [vmem:[%s5287_s23 + $0xa8] sm:$0xf]  ;;  %v5593_v52 = vld [vmem:[%s7025_s1 + $0xf8] sm:$0xff]  }
  0x44   : > { %7075 = vst [vmem:[#allocation11_spill] sm:$0xff] %v5572_v61  ;;  %v393_v63 = vshll.u32 %v5558_v53, 16  ;;  %4716 = vmatprep.mubr.bf16.mxu1 %v5572_v61  ;;  %v579_v60 = vrot.slane %v577_v49, 5  ;;  %v399_v17 = vshll.u32 %v5567_v15, 16  ;;  %v403_v43 = vshrl.u32 %v5567_v15, 16  ;;  %7076 = vst [vmem:[#allocation12_spill] sm:$0xff] %v5588_v46 }
  0x45   : > { %4737 = vmatpush3.bf16.msra.mxu1 %v5154_v3  ;;  %v388_v25 = vsel %vm5321_vm2, %v383_v48, %v387_v50  ;;  %4785 = vmatpush3.bf16.msra.mxu0 %v5155_v26  ;;  %v565_v45 = vrot.slane %v564_v24, 4  ;;  %v574_v58 = vor.u32 %v573_v62, %v569_v14  ;;  %v392_v50 = vrot.slane %v390_v38, 4  ;;  %v5598_v48 = vld [vmem:[%s5287_s23 + $0xac] sm:$0xf]  ;;  %v5603_v49 = vld [vmem:[%s7025_s1 + $0x138] sm:$0xff]  }
  0x46   : > { %v5595_v3 = vcombine.low %v378_v20, %v388_v25  ;;  %7078 = vst [vmem:[#allocation14_spill] sm:$0xff] %v5598_v48  ;;  %4738 = vmatprep.subr.bf16.mxu1 %v5156_v59  ;;  %4786 = vmatprep.subr.bf16.mxu0 %v5157_v9  ;;  %v395_v26 = vrot.slane %v393_v63, 5  ;;  %v401_v13 = vrot.slane %v399_v17, 5  ;;  %v405_v61 = vrot.slane %v403_v43, 4  ;;  %v5607_v20 = vld [vmem:[%s5287_s23 + $0xb0] sm:$0x1] }
  0x47   : > { %v409_v12 = vshll.u32 %v5578_v37, 16  ;;  %7079 = vst [vmem:[#allocation15_spill] sm:$0xff] %v5607_v20  ;;  %v5610_v24 = vld [vmem:[%s5287_s23 + $0x54] sm:$0xf]  ;;  %v570_v62 = vsel %vm5321_vm2, %v565_v45, %v569_v14  ;;  %v575_v38 = vrot.slane %v574_v58, 4  ;;  %v582_v25 = vshrl.u32 %v5588_v46, 16 }
  0x48   : > { %7077 = vst [vmem:[#allocation13_spill] sm:$0xff] %v5595_v3  ;;  %4701 = vmatmul.mubr.bf16.gmra.mxu0 %v5595_v3  ;;  %v585_v56 = vshll.u32 %v5588_v46, 16  ;;  %v396_v63 = vor.u32 %v395_v26, %v392_v50  ;;  %v406_v17 = vor.u32 %v405_v61, %v401_v13  ;;  %v591_v7 = vshll.u32 %v5598_v48, 16  ;;  %v5632_v3 = vld [vmem:[%s5287_s23 + $0xb4] sm:$0xf] }
  0x49   : > { %4739 = vmatpush3.bf16.msra.mxu1 %v5156_v59  ;;  %v411_v43 = vrot.slane %v409_v12, 5  ;;  %4787 = vmatpush3.bf16.msra.mxu0 %v5157_v9  ;;  %v580_v14 = vsel %vm5321_vm2, %v575_v38, %v579_v60  ;;  %v584_v45 = vrot.slane %v582_v25, 4  ;;  %v595_v59 = vshrl.u32 %v5598_v48, 16  ;;  %v5629_v9 = vld [vmem:[%s5287_s23 + $0x5c] sm:$0x1] }
  0x4a   : > { %4820 = vmatprep.subr.bf16.mxu1 %v5593_v52  ;;  %v587_v58 = vrot.slane %v585_v56, 5  ;;  %4868 = vmatprep.subr.bf16.mxu0 %v5603_v49  ;;  %v5626_v61 = vcombine.low %v570_v62, %v580_v14  ;;  %v397_v12 = vrot.slane %v396_v63, 4  ;;  %v407_v50 = vrot.slane %v406_v17, 4  ;;  %v5637_v60 = vld [vmem:[%s5287_s23 + $0xb8] sm:$0xf] }
  0x4b   : > { %v593_v26 = vrot.slane %v591_v7, 5  ;;  %v597_v28 = vrot.slane %v595_v59, 4  ;;  %v601_v30 = vshll.u32 %v5607_v20, 16  ;;  %v414_v56 = vshrl.u32 %v5610_v24, 16  ;;  %v5650_v20 = vld [vmem:[%s5287_s23 + $0xbc] sm:$0x1] }
  0x4c   : > { %7080 = vst [vmem:[#allocation16_spill] sm:$0xff] %v5626_v61  ;;  %v588_v8 = vor.u32 %v587_v58, %v584_v45  ;;  %4717 = vmatmul.mubr.bf16.gmra.mxu1 %v5626_v61  ;;  %v402_v62 = vsel %vm5321_vm2, %v397_v12, %v401_v13  ;;  %v412_v7 = vsel %vm5321_vm2, %v407_v50, %v411_v43  ;;  %v417_v38 = vshll.u32 %v5610_v24, 16 }
  0x4d   : > { %v423_v25 = vshll.u32 %v5618_v1, 16  ;;  %v5646_v63 = vcombine.low %v402_v62, %v412_v7  ;;  %v598_v14 = vor.u32 %v597_v28, %v593_v26  ;;  %v603_v45 = vrot.slane %v601_v30, 5  ;;  %7082 = vst [vmem:[#allocation18_spill] sm:$0xff] %v5650_v20 }
  0x4e   : > { %v589_v17 = vrot.slane %v588_v8, 4  ;;  %v416_v58 = vrot.slane %v414_v56, 4  ;;  %v419_v59 = vrot.slane %v417_v38, 5  ;;  %v427_v61 = vshrl.u32 %v5618_v1, 16 }
  0x4f   : > { %7081 = vst [vmem:[#allocation17_spill] sm:$0xff] %v5646_v63  ;;  %v425_v36 = vrot.slane %v423_v25, 5  ;;  %4704 = vmatprep.mubr.bf16.mxu0 %v5646_v63  ;;  %v599_v43 = vrot.slane %v598_v14, 4  ;;  %v433_v12 = vshll.u32 %v5629_v9, 16  ;;  %v606_v50 = vshrl.u32 %v5632_v3, 16 }
  0x50   : > { %v594_v13 = vsel %vm5321_vm2, %v589_v17, %v593_v26  ;;  %v420_v8 = vor.u32 %v419_v59, %v416_v58  ;;  %v429_v28 = vrot.slane %v427_v61, 4  ;;  %v609_v30 = vshll.u32 %v5632_v3, 16 }
  0x51   : > { %v615_v56 = vshll.u32 %v5637_v60, 16  ;;  %v604_v62 = vsel %vm5321_vm2, %v599_v43, %v603_v45  ;;  %v435_v7 = vrot.slane %v433_v12, 5  ;;  %v608_v38 = vrot.slane %v606_v50, 4 }
  0x52   : > { %v619_v25 = vshrl.u32 %v5637_v60, 16  ;;  %v5662_v63 = vcombine.low %v594_v13, %v604_v62  ;;  %v421_v26 = vrot.slane %v420_v8, 4  ;;  %v430_v17 = vor.u32 %v429_v28, %v425_v36 }
  0x53   : > { %v611_v14 = vrot.slane %v609_v30, 5  ;;  %v617_v46 = vrot.slane %v615_v56, 5  ;;  %v625_v61 = vshll.u32 %v5650_v20, 16  ;;  %v7084_v58 = vmov 0 }
  0x54   : > { %7083 = vst [vmem:[#allocation19_spill] sm:$0xff] %v5662_v63  ;;  %v621_v48 = vrot.slane %v619_v25, 4  ;;  %v7085_v58 = vsel %vm5667_vm5, 4294967295, %v7084_v58  ;;  %v4105_v45 = vrot.slane %v5293_v4, 9  ;;  %4720 = vmatprep.mubr.bf16.mxu1 %v5662_v63  ;;  %v426_v59 = vsel %vm5321_vm2, %v421_v26, %v425_v36 }
  0x55   : > { %7086 = vst [vmem:[#allocation20_spill] sm:$0xff] %v7085_v58  ;;  %v431_v13 = vrot.slane %v430_v17, 4  ;;  %v612_v43 = vor.u32 %v611_v14, %v608_v38  ;;  %v1245_v12 = vrot.slane %v5296_v5, 5  ;;  %v627_v8 = vrot.slane %v625_v61, 5 }
  0x56   : > { %v622_v50 = vor.u32 %v621_v48, %v617_v46  ;;  %v4106_v28 = vrot.slane %v5314_v23, 9  ;;  %v1252_v30 = vrot.slane %v5326_v33, 5  ;;  %v7087_v26 = vrot.slane %v5299_v6, 5 }
  0x57   : > { %v436_v56 = vsel %vm5321_vm2, %v431_v13, %v435_v7  ;;  %v613_v62 = vrot.slane %v612_v43, 4  ;;  %v1246_v25 = vsel %vm5667_vm5, %v4105_v45, %v1245_v12  ;;  %v1247_v63 = vrot.slane %v1245_v12, 4 }
  0x58   : > { %v5682_v20 = vcombine.low %v426_v59, %v436_v56  ;;  %v623_v36 = vrot.slane %v622_v50, 4  ;;  %v1254_v38 = vrot.slane %v1252_v30, 4  ;;  %v5692_v33 = vcombine.low %v5354_v16, %v5362_v21 }
  0x59   : > { %v618_v48 = vsel %vm5321_vm2, %v613_v62, %v617_v46  ;;  %v1249_v23 = vsel %vm5667_vm5, %v1247_v63, %v7087_v26  ;;  %v4107_v7 = vrot.slane %v5354_v16, 9  ;;  %v4081_v14 = vcombine.low %v5293_v4, %v5296_v5 }
  0x5a   : > { %4705 = vmatmul.mubr.bf16.gmra.mxu0 %v5682_v20  ;;  %v628_v17 = vsel %vm5321_vm2, %v623_v36, %v627_v8  ;;  %v4137_v46 = vcombine.low %v1246_v25, %v1249_v23  ;;  %v1259_v6 = vrot.slane %v5362_v21, 5  ;;  %v1253_v63 = vsel %vm5667_vm5, %v4106_v28, %v1252_v30  ;;  %v5164_v36 = vld [vmem:[%s7025_s1 + $0xf0] sm:$0xff]  }
  0x5b   : > { %v5701_v61 = vcombine.low %v618_v48, %v628_v17  ;;  %v7088_v45 = vrot.slane %v5330_v39, 5  ;;  %v1262_v59 = vrot.slane %v5370_v27, 5  ;;  %v1266_v5 = vrot.slane %v5405_v0, 5  ;;  %v7105_v58 = vld [vmem:[#allocation19_spill] sm:$0xff] }
  0x5c   : > { %4788 = vmatprep.mubr.bf16.mxu0 %v4137_v46  ;;  %v1260_v13 = vsel %vm5667_vm5, %v4107_v7, %v1259_v6  ;;  %v1261_v4 = vrot.slane %v1259_v6, 4  ;;  %v4108_v21 = vrot.slane %v5396_v57, 9  ;;  %v1269_v43 = vrot.slane %v5413_v10, 5  ;;  %v5165_v10 = vld [vmem:[%s7025_s1 + $0x130] sm:$0xff]  }
  0x5d   : > { %v1256_v16 = vsel %vm5667_vm5, %v1254_v38, %v7088_v45  ;;  %4721 = vmatmul.mubr.bf16.gmra.mxu1 %v5701_v61  ;;  %v1273_v39 = vrot.slane %v5464_v2, 5  ;;  %v1268_v50 = vrot.slane %v1266_v5, 4  ;;  %v4109_v8 = vrot.slane %v5450_v51, 9 }
  0x5e   : > { %4740 = vmatprep.mubr.bf16.mxu1 %v4081_v14  ;;  %v5717_v12 = vcombine.low %v1253_v63, %v1256_v16  ;;  %v1263_v27 = vsel %vm5667_vm5, %v1261_v4, %v1262_v59  ;;  %v1276_v56 = vrot.slane %v5472_v19, 5  ;;  %v1280_v62 = vrot.slane %v5504_v55, 5  ;;  %v5169_v14 = vld [vmem:[%s7025_s1 + $0x128] sm:$0xff]  }
  0x5f   : > { %v5722_v28 = vcombine.low %v1260_v13, %v1263_v27  ;;  %v1275_v30 = vrot.slane %v1273_v39, 4  ;;  %v1267_v25 = vsel %vm5667_vm5, %v4108_v21, %v1266_v5  ;;  %v4110_v38 = vrot.slane %v5501_v54, 9  ;;  %v5168_v16 = vld [vmem:[%s7025_s1 + $0xe8] sm:$0xff]   ;;  %v5764_v13 = vld [vmem:[%s5287_s23 + $0x64] sm:$0xf] }
  0x60   : > { %v1270_v19 = vsel %vm5667_vm5, %v1268_v50, %v1269_v43  ;;  %v1274_v48 = vsel %vm5667_vm5, %v4109_v8, %v1273_v39  ;;  %v1283_v26 = vrot.slane %v5522_v31, 5  ;;  %v1287_v23 = vrot.slane %v5567_v15, 5 }
  0x61   : > { %v1277_v7 = vsel %vm5667_vm5, %v1275_v30, %v1276_v56  ;;  %v1282_v17 = vrot.slane %v1280_v62, 4  ;;  %v4111_v46 = vrot.slane %v5558_v53, 9  ;;  %v1294_v6 = vrot.slane %v5618_v1, 5  ;;  %v5799_v30 = vld [vmem:[%s5287_s23 + $0x60] sm:$0xf] }
  0x62   : > { %4789 = vmatmul.mubr.bf16.vlgmr.msra.gmra.mxu0 %v5717_v12  ;;  %v1289_v31 = vrot.slane %v1287_v23, 4  ;;  %v1290_v63 = vrot.slane %v5578_v37, 5  ;;  %v5757_v45 = vcombine.low %v1274_v48, %v1277_v7  ;;  %v4112_v59 = vrot.slane %v5610_v24, 9 }
  0x63   : > { %4869 = vmatpush3.bf16.msra.mxu0 %v5603_v49  ;;  %4792 = vmatprep.mubr.bf16.mxu0 %v5722_v28  ;;  %v5755_v49 = vcombine.low %v1267_v25, %v1270_v19  ;;  %v1301_v37 = vrot.slane %v5764_v13, 5  ;;  %v1284_v4 = vsel %vm5667_vm5, %v1282_v17, %v1283_v26  ;;  %v1296_v5 = vrot.slane %v1294_v6, 4 }
  0x64   : > { %4870 = vmatprep.subr.bf16.mxu0 %v5165_v10  ;;  %v1297_v21 = vrot.slane %v5629_v9, 5  ;;  %v5774_v43 = vcombine.low %v5396_v57, %v5405_v0  ;;  %v1288_v39 = vsel %vm5667_vm5, %v4111_v46, %v1287_v23  ;;  %v1291_v27 = vsel %vm5667_vm5, %v1289_v31, %v1290_v63  ;;  %v5172_v0 = vld [vmem:[%s7025_s1 + $0xe0] sm:$0xff]  }
  0x65   : > { %4741 = vmatmul.mubr.bf16.vlgmr.msra.gmra.mxu1 %v5366_v22  ;;  %v5782_v50 = vcombine.low %v5450_v51, %v5464_v2  ;;  %v5786_v8 = vcombine.low %v5501_v54, %v5504_v55  ;;  %v5790_v57 = vcombine.low %v5558_v53, %v5567_v15  ;;  %v5173_v9 = vld [vmem:[%s7025_s1 + $0x120] sm:$0xff]   ;;  %v4113_v51 = vrot.slane %v5799_v30, 9  ;;  %v5226_v53 = vld [vmem:[%s5287_s23 + $0x68] sm:$0x1] }
  0x66   : > { %4821 = vmatpush3.bf16.msra.mxu1 %v5593_v52  ;;  %4744 = vmatprep.mubr.bf16.mxu1 %v5692_v33  ;;  %v1281_v52 = vsel %vm5667_vm5, %v4110_v38, %v1280_v62  ;;  %v5807_v54 = vsel %vm5667_vm5, %v4112_v59, %v1294_v6  ;;  %v1303_v55 = vrot.slane %v1301_v37, 4  ;;  %v1304_v15 = vrot.slane %v5226_v53, 5  ;;  %v5177_v62 = vld [vmem:[%s7025_s1 + $0x118] sm:$0xff]   ;;  %v5180_v53 = vld [vmem:[%s7025_s1 + $0xd0] sm:$0xff]  }
  0x67   : > { %4822 = vmatprep.subr.bf16.mxu1 %v5164_v36  ;;  %4871 = vmatpush3.bf16.msra.mxu0 %v5165_v10  ;;  %v5803_v2 = vcombine.low %v1281_v52, %v1284_v4  ;;  %v5811_v56 = vcombine.low %v1288_v39, %v1291_v27  ;;  %v1298_v10 = vsel %vm5667_vm5, %v1296_v5, %v1297_v21  ;;  %v4116_v19 = vrot.slane %v5416_v11, 9  ;;  %v5176_v6 = vld [vmem:[%s7025_s1 + $0xd8] sm:$0xff]   ;;  %v5181_v4 = vld [vmem:[%s7025_s1 + $0x110] sm:$0xff]   ;;  %v7089_v5 = vld [vmem:[#allocation14_spill] sm:$0xff] }
  0x68   : > { %4872 = vmatprep.subr.bf16.mxu0 %v5169_v14  ;;  %v5820_v25 = vcombine.low %v5416_v11, %v5420_v18  ;;  %v1322_v48 = vrot.slane %v5420_v18, 5  ;;  %v1325_v26 = vrot.slane %v5440_v44, 5  ;;  %v1302_v23 = vsel %vm5667_vm5, %v4113_v51, %v1301_v37  ;;  %v7090_v21 = vld [vmem:[#allocation12_spill] sm:$0xff]  ;;  %v7091_v51 = vld [vmem:[#allocation15_spill] sm:$0xff] }
  0x69   : > { %v1315_v7 = vrot.slane %v5382_v41, 5  ;;  %v5835_v17 = vcombine.low %v5477_v34, %v5483_v42  ;;  %v1305_v11 = vsel %vm5667_vm5, %v1303_v55, %v1304_v15  ;;  %v1329_v46 = vrot.slane %v5483_v42, 5 }
  0x6a   : > { %4793 = vmatmul.mubr.bf16.gmra.mxu0 %v5755_v49  ;;  %4823 = vmatpush3.bf16.msra.mxu1 %v5164_v36  ;;  %v5823_v36 = vld [vmem:[%s5287_s23 + $0x70] sm:$0xf]  ;;  %v1323_v18 = vsel %vm5667_vm5, %v4116_v19, %v1322_v48  ;;  %v1324_v44 = vrot.slane %v1322_v48, 4  ;;  %v1332_v31 = vrot.slane %v5492_v47, 5  ;;  %v4118_v63 = vrot.slane %v5525_v32, 9 }
  0x6b   : > { %4796 = vmatprep.mubr.bf16.mxu0 %v5757_v45  ;;  %4824 = vmatprep.subr.bf16.mxu1 %v5168_v16  ;;  %v1308_v38 = vrot.slane %v5823_v36, 5  ;;  %v1331_v37 = vrot.slane %v1329_v46, 4  ;;  %v1339_v52 = vrot.slane %v5553_v35, 5  ;;  %v5868_v39 = vcombine.low %v7090_v21, %v7089_v5 }
  0x6c   : > { %4873 = vmatpush3.bf16.msra.mxu0 %v5169_v14  ;;  %v4117_v14 = vrot.slane %v5477_v34, 9  ;;  %v5850_v34 = vcombine.low %v5525_v32, %v5533_v40  ;;  %v1326_v59 = vsel %vm5667_vm5, %v1324_v44, %v1325_v26  ;;  %v4119_v27 = vrot.slane %v7090_v21, 9 }
  0x6d   : > { %4745 = vmatmul.mubr.bf16.gmra.mxu1 %v5774_v43  ;;  %4874 = vmatprep.subr.bf16.mxu0 %v5173_v9  ;;  %v5859_v47 = vcombine.low %v1323_v18, %v1326_v59  ;;  %v1333_v35 = vsel %vm5667_vm5, %v1331_v37, %v1332_v31  ;;  %v1346_v55 = vrot.slane %v7091_v51, 5  ;;  %v5886_v19 = vcombine.low %v5632_v3, %v5637_v60  ;;  %v5228_v31 = vld [vmem:[%s5287_s23 + $0x6c] sm:$0xf]  ;;  %v5229_v59 = vld [vmem:[%s5287_s23 + $0x74] sm:$0x1]  ;;  %v5189_v51 = vld [vmem:[%s7025_s1 + $0x100] sm:$0xff]  }
  0x6e   : > { %4748 = vmatprep.mubr.bf16.mxu1 %v5782_v50  ;;  %4825 = vmatpush3.bf16.msra.mxu1 %v5168_v16  ;;  %v1336_v16 = vrot.slane %v5533_v40, 5  ;;  %v1330_v42 = vsel %vm5667_vm5, %v4117_v14, %v1329_v46  ;;  %v4120_v48 = vrot.slane %v5632_v3, 9  ;;  %v1350_v44 = vrot.slane %v5637_v60, 5  ;;  %v5185_v3 = vld [vmem:[%s7025_s1 + $0x108] sm:$0xff]  }
  0x6f   : > { %4826 = vmatprep.subr.bf16.mxu1 %v5172_v0  ;;  %v5880_v15 = vcombine.low %v1330_v42, %v1333_v35  ;;  %v5896_v46 = vcombine.low %v5807_v54, %v1298_v10  ;;  %v1311_v60 = vrot.slane %v5229_v59, 5  ;;  %v5909_v37 = vcombine.low %v1302_v23, %v1305_v11  ;;  %v5231_v35 = vld [vmem:[%s5287_s23 + $0x80] sm:$0x1] }
  0x70   : > { %4875 = vmatpush3.bf16.msra.mxu0 %v5173_v9  ;;  %v1337_v32 = vsel %vm5667_vm5, %v4118_v63, %v1336_v16  ;;  %v1338_v40 = vrot.slane %v1336_v16, 4  ;;  %v1343_v9 = vrot.slane %v7089_v5, 5  ;;  %v4114_v63 = vrot.slane %v5228_v31, 9  ;;  %v5184_v5 = vld [vmem:[%s7025_s1 + $0xc8] sm:$0xff]  }
  0x71   : > { %4876 = vmatprep.subr.bf16.mxu0 %v5177_v62  ;;  %v1351_v54 = vsel %vm5667_vm5, %v4120_v48, %v1350_v44  ;;  %v1352_v10 = vrot.slane %v1350_v44, 4  ;;  %v1317_v21 = vrot.slane %v1315_v7, 4  ;;  %v5926_v11 = vcombine.low %v5610_v24, %v5618_v1  ;;  %v5232_v48 = vld [vmem:[%s5287_s23 + $0x7c] sm:$0xf]  ;;  %v5989_v44 = vld [vmem:[%s5287_s23 + $0xc0] sm:$0xf] }
  0x72   : > { %4797 = vmatmul.mubr.bf16.gmra.mxu0 %v5803_v2  ;;  %4827 = vmatpush3.bf16.msra.mxu1 %v5172_v0  ;;  %v1340_v0 = vsel %vm5667_vm5, %v1338_v40, %v1339_v52  ;;  %v1344_v14 = vsel %vm5667_vm5, %v4119_v27, %v1343_v9  ;;  %v1345_v18 = vrot.slane %v1343_v9, 4  ;;  %v1310_v52 = vrot.slane %v1308_v38, 4 }
  0x73   : > { %4800 = vmatprep.mubr.bf16.mxu0 %v5811_v56  ;;  %4828 = vmatprep.subr.bf16.mxu1 %v5176_v6  ;;  %v5889_v26 = vcombine.low %v1337_v32, %v1340_v0  ;;  %v5230_v32 = vld [vmem:[%s5287_s23 + $0x78] sm:$0xf]  ;;  %v1318_v27 = vrot.slane %v5231_v35, 5  ;;  %v1309_v1 = vsel %vm5667_vm5, %v4114_v63, %v1308_v38  ;;  %v5967_v0 = vcombine.low %v5228_v31, %v5823_v36  ;;  %v5984_v36 = vld [vmem:[%s5287_s23 + $0xc4] sm:$0xf] }
  0x74   : > { %4877 = vmatpush3.bf16.msra.mxu0 %v5177_v62  ;;  %v7092_v62 = vld [vmem:[#allocation18_spill] sm:$0xff]  ;;  %v1347_v42 = vsel %vm5667_vm5, %v1345_v18, %v1346_v55  ;;  %v4115_v40 = vrot.slane %v5230_v32, 9  ;;  %v5936_v55 = vcombine.low %v5799_v30, %v5764_v13  ;;  %v1312_v24 = vsel %vm5667_vm5, %v1310_v52, %v1311_v60  ;;  %v5191_v38 = vld [vmem:[%s7025_s1 + $0x1b8] sm:$0xff]   ;;  %v5992_v31 = vld [vmem:[%s5287_s23 + $0xc8] sm:$0x1] }
  0x75   : > { %4749 = vmatmul.mubr.bf16.gmra.mxu1 %v5786_v8  ;;  %4878 = vmatprep.subr.bf16.mxu0 %v5181_v4  ;;  %v1353_v16 = vrot.slane %v7092_v62, 5  ;;  %v1319_v30 = vsel %vm5667_vm5, %v1317_v21, %v1318_v27  ;;  %v2230_v18 = vrot.slane %v5984_v36, 5  ;;  %v4211_v63 = vrot.slane %v5989_v44, 9  ;;  %v7093_v60 = vld [vmem:[#allocation4_spill] sm:$0xff]  ;;  %v7096_v21 = vld [vmem:[#allocation10_spill] sm:$0xff]  ;;  %v7097_v35 = vld [vmem:[#allocation13_spill] sm:$0xff] }
  0x76   : > { %4752 = vmatprep.mubr.bf16.mxu1 %v5790_v57  ;;  %4829 = vmatpush3.bf16.msra.mxu1 %v5176_v6  ;;  %v5917_v6 = vcombine.low %v1344_v14, %v1347_v42  ;;  %v1316_v13 = vsel %vm5667_vm5, %v4115_v40, %v1315_v7  ;;  %v5190_v7 = vld [vmem:[%s7025_s1 + $0x178] sm:$0xff]   ;;  %v5971_v14 = vcombine.low %v5230_v32, %v5232_v48  ;;  %v2233_v62 = vrot.slane %v5992_v31, 5  ;;  %v7095_v52 = vld [vmem:[#allocation8_spill] sm:$0xff]  ;;  %v5195_v40 = vld [vmem:[%s7025_s1 + $0x1a8] sm:$0xff]  }
  0x77   : > { %4830 = vmatprep.subr.bf16.mxu1 %v5180_v53  ;;  %v1354_v23 = vsel %vm5667_vm5, %v1352_v10, %v1353_v16  ;;  %v5961_v41 = vcombine.low %v1316_v13, %v1319_v30  ;;  %v2231_v16 = vsel %vm5667_vm5, %v4211_v63, %v2230_v18  ;;  %v7094_v10 = vld [vmem:[#allocation6_spill] sm:$0xff]  ;;  %v5192_v32 = vld [vmem:[%s7025_s1 + $0x170] sm:$0xff]   ;;  %v5203_v13 = vld [vmem:[%s7025_s1 + $0x188] sm:$0xff]  }
  0x78   : > { %4879 = vmatpush3.bf16.msra.mxu0 %v5181_v4  ;;  %v5928_v9 = vcombine.low %v1351_v54, %v1354_v23  ;;  %v5188_v4 = vld [vmem:[%s7025_s1 + $0xc0] sm:$0xff]   ;;  %v5193_v54 = vld [vmem:[%s7025_s1 + $0x1b0] sm:$0xff]   ;;  %v5199_v23 = vld [vmem:[%s7025_s1 + $0x198] sm:$0xff]  }
  0x79   : > { %4880 = vmatprep.subr.bf16.mxu0 %v5185_v3  ;;  %v5196_v27 = vld [vmem:[%s7025_s1 + $0x160] sm:$0xff]   ;;  %v5202_v30 = vld [vmem:[%s7025_s1 + $0x148] sm:$0xff]   ;;  %v7100_v48 = vld [vmem:[#allocation5_spill] sm:$0xff] }
  0x7a   : > { %4801 = vmatmul.mubr.bf16.gmra.mxu0 %v5896_v46  ;;  %4831 = vmatpush3.bf16.msra.mxu1 %v5180_v53  ;;  %v5959_v53 = vcombine.low %v1309_v1, %v1312_v24  ;;  %v5201_v1 = vld [vmem:[%s7025_s1 + $0x190] sm:$0xff]   ;;  %v7098_v24 = vld [vmem:[#allocation17_spill] sm:$0xff] }
  0x7b   : > { %4804 = vmatprep.mubr.bf16.mxu0 %v5909_v37  ;;  %4832 = vmatprep.subr.bf16.mxu1 %v5184_v5  ;;  %v5208_v63 = vld [vmem:[%s7025_s1 + $0x238] sm:$0xff]  }
  0x7c   : > { %4881 = vmatpush3.bf16.msra.mxu0 %v5185_v3  ;;  %v2232_v3 = vrot.slane %v2230_v18, 4  ;;  %v5205_v18 = vld [vmem:[%s7025_s1 + $0x140] sm:$0xff]  }
  0x7d   : > { %4753 = vmatmul.mubr.bf16.gmra.mxu1 %v5926_v11  ;;  %4882 = vmatprep.subr.bf16.mxu0 %v5189_v51 }
  0x7e   : > { %4756 = vmatprep.mubr.bf16.mxu1 %v5936_v55  ;;  %4833 = vmatpush3.bf16.msra.mxu1 %v5184_v5  ;;  %v2234_v59 = vsel %vm5667_vm5, %v2232_v3, %v2233_v62  ;;  %v5197_v5 = vld [vmem:[%s7025_s1 + $0x1a0] sm:$0xff]   ;;  %v5207_v3 = vld [vmem:[%s7025_s1 + $0x1f8] sm:$0xff]   ;;  %v7101_v62 = vld [vmem:[#allocation7_spill] sm:$0xff] }
  0x7f   : > { %4834 = vmatprep.subr.bf16.mxu1 %v5188_v4  ;;  %v6002_v42 = vcombine.low %v2231_v16, %v2234_v59  ;;  %v7102_v16 = vld [vmem:[#allocation9_spill] sm:$0xff]  ;;  %v1942_v59 = vshrl.u32 %v5989_v44, 16 }
  0x80   : > { %4883 = vmatpush3.bf16.msra.mxu0 %v5189_v51  ;;  %v5198_v51 = vld [vmem:[%s7025_s1 + $0x158] sm:$0xff]  }
  0x81   : > { %4964 = vmatprep.subr.bf16.mxu0 %v5191_v38 }
  0x82   : > { %4805 = vmatmul.mubr.bf16.gmra.mxu0 %v5959_v53  ;;  %4835 = vmatpush3.bf16.msra.mxu1 %v5188_v4  ;;  %v5200_v4 = vld [vmem:[%s7025_s1 + $0x150] sm:$0xff]  }
  0x83   : > { %4808 = vmatprep.mubr.bf16.mxu0 %v5961_v41  ;;  %4916 = vmatprep.subr.bf16.mxu1 %v5190_v7 }
  0x85   : > { %4757 = vmatmul.mubr.bf16.gmra.mxu1 %v5967_v0 }
  0x86   : > { %4760 = vmatprep.mubr.bf16.mxu1 %v5971_v14 }
  0x8a   : > { %4809 = vmatmul.mubr.bf16.gmra.mxu0 %v5859_v47 }
  0x8b   : > { %4812 = vmatprep.mubr.bf16.mxu0 %v5880_v15 }
  0x8d   : > { %4761 = vmatmul.mubr.bf16.gmra.mxu1 %v5820_v25 }
  0x8e   : > { %4764 = vmatprep.mubr.bf16.mxu1 %v5835_v17 }
  0x92   : > { %4813 = vmatmul.mubr.bf16.gmra.mxu0 %v5889_v26 }
  0x93   : > { %4816 = vmatprep.mubr.bf16.mxu0 %v5917_v6 }
  0x95   : > { %4765 = vmatmul.mubr.bf16.gmra.mxu1 %v5850_v34 }
  0x96   : > { %4768 = vmatprep.mubr.bf16.mxu1 %v5868_v39 }
  0x9a   : > { %4817 = vmatmul.mubr.bf16.gmra.mxu0 %v5928_v9 }
  0x9b   : > { %4884 = vmatprep.mubr.bf16.mxu0 %v7093_v60  ;;  %v1945_v60 = vshll.u32 %v5989_v44, 16 }
  0x9d   : > { %4769 = vmatmul.mubr.bf16.gmra.mxu1 %v5886_v19 }
  0x9e   : > { %4836 = vmatprep.mubr.bf16.mxu1 %v5366_v22  ;;  %v5194_v22 = vld [vmem:[%s7025_s1 + $0x168] sm:$0xff]  }
  0xa2   : > { %4885 = vmatmul.mubr.bf16.vlgmr.msra.gmra.mxu0 %v7094_v10 }
  0xa3   : > { %4965 = vmatpush3.bf16.msra.mxu0 %v5191_v38  ;;  %4888 = vmatprep.mubr.bf16.mxu0 %v7095_v52  ;;  %v5206_v38 = vld [vmem:[%s7025_s1 + $0x180] sm:$0xff]  }
  0xa4   : > { %4966 = vmatprep.subr.bf16.mxu0 %v5193_v54 }
  0xa5   : > { %4837 = vmatmul.mubr.bf16.vlgmr.msra.gmra.mxu1 %v5692_v33 }
  0xa6   : > { %4917 = vmatpush3.bf16.msra.mxu1 %v5190_v7  ;;  %4840 = vmatprep.mubr.bf16.mxu1 %v5774_v43  ;;  %v7099_v7 = vld [vmem:[#allocation3_spill] sm:$0xff] }
  0xa7   : > { %4918 = vmatprep.subr.bf16.mxu1 %v5192_v32  ;;  %4967 = vmatpush3.bf16.msra.mxu0 %v5193_v54  ;;  %v1955_v54 = vshrl.u32 %v5984_v36, 16 }
  0xa8   : > { %4968 = vmatprep.subr.bf16.mxu0 %v5195_v40 }
  0xaa   : > { %4889 = vmatmul.mubr.bf16.gmra.mxu0 %v7096_v21  ;;  %4919 = vmatpush3.bf16.msra.mxu1 %v5192_v32  ;;  %v1951_v32 = vshll.u32 %v5984_v36, 16 }
  0xab   : > { %4892 = vmatprep.mubr.bf16.mxu0 %v7097_v35  ;;  %4920 = vmatprep.subr.bf16.mxu1 %v5194_v22 }
  0xac   : > { %4969 = vmatpush3.bf16.msra.mxu0 %v5195_v40  ;;  %v1944_v40 = vrot.slane %v1942_v59, 4 }
  0xad   : > { %4841 = vmatmul.mubr.bf16.gmra.mxu1 %v5782_v50  ;;  %4970 = vmatprep.subr.bf16.mxu0 %v5197_v5 }
  0xae   : > { %4844 = vmatprep.mubr.bf16.mxu1 %v5786_v8  ;;  %4921 = vmatpush3.bf16.msra.mxu1 %v5194_v22  ;;  %v1947_v22 = vrot.slane %v1945_v60, 5 }
  0xaf   : > { %4922 = vmatprep.subr.bf16.mxu1 %v5196_v27 }
  0xb0   : > { %4971 = vmatpush3.bf16.msra.mxu0 %v5197_v5  ;;  %v1953_v5 = vrot.slane %v1951_v32, 5  ;;  %v5210_v32 = vld [vmem:[%s7025_s1 + $0x230] sm:$0xff]  }
  0xb1   : > { %4972 = vmatprep.subr.bf16.mxu0 %v5199_v23 }
  0xb2   : > { %4893 = vmatmul.mubr.bf16.gmra.mxu0 %v7098_v24  ;;  %4923 = vmatpush3.bf16.msra.mxu1 %v5196_v27  ;;  %v1957_v27 = vrot.slane %v1955_v54, 4  ;;  %v6095_v54 = vcombine.low %v5989_v44, %v5984_v36  ;;  %v5209_v36 = vld [vmem:[%s7025_s1 + $0x1f0] sm:$0xff]  }
  0xb3   : > { %4896 = vmatprep.mubr.bf16.mxu0 %v5682_v20  ;;  %4924 = vmatprep.subr.bf16.mxu1 %v5198_v51 }
  0xb4   : > { %4973 = vmatpush3.bf16.msra.mxu0 %v5199_v23  ;;  %v7103_v23 = vld [vmem:[#allocation11_spill] sm:$0xff] }
  0xb5   : > { %4845 = vmatmul.mubr.bf16.gmra.mxu1 %v5790_v57  ;;  %4974 = vmatprep.subr.bf16.mxu0 %v5201_v1 }
  0xb6   : > { %4848 = vmatprep.mubr.bf16.mxu1 %v5926_v11  ;;  %4925 = vmatpush3.bf16.msra.mxu1 %v5198_v51  ;;  %v7104_v51 = vld [vmem:[#allocation16_spill] sm:$0xff] }
  0xb7   : > { %4926 = vmatprep.subr.bf16.mxu1 %v5200_v4 }
  0xb8   : > { %4975 = vmatpush3.bf16.msra.mxu0 %v5201_v1  ;;  %v1948_v1 = vor.u32 %v1947_v22, %v1944_v40  ;;  %v5218_v22 = vld [vmem:[%s7025_s1 + $0x210] sm:$0xff]  }
  0xb9   : > { %4976 = vmatprep.subr.bf16.mxu0 %v5203_v13 }
  0xba   : > { %4897 = vmatmul.mubr.bf16.gmra.mxu0 %v7099_v7  ;;  %4927 = vmatpush3.bf16.msra.mxu1 %v5200_v4  ;;  %v1958_v4 = vor.u32 %v1957_v27, %v1953_v5  ;;  %v5217_v27 = vld [vmem:[%s7025_s1 + $0x1d0] sm:$0xff]  }
  0xbb   : > { %4900 = vmatprep.mubr.bf16.mxu0 %v7100_v48  ;;  %4928 = vmatprep.subr.bf16.mxu1 %v5202_v30 }
  0xbc   : > { %4977 = vmatpush3.bf16.msra.mxu0 %v5203_v13  ;;  %v1961_v13 = vshll.u32 %v5992_v31, 16 }
  0xbd   : > { %4849 = vmatmul.mubr.bf16.gmra.mxu1 %v5936_v55  ;;  %4978 = vmatprep.subr.bf16.mxu0 %v5206_v38 }
  0xbe   : > { %4852 = vmatprep.mubr.bf16.mxu1 %v5967_v0  ;;  %4929 = vmatpush3.bf16.msra.mxu1 %v5202_v30  ;;  %v1949_v30 = vrot.slane %v1948_v1, 4 }
  0xbf   : > { %4930 = vmatprep.subr.bf16.mxu1 %v5205_v18 }
  0xc0   : > { %4979 = vmatpush3.bf16.msra.mxu0 %v5206_v38  ;;  %v1959_v38 = vrot.slane %v1958_v4, 4  ;;  %v1954_v59 = vsel %vm5321_vm2, %v1949_v30, %v1953_v5  ;;  %v5223_v30 = vld [vmem:[%s7025_s1 + $0x200] sm:$0xff]  }
  0xc1   : > { %5060 = vmatprep.subr.bf16.mxu0 %v5208_v63 }
  0xc2   : > { %4901 = vmatmul.mubr.bf16.gmra.mxu0 %v7101_v62  ;;  %4931 = vmatpush3.bf16.msra.mxu1 %v5205_v18  ;;  %v1963_v18 = vrot.slane %v1961_v13, 5 }
  0xc3   : > { %4904 = vmatprep.mubr.bf16.mxu0 %v7102_v16  ;;  %5012 = vmatprep.subr.bf16.mxu1 %v5207_v3 }
  0xc4   : > { %v1964_v60 = vsel %vm5321_vm2, %v1959_v38, %v1963_v18  ;;  %v5222_v18 = vld [vmem:[%s7025_s1 + $0x1c0] sm:$0xff]  }
  0xc5   : > { %4853 = vmatmul.mubr.bf16.gmra.mxu1 %v5971_v14  ;;  %v6091_v31 = vcombine.low %v1954_v59, %v1964_v60 }
  0xc6   : > { %4856 = vmatprep.mubr.bf16.mxu1 %v5820_v25 }
  0xc7   : > { %7106 = vst [vmem:[#allocation14_spill] sm:$0xff] %v6091_v31 }
  0xca   : > { %4905 = vmatmul.mubr.bf16.gmra.mxu0 %v7103_v23 }
  0xcb   : > { %4908 = vmatprep.mubr.bf16.mxu0 %v7104_v51 }
  0xcd   : > { %4857 = vmatmul.mubr.bf16.gmra.mxu1 %v5835_v17 }
  0xce   : > { %4860 = vmatprep.mubr.bf16.mxu1 %v5850_v34 }
  0xd2   : > { %4909 = vmatmul.mubr.bf16.gmra.mxu0 %v7105_v58 }
  0xd3   : > { %4912 = vmatprep.mubr.bf16.mxu0 %v5701_v61 }
  0xd5   : > { %4861 = vmatmul.mubr.bf16.gmra.mxu1 %v5868_v39 }
  0xd6   : > { %4864 = vmatprep.mubr.bf16.mxu1 %v5886_v19 }
  0xda   : > { %4913 = vmatmul.mubr.bf16.gmra.mxu0 %v6091_v31 }
  0xdb   : > { %4980 = vmatprep.mubr.bf16.mxu0 %v5692_v33  ;;  %v5212_v33 = vld [vmem:[%s7025_s1 + $0x228] sm:$0xff]  }
  0xdd   : > { %4865 = vmatmul.mubr.bf16.gmra.mxu1 %v6095_v54 }
  0xde   : > { %4932 = vmatprep.mubr.bf16.mxu1 %v5717_v12  ;;  %v5211_v12 = vld [vmem:[%s7025_s1 + $0x1e8] sm:$0xff]  }
  0xe2   : > { %4981 = vmatmul.mubr.bf16.vlgmr.msra.gmra.mxu0 %v5774_v43  ;;  %v5214_v43 = vld [vmem:[%s7025_s1 + $0x220] sm:$0xff]  }
  0xe3   : > { %5061 = vmatpush3.bf16.msra.mxu0 %v5208_v63  ;;  %4984 = vmatprep.mubr.bf16.mxu0 %v5782_v50  ;;  %v5213_v50 = vld [vmem:[%s7025_s1 + $0x1e0] sm:$0xff]  }
  0xe4   : > { %5062 = vmatprep.subr.bf16.mxu0 %v5210_v32 }
  0xe5   : > { %4933 = vmatmul.mubr.bf16.vlgmr.msra.gmra.mxu1 %v5722_v28 }
  0xe6   : > { %5013 = vmatpush3.bf16.msra.mxu1 %v5207_v3  ;;  %4936 = vmatprep.mubr.bf16.mxu1 %v5755_v49  ;;  %v5215_v3 = vld [vmem:[%s7025_s1 + $0x1d8] sm:$0xff]  }
  0xe7   : > { %5014 = vmatprep.subr.bf16.mxu1 %v5209_v36  ;;  %5063 = vmatpush3.bf16.msra.mxu0 %v5210_v32 }
  0xe8   : > { %5064 = vmatprep.subr.bf16.mxu0 %v5212_v33 }
  0xea   : > { %4985 = vmatmul.mubr.bf16.gmra.mxu0 %v5786_v8  ;;  %5015 = vmatpush3.bf16.msra.mxu1 %v5209_v36  ;;  %v5216_v8 = vld [vmem:[%s7025_s1 + $0x218] sm:$0xff]  }
  0xeb   : > { %4988 = vmatprep.mubr.bf16.mxu0 %v5790_v57  ;;  %5016 = vmatprep.subr.bf16.mxu1 %v5211_v12 }
  0xec   : > { %v6125_v44 = vpop.f32.mrf.mxu0  ;;  %5065 = vmatpush3.bf16.msra.mxu0 %v5212_v33  ;;  %v6128_v63 = vpop.f32.mrf.mxu1 }
  0xed   : > { %4937 = vmatmul.mubr.bf16.gmra.mxu1 %v5757_v45  ;;  %5066 = vmatprep.subr.bf16.mxu0 %v5214_v43 }
  0xee   : > { %4940 = vmatprep.mubr.bf16.mxu1 %v5803_v2  ;;  %5017 = vmatpush3.bf16.msra.mxu1 %v5211_v12  ;;  %v6134_v57 = vpop.f32.mrf.mxu0  ;;  %v6139_v40 = vpop.f32.mrf.mxu1 }
  0xef   : > { %5018 = vmatprep.subr.bf16.mxu1 %v5213_v50 }
  0xf0   : > { %5067 = vmatpush3.bf16.msra.mxu0 %v5214_v43  ;;  %v6145_v5 = vpop.f32.mrf.mxu0  ;;  %v6152_v1 = vpop.f32.mrf.mxu1 }
  0xf1   : > { %5068 = vmatprep.subr.bf16.mxu0 %v5216_v8 }
  0xf2   : > { %4989 = vmatmul.mubr.bf16.gmra.mxu0 %v5926_v11  ;;  %5019 = vmatpush3.bf16.msra.mxu1 %v5213_v50  ;;  %v5220_v11 = vld [vmem:[%s7025_s1 + $0x208] sm:$0xff]   ;;  %v6158_v4 = vpop.f32.mrf.mxu0  ;;  %v6163_v13 = vpop.f32.mrf.mxu1 }
  0xf3   : > { %4992 = vmatprep.mubr.bf16.mxu0 %v5936_v55  ;;  %5020 = vmatprep.subr.bf16.mxu1 %v5215_v3  ;;  %v5219_v55 = vld [vmem:[%s7025_s1 + $0x1c8] sm:$0xff]  }
  0xf4   : > { %5069 = vmatpush3.bf16.msra.mxu0 %v5216_v8  ;;  %v6215_v8 = vld [vmem:[%s5287_s23 + $0xd0] sm:$0xf] }
  0xf5   : > { %4941 = vmatmul.mubr.bf16.gmra.mxu1 %v5811_v56  ;;  %5070 = vmatprep.subr.bf16.mxu0 %v5218_v22 }
  0xf6   : > { %4944 = vmatprep.mubr.bf16.mxu1 %v5896_v46  ;;  %5021 = vmatpush3.bf16.msra.mxu1 %v5215_v3 }
  0xf7   : > { %5022 = vmatprep.subr.bf16.mxu1 %v5217_v27  ;;  %v6169_v38 = vpop.f32.mrf.mxu0 }
  0xf8   : > { %5071 = vmatpush3.bf16.msra.mxu0 %v5218_v22 }
  0xf9   : > { %5072 = vmatprep.subr.bf16.mxu0 %v5220_v11  ;;  %v6179_v60 = vpop.f32.mrf.mxu0 }
  0xfa   : > { %4993 = vmatmul.mubr.bf16.gmra.mxu0 %v5967_v0  ;;  %5023 = vmatpush3.bf16.msra.mxu1 %v5217_v27 }
  0xfb   : > { %4996 = vmatprep.mubr.bf16.mxu0 %v5971_v14  ;;  %5024 = vmatprep.subr.bf16.mxu1 %v5219_v55  ;;  %v6176_v59 = vpop.f32.mrf.mxu1  ;;  %v6184_v14 = vpop.f32.mrf.mxu0 }
  0xfc   : > { %5073 = vmatpush3.bf16.msra.mxu0 %v5220_v11 }
  0xfd   : > { %4945 = vmatmul.mubr.bf16.gmra.mxu1 %v5909_v37  ;;  %5074 = vmatprep.subr.bf16.mxu0 %v5223_v30  ;;  %v6181_v0 = vpop.f32.mrf.mxu1  ;;  %v6191_v36 = vpop.f32.mrf.mxu0 }
  0xfe   : > { %4948 = vmatprep.mubr.bf16.mxu1 %v5959_v53  ;;  %5025 = vmatpush3.bf16.msra.mxu1 %v5219_v55 }
  0xff   : > { %5026 = vmatprep.subr.bf16.mxu1 %v5222_v18  ;;  %v6188_v32 = vpop.f32.mrf.mxu1 }
 0x100   : > { %5075 = vmatpush3.bf16.msra.mxu0 %v5223_v30 }
 0x101   : > { %v6193_v33 = vpop.f32.mrf.mxu1 }
 0x102   : > { %4997 = vmatmul.mubr.bf16.gmra.mxu0 %v5820_v25  ;;  %5027 = vmatpush3.bf16.msra.mxu1 %v5222_v18 }
 0x103   : > { %5000 = vmatprep.mubr.bf16.mxu0 %v5835_v17 }
 0x105   : > { %4949 = vmatmul.mubr.bf16.gmra.mxu1 %v5961_v41 }
 0x106   : > { %4952 = vmatprep.mubr.bf16.mxu1 %v5859_v47 }
 0x108   : > { %v6196_v25 = vpop.f32.mrf.mxu0 }
 0x10a   : > { %5001 = vmatmul.mubr.bf16.gmra.mxu0 %v5850_v34  ;;  %v6203_v12 = vpop.f32.mrf.mxu0  ;;  %v6212_v34 = vld [vmem:[%s5287_s23 + $0xcc] sm:$0xf] }
 0x10b   : > { %5004 = vmatprep.mubr.bf16.mxu0 %v5868_v39  ;;  %v4253_v22 = vcombine.low %v6212_v34, %v6215_v8 }
 0x10c   : > { %v6200_v17 = vpop.f32.mrf.mxu1  ;;  %v6208_v50 = vpop.f32.mrf.mxu0 }
 0x10d   : > { %4953 = vmatmul.mubr.bf16.gmra.mxu1 %v5880_v15  ;;  %7107 = vst [vmem:[#allocation12_spill] sm:$0xff] %v6200_v17 }
 0x10e   : > { %4956 = vmatprep.mubr.bf16.mxu1 %v5889_v26  ;;  %v6205_v43 = vpop.f32.mrf.mxu1  ;;  %v6220_v3 = vpop.f32.mrf.mxu0 }
 0x10f   : > { %7108 = vst [vmem:[#allocation15_spill] sm:$0xff] %v6205_v43 }
 0x110   : > { %v6218_v39 = vpop.f32.mrf.mxu1 }
 0x111   : > { %7109 = vst [vmem:[#allocation18_spill] sm:$0xff] %v6218_v39 }
 0x112   : > { %5005 = vmatmul.mubr.bf16.gmra.mxu0 %v5886_v19  ;;  %v6225_v19 = vpop.f32.mrf.mxu1 }
 0x113   : > { %5008 = vmatprep.mubr.bf16.mxu0 %v6095_v54  ;;  %7110 = vst [vmem:[#allocation4_spill] sm:$0xff] %v6225_v19 }
 0x115   : > { %4957 = vmatmul.mubr.bf16.gmra.mxu1 %v5917_v6 }
 0x116   : > { %4960 = vmatprep.mubr.bf16.mxu1 %v5928_v9 }
 0x11a   : > { %v6227_v27 = vpop.f32.mrf.mxu0  ;;  %5009 = vmatmul.mubr.bf16.gmra.mxu0 %v4253_v22 }
 0x11b   : > { %5076 = vmatprep.mubr.bf16.mxu0 %v5722_v28 }
 0x11c   : > { %v6230_v54 = vpop.f32.mrf.mxu0 }
 0x11d   : > { %v6232_v11 = vpop.f32.mrf.mxu1  ;;  %4961 = vmatmul.mubr.bf16.gmra.mxu1 %v6002_v42 }
 0x11e   : > { %7111 = vst [vmem:[#allocation6_spill] sm:$0xff] %v6232_v11  ;;  %v6235_v55 = vpop.f32.mrf.mxu0  ;;  %5028 = vmatprep.mubr.bf16.mxu1 %v7094_v10 }
 0x11f   : > { %v6238_v30 = vpop.f32.mrf.mxu1 }
 0x120   : > { %7112 = vst [vmem:[#allocation8_spill] sm:$0xff] %v6238_v30  ;;  %v6240_v18 = vpop.f32.mrf.mxu0 }
 0x121   : > { %v6242_v19 = vpop.f32.mrf.mxu1 }
 0x122   : > { %7113 = vst [vmem:[#allocation10_spill] sm:$0xff] %v6242_v19  ;;  %v4790_v39 = vpop.f32.mrf.mxu0  ;;  %5077 = vmatmul.mubr.bf16.vlgmr.msra.gmra.mxu0 %v5755_v49 }
 0x123   : > { %v6245_v28 = vpop.f32.mrf.mxu1  ;;  %5080 = vmatprep.mubr.bf16.mxu0 %v5757_v45 }
 0x124   : > { %7114 = vst [vmem:[#allocation13_spill] sm:$0xff] %v6245_v28  ;;  %v1518_v22 = vpop.f32.mrf.mxu0 }
 0x125   : > { %v4742_v11 = vpop.f32.mrf.mxu1  ;;  %5029 = vmatmul.mubr.bf16.vlgmr.msra.gmra.mxu1 %v7095_v52 }
 0x126   : > { %v1106_v43 = vadd.f32 %v4742_v11, %v6125_v44  ;;  %v4791_v10 = vpop.f32.mrf.mxu0  ;;  %5032 = vmatprep.mubr.bf16.mxu1 %v7096_v21 }
 0x127   : > { %v1097_v30 = vpop.f32.mrf.mxu1 }
 0x128   : > { %v6251_v31 = vadd.f32 %v4790_v39, %v1106_v43  ;;  %v1098_v19 = vadd.f32 %v1097_v30, %v6134_v57  ;;  %v1521_v17 = vpop.f32.mrf.mxu0 }
 0x129   : > { %v4743_v49 = vpop.f32.mrf.mxu1 }
 0x12a   : > { %v6254_v29 = vadd.f32 %v1518_v22, %v1098_v19  ;;  %v1109_v45 = vadd.f32 %v4743_v49, %v6145_v5  ;;  %v4794_v28 = vpop.f32.mrf.mxu0  ;;  %5081 = vmatmul.mubr.bf16.gmra.mxu0 %v5803_v2 }
 0x12b   : > { %v1100_v52 = vpop.f32.mrf.mxu1  ;;  %5084 = vmatprep.mubr.bf16.mxu0 %v5811_v56 }
 0x12c   : > { %v6259_v44 = vadd.f32 %v4791_v10, %v1109_v45  ;;  %v1101_v21 = vadd.f32 %v1100_v52, %v6158_v4  ;;  %v1534_v43 = vpop.f32.mrf.mxu0 }
 0x12d   : > { %v4746_v39 = vpop.f32.mrf.mxu1  ;;  %5033 = vmatmul.mubr.bf16.gmra.mxu1 %v7097_v35 }
 0x12e   : > { %v6263_v57 = vadd.f32 %v1521_v17, %v1101_v21  ;;  %v1122_v19 = vadd.f32 %v4746_v39, %v6169_v38  ;;  %v4795_v11 = vpop.f32.mrf.mxu0  ;;  %5036 = vmatprep.mubr.bf16.mxu1 %v7098_v24 }
 0x12f   : > { %v1113_v5 = vpop.f32.mrf.mxu1 }
 0x130   : > { %v6267_v2 = vadd.f32 %v4794_v28, %v1122_v19  ;;  %v1114_v56 = vadd.f32 %v1113_v5, %v6179_v60  ;;  %v1537_v30 = vpop.f32.mrf.mxu0 }
 0x131   : > { %v4747_v22 = vpop.f32.mrf.mxu1 }
 0x132   : > { %v6270_v10 = vadd.f32 %v1534_v43, %v1114_v56  ;;  %v1125_v4 = vadd.f32 %v4747_v22, %v6184_v14  ;;  %v4798_v49 = vpop.f32.mrf.mxu0  ;;  %5085 = vmatmul.mubr.bf16.gmra.mxu0 %v5896_v46 }
 0x133   : > { %v1116_v35 = vpop.f32.mrf.mxu1  ;;  %5088 = vmatprep.mubr.bf16.mxu0 %v5909_v37 }
 0x134   : > { %v6275_v38 = vadd.f32 %v4795_v11, %v1125_v4  ;;  %v1117_v24 = vadd.f32 %v1116_v35, %v6191_v36  ;;  %v1550_v17 = vpop.f32.mrf.mxu0 }
 0x135   : > { %v4750_v28 = vpop.f32.mrf.mxu1  ;;  %5037 = vmatmul.mubr.bf16.gmra.mxu1 %v5682_v20 }
 0x136   : > { %v6279_v60 = vadd.f32 %v1537_v30, %v1117_v24  ;;  %v1138_v45 = vadd.f32 %v4750_v28, %v6196_v25  ;;  %v4799_v52 = vpop.f32.mrf.mxu0  ;;  %5040 = vmatprep.mubr.bf16.mxu1 %v7099_v7 }
 0x137   : > { %v1129_v14 = vpop.f32.mrf.mxu1 }
 0x138   : > { %v6283_v46 = vadd.f32 %v4798_v49, %v1138_v45  ;;  %v1130_v37 = vadd.f32 %v1129_v14, %v6203_v12  ;;  %v1553_v21 = vpop.f32.mrf.mxu0  ;;  %v2775_v45 = vshrl.u32 %v6215_v8, 16 }
 0x139   : > { %v4751_v43 = vpop.f32.mrf.mxu1 }
 0x13a   : > { %v6286_v39 = vadd.f32 %v1550_v17, %v1130_v37  ;;  %v1141_v36 = vadd.f32 %v4751_v43, %v6208_v50  ;;  %v4802_v19 = vpop.f32.mrf.mxu0  ;;  %5089 = vmatmul.mubr.bf16.gmra.mxu0 %v5959_v53  ;;  %v2762_v17 = vshrl.u32 %v6212_v34, 16 }
 0x13b   : > { %v1132_v20 = vpop.f32.mrf.mxu1  ;;  %5092 = vmatprep.mubr.bf16.mxu0 %v5961_v41 }
 0x13c   : > { %v6291_v25 = vadd.f32 %v4799_v52, %v1141_v36  ;;  %v1133_v7 = vadd.f32 %v1132_v20, %v6220_v3  ;;  %v1566_v11 = vpop.f32.mrf.mxu0  ;;  %v2764_v43 = vrot.slane %v2762_v17, 4  ;;  %v2777_v20 = vrot.slane %v2775_v45, 4 }
 0x13d   : > { %v4754_v5 = vpop.f32.mrf.mxu1  ;;  %5041 = vmatmul.mubr.bf16.gmra.mxu1 %v7100_v48 }
 0x13e   : > { %v6295_v12 = vadd.f32 %v1553_v21, %v1133_v7  ;;  %v1154_v56 = vadd.f32 %v4754_v5, %v6227_v27  ;;  %v4803_v30 = vpop.f32.mrf.mxu0  ;;  %5044 = vmatprep.mubr.bf16.mxu1 %v7101_v62 }
 0x13f   : > { %v1145_v50 = vpop.f32.mrf.mxu1 }
 0x140   : > { %v6299_v53 = vadd.f32 %v4802_v19, %v1154_v56  ;;  %v1146_v41 = vadd.f32 %v1145_v50, %v6230_v54  ;;  %v1569_v22 = vpop.f32.mrf.mxu0  ;;  %v2765_v54 = vshll.u32 %v6212_v34, 16  ;;  %v225_v56 = vld [vmem:[%s5287_s23 + $0xd4] sm:$0x1] }
 0x141   : > { %v4755_v4 = vpop.f32.mrf.mxu1 }
 0x142   : > { %v6302_v49 = vadd.f32 %v1566_v11, %v1146_v41  ;;  %v1157_v3 = vadd.f32 %v4755_v4, %v6235_v55  ;;  %v4806_v35 = vpop.f32.mrf.mxu0  ;;  %5093 = vmatmul.mubr.bf16.gmra.mxu0 %v5859_v47  ;;  %v2771_v55 = vshll.u32 %v6215_v8, 16 }
 0x143   : > { %v1148_v48 = vpop.f32.mrf.mxu1  ;;  %5096 = vmatprep.mubr.bf16.mxu0 %v5880_v15 }
 0x144   : > { %v6307_v27 = vadd.f32 %v4803_v30, %v1157_v3  ;;  %v1149_v62 = vadd.f32 %v1148_v48, %v6240_v18  ;;  %v1582_v24 = vpop.f32.mrf.mxu0  ;;  %v2773_v19 = vrot.slane %v2771_v55, 5  ;;  %v2781_v3 = vshll.u32 %v225_v56, 16 }
 0x145   : > { %v4758_v28 = vpop.f32.mrf.mxu1  ;;  %5045 = vmatmul.mubr.bf16.gmra.mxu1 %v7102_v16  ;;  %v2767_v16 = vrot.slane %v2765_v54, 5 }
 0x146   : > { %v6315_v47 = vadd.f32 %v1569_v22, %v1149_v62  ;;  %v1170_v15 = vadd.f32 %v4758_v28, %v6128_v63  ;;  %v4807_v52 = vpop.f32.mrf.mxu0  ;;  %5048 = vmatprep.mubr.bf16.mxu1 %v7103_v23  ;;  %v3050_v23 = vrot.slane %v6215_v8, 5  ;;  %v2778_v8 = vor.u32 %v2777_v20, %v2773_v19 }
 0x147   : > { %v1161_v18 = vpop.f32.mrf.mxu1  ;;  %v2768_v22 = vor.u32 %v2767_v16, %v2764_v43  ;;  %v3053_v62 = vrot.slane %v225_v56, 5  ;;  %v2783_v45 = vrot.slane %v2781_v3, 5  ;;  %v7119_v56 = vld [vmem:[#allocation15_spill] sm:$0xff] }
 0x148   : > { %v6319_v14 = vadd.f32 %v4806_v35, %v1170_v15  ;;  %v1162_v37 = vadd.f32 %v1161_v18, %v6139_v40  ;;  %v1585_v21 = vpop.f32.mrf.mxu0  ;;  %v3052_v48 = vrot.slane %v3050_v23, 4 }
 0x149   : > { %v4759_v36 = vpop.f32.mrf.mxu1  ;;  %v2769_v54 = vrot.slane %v2768_v22, 4  ;;  %v7120_v22 = vld [vmem:[#allocation18_spill] sm:$0xff] }
 0x14a   : > { %v6322_v7 = vadd.f32 %v1582_v24, %v1162_v37  ;;  %v1173_v11 = vadd.f32 %v4759_v36, %v6152_v1  ;;  %v4810_v63 = vpop.f32.mrf.mxu0  ;;  %5097 = vmatmul.mubr.bf16.gmra.mxu0 %v5889_v26 }
 0x14b   : > { %v1164_v5 = vpop.f32.mrf.mxu1  ;;  %5100 = vmatprep.mubr.bf16.mxu0 %v5917_v6  ;;  %v4287_v6 = vrot.slane %v6212_v34, 9  ;;  %v2774_v43 = vsel %vm5321_vm2, %v2769_v54, %v2773_v19 }
 0x14c   : > { %v6329_v40 = vadd.f32 %v4807_v52, %v1173_v11  ;;  %v1165_v30 = vadd.f32 %v1164_v5, %v6163_v13  ;;  %v1598_v50 = vpop.f32.mrf.mxu0  ;;  %v7118_v11 = vld [vmem:[#allocation14_spill] sm:$0xff] }
 0x14d   : > { %v4762_v41 = vpop.f32.mrf.mxu1  ;;  %5049 = vmatmul.mubr.bf16.gmra.mxu1 %v7104_v51  ;;  %v3051_v52 = vsel %vm5667_vm5, %v4287_v6, %v3050_v23  ;;  %v7121_v6 = vld [vmem:[#allocation4_spill] sm:$0xff] }
 0x14e   : > { %v6333_v4 = vadd.f32 %v1585_v21, %v1165_v30  ;;  %v1186_v1 = vadd.f32 %v4762_v41, %v6176_v59  ;;  %v4811_v26 = vpop.f32.mrf.mxu0  ;;  %5052 = vmatprep.mubr.bf16.mxu1 %v7105_v58  ;;  %v2779_v58 = vrot.slane %v2778_v8, 4 }
 0x14f   : > { %v1177_v35 = vpop.f32.mrf.mxu1 }
 0x150   : > { %v6338_v13 = vadd.f32 %v4810_v63, %v1186_v1  ;;  %v1178_v24 = vadd.f32 %v1177_v35, %v6181_v0  ;;  %v1601_v51 = vpop.f32.mrf.mxu0  ;;  %v3054_v0 = vsel %vm5667_vm5, %v3052_v48, %v3053_v62  ;;  %v2784_v63 = vsel %vm5321_vm2, %v2779_v58, %v2783_v45  ;;  %v7123_v58 = vld [vmem:[#allocation8_spill] sm:$0xff] }
 0x151   : > { %v4763_v17 = vpop.f32.mrf.mxu1  ;;  %v4304_v23 = vcombine.low %v3051_v52, %v3054_v0  ;;  %v4278_v41 = vcombine.low %v2774_v43, %v2784_v63  ;;  %v7124_v0 = vld [vmem:[#allocation10_spill] sm:$0xff]  ;;  %v7125_v43 = vld [vmem:[#allocation13_spill] sm:$0xff] }
 0x152   : > { %v6341_v28 = vadd.f32 %v1598_v50, %v1178_v24  ;;  %v1189_v59 = vadd.f32 %v4763_v17, %v6188_v32  ;;  %v4814_v55 = vpop.f32.mrf.mxu0  ;;  %5101 = vmatmul.mubr.bf16.gmra.mxu0 %v5928_v9 }
 0x153   : > { %v1180_v34 = vpop.f32.mrf.mxu1  ;;  %5104 = vmatprep.mubr.bf16.mxu0 %v6002_v42  ;;  %v7117_v42 = vld [vmem:[#allocation12_spill] sm:$0xff] }
 0x154   : > { %v6350_v18 = vadd.f32 %v4811_v26, %v1189_v59  ;;  %v1181_v37 = vadd.f32 %v1180_v34, %v6193_v33  ;;  %v1614_v21 = vpop.f32.mrf.mxu0 }
 0x155   : > { %v4766_v32 = vpop.f32.mrf.mxu1  ;;  %5053 = vmatmul.mubr.bf16.gmra.mxu1 %v5701_v61 }
 0x156   : > { %v6356_v16 = vadd.f32 %v1601_v51, %v1181_v37  ;;  %v1202_v36 = vadd.f32 %v4766_v32, %v7117_v42  ;;  %v4815_v20 = vpop.f32.mrf.mxu0  ;;  %5056 = vmatprep.mubr.bf16.mxu1 %v7118_v11  ;;  %v7122_v51 = vld [vmem:[#allocation6_spill] sm:$0xff] }
 0x157   : > { %v1193_v5 = vpop.f32.mrf.mxu1 }
 0x158   : > { %v6362_v33 = vadd.f32 %v4814_v55, %v1202_v36  ;;  %v1194_v30 = vadd.f32 %v1193_v5, %v7119_v56  ;;  %v1617_v61 = vpop.f32.mrf.mxu0 }
 0x159   : > { %v4767_v50 = vpop.f32.mrf.mxu1 }
 0x15a   : > { %v6365_v19 = vadd.f32 %v1614_v21, %v1194_v30  ;;  %v1205_v1 = vadd.f32 %v4767_v50, %v7120_v22  ;;  %v4818_v26 = vpop.f32.mrf.mxu0  ;;  %5105 = vmatmul.mubr.bf16.gmra.mxu0 %v4304_v23 }
 0x15b   : > { %v1196_v8 = vpop.f32.mrf.mxu1 }
 0x15c   : > { %v6368_v3 = vadd.f32 %v4815_v20, %v1205_v1  ;;  %v1197_v35 = vadd.f32 %v1196_v8, %v7121_v6  ;;  %v1630_v48 = vpop.f32.mrf.mxu0 }
 0x15d   : > { %v4770_v62 = vpop.f32.mrf.mxu1  ;;  %5057 = vmatmul.mubr.bf16.gmra.mxu1 %v4278_v41 }
 0x15e   : > { %v6371_v24 = vadd.f32 %v1617_v61, %v1197_v35  ;;  %v1218_v17 = vadd.f32 %v4770_v62, %v7122_v51  ;;  %v4819_v54 = vpop.f32.mrf.mxu0  ;;  %v5241_v35 = vmov 0  }
 0x15f   : > { %v1209_v59 = vpop.f32.mrf.mxu1  ;;  %3410 = vst [vmem:[%s6396_s25 + $0x18] sm:$0xf] %v5241_v35  ;;  %3404 = vst [vmem:[%s6396_s25] sm:$0xf] %v5241_v35 }
 0x160   : > { %v6374_v55 = vadd.f32 %v4818_v26, %v1218_v17  ;;  %v1210_v45 = vadd.f32 %v1209_v59, %v7123_v58  ;;  %v1633_v34 = vpop.f32.mrf.mxu0  ;;  %3405 = vst [vmem:[%s6396_s25 + $0x4] sm:$0xf] %v5241_v35  ;;  %3406 = vst [vmem:[%s6396_s25 + $0x8] sm:$0x1] %v5241_v35 }
 0x161   : > { %v4771_v15 = vpop.f32.mrf.mxu1  ;;  %3407 = vst [vmem:[%s6396_s25 + $0xc] sm:$0xf] %v5241_v35  ;;  %3408 = vst [vmem:[%s6396_s25 + $0x10] sm:$0xf] %v5241_v35 }
 0x162   : > { %v6377_v52 = vadd.f32 %v1630_v48, %v1210_v45  ;;  %v1221_v37 = vadd.f32 %v4771_v15, %v7124_v0  ;;  %v4886_v21 = vpop.f32.mrf.mxu0  ;;  %3409 = vst [vmem:[%s6396_s25 + $0x14] sm:$0x1] %v5241_v35  ;;  %3411 = vst [vmem:[%s6396_s25 + $0x1c] sm:$0xf] %v5241_v35 }
 0x163   : > { %v1212_v32 = vpop.f32.mrf.mxu1  ;;  %3412 = vst [vmem:[%s6396_s25 + $0x20] sm:$0x1] %v5241_v35  ;;  %3413 = vst [vmem:[%s6396_s25 + $0x24] sm:$0xf] %v5241_v35 }
 0x164   : > { %v6380_v9 = vadd.f32 %v4819_v54, %v1221_v37  ;;  %v1213_v42 = vadd.f32 %v1212_v32, %v7125_v43  ;;  %v2068_v36 = vpop.f32.mrf.mxu0  ;;  %3414 = vst [vmem:[%s6396_s25 + $0x28] sm:$0xf] %v5241_v35  ;;  %3415 = vst [vmem:[%s6396_s25 + $0x2c] sm:$0x1] %v5241_v35 }
 0x165   : > { %v4838_v20 = vpop.f32.mrf.mxu1  ;;  %3416 = vst [vmem:[%s6396_s25 + $0x30] sm:$0xf] %v5241_v35  ;;  %3417 = vst [vmem:[%s6396_s25 + $0x34] sm:$0xf] %v5241_v35 }
 0x166   : > { %v6383_v11 = vadd.f32 %v1633_v34, %v1213_v42  ;;  %v1911_v63 = vadd.f32 %v4838_v20, %v6251_v31  ;;  %v4887_v23 = vpop.f32.mrf.mxu0  ;;  %3418 = vst [vmem:[%s6396_s25 + $0x38] sm:$0x1] %v5241_v35  ;;  %3419 = vst [vmem:[%s6396_s25 + $0x3c] sm:$0xf] %v5241_v35 }
 0x167   : > { %v1782_v5 = vpop.f32.mrf.mxu1  ;;  %3420 = vst [vmem:[%s6396_s25 + $0x40] sm:$0xf] %v5241_v35  ;;  %3421 = vst [vmem:[%s6396_s25 + $0x44] sm:$0x1] %v5241_v35 }
 0x168   : > { %v6386_v56 = vadd.f32 %v4886_v21, %v1911_v63  ;;  %v1909_v30 = vadd.f32 %v1782_v5, %v6254_v29  ;;  %v6389_v61 = vpop.f32.mrf.mxu0  ;;  %3422 = vst [vmem:[%s6396_s25 + $0x48] sm:$0xf] %v5241_v35  ;;  %3423 = vst [vmem:[%s6396_s25 + $0x4c] sm:$0xf] %v5241_v35 }
 0x169   : > { %v4839_v50 = vpop.f32.mrf.mxu1  ;;  %3424 = vst [vmem:[%s6396_s25 + $0x50] sm:$0x1] %v5241_v35  ;;  %3425 = vst [vmem:[%s6396_s25 + $0x54] sm:$0xf] %v5241_v35 }
 0x16a   : > { %v6398_v31 = vadd.f32 %v2068_v36, %v1909_v30  ;;  %v1912_v29 = vadd.f32 %v4839_v50, %v6259_v44  ;;  %v6401_v41 = vpop.f32.mrf.mxu0  ;;  %3426 = vst [vmem:[%s6396_s25 + $0x58] sm:$0xf] %v5241_v35  ;;  %3427 = vst [vmem:[%s6396_s25 + $0x5c] sm:$0x1] %v5241_v35 }
 0x16b   : > { %v1785_v22 = vpop.f32.mrf.mxu1  ;;  %3428 = vst [vmem:[%s6396_s25 + $0x60] sm:$0xf] %v5241_v35  ;;  %3429 = vst [vmem:[%s6396_s25 + $0x64] sm:$0xf] %v5241_v35 }
 0x16c   : > { %v6403_v1 = vadd.f32 %v4887_v23, %v1912_v29  ;;  %v1910_v26 = vadd.f32 %v1785_v22, %v6263_v57  ;;  %v6406_v8 = vpop.f32.mrf.mxu0  ;;  %3430 = vst [vmem:[%s6396_s25 + $0x68] sm:$0x1] %v5241_v35  ;;  %3431 = vst [vmem:[%s6396_s25 + $0x6c] sm:$0xf] %v5241_v35 }
 0x16d   : > { %v4842_v6 = vpop.f32.mrf.mxu1  ;;  %3432 = vst [vmem:[%s6396_s25 + $0x70] sm:$0xf] %v5241_v35  ;;  %3433 = vst [vmem:[%s6396_s25 + $0x74] sm:$0x1] %v5241_v35 }
 0x16e   : > { %3434 = vst [vmem:[%s6396_s25 + $0x78] sm:$0xf] %v5241_v35  ;;  %3435 = vst [vmem:[%s6396_s25 + $0x7c] sm:$0xf] %v5241_v35  ;;  %v6463_v44 = vadd.f32 %v6389_v61, %v1910_v26  ;;  %v1915_v57 = vadd.f32 %v4842_v6, %v6267_v2  ;;  %v4891_v48 = vpop.f32.mrf.mxu0 }
 0x16f   : > { %3436 = vst [vmem:[%s6396_s25 + $0x80] sm:$0x1] %v5241_v35  ;;  %3437 = vst [vmem:[%s6396_s25 + $0x84] sm:$0xf] %v5241_v35  ;;  %v1798_v62 = vpop.f32.mrf.mxu1 }
 0x170   : > { %3438 = vst [vmem:[%s6396_s25 + $0x88] sm:$0xf] %v5241_v35  ;;  %3439 = vst [vmem:[%s6396_s25 + $0x8c] sm:$0x1] %v5241_v35  ;;  %v6467_v51 = vadd.f32 %v6401_v41, %v1915_v57  ;;  %v1913_v17 = vadd.f32 %v1798_v62, %v6270_v10  ;;  %v2087_v54 = vpop.f32.mrf.mxu0 }
 0x171   : > { %3440 = vst [vmem:[%s6396_s25 + $0x90] sm:$0xf] %v5241_v35  ;;  %3441 = vst [vmem:[%s6396_s25 + $0x94] sm:$0xf] %v5241_v35  ;;  %v4843_v59 = vpop.f32.mrf.mxu1 }
 0x172   : > { %3442 = vst [vmem:[%s6396_s25 + $0x98] sm:$0x1] %v5241_v35  ;;  %3443 = vst [vmem:[%s6396_s25 + $0x9c] sm:$0xf] %v5241_v35  ;;  %v6471_v58 = vadd.f32 %v6406_v8, %v1913_v17  ;;  %v1916_v45 = vadd.f32 %v4843_v59, %v6275_v38  ;;  %v4894_v34 = vpop.f32.mrf.mxu0 }
 0x173   : > { %3444 = vst [vmem:[%s6396_s25 + $0xa0] sm:$0xf] %v5241_v35  ;;  %3445 = vst [vmem:[%s6396_s25 + $0xa4] sm:$0x1] %v5241_v35  ;;  %v1801_v15 = vpop.f32.mrf.mxu1 }
 0x174   : > { %3446 = vst [vmem:[%s6396_s25 + $0xa8] sm:$0xf] %v5241_v35  ;;  %3447 = vst [vmem:[%s6396_s25 + $0xac] sm:$0xf] %v5241_v35  ;;  %v6474_v0 = vadd.f32 %v4891_v48, %v1916_v45  ;;  %v1914_v2 = vadd.f32 %v1801_v15, %v6279_v60  ;;  %v2100_v37 = vpop.f32.mrf.mxu0 }
 0x175   : > { %3448 = vst [vmem:[%s6396_s25 + $0xb0] sm:$0x1] %v5241_v35  ;;  %3449 = vst [vmem:[%s6396_s25 + $0xb4] sm:$0xf] %v5241_v35  ;;  %v4846_v21 = vpop.f32.mrf.mxu1 }
 0x176   : > { %3450 = vst [vmem:[%s6396_s25 + $0xb8] sm:$0xf] %v5241_v35  ;;  %3451 = vst [vmem:[%s6396_s25 + $0xbc] sm:$0x1] %v5241_v35  ;;  %v6477_v32 = vadd.f32 %v2087_v54, %v1914_v2  ;;  %v1919_v43 = vadd.f32 %v4846_v21, %v6283_v46  ;;  %v4895_v10 = vpop.f32.mrf.mxu0 }
 0x177   : > { %3452 = vst [vmem:[%s6396_s25 + $0xc0] sm:$0xf] %v5241_v35  ;;  %3453 = vst [vmem:[%s6396_s25 + $0xc4] sm:$0xf] %v5241_v35  ;;  %v1814_v42 = vpop.f32.mrf.mxu1 }
 0x178   : > { %3454 = vst [vmem:[%s6396_s25 + $0xc8] sm:$0x1] %v5241_v35  ;;  %3455 = vst [vmem:[%s6396_s25 + $0xcc] sm:$0xf] %v5241_v35  ;;  %v6480_v36 = vadd.f32 %v4894_v34, %v1919_v43  ;;  %v1917_v20 = vadd.f32 %v1814_v42, %v6286_v39  ;;  %v2103_v63 = vpop.f32.mrf.mxu0 }
 0x179   : > { %3456 = vst [vmem:[%s6396_s25 + $0xd0] sm:$0xf] %v5241_v35  ;;  %3457 = vst [vmem:[%s6396_s25 + $0xd4] sm:$0x1] %v5241_v35  ;;  %v4847_v38 = vpop.f32.mrf.mxu1 }
 0x17a   : > { %v6483_v23 = vadd.f32 %v2100_v37, %v1917_v20  ;;  %v1920_v5 = vadd.f32 %v4847_v38, %v6291_v25  ;;  %v4898_v30 = vpop.f32.mrf.mxu0 }
 0x17b   : > { %v1817_v60 = vpop.f32.mrf.mxu1 }
 0x17c   : > { %v6486_v61 = vadd.f32 %v4895_v10, %v1920_v5  ;;  %v1918_v50 = vadd.f32 %v1817_v60, %v6295_v12  ;;  %v2116_v29 = vpop.f32.mrf.mxu0 }
 0x17d   : > { %v4850_v46 = vpop.f32.mrf.mxu1 }
 0x17e   : > { %v6489_v41 = vadd.f32 %v2103_v63, %v1918_v50  ;;  %v1923_v22 = vadd.f32 %v4850_v46, %v6299_v53  ;;  %v4899_v26 = vpop.f32.mrf.mxu0 }
 0x17f   : > { %v1830_v39 = vpop.f32.mrf.mxu1 }
 0x180   : > { %v6492_v8 = vadd.f32 %v4898_v30, %v1923_v22  ;;  %v1921_v6 = vadd.f32 %v1830_v39, %v6302_v49  ;;  %v2119_v35 = vpop.f32.mrf.mxu0 }
 0x181   : > { %v4851_v25 = vpop.f32.mrf.mxu1 }
 0x182   : > { %v6495_v57 = vadd.f32 %v2116_v29, %v1921_v6  ;;  %v1924_v48 = vadd.f32 %v4851_v25, %v6307_v27  ;;  %v4902_v62 = vpop.f32.mrf.mxu0 }
 0x183   : > { %v1833_v12 = vpop.f32.mrf.mxu1 }
 0x184   : > { %v6498_v17 = vadd.f32 %v4899_v26, %v1924_v48  ;;  %v1922_v54 = vadd.f32 %v1833_v12, %v6315_v47  ;;  %v2132_v59 = vpop.f32.mrf.mxu0 }
 0x185   : > { %v4854_v53 = vpop.f32.mrf.mxu1 }
 0x186   : > { %v6501_v45 = vadd.f32 %v2119_v35, %v1922_v54  ;;  %v1927_v34 = vadd.f32 %v4854_v53, %v6319_v14  ;;  %v4903_v15 = vpop.f32.mrf.mxu0 }
 0x187   : > { %v1846_v49 = vpop.f32.mrf.mxu1 }
 0x188   : > { %v6504_v2 = vadd.f32 %v4902_v62, %v1927_v34  ;;  %v1925_v37 = vadd.f32 %v1846_v49, %v6322_v7  ;;  %v2135_v21 = vpop.f32.mrf.mxu0 }
 0x189   : > { %v4855_v27 = vpop.f32.mrf.mxu1 }
 0x18a   : > { %v6507_v43 = vadd.f32 %v2132_v59, %v1925_v37  ;;  %v1928_v10 = vadd.f32 %v4855_v27, %v6329_v40  ;;  %v4906_v42 = vpop.f32.mrf.mxu0 }
 0x18b   : > { %v1849_v47 = vpop.f32.mrf.mxu1 }
 0x18c   : > { %v6510_v20 = vadd.f32 %v4903_v15, %v1928_v10  ;;  %v1926_v63 = vadd.f32 %v1849_v47, %v6333_v4  ;;  %v2148_v38 = vpop.f32.mrf.mxu0 }
 0x18d   : > { %v4858_v14 = vpop.f32.mrf.mxu1 }
 0x18e   : > { %v6513_v5 = vadd.f32 %v2135_v21, %v1926_v63  ;;  %v1931_v30 = vadd.f32 %v4858_v14, %v6338_v13  ;;  %v4907_v60 = vpop.f32.mrf.mxu0 }
 0x18f   : > { %v1862_v7 = vpop.f32.mrf.mxu1 }
 0x190   : > { %v6516_v50 = vadd.f32 %v4906_v42, %v1931_v30  ;;  %v1929_v29 = vadd.f32 %v1862_v7, %v6341_v28  ;;  %v2151_v46 = vpop.f32.mrf.mxu0 }
 0x191   : > { %v4859_v40 = vpop.f32.mrf.mxu1 }
 0x192   : > { %v6519_v22 = vadd.f32 %v2148_v38, %v1929_v29  ;;  %v1932_v26 = vadd.f32 %v4859_v40, %v6350_v18  ;;  %v4910_v39 = vpop.f32.mrf.mxu0 }
 0x193   : > { %v1865_v4 = vpop.f32.mrf.mxu1 }
 0x194   : > { %v6522_v6 = vadd.f32 %v4907_v60, %v1932_v26  ;;  %v1930_v35 = vadd.f32 %v1865_v4, %v6356_v16  ;;  %v2164_v25 = vpop.f32.mrf.mxu0 }
 0x195   : > { %v4862_v13 = vpop.f32.mrf.mxu1 }
 0x196   : > { %v6525_v48 = vadd.f32 %v2151_v46, %v1930_v35  ;;  %v1935_v62 = vadd.f32 %v4862_v13, %v6362_v33  ;;  %v4911_v12 = vpop.f32.mrf.mxu0 }
 0x197   : > { %v1878_v28 = vpop.f32.mrf.mxu1 }
 0x198   : > { %v6528_v54 = vadd.f32 %v4910_v39, %v1935_v62  ;;  %v1933_v59 = vadd.f32 %v1878_v28, %v6365_v19  ;;  %v2167_v53 = vpop.f32.mrf.mxu0 }
 0x199   : > { %v4863_v18 = vpop.f32.mrf.mxu1 }
 0x19a   : > { %v6531_v34 = vadd.f32 %v2164_v25, %v1933_v59  ;;  %v1936_v15 = vadd.f32 %v4863_v18, %v6368_v3  ;;  %v4914_v49 = vpop.f32.mrf.mxu0 }
 0x19b   : > { %v1881_v16 = vpop.f32.mrf.mxu1 }
 0x19c   : > { %v6534_v37 = vadd.f32 %v4911_v12, %v1936_v15  ;;  %v1934_v21 = vadd.f32 %v1881_v16, %v6371_v24  ;;  %v2180_v27 = vpop.f32.mrf.mxu0 }
 0x19d   : > { %v4866_v33 = vpop.f32.mrf.mxu1 }
 0x19e   : > { %v6537_v10 = vadd.f32 %v2167_v53, %v1934_v21  ;;  %v1939_v42 = vadd.f32 %v4866_v33, %v6374_v55  ;;  %v4915_v47 = vpop.f32.mrf.mxu0 }
 0x19f   : > { %v1894_v19 = vpop.f32.mrf.mxu1 }
 0x1a0   : > { %v6540_v63 = vadd.f32 %v4914_v49, %v1939_v42  ;;  %v1937_v38 = vadd.f32 %v1894_v19, %v6377_v52  ;;  %v2183_v14 = vpop.f32.mrf.mxu0 }
 0x1a1   : > { %v4867_v3 = vpop.f32.mrf.mxu1 }
 0x1a2   : > { %v6543_v30 = vadd.f32 %v2180_v27, %v1937_v38  ;;  %v1940_v60 = vadd.f32 %v4867_v3, %v6380_v9  ;;  %v6546_v7 = vpop.f32.mrf.mxu0 }
 0x1a3   : > { %v1897_v24 = vpop.f32.mrf.mxu1 }
 0x1a4   : > { %v6548_v29 = vadd.f32 %v4915_v47, %v1940_v60  ;;  %v1938_v46 = vadd.f32 %v1897_v24, %v6383_v11  ;;  %v6551_v55 = vpop.f32.mrf.mxu0 }
 0x1a5   : > { %v6553_v40 = vpop.f32.mrf.mxu1 }
 0x1a6   : > { %v6555_v26 = vadd.f32 %v2183_v14, %v1938_v46  ;;  %v6557_v52 = vpop.f32.mrf.mxu0 }
 0x1a7   : > { %v6559_v39 = vpop.f32.mrf.mxu1 }
 0x1a8   : > { %v6561_v4 = vpop.f32.mrf.mxu0 }
 0x1a9   : > { %v6563_v9 = vpop.f32.mrf.mxu1 }
 0x1aa   : > { %v6565_v35 = vpop.f32.mrf.mxu0 }
 0x1ab   : > { %v6567_v25 = vpop.f32.mrf.mxu1 }
 0x1ac   : > { %v6569_v13 = vpop.f32.mrf.mxu0 }
 0x1ad   : > { %v6571_v11 = vpop.f32.mrf.mxu1 }
 0x1ae   : > { %v4987_v62 = vpop.f32.mrf.mxu0 }
 0x1af   : > { %v6573_v12 = vpop.f32.mrf.mxu1 }
 0x1b0   : > { %v2621_v28 = vpop.f32.mrf.mxu0 }
 0x1b1   : > { %v4939_v59 = vpop.f32.mrf.mxu1 }
 0x1b2   : > { %v2472_v53 = vadd.f32 %v4939_v59, %v6474_v0  ;;  %v4990_v18 = vpop.f32.mrf.mxu0 }
 0x1b3   : > { %v2357_v15 = vpop.f32.mrf.mxu1 }
 0x1b4   : > { %v6576_v49 = vadd.f32 %v4987_v62, %v2472_v53  ;;  %v2470_v16 = vadd.f32 %v2357_v15, %v6477_v32  ;;  %v2634_v21 = vpop.f32.mrf.mxu0 }
 0x1b5   : > { %v4942_v27 = vpop.f32.mrf.mxu1 }
 0x1b6   : > { %v6579_v33 = vadd.f32 %v2621_v28, %v2470_v16  ;;  %v2475_v42 = vadd.f32 %v4942_v27, %v6480_v36  ;;  %v4991_v47 = vpop.f32.mrf.mxu0 }
 0x1b7   : > { %v2370_v19 = vpop.f32.mrf.mxu1 }
 0x1b8   : > { %v6582_v38 = vadd.f32 %v4990_v18, %v2475_v42  ;;  %v2473_v14 = vadd.f32 %v2370_v19, %v6483_v23  ;;  %v2637_v3 = vpop.f32.mrf.mxu0 }
 0x1b9   : > { %v4943_v0 = vpop.f32.mrf.mxu1 }
 0x1ba   : > { %v6585_v60 = vadd.f32 %v2634_v21, %v2473_v14  ;;  %v2476_v24 = vadd.f32 %v4943_v0, %v6486_v61  ;;  %v4994_v46 = vpop.f32.mrf.mxu0 }
 0x1bb   : > { %v2373_v32 = vpop.f32.mrf.mxu1 }
 0x1bc   : > { %v6588_v62 = vadd.f32 %v4991_v47, %v2476_v24  ;;  %v2474_v28 = vadd.f32 %v2373_v32, %v6489_v41  ;;  %v2650_v59 = vpop.f32.mrf.mxu0 }
 0x1bd   : > { %v4946_v36 = vpop.f32.mrf.mxu1 }
 0x1be   : > { %v6591_v53 = vadd.f32 %v2637_v3, %v2474_v28  ;;  %v2479_v18 = vadd.f32 %v4946_v36, %v6492_v8  ;;  %v4995_v15 = vpop.f32.mrf.mxu0 }
 0x1bf   : > { %v2386_v23 = vpop.f32.mrf.mxu1 }
 0x1c0   : > { %v6594_v16 = vadd.f32 %v4994_v46, %v2479_v18  ;;  %v2477_v21 = vadd.f32 %v2386_v23, %v6495_v57  ;;  %v2653_v27 = vpop.f32.mrf.mxu0 }
 0x1c1   : > { %v4947_v61 = vpop.f32.mrf.mxu1 }
 0x1c2   : > { %v6597_v42 = vadd.f32 %v2650_v59, %v2477_v21  ;;  %v2480_v47 = vadd.f32 %v4947_v61, %v6498_v17  ;;  %v4998_v19 = vpop.f32.mrf.mxu0 }
 0x1c3   : > { %v2389_v41 = vpop.f32.mrf.mxu1 }
 0x1c4   : > { %v6600_v14 = vadd.f32 %v4995_v15, %v2480_v47  ;;  %v2478_v3 = vadd.f32 %v2389_v41, %v6501_v45  ;;  %v2666_v0 = vpop.f32.mrf.mxu0 }
 0x1c5   : > { %v4950_v8 = vpop.f32.mrf.mxu1 }
 0x1c6   : > { %v6603_v24 = vadd.f32 %v2653_v27, %v2478_v3  ;;  %v2483_v46 = vadd.f32 %v4950_v8, %v6504_v2  ;;  %v4999_v32 = vpop.f32.mrf.mxu0 }
 0x1c7   : > { %v2402_v57 = vpop.f32.mrf.mxu1 }
 0x1c8   : > { %v6606_v28 = vadd.f32 %v4998_v19, %v2483_v46  ;;  %v2481_v59 = vadd.f32 %v2402_v57, %v6507_v43  ;;  %v2669_v36 = vpop.f32.mrf.mxu0 }
 0x1c9   : > { %v4951_v17 = vpop.f32.mrf.mxu1 }
 0x1ca   : > { %v6609_v18 = vadd.f32 %v2666_v0, %v2481_v59  ;;  %v2484_v15 = vadd.f32 %v4951_v17, %v6510_v20  ;;  %v5002_v23 = vpop.f32.mrf.mxu0 }
 0x1cb   : > { %v2405_v45 = vpop.f32.mrf.mxu1 }
 0x1cc   : > { %v6612_v21 = vadd.f32 %v4999_v32, %v2484_v15  ;;  %v2482_v27 = vadd.f32 %v2405_v45, %v6513_v5  ;;  %v2682_v61 = vpop.f32.mrf.mxu0 }
 0x1cd   : > { %v4954_v2 = vpop.f32.mrf.mxu1 }
 0x1ce   : > { %v6615_v47 = vadd.f32 %v2669_v36, %v2482_v27  ;;  %v2487_v19 = vadd.f32 %v4954_v2, %v6516_v50  ;;  %v5003_v41 = vpop.f32.mrf.mxu0 }
 0x1cf   : > { %v2418_v43 = vpop.f32.mrf.mxu1 }
 0x1d0   : > { %v6618_v3 = vadd.f32 %v5002_v23, %v2487_v19  ;;  %v2485_v0 = vadd.f32 %v2418_v43, %v6519_v22  ;;  %v2685_v8 = vpop.f32.mrf.mxu0 }
 0x1d1   : > { %v4955_v20 = vpop.f32.mrf.mxu1 }
 0x1d2   : > { %v6621_v46 = vadd.f32 %v2682_v61, %v2485_v0  ;;  %v2488_v32 = vadd.f32 %v4955_v20, %v6522_v6  ;;  %v5006_v57 = vpop.f32.mrf.mxu0 }
 0x1d3   : > { %v2421_v5 = vpop.f32.mrf.mxu1 }
 0x1d4   : > { %v6624_v59 = vadd.f32 %v5003_v41, %v2488_v32  ;;  %v2486_v36 = vadd.f32 %v2421_v5, %v6525_v48  ;;  %v2698_v17 = vpop.f32.mrf.mxu0 }
 0x1d5   : > { %v4958_v50 = vpop.f32.mrf.mxu1 }
 0x1d6   : > { %v6627_v15 = vadd.f32 %v2685_v8, %v2486_v36  ;;  %v2491_v23 = vadd.f32 %v4958_v50, %v6528_v54  ;;  %v5007_v45 = vpop.f32.mrf.mxu0  ;;  %v2467_v36 = vadd.f32 %v6553_v40, %v6386_v56  ;;  %v2468_v56 = vadd.f32 %v6563_v9, %v6403_v1 }
 0x1d7   : > { %v2434_v22 = vpop.f32.mrf.mxu1 }
 0x1d8   : > { %v6630_v27 = vadd.f32 %v5006_v57, %v2491_v23  ;;  %v2489_v61 = vadd.f32 %v2434_v22, %v6531_v34  ;;  %v2701_v2 = vpop.f32.mrf.mxu0  ;;  %v2732_v9 = vadd.f32 %v6557_v52, %v2468_v56 }
 0x1d9   : > { %v4959_v6 = vpop.f32.mrf.mxu1 }
 0x1da   : > { %v6633_v19 = vadd.f32 %v2698_v17, %v2489_v61  ;;  %v2492_v41 = vadd.f32 %v4959_v6, %v6534_v37  ;;  %v5010_v43 = vpop.f32.mrf.mxu0 }
 0x1db   : > { %v2437_v48 = vpop.f32.mrf.mxu1 }
 0x1dc   : > { %v6636_v0 = vadd.f32 %v5007_v45, %v2492_v41  ;;  %v2490_v8 = vadd.f32 %v2437_v48, %v6537_v10  ;;  %v2714_v20 = vpop.f32.mrf.mxu0  ;;  %v2465_v10 = vadd.f32 %v6559_v39, %v6398_v31  ;;  %v2466_v31 = vadd.f32 %v6567_v25, %v6463_v44 }
 0x1dd   : > { %v4962_v54 = vpop.f32.mrf.mxu1 }
 0x1de   : > { %v6639_v32 = vadd.f32 %v2701_v2, %v2490_v8  ;;  %v2495_v57 = vadd.f32 %v4962_v54, %v6540_v63  ;;  %v5011_v5 = vpop.f32.mrf.mxu0  ;;  %v2731_v2 = vadd.f32 %v6546_v7, %v2467_v36  ;;  %v6666_v7 = vld [vmem:[%s7026_s2] ss:$0 sm:$0xff]  ;;  %v2730_v44 = vadd.f32 %v6561_v4, %v2466_v31 }
 0x1df   : > { %v2450_v34 = vpop.f32.mrf.mxu1  ;;  %v2469_v36 = vadd.f32 %v6573_v12, %v6471_v58 }
 0x1e0   : > { %v6644_v17 = vadd.f32 %v5010_v43, %v2495_v57  ;;  %v2493_v37 = vadd.f32 %v2450_v34, %v6543_v30  ;;  %v2717_v50 = vpop.f32.mrf.mxu0  ;;  %v2729_v43 = vadd.f32 %v6551_v55, %v2465_v10  ;;  %v2471_v55 = vadd.f32 %v6571_v11, %v6467_v51 }
 0x1e1   : > { %v4963_v23 = vpop.f32.mrf.mxu1  ;;  %v2733_v58 = vadd.f32 %v6569_v13, %v2469_v36 }
 0x1e2   : > { %v6649_v45 = vadd.f32 %v2714_v20, %v2493_v37  ;;  %v2496_v22 = vadd.f32 %v4963_v23, %v6548_v29  ;;  %v5078_v61 = vpop.f32.mrf.mxu0  ;;  %v2735_v51 = vadd.f32 %v6565_v35, %v2471_v55 }
 0x1e3   : > { %v2453_v63 = vpop.f32.mrf.mxu1 }
 0x1e4   : > { %v6655_v40 = vadd.f32 %v5011_v5, %v2496_v22  ;;  %v2494_v30 = vadd.f32 %v2453_v63, %v6555_v26  ;;  %v3158_v6 = vpop.f32.mrf.mxu0 }
 0x1e5   : > { %v5030_v41 = vpop.f32.mrf.mxu1 }
 0x1e6   : > { %v6661_v39 = vadd.f32 %v2717_v50, %v2494_v30  ;;  %v3017_v29 = vadd.f32 %v5030_v41, %v2731_v2  ;;  %v5079_v48 = vpop.f32.mrf.mxu0 }
 0x1e7   : > { %v2888_v1 = vpop.f32.mrf.mxu1 }
 0x1e8   : > { %v3287_v26 = vadd.f32 %v5078_v61, %v3017_v29  ;;  %v3015_v8 = vadd.f32 %v2888_v1, %v2729_v43  ;;  %v3161_v20 = vpop.f32.mrf.mxu0 }
 0x1e9   : > { %v5031_v54 = vpop.f32.mrf.mxu1 }
 0x1ea   : > { %v3326_v25 = vadd.f32 %v6666_v7, %v3287_v26  ;;  %v3285_v57 = vadd.f32 %v3158_v6, %v3015_v8  ;;  %v3018_v5 = vadd.f32 %v5031_v54, %v2732_v9  ;;  %v5082_v34 = vpop.f32.mrf.mxu0 }
 0x1eb   : > { %v2891_v37 = vpop.f32.mrf.mxu1 }
 0x1ec   : > { %v3358_v50 = vmax.f32 %v3326_v25, 0.0  ;;  %v3324_v52 = vadd.f32 %v6666_v7, %v3285_v57  ;;  %v3288_v23 = vadd.f32 %v5079_v48, %v3018_v5  ;;  %v3016_v10 = vadd.f32 %v2891_v37, %v2730_v44  ;;  %v3174_v22 = vpop.f32.mrf.mxu0  ;;  %v4351_v44 = vld [vmem:[%s6396_s25 + $0x18] sm:$0xf] }
 0x1ed   : > { %v5034_v4 = vpop.f32.mrf.mxu1 }
 0x1ee   : > { %v4430_v11 = vpack.c.bf16 %v3358_v50, %v3358_v50  ;;  %v3356_v61 = vmax.f32 %v3324_v52, 0.0  ;;  %v3327_v63 = vadd.f32 %v6666_v7, %v3288_v23  ;;  %v3286_v2 = vadd.f32 %v3161_v20, %v3016_v10  ;;  %v5083_v56 = vpop.f32.mrf.mxu0 }
 0x1ef   : > { %v3021_v12 = vadd.f32 %v5034_v4, %v2735_v51  ;;  %v2904_v30 = vpop.f32.mrf.mxu1  ;;  %v4346_v51 = vld [vmem:[%s6396_s25 + $0xc] sm:$0xf] }
 0x1f0   : > { %v3559_v6 = vshrl.u32 %v4430_v11, 16  ;;  %v4428_v41 = vpack.c.bf16 %v3356_v61, %v3356_v61  ;;  %v3359_v43 = vmax.f32 %v3327_v63, 0.0  ;;  %v6679_v35 = vpop.f32.mrf.mxu0  ;;  %v3562_v31 = vshll.u32 %v4430_v11, 16 }
 0x1f1   : > { %v3325_v29 = vadd.f32 %v6666_v7, %v3286_v2  ;;  %v3291_v48 = vadd.f32 %v5082_v34, %v3021_v12  ;;  %v3019_v1 = vadd.f32 %v2904_v30, %v2733_v58  ;;  %v5035_v9 = vpop.f32.mrf.mxu1 }
 0x1f2   : > { %v3561_v26 = vrot.slane %v3559_v6, 7  ;;  %v3542_v8 = vshrl.u32 %v4428_v41, 16  ;;  %v3545_v13 = vshll.u32 %v4428_v41, 16  ;;  %v4431_v20 = vpack.c.bf16 %v3359_v43, %v3359_v43  ;;  %v6682_v55 = vpop.f32.mrf.mxu0  ;;  %v4354_v43 = vld [vmem:[%s6396_s25 + $0x20] sm:$0x1] }
 0x1f3   : > { %v3357_v25 = vmax.f32 %v3325_v29, 0.0  ;;  %v3330_v57 = vadd.f32 %v6666_v7, %v3291_v48  ;;  %v3289_v5 = vadd.f32 %v3174_v22, %v3019_v1  ;;  %v3022_v34 = vadd.f32 %v5035_v9, %v6576_v49  ;;  %v2907_v36 = vpop.f32.mrf.mxu1 }
 0x1f4   : > { %v3564_v37 = vor.u32 %v3562_v31, %v3561_v26  ;;  %v3565_v50 = vrot.slane %v3561_v26, 4  ;;  %v3544_v52 = vrot.slane %v3542_v8, 7  ;;  %v3567_v23 = vshrl.u32 %v4431_v20, 16  ;;  %v6693_v10 = vpop.f32.mrf.mxu0 }
 0x1f5   : > { %v3570_v4 = vshll.u32 %v4431_v20, 16  ;;  %v4429_v11 = vpack.c.bf16 %v3357_v25, %v3357_v25  ;;  %v3362_v61 = vmax.f32 %v3330_v57, 0.0  ;;  %v3328_v63 = vadd.f32 %v6666_v7, %v3289_v5  ;;  %v5038_v2 = vpop.f32.mrf.mxu1 }
 0x1f6   : > { %v3875_v22 = vsel %vm6686_vm11, %v3564_v37, %v4351_v44  ;;  %v3547_v49 = vor.u32 %v3545_v13, %v3544_v52  ;;  %v3548_v58 = vrot.slane %v3544_v52, 4  ;;  %v3569_v30 = vrot.slane %v3567_v23, 7  ;;  %v6705_v6 = vpop.f32.mrf.mxu0 }
 0x1f7   : > { %4352 = vst [vmem:[%s6396_s25 + $0x18] sm:$0xf] %v3875_v22  ;;  %v3550_v31 = vshrl.u32 %v4429_v11, 16  ;;  %v3553_v29 = vshll.u32 %v4429_v11, 16  ;;  %v4434_v48 = vpack.c.bf16 %v3362_v61, %v3362_v61  ;;  %v3360_v1 = vmax.f32 %v3328_v63, 0.0  ;;  %v2920_v9 = vpop.f32.mrf.mxu1 }
 0x1f8   : > { %v3866_v26 = vsel %vm6686_vm11, %v3547_v49, %v4346_v51  ;;  %v3572_v8 = vor.u32 %v3570_v4, %v3569_v30  ;;  %v3574_v13 = vrot.slane %v3569_v30, 4  ;;  %v3292_v20 = vadd.f32 %v5083_v56, %v3022_v34  ;;  %v3193_v44 = vpop.f32.mrf.mxu0  ;;  %v4349_v51 = vld [vmem:[%s6396_s25 + $0x14] sm:$0x1] }
 0x1f9   : > { %4347 = vst [vmem:[%s6396_s25 + $0xc] sm:$0xf] %v3866_v26  ;;  %v3552_v25 = vrot.slane %v3550_v31, 7  ;;  %v3593_v57 = vshrl.u32 %v4434_v48, 16  ;;  %v3596_v5 = vshll.u32 %v4434_v48, 16  ;;  %v4432_v37 = vpack.c.bf16 %v3360_v1, %v3360_v1  ;;  %v5039_v52 = vpop.f32.mrf.mxu1 }
 0x1fa   : > { %v3573_v23 = vsel %vm6701_vm12, %v3565_v50, %v3572_v8  ;;  %v3879_v11 = vsel %vm6710_vm13, %v3574_v13, %v4354_v43  ;;  %v3331_v4 = vadd.f32 %v6666_v7, %v3292_v20  ;;  %v3020_v61 = vadd.f32 %v2907_v36, %v6579_v33  ;;  %v5090_v56 = vpop.f32.mrf.mxu0  ;;  %v4361_v31 = vld [vmem:[%s6396_s25 + $0x30] sm:$0xf] }
 0x1fb   : > { %4353 = vst [vmem:[%s6396_s25 + $0x1c] sm:$0xf] %v3573_v23  ;;  %4355 = vst [vmem:[%s6396_s25 + $0x20] sm:$0x1] %v3879_v11  ;;  %v3555_v34 = vor.u32 %v3553_v29, %v3552_v25  ;;  %v3557_v63 = vrot.slane %v3552_v25, 4  ;;  %v3595_v22 = vrot.slane %v3593_v57, 7  ;;  %v2923_v30 = vpop.f32.mrf.mxu1  ;;  %v3025_v1 = vadd.f32 %v5038_v2, %v6582_v38 }
 0x1fc   : > { %v3576_v49 = vshrl.u32 %v4432_v37, 16  ;;  %v3579_v50 = vshll.u32 %v4432_v37, 16  ;;  %v3363_v48 = vmax.f32 %v3331_v4, 0.0  ;;  %v3290_v43 = vadd.f32 %v6679_v35, %v3020_v61  ;;  %v6730_v26 = vpop.f32.mrf.mxu0  ;;  %v4356_v57 = vld [vmem:[%s6396_s25 + $0x24] sm:$0xf] }
 0x1fd   : > { %v3556_v33 = vsel %vm6701_vm12, %v3548_v58, %v3555_v34  ;;  %v3872_v36 = vsel %vm6710_vm13, %v3557_v63, %v4349_v51  ;;  %v3598_v29 = vor.u32 %v3596_v5, %v3595_v22  ;;  %v3599_v8 = vrot.slane %v3595_v22, 4  ;;  %v5042_v13 = vpop.f32.mrf.mxu1 }
 0x1fe   : > { %4348 = vst [vmem:[%s6396_s25 + $0x10] sm:$0xf] %v3556_v33  ;;  %4350 = vst [vmem:[%s6396_s25 + $0x14] sm:$0x1] %v3872_v36  ;;  %v6738_v20 = vrot.slane %v3576_v49, 7  ;;  %v4435_v35 = vpack.c.bf16 %v3363_v48, %v3363_v48  ;;  %v3329_v25 = vadd.f32 %v6666_v7, %v3290_v43  ;;  %v3295_v38 = vadd.f32 %v6682_v55, %v3025_v1  ;;  %v6742_v2 = vpop.f32.mrf.mxu0 }
 0x1ff   : > { %v3889_v58 = vsel %vm6686_vm11, %v3598_v29, %v4361_v31  ;;  %v3023_v5 = vadd.f32 %v2920_v9, %v6585_v60  ;;  %v3026_v37 = vadd.f32 %v5039_v52, %v6588_v62  ;;  %v3024_v23 = vadd.f32 %v2923_v30, %v6591_v53  ;;  %v2936_v11 = vpop.f32.mrf.mxu1 }
 0x200   : > { %4362 = vst [vmem:[%s6396_s25 + $0x30] sm:$0xf] %v3889_v58  ;;  %v3581_v51 = vor.u32 %v3579_v50, %v6738_v20  ;;  %v3582_v55 = vrot.slane %v6738_v20, 4  ;;  %v3601_v4 = vshrl.u32 %v4435_v35, 16  ;;  %v3604_v61 = vshll.u32 %v4435_v35, 16  ;;  %v6753_v34 = vpop.f32.mrf.mxu0 }
 0x201   : > { %v3361_v63 = vmax.f32 %v3329_v25, 0.0  ;;  %v3334_v22 = vadd.f32 %v6666_v7, %v3295_v38  ;;  %v3293_v60 = vadd.f32 %v6693_v10, %v3023_v5  ;;  %v3296_v62 = vadd.f32 %v6705_v6, %v3026_v37  ;;  %v6758_v53 = vpop.f32.mrf.mxu1  ;;  %v4364_v50 = vld [vmem:[%s6396_s25 + $0x38] sm:$0x1] }
 0x202   : > { %v3882_v9 = vsel %vm6686_vm11, %v3581_v51, %v4356_v57  ;;  %v3603_v52 = vrot.slane %v3601_v4, 7  ;;  %v3294_v49 = vadd.f32 %v3193_v44, %v3024_v23  ;;  %v3029_v30 = vadd.f32 %v5042_v13, %v6594_v16  ;;  %v6763_v31 = vpop.f32.mrf.mxu0 }
 0x203   : > { %4357 = vst [vmem:[%s6396_s25 + $0x24] sm:$0xf] %v3882_v9  ;;  %v4433_v48 = vpack.c.bf16 %v3361_v63, %v3361_v63  ;;  %v3366_v43 = vmax.f32 %v3334_v22, 0.0  ;;  %v3332_v1 = vadd.f32 %v6666_v7, %v3293_v60  ;;  %v3335_v10 = vadd.f32 %v6666_v7, %v3296_v62  ;;  %v6769_v6 = vpop.f32.mrf.mxu1  ;;  %v4359_v22 = vld [vmem:[%s6396_s25 + $0x2c] sm:$0x1] }
 0x204   : > { %v3606_v33 = vor.u32 %v3604_v61, %v3603_v52  ;;  %v3608_v36 = vrot.slane %v3603_v52, 4  ;;  %v3333_v44 = vadd.f32 %v6666_v7, %v3294_v49  ;;  %v3299_v29 = vadd.f32 %v5090_v56, %v3029_v30  ;;  %v6772_v16 = vpop.f32.mrf.mxu0 }
 0x205   : > { %v3584_v13 = vshrl.u32 %v4433_v48, 16  ;;  %v3587_v20 = vshll.u32 %v4433_v48, 16  ;;  %v4438_v35 = vpack.c.bf16 %v3366_v43, %v3366_v43  ;;  %v3364_v25 = vmax.f32 %v3332_v1, 0.0  ;;  %v6774_v38 = vpop.f32.mrf.mxu1  ;;  %v4371_v43 = vld [vmem:[%s6396_s25 + $0x48] sm:$0xf] }
 0x206   : > { %v3607_v58 = vsel %vm6701_vm12, %v3599_v8, %v3606_v33  ;;  %v3893_v57 = vsel %vm6710_vm13, %v3608_v36, %v4364_v50  ;;  %v3367_v5 = vmax.f32 %v3335_v10, 0.0  ;;  %v3365_v37 = vmax.f32 %v3333_v44, 0.0  ;;  %v6780_v23 = vpop.f32.mrf.mxu0 }
 0x207   : > { %4363 = vst [vmem:[%s6396_s25 + $0x34] sm:$0xf] %v3607_v58  ;;  %4365 = vst [vmem:[%s6396_s25 + $0x38] sm:$0x1] %v3893_v57  ;;  %v3586_v56 = vrot.slane %v3584_v13, 7  ;;  %v3627_v51 = vshrl.u32 %v4438_v35, 16  ;;  %v4436_v61 = vpack.c.bf16 %v3364_v25, %v3364_v25  ;;  %v6784_v63 = vpop.f32.mrf.mxu1  ;;  %v3338_v8 = vadd.f32 %v6666_v7, %v3299_v29 }
 0x208   : > { %v3630_v4 = vshll.u32 %v4438_v35, 16  ;;  %v4439_v60 = vpack.c.bf16 %v3367_v5, %v3367_v5  ;;  %v4437_v62 = vpack.c.bf16 %v3365_v37, %v3365_v37  ;;  %v3027_v9 = vadd.f32 %v2936_v11, %v6597_v42  ;;  %v6790_v44 = vpop.f32.mrf.mxu0  ;;  %v4366_v37 = vld [vmem:[%s6396_s25 + $0x3c] sm:$0xf] }
 0x209   : > { %v3589_v52 = vor.u32 %v3587_v20, %v3586_v56  ;;  %v3591_v49 = vrot.slane %v3586_v56, 4  ;;  %v3629_v30 = vrot.slane %v3627_v51, 7  ;;  %v3610_v50 = vshrl.u32 %v4436_v61, 16  ;;  %v5047_v48 = vpop.f32.mrf.mxu1  ;;  %v4374_v56 = vld [vmem:[%s6396_s25 + $0x50] sm:$0x1] }
 0x20a   : > { %v3613_v1 = vshll.u32 %v4436_v61, 16  ;;  %v3635_v10 = vshrl.u32 %v4439_v60, 16  ;;  %v3638_v33 = vshll.u32 %v4439_v60, 16  ;;  %v3618_v36 = vshrl.u32 %v4437_v62, 16 }
 0x20b   : > { %v3590_v29 = vsel %vm6701_vm12, %v3582_v55, %v3589_v52  ;;  %v3886_v42 = vsel %vm6710_vm13, %v3591_v49, %v4359_v22  ;;  %v3632_v11 = vor.u32 %v3630_v4, %v3629_v30  ;;  %v3633_v13 = vrot.slane %v3629_v30, 4  ;;  %v2955_v20 = vpop.f32.mrf.mxu1  ;;  %v4369_v49 = vld [vmem:[%s6396_s25 + $0x44] sm:$0x1]  ;;  %v6809_v30 = vpop.f32.mrf.mxu0 }
 0x20c   : > { %4358 = vst [vmem:[%s6396_s25 + $0x28] sm:$0xf] %v3590_v29  ;;  %4360 = vst [vmem:[%s6396_s25 + $0x2c] sm:$0x1] %v3886_v42  ;;  %v3612_v35 = vrot.slane %v3610_v50, 7  ;;  %v3637_v25 = vrot.slane %v3635_v10, 7  ;;  %v3297_v51 = vadd.f32 %v6730_v26, %v3027_v9  ;;  %v3030_v4 = vadd.f32 %v6758_v53, %v6600_v14 }
 0x20d   : > { %v3620_v58 = vrot.slane %v3618_v36, 7  ;;  %v3621_v57 = vshll.u32 %v4437_v62, 16  ;;  %v3903_v5 = vsel %vm6686_vm11, %v3632_v11, %v4371_v43  ;;  %v3370_v55 = vmax.f32 %v3338_v8, 0.0  ;;  %v6805_v61 = vpop.f32.mrf.mxu1 }
 0x20e   : > { %4372 = vst [vmem:[%s6396_s25 + $0x48] sm:$0xf] %v3903_v5  ;;  %v3615_v22 = vor.u32 %v3613_v1, %v3612_v35  ;;  %v3616_v60 = vrot.slane %v3612_v35, 4  ;;  %v3640_v62 = vor.u32 %v3638_v33, %v3637_v25  ;;  %v3642_v52 = vrot.slane %v3637_v25, 4 }
 0x20f   : > { %v3623_v50 = vor.u32 %v3621_v57, %v3620_v58  ;;  %v3625_v8 = vrot.slane %v3620_v58, 4  ;;  %v4442_v26 = vpack.c.bf16 %v3370_v55, %v3370_v55  ;;  %v3336_v14 = vadd.f32 %v6666_v7, %v3297_v51  ;;  %v6812_v53 = vpop.f32.mrf.mxu1  ;;  %v6837_v58 = vpop.f32.mrf.mxu0  ;;  %v4381_v55 = vld [vmem:[%s6396_s25 + $0x60] sm:$0xf] }
 0x210   : > { %v3896_v9 = vsel %vm6686_vm11, %v3615_v22, %v4366_v37  ;;  %v3641_v43 = vsel %vm6701_vm12, %v3633_v13, %v3640_v62  ;;  %v3907_v1 = vsel %vm6710_vm13, %v3642_v52, %v4374_v56  ;;  %v3300_v10 = vadd.f32 %v6742_v2, %v3030_v4 }
 0x211   : > { %4367 = vst [vmem:[%s6396_s25 + $0x3c] sm:$0xf] %v3896_v9  ;;  %4373 = vst [vmem:[%s6396_s25 + $0x4c] sm:$0xf] %v3641_v43  ;;  %v3624_v33 = vsel %vm6701_vm12, %v3616_v60, %v3623_v50  ;;  %v3900_v36 = vsel %vm6710_vm13, %v3625_v8, %v4369_v49  ;;  %v3661_v29 = vshrl.u32 %v4442_v26, 16  ;;  %v3664_v42 = vshll.u32 %v4442_v26, 16  ;;  %v6828_v11 = vpop.f32.mrf.mxu1 }
 0x212   : > { %4375 = vst [vmem:[%s6396_s25 + $0x50] sm:$0x1] %v3907_v1  ;;  %4368 = vst [vmem:[%s6396_s25 + $0x40] sm:$0xf] %v3624_v33  ;;  %v3368_v13 = vmax.f32 %v3336_v14, 0.0  ;;  %v3339_v35 = vadd.f32 %v6666_v7, %v3300_v10  ;;  %v3028_v2 = vadd.f32 %v6769_v6, %v6603_v24  ;;  %v3033_v25 = vadd.f32 %v6774_v38, %v6606_v28 }
 0x213   : > { %4370 = vst [vmem:[%s6396_s25 + $0x44] sm:$0x1] %v3900_v36  ;;  %v3663_v57 = vrot.slane %v3661_v29, 7  ;;  %v3031_v5 = vadd.f32 %v6784_v63, %v6609_v18  ;;  %v3034_v37 = vadd.f32 %v5047_v48, %v6612_v21  ;;  %v3032_v56 = vadd.f32 %v2955_v20, %v6615_v47  ;;  %v6848_v18 = vpop.f32.mrf.mxu1  ;;  %v6851_v20 = vpop.f32.mrf.mxu0  ;;  %v4376_v8 = vld [vmem:[%s6396_s25 + $0x54] sm:$0xf] }
 0x214   : > { %v4440_v51 = vpack.c.bf16 %v3368_v13, %v3368_v13  ;;  %v3371_v4 = vmax.f32 %v3339_v35, 0.0  ;;  %v3298_v22 = vadd.f32 %v6753_v34, %v3028_v2  ;;  %v3303_v24 = vadd.f32 %v6763_v31, %v3033_v25  ;;  %v4384_v13 = vld [vmem:[%s6396_s25 + $0x68] sm:$0x1] }
 0x215   : > { %v3666_v6 = vor.u32 %v3664_v42, %v3663_v57  ;;  %v3667_v28 = vrot.slane %v3663_v57, 4  ;;  %v3301_v38 = vadd.f32 %v6772_v16, %v3031_v5  ;;  %v3304_v60 = vadd.f32 %v6780_v23, %v3034_v37  ;;  %v6861_v1 = vpop.f32.mrf.mxu1  ;;  %v6863_v42 = vpop.f32.mrf.mxu0 }
 0x216   : > { %v3644_v21 = vshrl.u32 %v4440_v51, 16  ;;  %v3647_v63 = vshll.u32 %v4440_v51, 16  ;;  %v4443_v47 = vpack.c.bf16 %v3371_v4, %v3371_v4  ;;  %v3337_v48 = vadd.f32 %v6666_v7, %v3298_v22 }
 0x217   : > { %v3917_v34 = vsel %vm6686_vm11, %v3666_v6, %v4381_v55  ;;  %v3342_v31 = vadd.f32 %v6666_v7, %v3303_v24  ;;  %v3340_v62 = vadd.f32 %v6666_v7, %v3301_v38  ;;  %v3343_v16 = vadd.f32 %v6666_v7, %v3304_v60  ;;  %v2984_v24 = vpop.f32.mrf.mxu1 }
 0x218   : > { %4382 = vst [vmem:[%s6396_s25 + $0x60] sm:$0xf] %v3917_v34  ;;  %v3646_v23 = vrot.slane %v3644_v21, 7  ;;  %v3669_v52 = vshrl.u32 %v4443_v47, 16  ;;  %v3672_v49 = vshll.u32 %v4443_v47, 16  ;;  %v3369_v50 = vmax.f32 %v3337_v48, 0.0 }
 0x219   : > { %v3374_v26 = vmax.f32 %v3342_v31, 0.0  ;;  %v3372_v14 = vmax.f32 %v3340_v62, 0.0  ;;  %v3375_v9 = vmax.f32 %v3343_v16, 0.0  ;;  %v3302_v43 = vadd.f32 %v6790_v44, %v3032_v56  ;;  %v4379_v47 = vld [vmem:[%s6396_s25 + $0x5c] sm:$0x1] }
 0x21a   : > { %v3649_v10 = vor.u32 %v3647_v63, %v3646_v23  ;;  %v3650_v33 = vrot.slane %v3646_v23, 4  ;;  %v3671_v36 = vrot.slane %v3669_v52, 7  ;;  %v4441_v29 = vpack.c.bf16 %v3369_v50, %v3369_v50  ;;  %v5102_v63 = vpop.f32.mrf.mxu0  ;;  %v4391_v52 = vld [vmem:[%s6396_s25 + $0x78] sm:$0xf] }
 0x21b   : > { %v4446_v35 = vpack.c.bf16 %v3374_v26, %v3374_v26  ;;  %v4444_v2 = vpack.c.bf16 %v3372_v14, %v3372_v14  ;;  %v4447_v25 = vpack.c.bf16 %v3375_v9, %v3375_v9  ;;  %v3341_v57 = vadd.f32 %v6666_v7, %v3302_v43  ;;  %v5055_v43 = vpop.f32.mrf.mxu1 }
 0x21c   : > { %v3910_v5 = vsel %vm6686_vm11, %v3649_v10, %v4376_v8  ;;  %v3674_v44 = vor.u32 %v3672_v49, %v3671_v36  ;;  %v3676_v37 = vrot.slane %v3671_v36, 4  ;;  %v3652_v56 = vshrl.u32 %v4441_v29, 16  ;;  %v4386_v49 = vld [vmem:[%s6396_s25 + $0x6c] sm:$0xf] }
 0x21d   : > { %4377 = vst [vmem:[%s6396_s25 + $0x54] sm:$0xf] %v3910_v5  ;;  %v3655_v55 = vshll.u32 %v4441_v29, 16  ;;  %v3695_v51 = vshrl.u32 %v4446_v35, 16  ;;  %v3698_v4 = vshll.u32 %v4446_v35, 16  ;;  %v3678_v22 = vshrl.u32 %v4444_v2, 16  ;;  %v3254_v35 = vpop.f32.mrf.mxu0 }
 0x21e   : > { %v3675_v6 = vsel %vm6701_vm12, %v3667_v28, %v3674_v44  ;;  %v3921_v38 = vsel %vm6710_vm13, %v3676_v37, %v4384_v13  ;;  %v3654_v60 = vrot.slane %v3652_v56, 7  ;;  %v3681_v21 = vshll.u32 %v4444_v2, 16  ;;  %v4394_v2 = vld [vmem:[%s6396_s25 + $0x80] sm:$0x1] }
 0x21f   : > { %4383 = vst [vmem:[%s6396_s25 + $0x64] sm:$0xf] %v3675_v6  ;;  %4385 = vst [vmem:[%s6396_s25 + $0x68] sm:$0x1] %v3921_v38  ;;  %v3697_v48 = vrot.slane %v3695_v51, 7  ;;  %v3680_v34 = vrot.slane %v3678_v22, 7  ;;  %v3037_v50 = vadd.f32 %v6805_v61, %v6618_v3  ;;  %v3038_v51 = vadd.f32 %v6828_v11, %v6624_v59  ;;  %v5103_v38 = vpop.f32.mrf.mxu0 }
 0x220   : > { %v3703_v31 = vshrl.u32 %v4447_v25, 16  ;;  %v3706_v62 = vshll.u32 %v4447_v25, 16  ;;  %v3657_v16 = vor.u32 %v3655_v55, %v3654_v60  ;;  %v3659_v23 = vrot.slane %v3654_v60, 4 }
 0x221   : > { %v3373_v28 = vmax.f32 %v3341_v57, 0.0  ;;  %v3700_v8 = vor.u32 %v3698_v4, %v3697_v48  ;;  %v3701_v26 = vrot.slane %v3697_v48, 4  ;;  %v3683_v14 = vor.u32 %v3681_v21, %v3680_v34 }
 0x222   : > { %v3684_v9 = vrot.slane %v3680_v34, 4  ;;  %v3658_v10 = vsel %vm6701_vm12, %v3650_v33, %v3657_v16  ;;  %v3914_v36 = vsel %vm6710_vm13, %v3659_v23, %v4379_v47  ;;  %v3705_v29 = vrot.slane %v3703_v31, 7 }
 0x223   : > { %v4445_v13 = vpack.c.bf16 %v3373_v28, %v3373_v28  ;;  %4378 = vst [vmem:[%s6396_s25 + $0x58] sm:$0xf] %v3658_v10  ;;  %4380 = vst [vmem:[%s6396_s25 + $0x5c] sm:$0x1] %v3914_v36  ;;  %v3931_v3 = vsel %vm6686_vm11, %v3700_v8, %v4391_v52  ;;  %v3924_v61 = vsel %vm6686_vm11, %v3683_v14, %v4386_v49 }
 0x224   : > { %v3307_v25 = vadd.f32 %v6809_v30, %v3037_v50  ;;  %v3035_v33 = vadd.f32 %v6812_v53, %v6621_v46  ;;  %4392 = vst [vmem:[%s6396_s25 + $0x78] sm:$0xf] %v3931_v3  ;;  %4387 = vst [vmem:[%s6396_s25 + $0x6c] sm:$0xf] %v3924_v61  ;;  %v3708_v57 = vor.u32 %v3706_v62, %v3705_v29  ;;  %v3710_v5 = vrot.slane %v3705_v29, 4  ;;  %v6903_v46 = vpop.f32.mrf.mxu1 }
 0x225   : > { %v3686_v44 = vshrl.u32 %v4445_v13, 16  ;;  %v3689_v37 = vshll.u32 %v4445_v13, 16  ;;  %v3036_v30 = vadd.f32 %v6848_v18, %v6627_v15  ;;  %v3041_v6 = vadd.f32 %v6861_v1, %v6630_v27  ;;  %v4401_v29 = vld [vmem:[%s6396_s25 + $0x90] sm:$0xf] }
 0x226   : > { %v3346_v56 = vadd.f32 %v6666_v7, %v3307_v25  ;;  %v3305_v55 = vadd.f32 %v6837_v58, %v3035_v33  ;;  %v3709_v53 = vsel %vm6701_vm12, %v3701_v26, %v3708_v57  ;;  %v3935_v4 = vsel %vm6710_vm13, %v3710_v5, %v4394_v2  ;;  %v4389_v58 = vld [vmem:[%s6396_s25 + $0x74] sm:$0x1]  ;;  %v6920_v62 = vpop.f32.mrf.mxu1 }
 0x227   : > { %v3688_v22 = vrot.slane %v3686_v44, 7  ;;  %4393 = vst [vmem:[%s6396_s25 + $0x7c] sm:$0xf] %v3709_v53  ;;  %4395 = vst [vmem:[%s6396_s25 + $0x80] sm:$0x1] %v3935_v4  ;;  %v3308_v15 = vadd.f32 %v6851_v20, %v3038_v51  ;;  %v3306_v18 = vadd.f32 %v6863_v42, %v3036_v30  ;;  %v3311_v47 = vadd.f32 %v5102_v63, %v3041_v6  ;;  %v6927_v63 = vpop.f32.mrf.mxu0 }
 0x228   : > { %v3378_v59 = vmax.f32 %v3346_v56, 0.0  ;;  %v3344_v11 = vadd.f32 %v6666_v7, %v3305_v55  ;;  %v3039_v48 = vadd.f32 %v2984_v24, %v6633_v19  ;;  %v3042_v8 = vadd.f32 %v5055_v43, %v6636_v0  ;;  %v3000_v36 = vpop.f32.mrf.mxu1  ;;  %v4396_v0 = vld [vmem:[%s6396_s25 + $0x84] sm:$0xf] }
 0x229   : > { %v3691_v60 = vor.u32 %v3689_v37, %v3688_v22  ;;  %v3693_v21 = vrot.slane %v3688_v22, 4  ;;  %v3347_v1 = vadd.f32 %v6666_v7, %v3308_v15  ;;  %v3345_v31 = vadd.f32 %v6666_v7, %v3306_v18  ;;  %v5106_v2 = vpop.f32.mrf.mxu0  ;;  %v4404_v22 = vld [vmem:[%s6396_s25 + $0x98] sm:$0x1] }
 0x22a   : > { %v4450_v34 = vpack.c.bf16 %v3378_v59, %v3378_v59  ;;  %v3376_v27 = vmax.f32 %v3344_v11, 0.0  ;;  %v3350_v16 = vadd.f32 %v6666_v7, %v3311_v47  ;;  %v3309_v23 = vadd.f32 %v3254_v35, %v3039_v48  ;;  %v5059_v4 = vpop.f32.mrf.mxu1  ;;  %v4411_v47 = vld [vmem:[%s6396_s25 + $0xa8] sm:$0xf] }
 0x22b   : > { %v3692_v20 = vsel %vm6701_vm12, %v3684_v9, %v3691_v60  ;;  %v3928_v42 = vsel %vm6710_vm13, %v3693_v21, %v4389_v58  ;;  %v3379_v52 = vmax.f32 %v3347_v1, 0.0  ;;  %v3377_v49 = vmax.f32 %v3345_v31, 0.0  ;;  %v3270_v11 = vpop.f32.mrf.mxu0  ;;  %v4399_v21 = vld [vmem:[%s6396_s25 + $0x8c] sm:$0x1] }
 0x22c   : > { %4388 = vst [vmem:[%s6396_s25 + $0x70] sm:$0xf] %v3692_v20  ;;  %4390 = vst [vmem:[%s6396_s25 + $0x74] sm:$0x1] %v3928_v42  ;;  %v3729_v19 = vshrl.u32 %v4450_v34, 16  ;;  %v4448_v24 = vpack.c.bf16 %v3376_v27, %v3376_v27  ;;  %v3382_v28 = vmax.f32 %v3350_v16, 0.0  ;;  %v3348_v50 = vadd.f32 %v6666_v7, %v3309_v23 }
 0x22d   : > { %v3732_v14 = vshll.u32 %v4450_v34, 16  ;;  %v4451_v10 = vpack.c.bf16 %v3379_v52, %v3379_v52  ;;  %v4449_v35 = vpack.c.bf16 %v3377_v49, %v3377_v49  ;;  %v3312_v5 = vadd.f32 %v5103_v38, %v3042_v8 }
 0x22e   : > { %v3731_v26 = vrot.slane %v3729_v19, 7  ;;  %v3712_v9 = vshrl.u32 %v4448_v24, 16  ;;  %v3715_v13 = vshll.u32 %v4448_v24, 16  ;;  %v4454_v3 = vpack.c.bf16 %v3382_v28, %v3382_v28  ;;  %v3003_v19 = vpop.f32.mrf.mxu1 }
 0x22f   : > { %v3380_v61 = vmax.f32 %v3348_v50, 0.0  ;;  %v3737_v57 = vshrl.u32 %v4451_v10, 16  ;;  %v3740_v43 = vshll.u32 %v4451_v10, 16  ;;  %v3720_v37 = vshrl.u32 %v4449_v35, 16  ;;  %v5107_v50 = vpop.f32.mrf.mxu0  ;;  %v4406_v10 = vld [vmem:[%s6396_s25 + $0x9c] sm:$0xf] }
 0x230   : > { %v3734_v25 = vor.u32 %v3732_v14, %v3731_v26  ;;  %v3714_v33 = vrot.slane %v3712_v9, 7  ;;  %v3735_v44 = vrot.slane %v3731_v26, 4  ;;  %v3763_v56 = vshrl.u32 %v4454_v3, 16 }
 0x231   : > { %v3739_v30 = vrot.slane %v3737_v57, 7  ;;  %v3723_v53 = vshll.u32 %v4449_v35, 16  ;;  %v3722_v6 = vrot.slane %v3720_v37, 7  ;;  %v3766_v38 = vshll.u32 %v4454_v3, 16  ;;  %v3273_v57 = vpop.f32.mrf.mxu0 }
 0x232   : > { %v3945_v55 = vsel %vm6686_vm11, %v3734_v25, %v4401_v29  ;;  %v3717_v51 = vor.u32 %v3715_v13, %v3714_v33  ;;  %v6939_v58 = vrot.slane %v3763_v56, 7  ;;  %v4452_v59 = vpack.c.bf16 %v3380_v61, %v3380_v61 }
 0x233   : > { %4402 = vst [vmem:[%s6396_s25 + $0x90] sm:$0xf] %v3945_v55  ;;  %v3742_v18 = vor.u32 %v3740_v43, %v3739_v30  ;;  %v3744_v60 = vrot.slane %v3739_v30, 4  ;;  %v3351_v48 = vadd.f32 %v6666_v7, %v3312_v5  ;;  %v3718_v34 = vrot.slane %v3714_v33, 4 }
 0x234   : > { %v3938_v15 = vsel %vm6686_vm11, %v3717_v51, %v4396_v0  ;;  %v3725_v27 = vor.u32 %v3723_v53, %v3722_v6  ;;  %v3727_v1 = vrot.slane %v3722_v6, 4  ;;  %v3768_v31 = vor.u32 %v3766_v38, %v6939_v58 }
 0x235   : > { %4397 = vst [vmem:[%s6396_s25 + $0x84] sm:$0xf] %v3938_v15  ;;  %v3743_v20 = vsel %vm6701_vm12, %v3735_v44, %v3742_v18  ;;  %v3949_v42 = vsel %vm6710_vm13, %v3744_v60, %v4404_v22  ;;  %v3746_v16 = vshrl.u32 %v4452_v59, 16  ;;  %v3749_v23 = vshll.u32 %v4452_v59, 16  ;;  %v4414_v44 = vld [vmem:[%s6396_s25 + $0xb0] sm:$0x1] }
 0x236   : > { %4403 = vst [vmem:[%s6396_s25 + $0x94] sm:$0xf] %v3743_v20  ;;  %4405 = vst [vmem:[%s6396_s25 + $0x98] sm:$0x1] %v3949_v42  ;;  %v3726_v24 = vsel %vm6701_vm12, %v3718_v34, %v3725_v27  ;;  %v3942_v52 = vsel %vm6710_vm13, %v3727_v1, %v4399_v21  ;;  %v3959_v49 = vsel %vm6686_vm11, %v3768_v31, %v4411_v47  ;;  %v3383_v28 = vmax.f32 %v3351_v48, 0.0 }
 0x237   : > { %4398 = vst [vmem:[%s6396_s25 + $0x88] sm:$0xf] %v3726_v24  ;;  %4400 = vst [vmem:[%s6396_s25 + $0x8c] sm:$0x1] %v3942_v52  ;;  %v6963_v8 = vrot.slane %v3746_v16, 7  ;;  %v3040_v26 = vadd.f32 %v6903_v46, %v6639_v32  ;;  %v3045_v14 = vadd.f32 %v6920_v62, %v6644_v17  ;;  %v3043_v9 = vadd.f32 %v3000_v36, %v6649_v45 }
 0x238   : > { %4412 = vst [vmem:[%s6396_s25 + $0xa8] sm:$0xf] %v3959_v49  ;;  %v4455_v29 = vpack.c.bf16 %v3383_v28, %v3383_v28  ;;  %v3046_v13 = vadd.f32 %v5059_v4, %v6655_v40  ;;  %v3044_v35 = vadd.f32 %v3003_v19, %v6661_v39  ;;  %v4409_v47 = vld [vmem:[%s6396_s25 + $0xa4] sm:$0x1]  ;;  %v4421_v1 = vld [vmem:[%s6396_s25 + $0xc0] sm:$0xf] }
 0x239   : > { %v3751_v3 = vor.u32 %v3749_v23, %v6963_v8  ;;  %v3310_v61 = vadd.f32 %v6927_v63, %v3040_v26  ;;  %v3315_v25 = vadd.f32 %v5106_v2, %v3045_v14  ;;  %v3313_v32 = vadd.f32 %v3270_v11, %v3043_v9  ;;  %v4416_v49 = vld [vmem:[%s6396_s25 + $0xb4] sm:$0xf]  ;;  %v4424_v28 = vld [vmem:[%s6396_s25 + $0xc8] sm:$0x1] }
 0x23a   : > { %v3771_v33 = vshrl.u32 %v4455_v29, 16  ;;  %v3316_v46 = vadd.f32 %v5107_v50, %v3046_v13  ;;  %v3314_v40 = vadd.f32 %v3273_v57, %v3044_v35  ;;  %v3774_v36 = vshll.u32 %v4455_v29, 16 }
 0x23b   : > { %v3952_v17 = vsel %vm6686_vm11, %v3751_v3, %v4406_v10  ;;  %v3349_v45 = vadd.f32 %v6666_v7, %v3310_v61  ;;  %v3354_v62 = vadd.f32 %v6666_v7, %v3315_v25  ;;  %v3352_v5 = vadd.f32 %v6666_v7, %v3313_v32  ;;  %v4419_v32 = vld [vmem:[%s6396_s25 + $0xbc] sm:$0x1] }
 0x23c   : > { %4407 = vst [vmem:[%s6396_s25 + $0x9c] sm:$0xf] %v3952_v17  ;;  %v3773_v39 = vrot.slane %v3771_v33, 7  ;;  %v3355_v63 = vadd.f32 %v6666_v7, %v3316_v46  ;;  %v3769_v2 = vrot.slane %v6939_v58, 4  ;;  %v3353_v37 = vadd.f32 %v6666_v7, %v3314_v40 }
 0x23d   : > { %v3381_v0 = vmax.f32 %v3349_v45, 0.0  ;;  %v3386_v43 = vmax.f32 %v3354_v62, 0.0  ;;  %v3384_v51 = vmax.f32 %v3352_v5, 0.0  ;;  %v3752_v23 = vrot.slane %v6963_v8, 4 }
 0x23e   : > { %v3776_v56 = vor.u32 %v3774_v36, %v3773_v39  ;;  %v3778_v55 = vrot.slane %v3773_v39, 4  ;;  %v3387_v30 = vmax.f32 %v3355_v63, 0.0  ;;  %v3385_v22 = vmax.f32 %v3353_v37, 0.0 }
 0x23f   : > { %v4453_v53 = vpack.c.bf16 %v3381_v0, %v3381_v0  ;;  %v4458_v4 = vpack.c.bf16 %v3386_v43, %v3386_v43  ;;  %v4456_v38 = vpack.c.bf16 %v3384_v51, %v3384_v51 }
 0x240   : > { %v3777_v6 = vsel %vm6701_vm12, %v3769_v2, %v3776_v56  ;;  %v3963_v58 = vsel %vm6710_vm13, %v3778_v55, %v4414_v44  ;;  %v4459_v59 = vpack.c.bf16 %v3387_v30, %v3387_v30  ;;  %v4457_v27 = vpack.c.bf16 %v3385_v22, %v3385_v22 }
 0x241   : > { %4413 = vst [vmem:[%s6396_s25 + $0xac] sm:$0xf] %v3777_v6  ;;  %4415 = vst [vmem:[%s6396_s25 + $0xb0] sm:$0x1] %v3963_v58  ;;  %v3754_v7 = vshrl.u32 %v4453_v53, 16  ;;  %v3797_v11 = vshrl.u32 %v4458_v4, 16 }
 0x242   : > { %v3757_v15 = vshll.u32 %v4453_v53, 16  ;;  %v3780_v18 = vshrl.u32 %v4456_v38, 16  ;;  %v3805_v60 = vshrl.u32 %v4459_v59, 16  ;;  %v3800_v34 = vshll.u32 %v4458_v4, 16 }
 0x243   : > { %v3756_v21 = vrot.slane %v3754_v7, 7  ;;  %v3799_v48 = vrot.slane %v3797_v11, 7  ;;  %v3783_v20 = vshll.u32 %v4456_v38, 16  ;;  %v3808_v16 = vshll.u32 %v4459_v59, 16 }
 0x244   : > { %v3782_v31 = vrot.slane %v3780_v18, 7  ;;  %v3807_v42 = vrot.slane %v3805_v60, 7  ;;  %v3788_v13 = vshrl.u32 %v4457_v27, 16  ;;  %v3791_v33 = vshll.u32 %v4457_v27, 16 }
 0x245   : > { %v3759_v19 = vor.u32 %v3757_v15, %v3756_v21  ;;  %v3761_v24 = vrot.slane %v3756_v21, 4  ;;  %v3802_v52 = vor.u32 %v3800_v34, %v3799_v48  ;;  %v3803_v50 = vrot.slane %v3799_v48, 4 }
 0x246   : > { %v3785_v26 = vor.u32 %v3783_v20, %v3782_v31  ;;  %v3810_v14 = vor.u32 %v3808_v16, %v3807_v42  ;;  %v3812_v9 = vrot.slane %v3807_v42, 4  ;;  %v3790_v25 = vrot.slane %v3788_v13, 7 }
 0x247   : > { %v3760_v10 = vsel %vm6701_vm12, %v3752_v23, %v3759_v19  ;;  %v3956_v8 = vsel %vm6710_vm13, %v3761_v24, %v4409_v47  ;;  %v3973_v29 = vsel %vm6686_vm11, %v3802_v52, %v4421_v1  ;;  %v3786_v46 = vrot.slane %v3782_v31, 4 }
 0x248   : > { %4408 = vst [vmem:[%s6396_s25 + $0xa0] sm:$0xf] %v3760_v10  ;;  %4410 = vst [vmem:[%s6396_s25 + $0xa4] sm:$0x1] %v3956_v8  ;;  %v3966_v35 = vsel %vm6686_vm11, %v3785_v26, %v4416_v49  ;;  %v3811_v3 = vsel %vm6701_vm12, %v3803_v50, %v3810_v14  ;;  %v3977_v61 = vsel %vm6710_vm13, %v3812_v9, %v4424_v28  ;;  %v3795_v17 = vrot.slane %v3790_v25, 4 }
 0x249   : > { %4422 = vst [vmem:[%s6396_s25 + $0xc0] sm:$0xf] %v3973_v29  ;;  %4417 = vst [vmem:[%s6396_s25 + $0xb4] sm:$0xf] %v3966_v35  ;;  %v3793_v57 = vor.u32 %v3791_v33, %v3790_v25 }
 0x24a   : > { %4423 = vst [vmem:[%s6396_s25 + $0xc4] sm:$0xf] %v3811_v3  ;;  %4425 = vst [vmem:[%s6396_s25 + $0xc8] sm:$0x1] %v3977_v61  ;;  %v3970_v45 = vsel %vm6710_vm13, %v3795_v17, %v4419_v32 }
 0x24b   : > { %v3794_v54 = vsel %vm6701_vm12, %v3786_v46, %v3793_v57  ;;  %4420 = vst [vmem:[%s6396_s25 + $0xbc] sm:$0x1] %v3970_v45 }
 0x24c   : > { %4418 = vst [vmem:[%s6396_s25 + $0xb8] sm:$0xf] %v3794_v54 }
 0x24d PF: > { %s13_s12 = sadd.s32 1, %s5239_s12  }
 0x24e   : > { %p10_p4 = scmp.ge.s32.totalorder %s13_s12, 4  }
 0x250   :  { %12 = sbr.rel (!%p10_p4) target bundleno = 1 (0x1), region = 71 }

</bundles_post_ra>
